<compile_context>
chip_gen: v7x
topology: tpu7x:2x2x1
jax: 0.10.0
libtpu: 0.0.40
codegen_flags: <defaults>
</compile_context>

<pallas_src>
import jax
import jax.numpy as jnp
from jax import lax
from jax.experimental import pallas as pl
from jax.experimental.pallas import tpu as pltpu


def _round_up(x, m):
    return (x + m - 1) // m * m


# ----------------------------------------------------------------------------
# Fused GEMM kernel: out = maybe_leaky_relu((A @ B^T) * scale + bias)
#   A: (M, K) activations, B: (N, K) weights in native (out, in) layout.
# ----------------------------------------------------------------------------
_DOT_NT = (((1,), (1,)), ((), ()))  # contract last dim of both operands


def fused_matmul(a, b_nk, scale, bias, *, leaky, compute_dtype=jnp.bfloat16):
    """Pallas GEMM (A @ B^T) with per-output-column scale/bias + optional LeakyReLU."""
    M, K = a.shape
    N, Kb = b_nk.shape
    assert K == Kb

    itemsize = jnp.dtype(compute_dtype).itemsize

    # --- shape-adaptive tiling -------------------------------------------------
    tm = min(_round_up(M, 16), 256)          # bf16 sublane granularity = 16
    Mp = _round_up(M, tm)
    Np = _round_up(N, 128)                   # lane-dense outputs / weight rows

    if K < 128:
        Kp = _round_up(K, 32)                # e.g. first conv K=27 -> 32 (full block)
        tk = Kp
    else:
        Kp = _round_up(K, 128)
        tk = Kp if Kp <= 4608 else 2048      # single k-block for all conv layers
        Kp = _round_up(Kp, tk)
    nk = Kp // tk

    # tn: <=512 (keep >=2 parallel j blocks when N=1024, good for v7x megacore),
    # and cap B-block bytes so double-buffered tiles fit scoped VMEM everywhere.
    tn = 128
    for cand in (512, 256, 128):
        if Np % cand == 0 and cand * tk * itemsize <= (4 << 20):
            tn = cand
            break

    # --- pad operands (bf16 A/B, f32 scale/bias) -------------------------------
    a_p = jnp.pad(a.astype(compute_dtype), ((0, Mp - M), (0, Kp - K)))
    b_p = jnp.pad(b_nk.astype(compute_dtype), ((0, Np - N), (0, Kp - K)))
    s_p = jnp.pad(scale.astype(jnp.float32).reshape(1, N), ((0, 0), (0, Np - N)))
    c_p = jnp.pad(bias.astype(jnp.float32).reshape(1, N), ((0, 0), (0, Np - N)))

    grid = (Mp // tm, Np // tn, nk)

    if nk == 1:
        # Single K block: no accumulator scratch, no init/finalize gating.
        def kernel(a_ref, b_ref, s_ref, c_ref, o_ref):
            y = lax.dot_general(a_ref[...], b_ref[...], _DOT_NT,
                                preferred_element_type=jnp.float32)
            y = y * s_ref[...] + c_ref[...]
            if leaky:
                y = jnp.where(y > 0, y, 0.2 * y)
            o_ref[...] = y.astype(o_ref.dtype)

        scratch = []
    else:
        def kernel(a_ref, b_ref, s_ref, c_ref, o_ref, acc_ref):
            @pl.when(pl.program_id(2) == 0)
            def _init():
                acc_ref[...] = jnp.zeros_like(acc_ref)

            acc_ref[...] += lax.dot_general(a_ref[...], b_ref[...], _DOT_NT,
                                            preferred_element_type=jnp.float32)

            @pl.when(pl.program_id(2) == pl.num_programs(2) - 1)
            def _finalize():
                y = acc_ref[...] * s_ref[...] + c_ref[...]
                if leaky:
                    y = jnp.where(y > 0, y, 0.2 * y)
                o_ref[...] = y.astype(o_ref.dtype)

        scratch = [pltpu.VMEM((tm, tn), jnp.float32)]

    out = pl.pallas_call(
        kernel,
        out_shape=jax.ShapeDtypeStruct((Mp, Np), jnp.float32),
        grid_spec=pltpu.PrefetchScalarGridSpec(
            num_scalar_prefetch=0,
            grid=grid,
            in_specs=[
                pl.BlockSpec((tm, tk), lambda i, j, k: (i, k)),
                pl.BlockSpec((tn, tk), lambda i, j, k: (j, k)),   # weights, native (N, K)
                pl.BlockSpec((1, tn), lambda i, j, k: (0, j)),    # k-invariant scale
                pl.BlockSpec((1, tn), lambda i, j, k: (0, j)),    # k-invariant bias
            ],
            out_specs=pl.BlockSpec((tm, tn), lambda i, j, k: (i, j)),
            scratch_shapes=scratch,
        ),
        compiler_params=pltpu.CompilerParams(
            dimension_semantics=("parallel", "parallel", "arbitrary")),
    )(a_p, b_p, s_p, c_p)
    return out[:M, :N]


# ----------------------------------------------------------------------------
# JAX glue: im2col, conv block, adaptive average pooling
# ----------------------------------------------------------------------------
def _im2col(x, stride):
    """x: (N, H, W, C) -> (N*Ho*Wo, C*9), reduction columns ordered [cin, kh, kw]."""
    n, h, w, c = x.shape
    xp = jnp.pad(x, ((0, 0), (1, 1), (1, 1), (0, 0)))
    ho = (h + 2 - 3) // stride + 1
    wo = (w + 2 - 3) // stride + 1
    cols = []
    for kh in range(3):
        for kw in range(3):
            patch = xp[:, kh:kh + stride * (ho - 1) + 1:stride,
                          kw:kw + stride * (wo - 1) + 1:stride, :]
            cols.append(patch)
    patches = jnp.stack(cols, axis=-1)            # (n, ho, wo, c, 9); 9 ordered kh*3+kw
    return patches.reshape(n * ho * wo, c * 9), (n, ho, wo)


def _conv_block(x, blk, stride, use_bn):
    """ConvBlock: Conv2d(3x3, pad=1) -> [BatchNorm] -> LeakyReLU(0.2)."""
    w = blk["w"]                                  # (Cout, Cin, 3, 3) -- torch layout
    b = blk["b"]                                  # (Cout,)
    cout, cin = w.shape[0], w.shape[1]
    a, (n, ho, wo) = _im2col(x, stride)
    w_nk = w.reshape(cout, cin * 9)               # K order [cin, kh, kw]; no transpose
    if use_bn:
        inv = blk["gamma"] / jnp.sqrt(blk["var"] + 1e-5)
        scale = inv
        bias = blk["beta"] + (b - blk["mean"]) * inv
    else:
        scale = jnp.ones((cout,), jnp.float32)
        bias = b
    out = fused_matmul(a, w_nk, scale, bias, leaky=True)
    return out.reshape(n, ho, wo, cout)


def _adaptive_avg_pool_nchw(x, out_hw=8):
    """Matches torch.nn.AdaptiveAvgPool2d((out_hw, out_hw)) on NCHW input."""
    n, c, h, w = x.shape
    if h == out_hw and w == out_hw:
        return x
    if h % out_hw == 0 and w % out_hw == 0:
        return x.reshape(n, c, out_hw, h // out_hw, out_hw, w // out_hw).mean(axis=(3, 5))

    def pool_axis(arr, size, axis):
        slabs = []
        for i in range(out_hw):
            s = (i * size) // out_hw
            e = ((i + 1) * size + out_hw - 1) // out_hw
            sl = [slice(None)] * arr.ndim
            sl[axis] = slice(s, e)
            slabs.append(jnp.mean(arr[tuple(sl)], axis=axis, keepdims=True))
        return jnp.concatenate(slabs, axis=axis)

    return pool_axis(pool_axis(x, h, 2), w, 3)


# ----------------------------------------------------------------------------
# Parameters + full forward
# ----------------------------------------------------------------------------
FEATURES = (64, 64, 128, 128, 256, 256, 512, 512)


def init_params(key, in_channels=3, features=FEATURES):
    params = {"blocks": []}
    cin = in_channels
    for idx, feat in enumerate(features):
        key, k1, k2, k3, k4, k5, k6 = jax.random.split(key, 7)
        blk = {
            "w": jax.random.normal(k1, (feat, cin, 3, 3), jnp.float32)
                 * (1.0 / jnp.sqrt(9.0 * cin)),
            "b": 0.05 * jax.random.normal(k2, (feat,), jnp.float32),
        }
        if idx != 0:
            blk["gamma"] = 1.0 + 0.1 * jax.random.normal(k3, (feat,), jnp.float32)
            blk["beta"] = 0.1 * jax.random.normal(k4, (feat,), jnp.float32)
            blk["mean"] = 0.1 * jax.random.normal(k5, (feat,), jnp.float32)
            blk["var"] = 1.0 + 0.5 * jax.random.uniform(k6, (feat,), jnp.float32)
        params["blocks"].append(blk)
        cin = feat
    key, k1, k2, k3, k4 = jax.random.split(key, 5)
    fin = 512 * 8 * 8
    params["fc1_w"] = jax.random.normal(k1, (1024, fin), jnp.float32) / jnp.sqrt(fin)
    params["fc1_b"] = 0.05 * jax.random.normal(k2, (1024,), jnp.float32)
    params["fc2_w"] = jax.random.normal(k3, (1, 1024), jnp.float32) / jnp.sqrt(1024.0)
    params["fc2_b"] = 0.05 * jax.random.normal(k4, (1,), jnp.float32)
    return params


def discriminator_forward(x_nchw, params):
    # NCHW (torch) -> NHWC for the conv stages.
    x = jnp.transpose(x_nchw.astype(jnp.float32), (0, 2, 3, 1))
    for idx, blk in enumerate(params["blocks"]):
        stride = idx % 2 + 1
        x = _conv_block(x, blk, stride, use_bn=(idx != 0))

    n, h, w, c = x.shape
    fc1_w, fc1_b = params["fc1_w"], params["fc1_b"]

    if h == 1 and w == 1 and c * 64 == fc1_w.shape[1]:
        # AdaptiveAvgPool((8,8)) on a 1x1 map replicates each channel 64x and
        # Flatten orders them contiguously per channel, so fold the replication
        # into fc1 by summing its 64 spatial columns per channel (exact).
        w_eff = fc1_w.reshape(fc1_w.shape[0], c, 64).sum(axis=-1)   # (1024, C)
        feats = x.reshape(n, c)
    else:
        # General path: back to NCHW so pool + Flatten match torch (C, H, W) order.
        x_nchw2 = jnp.transpose(x, (0, 3, 1, 2))
        pooled = _adaptive_avg_pool_nchw(x_nchw2, 8)
        feats = pooled.reshape(n, c * 64)
        w_eff = fc1_w                                               # native (N, K)

    # Linear(512*8*8 -> 1024) + LeakyReLU(0.2)   (weight consumed untransposed)
    h1 = fused_matmul(feats, w_eff,
                      jnp.ones((fc1_w.shape[0],), jnp.float32), fc1_b, leaky=True)
    # Linear(1024 -> 1)
    out = fused_matmul(h1, params["fc2_w"],
                       jnp.ones((1,), jnp.float32), params["fc2_b"], leaky=False)
    return out  # (N, 1)


if __name__ == "__main__":
    key = jax.random.PRNGKey(0)
    kp, kx = jax.random.split(key)
    params = init_params(kp, in_channels=3)
    # Small input consistent with the module: batch=2, C=3, 16x16 spatial.
    x = jax.random.normal(kx, (2, 3, 16, 16), jnp.float32)

    fwd = jax.jit(discriminator_forward)
    out = fwd(x, params)
    out = jax.block_until_ready(out)
    assert out.shape == (2, 1) and out.dtype == jnp.float32
    assert bool(jnp.all(jnp.isfinite(out)))
    print("KERNEL_OK")
</pallas_src>

<mosaic_0001>
module attributes {stable_mosaic.version = 11 : i64} {
  func.func private @main(%arg0: i32) attributes {dimension_semantics = [#tpu.dimension_semantics<core_parallel>], iteration_bounds = array<i64: 2>, tpu.core_type = #tpu.core_type<sc_scalar_subcore>, window_params = []} {
    return
  }
}

module attributes {stable_mosaic.version = 11 : i64} {
  func.func private @main(%arg0: i32) attributes {dimension_semantics = [#tpu.dimension_semantics<core_parallel>], iteration_bounds = array<i64: 2>, tpu.core_type = #tpu.core_type<sc_scalar_subcore>, window_params = []} {
    return
  }
}

module attributes {stable_mosaic.version = 11 : i64} {
  func.func @kernel(%arg0: i32, %arg1: i32, %arg2: i32, %arg3: memref<256x32xbf16, #tpu.memory_space<vmem>>, %arg4: memref<128x32xbf16, #tpu.memory_space<vmem>>, %arg5: memref<1x128xf32, #tpu.memory_space<vmem>>, %arg6: memref<1x128xf32, #tpu.memory_space<vmem>>, %arg7: memref<256x128xf32, #tpu.memory_space<vmem>>) attributes {dimension_semantics = [#tpu.dimension_semantics<parallel>, #tpu.dimension_semantics<parallel>, #tpu.dimension_semantics<arbitrary>], iteration_bounds = array<i64: 2, 1, 1>, scalar_prefetch = 0 : i64, scratch_operands = 0 : i64, tpu.core_type = #tpu.core_type<tc>, window_params = [{transform_indices = @transform_0, window_bounds = array<i64: 256, 32>}, {transform_indices = @transform_1, window_bounds = array<i64: 128, 32>}, {transform_indices = @transform_2, window_bounds = array<i64: 1, 128>}, {transform_indices = @transform_3, window_bounds = array<i64: 1, 128>}, {transform_indices = @transform_4, window_bounds = array<i64: 256, 128>}]} {
    %c0 = arith.constant 0 : index
    %c0_0 = arith.constant 0 : index
    %0 = vector.load %arg3[%c0, %c0_0] : memref<256x32xbf16, #tpu.memory_space<vmem>>, vector<256x32xbf16>
    %c0_1 = arith.constant 0 : index
    %c0_2 = arith.constant 0 : index
    %1 = vector.load %arg4[%c0_1, %c0_2] : memref<128x32xbf16, #tpu.memory_space<vmem>>, vector<128x32xbf16>
    %cst = arith.constant dense<0.000000e+00> : vector<256x128xf32>
    %2 = tpu.matmul %0, %1, %cst {dimension_numbers = #tpu.dot_dimension_numbers<[1], [1], [0], [0], [0, 0, 1, 0], [], []>} : vector<256x32xbf16>, vector<128x32xbf16>, vector<256x128xf32> -> vector<256x128xf32>
    %c0_3 = arith.constant 0 : index
    %c0_4 = arith.constant 0 : index
    %3 = vector.load %arg5[%c0_3, %c0_4] : memref<1x128xf32, #tpu.memory_space<vmem>>, vector<1x128xf32>
    %4 = vector.broadcast %3 : vector<1x128xf32> to vector<256x128xf32>
    %5 = arith.mulf %2, %4 : vector<256x128xf32>
    %c0_5 = arith.constant 0 : index
    %c0_6 = arith.constant 0 : index
    %6 = vector.load %arg6[%c0_5, %c0_6] : memref<1x128xf32, #tpu.memory_space<vmem>>, vector<1x128xf32>
    %7 = vector.broadcast %6 : vector<1x128xf32> to vector<256x128xf32>
    %8 = arith.addf %5, %7 : vector<256x128xf32>
    %cst_7 = arith.constant 0.000000e+00 : f32
    %9 = vector.broadcast %cst_7 : f32 to vector<256x128xf32>
    %10 = arith.cmpf ogt, %8, %9 : vector<256x128xf32>
    %cst_8 = arith.constant 2.000000e-01 : f32
    %11 = vector.broadcast %cst_8 : f32 to vector<256x128xf32>
    %12 = arith.mulf %11, %8 : vector<256x128xf32>
    %13 = arith.select %10, %8, %12 : vector<256x128xi1>, vector<256x128xf32>
    %c0_9 = arith.constant 0 : index
    %c0_10 = arith.constant 0 : index
    %14 = vector.load %arg7[%c0_9, %c0_10] : memref<256x128xf32, #tpu.memory_space<vmem>>, vector<256x128xf32>
    tpu.vector_store %arg7[%c0_9, %c0_10], %13 {strides = array<i32>} : memref<256x128xf32, #tpu.memory_space<vmem>>, vector<256x128xf32>,
    return
  }
  func.func @transform_0(%arg0: i32, %arg1: i32, %arg2: i32) -> (i32, i32) {
    %c0_i32 = arith.constant 0 : i32
    return %arg0, %arg2 : i32, i32
  }
  func.func @transform_1(%arg0: i32, %arg1: i32, %arg2: i32) -> (i32, i32) {
    %c0_i32 = arith.constant 0 : i32
    return %arg1, %arg2 : i32, i32
  }
  func.func @transform_2(%arg0: i32, %arg1: i32, %arg2: i32) -> (i32, i32) {
    %c0_i32 = arith.constant 0 : i32
    %c0_i32_0 = arith.constant 0 : i32
    return %c0_i32, %arg1 : i32, i32
  }
  func.func @transform_3(%arg0: i32, %arg1: i32, %arg2: i32) -> (i32, i32) {
    %c0_i32 = arith.constant 0 : i32
    %c0_i32_0 = arith.constant 0 : i32
    return %c0_i32, %arg1 : i32, i32
  }
  func.func @transform_4(%arg0: i32, %arg1: i32, %arg2: i32) -> (i32, i32) {
    %c0_i32 = arith.constant 0 : i32
    return %arg0, %arg1 : i32, i32
  }
}

module attributes {stable_mosaic.version = 11 : i64} {
  func.func @kernel(%arg0: i32, %arg1: i32, %arg2: i32, %arg3: memref<128x640xbf16, #tpu.memory_space<vmem>>, %arg4: memref<128x640xbf16, #tpu.memory_space<vmem>>, %arg5: memref<1x128xf32, #tpu.memory_space<vmem>>, %arg6: memref<1x128xf32, #tpu.memory_space<vmem>>, %arg7: memref<128x128xf32, #tpu.memory_space<vmem>>) attributes {dimension_semantics = [#tpu.dimension_semantics<parallel>, #tpu.dimension_semantics<parallel>, #tpu.dimension_semantics<arbitrary>], iteration_bounds = array<i64: 1, 1, 1>, scalar_prefetch = 0 : i64, scratch_operands = 0 : i64, tpu.core_type = #tpu.core_type<tc>, window_params = [{transform_indices = @transform_0, window_bounds = array<i64: 128, 640>}, {transform_indices = @transform_1, window_bounds = array<i64: 128, 640>}, {transform_indices = @transform_2, window_bounds = array<i64: 1, 128>}, {transform_indices = @transform_3, window_bounds = array<i64: 1, 128>}, {transform_indices = @transform_4, window_bounds = array<i64: 128, 128>}]} {
    %c0 = arith.constant 0 : index
    %c0_0 = arith.constant 0 : index
    %0 = vector.load %arg3[%c0, %c0_0] : memref<128x640xbf16, #tpu.memory_space<vmem>>, vector<128x640xbf16>
    %c0_1 = arith.constant 0 : index
    %c0_2 = arith.constant 0 : index
    %1 = vector.load %arg4[%c0_1, %c0_2] : memref<128x640xbf16, #tpu.memory_space<vmem>>, vector<128x640xbf16>
    %cst = arith.constant dense<0.000000e+00> : vector<128x128xf32>
    %2 = tpu.matmul %0, %1, %cst {dimension_numbers = #tpu.dot_dimension_numbers<[1], [1], [0], [0], [0, 0, 1, 0], [], []>} : vector<128x640xbf16>, vector<128x640xbf16>, vector<128x128xf32> -> vector<128x128xf32>
    %c0_3 = arith.constant 0 : index
    %c0_4 = arith.constant 0 : index
    %3 = vector.load %arg5[%c0_3, %c0_4] : memref<1x128xf32, #tpu.memory_space<vmem>>, vector<1x128xf32>
    %4 = vector.broadcast %3 : vector<1x128xf32> to vector<128x128xf32>
    %5 = arith.mulf %2, %4 : vector<128x128xf32>
    %c0_5 = arith.constant 0 : index
    %c0_6 = arith.constant 0 : index
    %6 = vector.load %arg6[%c0_5, %c0_6] : memref<1x128xf32, #tpu.memory_space<vmem>>, vector<1x128xf32>
    %7 = vector.broadcast %6 : vector<1x128xf32> to vector<128x128xf32>
    %8 = arith.addf %5, %7 : vector<128x128xf32>
    %cst_7 = arith.constant 0.000000e+00 : f32
    %9 = vector.broadcast %cst_7 : f32 to vector<128x128xf32>
    %10 = arith.cmpf ogt, %8, %9 : vector<128x128xf32>
    %cst_8 = arith.constant 2.000000e-01 : f32
    %11 = vector.broadcast %cst_8 : f32 to vector<128x128xf32>
    %12 = arith.mulf %11, %8 : vector<128x128xf32>
    %13 = arith.select %10, %8, %12 : vector<128x128xi1>, vector<128x128xf32>
    %c0_9 = arith.constant 0 : index
    %c0_10 = arith.constant 0 : index
    %14 = vector.load %arg7[%c0_9, %c0_10] : memref<128x128xf32, #tpu.memory_space<vmem>>, vector<128x128xf32>
    tpu.vector_store %arg7[%c0_9, %c0_10], %13 {strides = array<i32>} : memref<128x128xf32, #tpu.memory_space<vmem>>, vector<128x128xf32>,
    return
  }
  func.func @transform_0(%arg0: i32, %arg1: i32, %arg2: i32) -> (i32, i32) {
    %c0_i32 = arith.constant 0 : i32
    return %arg0, %arg2 : i32, i32
  }
  func.func @transform_1(%arg0: i32, %arg1: i32, %arg2: i32) -> (i32, i32) {
    %c0_i32 = arith.constant 0 : i32
    return %arg1, %arg2 : i32, i32
  }
  func.func @transform_2(%arg0: i32, %arg1: i32, %arg2: i32) -> (i32, i32) {
    %c0_i32 = arith.constant 0 : i32
    %c0_i32_0 = arith.constant 0 : i32
    return %c0_i32, %arg1 : i32, i32
  }
  func.func @transform_3(%arg0: i32, %arg1: i32, %arg2: i32) -> (i32, i32) {
    %c0_i32 = arith.constant 0 : i32
    %c0_i32_0 = arith.constant 0 : i32
    return %c0_i32, %arg1 : i32, i32
  }
  func.func @transform_4(%arg0: i32, %arg1: i32, %arg2: i32) -> (i32, i32) {
    %c0_i32 = arith.constant 0 : i32
    return %arg0, %arg1 : i32, i32
  }
}

module attributes {stable_mosaic.version = 11 : i64} {
  func.func @kernel(%arg0: i32, %arg1: i32, %arg2: i32, %arg3: memref<32x1152xbf16, #tpu.memory_space<vmem>>, %arg4: memref<128x1152xbf16, #tpu.memory_space<vmem>>, %arg5: memref<1x128xf32, #tpu.memory_space<vmem>>, %arg6: memref<1x128xf32, #tpu.memory_space<vmem>>, %arg7: memref<32x128xf32, #tpu.memory_space<vmem>>) attributes {dimension_semantics = [#tpu.dimension_semantics<parallel>, #tpu.dimension_semantics<parallel>, #tpu.dimension_semantics<arbitrary>], iteration_bounds = array<i64: 1, 1, 1>, scalar_prefetch = 0 : i64, scratch_operands = 0 : i64, tpu.core_type = #tpu.core_type<tc>, window_params = [{transform_indices = @transform_0, window_bounds = array<i64: 32, 1152>}, {transform_indices = @transform_1, window_bounds = array<i64: 128, 1152>}, {transform_indices = @transform_2, window_bounds = array<i64: 1, 128>}, {transform_indices = @transform_3, window_bounds = array<i64: 1, 128>}, {transform_indices = @transform_4, window_bounds = array<i64: 32, 128>}]} {
    %c0 = arith.constant 0 : index
    %c0_0 = arith.constant 0 : index
    %0 = vector.load %arg3[%c0, %c0_0] : memref<32x1152xbf16, #tpu.memory_space<vmem>>, vector<32x1152xbf16>
    %c0_1 = arith.constant 0 : index
    %c0_2 = arith.constant 0 : index
    %1 = vector.load %arg4[%c0_1, %c0_2] : memref<128x1152xbf16, #tpu.memory_space<vmem>>, vector<128x1152xbf16>
    %cst = arith.constant dense<0.000000e+00> : vector<32x128xf32>
    %2 = tpu.matmul %0, %1, %cst {dimension_numbers = #tpu.dot_dimension_numbers<[1], [1], [0], [0], [0, 0, 1, 0], [], []>} : vector<32x1152xbf16>, vector<128x1152xbf16>, vector<32x128xf32> -> vector<32x128xf32>
    %c0_3 = arith.constant 0 : index
    %c0_4 = arith.constant 0 : index
    %3 = vector.load %arg5[%c0_3, %c0_4] : memref<1x128xf32, #tpu.memory_space<vmem>>, vector<1x128xf32>
    %4 = vector.broadcast %3 : vector<1x128xf32> to vector<32x128xf32>
    %5 = arith.mulf %2, %4 : vector<32x128xf32>
    %c0_5 = arith.constant 0 : index
    %c0_6 = arith.constant 0 : index
    %6 = vector.load %arg6[%c0_5, %c0_6] : memref<1x128xf32, #tpu.memory_space<vmem>>, vector<1x128xf32>
    %7 = vector.broadcast %6 : vector<1x128xf32> to vector<32x128xf32>
    %8 = arith.addf %5, %7 : vector<32x128xf32>
    %cst_7 = arith.constant 0.000000e+00 : f32
    %9 = vector.broadcast %cst_7 : f32 to vector<32x128xf32>
    %10 = arith.cmpf ogt, %8, %9 : vector<32x128xf32>
    %cst_8 = arith.constant 2.000000e-01 : f32
    %11 = vector.broadcast %cst_8 : f32 to vector<32x128xf32>
    %12 = arith.mulf %11, %8 : vector<32x128xf32>
    %13 = arith.select %10, %8, %12 : vector<32x128xi1>, vector<32x128xf32>
    %c0_9 = arith.constant 0 : index
    %c0_10 = arith.constant 0 : index
    %14 = vector.load %arg7[%c0_9, %c0_10] : memref<32x128xf32, #tpu.memory_space<vmem>>, vector<32x128xf32>
    tpu.vector_store %arg7[%c0_9, %c0_10], %13 {strides = array<i32>} : memref<32x128xf32, #tpu.memory_space<vmem>>, vector<32x128xf32>,
    return
  }
  func.func @transform_0(%arg0: i32, %arg1: i32, %arg2: i32) -> (i32, i32) {
    %c0_i32 = arith.constant 0 : i32
    return %arg0, %arg2 : i32, i32
  }
  func.func @transform_1(%arg0: i32, %arg1: i32, %arg2: i32) -> (i32, i32) {
    %c0_i32 = arith.constant 0 : i32
    return %arg1, %arg2 : i32, i32
  }
  func.func @transform_2(%arg0: i32, %arg1: i32, %arg2: i32) -> (i32, i32) {
    %c0_i32 = arith.constant 0 : i32
    %c0_i32_0 = arith.constant 0 : i32
    return %c0_i32, %arg1 : i32, i32
  }
  func.func @transform_3(%arg0: i32, %arg1: i32, %arg2: i32) -> (i32, i32) {
    %c0_i32 = arith.constant 0 : i32
    %c0_i32_0 = arith.constant 0 : i32
    return %c0_i32, %arg1 : i32, i32
  }
  func.func @transform_4(%arg0: i32, %arg1: i32, %arg2: i32) -> (i32, i32) {
    %c0_i32 = arith.constant 0 : i32
    return %arg0, %arg1 : i32, i32
  }
}

module attributes {stable_mosaic.version = 11 : i64} {
  func.func @kernel(%arg0: i32, %arg1: i32, %arg2: i32, %arg3: memref<32x1152xbf16, #tpu.memory_space<vmem>>, %arg4: memref<256x1152xbf16, #tpu.memory_space<vmem>>, %arg5: memref<1x256xf32, #tpu.memory_space<vmem>>, %arg6: memref<1x256xf32, #tpu.memory_space<vmem>>, %arg7: memref<32x256xf32, #tpu.memory_space<vmem>>) attributes {dimension_semantics = [#tpu.dimension_semantics<parallel>, #tpu.dimension_semantics<parallel>, #tpu.dimension_semantics<arbitrary>], iteration_bounds = array<i64: 1, 1, 1>, scalar_prefetch = 0 : i64, scratch_operands = 0 : i64, tpu.core_type = #tpu.core_type<tc>, window_params = [{transform_indices = @transform_0, window_bounds = array<i64: 32, 1152>}, {transform_indices = @transform_1, window_bounds = array<i64: 256, 1152>}, {transform_indices = @transform_2, window_bounds = array<i64: 1, 256>}, {transform_indices = @transform_3, window_bounds = array<i64: 1, 256>}, {transform_indices = @transform_4, window_bounds = array<i64: 32, 256>}]} {
    %c0 = arith.constant 0 : index
    %c0_0 = arith.constant 0 : index
    %0 = vector.load %arg3[%c0, %c0_0] : memref<32x1152xbf16, #tpu.memory_space<vmem>>, vector<32x1152xbf16>
    %c0_1 = arith.constant 0 : index
    %c0_2 = arith.constant 0 : index
    %1 = vector.load %arg4[%c0_1, %c0_2] : memref<256x1152xbf16, #tpu.memory_space<vmem>>, vector<256x1152xbf16>
    %cst = arith.constant dense<0.000000e+00> : vector<32x256xf32>
    %2 = tpu.matmul %0, %1, %cst {dimension_numbers = #tpu.dot_dimension_numbers<[1], [1], [0], [0], [0, 0, 1, 0], [], []>} : vector<32x1152xbf16>, vector<256x1152xbf16>, vector<32x256xf32> -> vector<32x256xf32>
    %c0_3 = arith.constant 0 : index
    %c0_4 = arith.constant 0 : index
    %3 = vector.load %arg5[%c0_3, %c0_4] : memref<1x256xf32, #tpu.memory_space<vmem>>, vector<1x256xf32>
    %4 = vector.broadcast %3 : vector<1x256xf32> to vector<32x256xf32>
    %5 = arith.mulf %2, %4 : vector<32x256xf32>
    %c0_5 = arith.constant 0 : index
    %c0_6 = arith.constant 0 : index
    %6 = vector.load %arg6[%c0_5, %c0_6] : memref<1x256xf32, #tpu.memory_space<vmem>>, vector<1x256xf32>
    %7 = vector.broadcast %6 : vector<1x256xf32> to vector<32x256xf32>
    %8 = arith.addf %5, %7 : vector<32x256xf32>
    %cst_7 = arith.constant 0.000000e+00 : f32
    %9 = vector.broadcast %cst_7 : f32 to vector<32x256xf32>
    %10 = arith.cmpf ogt, %8, %9 : vector<32x256xf32>
    %cst_8 = arith.constant 2.000000e-01 : f32
    %11 = vector.broadcast %cst_8 : f32 to vector<32x256xf32>
    %12 = arith.mulf %11, %8 : vector<32x256xf32>
    %13 = arith.select %10, %8, %12 : vector<32x256xi1>, vector<32x256xf32>
    %c0_9 = arith.constant 0 : index
    %c0_10 = arith.constant 0 : index
    %14 = vector.load %arg7[%c0_9, %c0_10] : memref<32x256xf32, #tpu.memory_space<vmem>>, vector<32x256xf32>
    tpu.vector_store %arg7[%c0_9, %c0_10], %13 {strides = array<i32>} : memref<32x256xf32, #tpu.memory_space<vmem>>, vector<32x256xf32>,
    return
  }
  func.func @transform_0(%arg0: i32, %arg1: i32, %arg2: i32) -> (i32, i32) {
    %c0_i32 = arith.constant 0 : i32
    return %arg0, %arg2 : i32, i32
  }
  func.func @transform_1(%arg0: i32, %arg1: i32, %arg2: i32) -> (i32, i32) {
    %c0_i32 = arith.constant 0 : i32
    return %arg1, %arg2 : i32, i32
  }
  func.func @transform_2(%arg0: i32, %arg1: i32, %arg2: i32) -> (i32, i32) {
    %c0_i32 = arith.constant 0 : i32
    %c0_i32_0 = arith.constant 0 : i32
    return %c0_i32, %arg1 : i32, i32
  }
  func.func @transform_3(%arg0: i32, %arg1: i32, %arg2: i32) -> (i32, i32) {
    %c0_i32 = arith.constant 0 : i32
    %c0_i32_0 = arith.constant 0 : i32
    return %c0_i32, %arg1 : i32, i32
  }
  func.func @transform_4(%arg0: i32, %arg1: i32, %arg2: i32) -> (i32, i32) {
    %c0_i32 = arith.constant 0 : i32
    return %arg0, %arg1 : i32, i32
  }
}

module attributes {stable_mosaic.version = 11 : i64} {
  func.func @kernel(%arg0: i32, %arg1: i32, %arg2: i32, %arg3: memref<16x2304xbf16, #tpu.memory_space<vmem>>, %arg4: memref<256x2304xbf16, #tpu.memory_space<vmem>>, %arg5: memref<1x256xf32, #tpu.memory_space<vmem>>, %arg6: memref<1x256xf32, #tpu.memory_space<vmem>>, %arg7: memref<16x256xf32, #tpu.memory_space<vmem>>) attributes {dimension_semantics = [#tpu.dimension_semantics<parallel>, #tpu.dimension_semantics<parallel>, #tpu.dimension_semantics<arbitrary>], iteration_bounds = array<i64: 1, 1, 1>, scalar_prefetch = 0 : i64, scratch_operands = 0 : i64, tpu.core_type = #tpu.core_type<tc>, window_params = [{transform_indices = @transform_0, window_bounds = array<i64: 16, 2304>}, {transform_indices = @transform_1, window_bounds = array<i64: 256, 2304>}, {transform_indices = @transform_2, window_bounds = array<i64: 1, 256>}, {transform_indices = @transform_3, window_bounds = array<i64: 1, 256>}, {transform_indices = @transform_4, window_bounds = array<i64: 16, 256>}]} {
    %c0 = arith.constant 0 : index
    %c0_0 = arith.constant 0 : index
    %0 = vector.load %arg3[%c0, %c0_0] : memref<16x2304xbf16, #tpu.memory_space<vmem>>, vector<16x2304xbf16>
    %c0_1 = arith.constant 0 : index
    %c0_2 = arith.constant 0 : index
    %1 = vector.load %arg4[%c0_1, %c0_2] : memref<256x2304xbf16, #tpu.memory_space<vmem>>, vector<256x2304xbf16>
    %cst = arith.constant dense<0.000000e+00> : vector<16x256xf32>
    %2 = tpu.matmul %0, %1, %cst {dimension_numbers = #tpu.dot_dimension_numbers<[1], [1], [0], [0], [0, 0, 1, 0], [], []>} : vector<16x2304xbf16>, vector<256x2304xbf16>, vector<16x256xf32> -> vector<16x256xf32>
    %c0_3 = arith.constant 0 : index
    %c0_4 = arith.constant 0 : index
    %3 = vector.load %arg5[%c0_3, %c0_4] : memref<1x256xf32, #tpu.memory_space<vmem>>, vector<1x256xf32>
    %4 = vector.broadcast %3 : vector<1x256xf32> to vector<16x256xf32>
    %5 = arith.mulf %2, %4 : vector<16x256xf32>
    %c0_5 = arith.constant 0 : index
    %c0_6 = arith.constant 0 : index
    %6 = vector.load %arg6[%c0_5, %c0_6] : memref<1x256xf32, #tpu.memory_space<vmem>>, vector<1x256xf32>
    %7 = vector.broadcast %6 : vector<1x256xf32> to vector<16x256xf32>
    %8 = arith.addf %5, %7 : vector<16x256xf32>
    %cst_7 = arith.constant 0.000000e+00 : f32
    %9 = vector.broadcast %cst_7 : f32 to vector<16x256xf32>
    %10 = arith.cmpf ogt, %8, %9 : vector<16x256xf32>
    %cst_8 = arith.constant 2.000000e-01 : f32
    %11 = vector.broadcast %cst_8 : f32 to vector<16x256xf32>
    %12 = arith.mulf %11, %8 : vector<16x256xf32>
    %13 = arith.select %10, %8, %12 : vector<16x256xi1>, vector<16x256xf32>
    %c0_9 = arith.constant 0 : index
    %c0_10 = arith.constant 0 : index
    %14 = vector.load %arg7[%c0_9, %c0_10] : memref<16x256xf32, #tpu.memory_space<vmem>>, vector<16x256xf32>
    tpu.vector_store %arg7[%c0_9, %c0_10], %13 {strides = array<i32>} : memref<16x256xf32, #tpu.memory_space<vmem>>, vector<16x256xf32>,
    return
  }
  func.func @transform_0(%arg0: i32, %arg1: i32, %arg2: i32) -> (i32, i32) {
    %c0_i32 = arith.constant 0 : i32
    return %arg0, %arg2 : i32, i32
  }
  func.func @transform_1(%arg0: i32, %arg1: i32, %arg2: i32) -> (i32, i32) {
    %c0_i32 = arith.constant 0 : i32
    return %arg1, %arg2 : i32, i32
  }
  func.func @transform_2(%arg0: i32, %arg1: i32, %arg2: i32) -> (i32, i32) {
    %c0_i32 = arith.constant 0 : i32
    %c0_i32_0 = arith.constant 0 : i32
    return %c0_i32, %arg1 : i32, i32
  }
  func.func @transform_3(%arg0: i32, %arg1: i32, %arg2: i32) -> (i32, i32) {
    %c0_i32 = arith.constant 0 : i32
    %c0_i32_0 = arith.constant 0 : i32
    return %c0_i32, %arg1 : i32, i32
  }
  func.func @transform_4(%arg0: i32, %arg1: i32, %arg2: i32) -> (i32, i32) {
    %c0_i32 = arith.constant 0 : i32
    return %arg0, %arg1 : i32, i32
  }
}

module attributes {stable_mosaic.version = 11 : i64} {
  func.func @kernel(%arg0: i32, %arg1: i32, %arg2: i32, %arg3: memref<16x2304xbf16, #tpu.memory_space<vmem>>, %arg4: memref<512x2304xbf16, #tpu.memory_space<vmem>>, %arg5: memref<1x512xf32, #tpu.memory_space<vmem>>, %arg6: memref<1x512xf32, #tpu.memory_space<vmem>>, %arg7: memref<16x512xf32, #tpu.memory_space<vmem>>) attributes {dimension_semantics = [#tpu.dimension_semantics<parallel>, #tpu.dimension_semantics<parallel>, #tpu.dimension_semantics<arbitrary>], iteration_bounds = array<i64: 1, 1, 1>, scalar_prefetch = 0 : i64, scratch_operands = 0 : i64, tpu.core_type = #tpu.core_type<tc>, window_params = [{transform_indices = @transform_0, window_bounds = array<i64: 16, 2304>}, {transform_indices = @transform_1, window_bounds = array<i64: 512, 2304>}, {transform_indices = @transform_2, window_bounds = array<i64: 1, 512>}, {transform_indices = @transform_3, window_bounds = array<i64: 1, 512>}, {transform_indices = @transform_4, window_bounds = array<i64: 16, 512>}]} {
    %c0 = arith.constant 0 : index
    %c0_0 = arith.constant 0 : index
    %0 = vector.load %arg3[%c0, %c0_0] : memref<16x2304xbf16, #tpu.memory_space<vmem>>, vector<16x2304xbf16>
    %c0_1 = arith.constant 0 : index
    %c0_2 = arith.constant 0 : index
    %1 = vector.load %arg4[%c0_1, %c0_2] : memref<512x2304xbf16, #tpu.memory_space<vmem>>, vector<512x2304xbf16>
    %cst = arith.constant dense<0.000000e+00> : vector<16x512xf32>
    %2 = tpu.matmul %0, %1, %cst {dimension_numbers = #tpu.dot_dimension_numbers<[1], [1], [0], [0], [0, 0, 1, 0], [], []>} : vector<16x2304xbf16>, vector<512x2304xbf16>, vector<16x512xf32> -> vector<16x512xf32>
    %c0_3 = arith.constant 0 : index
    %c0_4 = arith.constant 0 : index
    %3 = vector.load %arg5[%c0_3, %c0_4] : memref<1x512xf32, #tpu.memory_space<vmem>>, vector<1x512xf32>
    %4 = vector.broadcast %3 : vector<1x512xf32> to vector<16x512xf32>
    %5 = arith.mulf %2, %4 : vector<16x512xf32>
    %c0_5 = arith.constant 0 : index
    %c0_6 = arith.constant 0 : index
    %6 = vector.load %arg6[%c0_5, %c0_6] : memref<1x512xf32, #tpu.memory_space<vmem>>, vector<1x512xf32>
    %7 = vector.broadcast %6 : vector<1x512xf32> to vector<16x512xf32>
    %8 = arith.addf %5, %7 : vector<16x512xf32>
    %cst_7 = arith.constant 0.000000e+00 : f32
    %9 = vector.broadcast %cst_7 : f32 to vector<16x512xf32>
    %10 = arith.cmpf ogt, %8, %9 : vector<16x512xf32>
    %cst_8 = arith.constant 2.000000e-01 : f32
    %11 = vector.broadcast %cst_8 : f32 to vector<16x512xf32>
    %12 = arith.mulf %11, %8 : vector<16x512xf32>
    %13 = arith.select %10, %8, %12 : vector<16x512xi1>, vector<16x512xf32>
    %c0_9 = arith.constant 0 : index
    %c0_10 = arith.constant 0 : index
    %14 = vector.load %arg7[%c0_9, %c0_10] : memref<16x512xf32, #tpu.memory_space<vmem>>, vector<16x512xf32>
    tpu.vector_store %arg7[%c0_9, %c0_10], %13 {strides = array<i32>} : memref<16x512xf32, #tpu.memory_space<vmem>>, vector<16x512xf32>,
    return
  }
  func.func @transform_0(%arg0: i32, %arg1: i32, %arg2: i32) -> (i32, i32) {
    %c0_i32 = arith.constant 0 : i32
    return %arg0, %arg2 : i32, i32
  }
  func.func @transform_1(%arg0: i32, %arg1: i32, %arg2: i32) -> (i32, i32) {
    %c0_i32 = arith.constant 0 : i32
    return %arg1, %arg2 : i32, i32
  }
  func.func @transform_2(%arg0: i32, %arg1: i32, %arg2: i32) -> (i32, i32) {
    %c0_i32 = arith.constant 0 : i32
    %c0_i32_0 = arith.constant 0 : i32
    return %c0_i32, %arg1 : i32, i32
  }
  func.func @transform_3(%arg0: i32, %arg1: i32, %arg2: i32) -> (i32, i32) {
    %c0_i32 = arith.constant 0 : i32
    %c0_i32_0 = arith.constant 0 : i32
    return %c0_i32, %arg1 : i32, i32
  }
  func.func @transform_4(%arg0: i32, %arg1: i32, %arg2: i32) -> (i32, i32) {
    %c0_i32 = arith.constant 0 : i32
    return %arg0, %arg1 : i32, i32
  }
}

module attributes {stable_mosaic.version = 11 : i64} {
  func.func @kernel(%arg0: i32, %arg1: i32, %arg2: i32, %arg3: memref<16x4608xbf16, #tpu.memory_space<vmem>>, %arg4: memref<256x4608xbf16, #tpu.memory_space<vmem>>, %arg5: memref<1x256xf32, #tpu.memory_space<vmem>>, %arg6: memref<1x256xf32, #tpu.memory_space<vmem>>, %arg7: memref<16x256xf32, #tpu.memory_space<vmem>>) attributes {dimension_semantics = [#tpu.dimension_semantics<parallel>, #tpu.dimension_semantics<parallel>, #tpu.dimension_semantics<arbitrary>], iteration_bounds = array<i64: 1, 2, 1>, scalar_prefetch = 0 : i64, scratch_operands = 0 : i64, tpu.core_type = #tpu.core_type<tc>, window_params = [{transform_indices = @transform_0, window_bounds = array<i64: 16, 4608>}, {transform_indices = @transform_1, window_bounds = array<i64: 256, 4608>}, {transform_indices = @transform_2, window_bounds = array<i64: 1, 256>}, {transform_indices = @transform_3, window_bounds = array<i64: 1, 256>}, {transform_indices = @transform_4, window_bounds = array<i64: 16, 256>}]} {
    %c0 = arith.constant 0 : index
    %c0_0 = arith.constant 0 : index
    %0 = vector.load %arg3[%c0, %c0_0] : memref<16x4608xbf16, #tpu.memory_space<vmem>>, vector<16x4608xbf16>
    %c0_1 = arith.constant 0 : index
    %c0_2 = arith.constant 0 : index
    %1 = vector.load %arg4[%c0_1, %c0_2] : memref<256x4608xbf16, #tpu.memory_space<vmem>>, vector<256x4608xbf16>
    %cst = arith.constant dense<0.000000e+00> : vector<16x256xf32>
    %2 = tpu.matmul %0, %1, %cst {dimension_numbers = #tpu.dot_dimension_numbers<[1], [1], [0], [0], [0, 0, 1, 0], [], []>} : vector<16x4608xbf16>, vector<256x4608xbf16>, vector<16x256xf32> -> vector<16x256xf32>
    %c0_3 = arith.constant 0 : index
    %c0_4 = arith.constant 0 : index
    %3 = vector.load %arg5[%c0_3, %c0_4] : memref<1x256xf32, #tpu.memory_space<vmem>>, vector<1x256xf32>
    %4 = vector.broadcast %3 : vector<1x256xf32> to vector<16x256xf32>
    %5 = arith.mulf %2, %4 : vector<16x256xf32>
    %c0_5 = arith.constant 0 : index
    %c0_6 = arith.constant 0 : index
    %6 = vector.load %arg6[%c0_5, %c0_6] : memref<1x256xf32, #tpu.memory_space<vmem>>, vector<1x256xf32>
    %7 = vector.broadcast %6 : vector<1x256xf32> to vector<16x256xf32>
    %8 = arith.addf %5, %7 : vector<16x256xf32>
    %cst_7 = arith.constant 0.000000e+00 : f32
    %9 = vector.broadcast %cst_7 : f32 to vector<16x256xf32>
    %10 = arith.cmpf ogt, %8, %9 : vector<16x256xf32>
    %cst_8 = arith.constant 2.000000e-01 : f32
    %11 = vector.broadcast %cst_8 : f32 to vector<16x256xf32>
    %12 = arith.mulf %11, %8 : vector<16x256xf32>
    %13 = arith.select %10, %8, %12 : vector<16x256xi1>, vector<16x256xf32>
    %c0_9 = arith.constant 0 : index
    %c0_10 = arith.constant 0 : index
    %14 = vector.load %arg7[%c0_9, %c0_10] : memref<16x256xf32, #tpu.memory_space<vmem>>, vector<16x256xf32>
    tpu.vector_store %arg7[%c0_9, %c0_10], %13 {strides = array<i32>} : memref<16x256xf32, #tpu.memory_space<vmem>>, vector<16x256xf32>,
    return
  }
  func.func @transform_0(%arg0: i32, %arg1: i32, %arg2: i32) -> (i32, i32) {
    %c0_i32 = arith.constant 0 : i32
    return %arg0, %arg2 : i32, i32
  }
  func.func @transform_1(%arg0: i32, %arg1: i32, %arg2: i32) -> (i32, i32) {
    %c0_i32 = arith.constant 0 : i32
    return %arg1, %arg2 : i32, i32
  }
  func.func @transform_2(%arg0: i32, %arg1: i32, %arg2: i32) -> (i32, i32) {
    %c0_i32 = arith.constant 0 : i32
    %c0_i32_0 = arith.constant 0 : i32
    return %c0_i32, %arg1 : i32, i32
  }
  func.func @transform_3(%arg0: i32, %arg1: i32, %arg2: i32) -> (i32, i32) {
    %c0_i32 = arith.constant 0 : i32
    %c0_i32_0 = arith.constant 0 : i32
    return %c0_i32, %arg1 : i32, i32
  }
  func.func @transform_4(%arg0: i32, %arg1: i32, %arg2: i32) -> (i32, i32) {
    %c0_i32 = arith.constant 0 : i32
    return %arg0, %arg1 : i32, i32
  }
}

module attributes {stable_mosaic.version = 11 : i64} {
  func.func @kernel(%arg0: i32, %arg1: i32, %arg2: i32, %arg3: memref<16x512xbf16, #tpu.memory_space<vmem>>, %arg4: memref<512x512xbf16, #tpu.memory_space<vmem>>, %arg5: memref<1x512xf32, #tpu.memory_space<vmem>>, %arg6: memref<1x512xf32, #tpu.memory_space<vmem>>, %arg7: memref<16x512xf32, #tpu.memory_space<vmem>>) attributes {dimension_semantics = [#tpu.dimension_semantics<parallel>, #tpu.dimension_semantics<parallel>, #tpu.dimension_semantics<arbitrary>], iteration_bounds = array<i64: 1, 2, 1>, scalar_prefetch = 0 : i64, scratch_operands = 0 : i64, tpu.core_type = #tpu.core_type<tc>, window_params = [{transform_indices = @transform_0, window_bounds = array<i64: 16, 512>}, {transform_indices = @transform_1, window_bounds = array<i64: 512, 512>}, {transform_indices = @transform_2, window_bounds = array<i64: 1, 512>}, {transform_indices = @transform_3, window_bounds = array<i64: 1, 512>}, {transform_indices = @transform_4, window_bounds = array<i64: 16, 512>}]} {
    %c0 = arith.constant 0 : index
    %c0_0 = arith.constant 0 : index
    %0 = vector.load %arg3[%c0, %c0_0] : memref<16x512xbf16, #tpu.memory_space<vmem>>, vector<16x512xbf16>
    %c0_1 = arith.constant 0 : index
    %c0_2 = arith.constant 0 : index
    %1 = vector.load %arg4[%c0_1, %c0_2] : memref<512x512xbf16, #tpu.memory_space<vmem>>, vector<512x512xbf16>
    %cst = arith.constant dense<0.000000e+00> : vector<16x512xf32>
    %2 = tpu.matmul %0, %1, %cst {dimension_numbers = #tpu.dot_dimension_numbers<[1], [1], [0], [0], [0, 0, 1, 0], [], []>} : vector<16x512xbf16>, vector<512x512xbf16>, vector<16x512xf32> -> vector<16x512xf32>
    %c0_3 = arith.constant 0 : index
    %c0_4 = arith.constant 0 : index
    %3 = vector.load %arg5[%c0_3, %c0_4] : memref<1x512xf32, #tpu.memory_space<vmem>>, vector<1x512xf32>
    %4 = vector.broadcast %3 : vector<1x512xf32> to vector<16x512xf32>
    %5 = arith.mulf %2, %4 : vector<16x512xf32>
    %c0_5 = arith.constant 0 : index
    %c0_6 = arith.constant 0 : index
    %6 = vector.load %arg6[%c0_5, %c0_6] : memref<1x512xf32, #tpu.memory_space<vmem>>, vector<1x512xf32>
    %7 = vector.broadcast %6 : vector<1x512xf32> to vector<16x512xf32>
    %8 = arith.addf %5, %7 : vector<16x512xf32>
    %cst_7 = arith.constant 0.000000e+00 : f32
    %9 = vector.broadcast %cst_7 : f32 to vector<16x512xf32>
    %10 = arith.cmpf ogt, %8, %9 : vector<16x512xf32>
    %cst_8 = arith.constant 2.000000e-01 : f32
    %11 = vector.broadcast %cst_8 : f32 to vector<16x512xf32>
    %12 = arith.mulf %11, %8 : vector<16x512xf32>
    %13 = arith.select %10, %8, %12 : vector<16x512xi1>, vector<16x512xf32>
    %c0_9 = arith.constant 0 : index
    %c0_10 = arith.constant 0 : index
    %14 = vector.load %arg7[%c0_9, %c0_10] : memref<16x512xf32, #tpu.memory_space<vmem>>, vector<16x512xf32>
    tpu.vector_store %arg7[%c0_9, %c0_10], %13 {strides = array<i32>} : memref<16x512xf32, #tpu.memory_space<vmem>>, vector<16x512xf32>,
    return
  }
  func.func @transform_0(%arg0: i32, %arg1: i32, %arg2: i32) -> (i32, i32) {
    %c0_i32 = arith.constant 0 : i32
    return %arg0, %arg2 : i32, i32
  }
  func.func @transform_1(%arg0: i32, %arg1: i32, %arg2: i32) -> (i32, i32) {
    %c0_i32 = arith.constant 0 : i32
    return %arg1, %arg2 : i32, i32
  }
  func.func @transform_2(%arg0: i32, %arg1: i32, %arg2: i32) -> (i32, i32) {
    %c0_i32 = arith.constant 0 : i32
    %c0_i32_0 = arith.constant 0 : i32
    return %c0_i32, %arg1 : i32, i32
  }
  func.func @transform_3(%arg0: i32, %arg1: i32, %arg2: i32) -> (i32, i32) {
    %c0_i32 = arith.constant 0 : i32
    %c0_i32_0 = arith.constant 0 : i32
    return %c0_i32, %arg1 : i32, i32
  }
  func.func @transform_4(%arg0: i32, %arg1: i32, %arg2: i32) -> (i32, i32) {
    %c0_i32 = arith.constant 0 : i32
    return %arg0, %arg1 : i32, i32
  }
}

module attributes {stable_mosaic.version = 11 : i64} {
  func.func @kernel(%arg0: i32, %arg1: i32, %arg2: i32, %arg3: memref<16x1024xbf16, #tpu.memory_space<vmem>>, %arg4: memref<128x1024xbf16, #tpu.memory_space<vmem>>, %arg5: memref<1x128xf32, #tpu.memory_space<vmem>>, %arg6: memref<1x128xf32, #tpu.memory_space<vmem>>, %arg7: memref<16x128xf32, #tpu.memory_space<vmem>>) attributes {dimension_semantics = [#tpu.dimension_semantics<parallel>, #tpu.dimension_semantics<parallel>, #tpu.dimension_semantics<arbitrary>], iteration_bounds = array<i64: 1, 1, 1>, scalar_prefetch = 0 : i64, scratch_operands = 0 : i64, tpu.core_type = #tpu.core_type<tc>, window_params = [{transform_indices = @transform_0, window_bounds = array<i64: 16, 1024>}, {transform_indices = @transform_1, window_bounds = array<i64: 128, 1024>}, {transform_indices = @transform_2, window_bounds = array<i64: 1, 128>}, {transform_indices = @transform_3, window_bounds = array<i64: 1, 128>}, {transform_indices = @transform_4, window_bounds = array<i64: 16, 128>}]} {
    %c0 = arith.constant 0 : index
    %c0_0 = arith.constant 0 : index
    %0 = vector.load %arg3[%c0, %c0_0] : memref<16x1024xbf16, #tpu.memory_space<vmem>>, vector<16x1024xbf16>
    %c0_1 = arith.constant 0 : index
    %c0_2 = arith.constant 0 : index
    %1 = vector.load %arg4[%c0_1, %c0_2] : memref<128x1024xbf16, #tpu.memory_space<vmem>>, vector<128x1024xbf16>
    %cst = arith.constant dense<0.000000e+00> : vector<16x128xf32>
    %2 = tpu.matmul %0, %1, %cst {dimension_numbers = #tpu.dot_dimension_numbers<[1], [1], [0], [0], [0, 0, 1, 0], [], []>} : vector<16x1024xbf16>, vector<128x1024xbf16>, vector<16x128xf32> -> vector<16x128xf32>
    %c0_3 = arith.constant 0 : index
    %c0_4 = arith.constant 0 : index
    %3 = vector.load %arg5[%c0_3, %c0_4] : memref<1x128xf32, #tpu.memory_space<vmem>>, vector<1x128xf32>
    %4 = vector.broadcast %3 : vector<1x128xf32> to vector<16x128xf32>
    %5 = arith.mulf %2, %4 : vector<16x128xf32>
    %c0_5 = arith.constant 0 : index
    %c0_6 = arith.constant 0 : index
    %6 = vector.load %arg6[%c0_5, %c0_6] : memref<1x128xf32, #tpu.memory_space<vmem>>, vector<1x128xf32>
    %7 = vector.broadcast %6 : vector<1x128xf32> to vector<16x128xf32>
    %8 = arith.addf %5, %7 : vector<16x128xf32>
    %c0_7 = arith.constant 0 : index
    %c0_8 = arith.constant 0 : index
    %9 = vector.load %arg7[%c0_7, %c0_8] : memref<16x128xf32, #tpu.memory_space<vmem>>, vector<16x128xf32>
    tpu.vector_store %arg7[%c0_7, %c0_8], %8 {strides = array<i32>} : memref<16x128xf32, #tpu.memory_space<vmem>>, vector<16x128xf32>,
    return
  }
  func.func @transform_0(%arg0: i32, %arg1: i32, %arg2: i32) -> (i32, i32) {
    %c0_i32 = arith.constant 0 : i32
    return %arg0, %arg2 : i32, i32
  }
  func.func @transform_1(%arg0: i32, %arg1: i32, %arg2: i32) -> (i32, i32) {
    %c0_i32 = arith.constant 0 : i32
    return %arg1, %arg2 : i32, i32
  }
  func.func @transform_2(%arg0: i32, %arg1: i32, %arg2: i32) -> (i32, i32) {
    %c0_i32 = arith.constant 0 : i32
    %c0_i32_0 = arith.constant 0 : i32
    return %c0_i32, %arg1 : i32, i32
  }
  func.func @transform_3(%arg0: i32, %arg1: i32, %arg2: i32) -> (i32, i32) {
    %c0_i32 = arith.constant 0 : i32
    %c0_i32_0 = arith.constant 0 : i32
    return %c0_i32, %arg1 : i32, i32
  }
  func.func @transform_4(%arg0: i32, %arg1: i32, %arg2: i32) -> (i32, i32) {
    %c0_i32 = arith.constant 0 : i32
    return %arg0, %arg1 : i32, i32
  }
}

</mosaic_0001>

<bundles_post_ra>
// kernel: discriminator_forward.10
= control target key start
LH: loop header
LB: loop body
LE: loop exit
PB: predicated region body
PF: predicated region fallthrough
CT: control target
= control target key end

     0   :  { %s1289_s15 = smov 0   ;;  %s1291_s16 = smov 0   ;;  %s1516_s0 = inlined_call_operand.vmem [shape: bf16[512,32], index: 0, kind: input, shape index: {}]   ;;  %s1517_s1 = inlined_call_operand.vmem [shape: bf16[128,32], index: 1, kind: input, shape index: {}]   ;;  %s1518_s2 = inlined_call_operand.vmem [shape: f32[1,128], index: 2, kind: input, shape index: {}]   ;;  %s1519_s3 = inlined_call_operand.vmem [shape: f32[1,128], index: 3, kind: input, shape index: {}]   ;;  %s1520_s4 = inlined_call_operand.vmem [shape: f32[512,128], index: 4, kind: output, shape index: {}]  }
   0x1   :  { %s1293_s17 = smov 0  }
   0x2 LB: > { %s33_s18 = sadd.s32 1, %s1258_s16  ;;  %p1039_p0 = scmp.ge.s32.totalorder %s1262_s17, 1  ;;  %s1262_s17 = sphi %s1293_s17, %s14_s17   ;;  %s1258_s16 = sphi %s1291_s16, %s1522_s16   ;;  %s1254_s15 = sphi %s1289_s15, %s1521_s15  }
   0x3   : > { %p35_p1 = scmp.ge.s32.totalorder %s33_s18, 2  ;;  %p221_p2 = scmp.lt.s32.totalorder %s1262_s17, 3 }
   0x5   : > { %s1524_s18 = smov (%p35_p1, %s33_s18), 0  ;;  %p222_p3 = pnand %p1039_p0, %p221_p2 }
   0x6   : > { %v1216_v0 = vld [vmem:[%s1517_s1] sm:$0xff] (!%p222_p3)   ;;  %vm469_vm0 = vcmask (!%p222_p3), 261120   ;;  %v1217_v1 = vld [vmem:[%s1517_s1 + $0x8] sm:$0xff] (!%p222_p3)   ;;  %s1040_s23 = sshll.u32 (!%p222_p3), %s1254_s15, 5  ;;  %v1218_v4 = vld [vmem:[%s1517_s1 + $0x10] sm:$0xff] (!%p222_p3)  }
   0x7   : > { %225 = sbr.rel (%p222_p3) target bundleno = 328 (0x148), region = 36  ;;  %1176 = vmatprep.subr.msk.bf16.mxu0 (!%p222_p3), %vm469_vm0, %v1216_v0  ;;  %1177 = vmatprep.subr.msk.bf16.mxu1 (!%p222_p3), %vm469_vm0, %v1216_v0  ;;  %v519_v2 = vsel (!%p222_p3), %vm469_vm0, %v1216_v0, 0  ;;  %v522_v3 = vsel (!%p222_p3), %vm469_vm0, %v1217_v1, 0  ;;  %p268_p4 = scmp.lt.s32.totalorder (!%p222_p3), %s1040_s23, 63  ;;  %v525_v7 = vsel (!%p222_p3), %vm469_vm0, %v1218_v4, 0  ;;  %v1219_v8 = vld [vmem:[%s1517_s1 + $0x18] sm:$0xff] (!%p222_p3)  }
   0x8   : > { %1113 = vmatpush3.bf16.xpose.msra.mxu0 (!%p222_p3), %v519_v2  ;;  %1168 = vmatpush3.bf16.xpose.msra.mxu1 (!%p222_p3), %v519_v2  ;;  %v528_v9 = vsel (!%p222_p3), %vm469_vm0, %v1219_v8, 0  ;;  %v1220_v10 = vld [vmem:[%s1517_s1 + $0x20] sm:$0xff] (!%p222_p3)   ;;  %v1221_v12 = vld [vmem:[%s1517_s1 + $0x28] sm:$0xff] (!%p222_p3)   ;;  %v1222_v14 = vld [vmem:[%s1517_s1 + $0x30] sm:$0xff] (!%p222_p3)  }
   0x9   : > { %1178 = vmatprep.subr.msk.bf16.mxu0 (!%p222_p3), %vm469_vm0, %v1217_v1  ;;  %1179 = vmatprep.subr.msk.bf16.mxu1 (!%p222_p3), %vm469_vm0, %v1217_v1  ;;  %v531_v11 = vsel (!%p222_p3), %vm469_vm0, %v1220_v10, 0  ;;  %v534_v13 = vsel (!%p222_p3), %vm469_vm0, %v1221_v12, 0  ;;  %v537_v15 = vsel (!%p222_p3), %vm469_vm0, %v1222_v14, 0  ;;  %v1223_v16 = vld [vmem:[%s1517_s1 + $0x38] sm:$0xff] (!%p222_p3)   ;;  %v1398_v32 = vld [vmem:[%s1518_s2] ss:$0 sm:$0xff] (!%p222_p3) }
   0xa   : > { %v540_v17 = vsel (!%p222_p3), %vm469_vm0, %v1223_v16, 0  ;;  %v1403_v34 = vld [vmem:[%s1519_s3] ss:$0 sm:$0xff] (!%p222_p3) }
   0xe   : > { %s1526_s23 = smov (!%p268_p4, %s1040_s23), 63 }
   0xf   : > { %s1041_s26 = sshll.u32 %s1526_s23, 2  ;;  %s1043_s21 = sshll.u32 %s1526_s23, 3 }
  0x10   : > { %1115 = vmatpush3.bf16.xpose.msra.mxu0 %v522_v3  ;;  %1169 = vmatpush3.bf16.xpose.msra.mxu1 %v522_v3  ;;  %s1330_s29 = scalar_lea.vmem %s1516_s0, %s1041_s26  ;;  %s1421_s24 = scalar_lea.vmem %s1520_s4, %s1043_s21 }
  0x11   : > { %1180 = vmatprep.subr.msk.bf16.mxu0 %vm469_vm0, %v1218_v4  ;;  %1181 = vmatprep.subr.msk.bf16.mxu1 %vm469_vm0, %v1218_v4  ;;  %v1224_v5 = vld [vmem:[%s1330_s29] sm:$0xff]   ;;  %v1226_v18 = vld [vmem:[%s1330_s29 + $0x8] sm:$0xff]   ;;  %v1228_v20 = vld [vmem:[%s1330_s29 + $0x10] sm:$0xff]  }
  0x12   : > { %v1225_v6 = vld [vmem:[%s1330_s29 + $0x40] sm:$0xff]   ;;  %1128 = vmatprep.mubr.msk.bf16.mxu0 %vm469_vm0, %v1224_v5  ;;  %v1227_v19 = vld [vmem:[%s1330_s29 + $0x48] sm:$0xff]   ;;  %v1229_v21 = vld [vmem:[%s1330_s29 + $0x50] sm:$0xff]  }
  0x13   : > { %1144 = vmatprep.mubr.msk.bf16.mxu1 %vm469_vm0, %v1225_v6  ;;  %v1230_v22 = vld [vmem:[%s1330_s29 + $0x18] sm:$0xff]   ;;  %v1232_v24 = vld [vmem:[%s1330_s29 + $0x20] sm:$0xff]   ;;  %v1234_v26 = vld [vmem:[%s1330_s29 + $0x28] sm:$0xff]  }
  0x14   : > { %v1231_v23 = vld [vmem:[%s1330_s29 + $0x58] sm:$0xff]   ;;  %v1233_v25 = vld [vmem:[%s1330_s29 + $0x60] sm:$0xff]   ;;  %v1235_v27 = vld [vmem:[%s1330_s29 + $0x68] sm:$0xff]  }
  0x15   : > { %v1236_v28 = vld [vmem:[%s1330_s29 + $0x30] sm:$0xff]   ;;  %v1238_v30 = vld [vmem:[%s1330_s29 + $0x38] sm:$0xff]  }
  0x16   : > { %v1237_v29 = vld [vmem:[%s1330_s29 + $0x70] sm:$0xff]   ;;  %v1239_v31 = vld [vmem:[%s1330_s29 + $0x78] sm:$0xff]  }
  0x18   : > { %1117 = vmatpush3.bf16.xpose.msra.mxu0 %v525_v7  ;;  %1170 = vmatpush3.bf16.xpose.msra.mxu1 %v525_v7 }
  0x19   : > { %1182 = vmatprep.subr.msk.bf16.mxu0 %vm469_vm0, %v1219_v8  ;;  %1183 = vmatprep.subr.msk.bf16.mxu1 %vm469_vm0, %v1219_v8 }
  0x20   : > { %1119 = vmatpush3.bf16.xpose.msra.mxu0 %v528_v9  ;;  %1171 = vmatpush3.bf16.xpose.msra.mxu1 %v528_v9 }
  0x21   : > { %1184 = vmatprep.subr.msk.bf16.mxu0 %vm469_vm0, %v1220_v10  ;;  %1185 = vmatprep.subr.msk.bf16.mxu1 %vm469_vm0, %v1220_v10 }
  0x28   : > { %1121 = vmatpush3.bf16.xpose.msra.mxu0 %v531_v11  ;;  %1172 = vmatpush3.bf16.xpose.msra.mxu1 %v531_v11 }
  0x29   : > { %1186 = vmatprep.subr.msk.bf16.mxu0 %vm469_vm0, %v1221_v12  ;;  %1187 = vmatprep.subr.msk.bf16.mxu1 %vm469_vm0, %v1221_v12 }
  0x30   : > { %1123 = vmatpush3.bf16.xpose.msra.mxu0 %v534_v13  ;;  %1173 = vmatpush3.bf16.xpose.msra.mxu1 %v534_v13 }
  0x31   : > { %1188 = vmatprep.subr.msk.bf16.mxu0 %vm469_vm0, %v1222_v14  ;;  %1189 = vmatprep.subr.msk.bf16.mxu1 %vm469_vm0, %v1222_v14 }
  0x38   : > { %1125 = vmatpush3.bf16.xpose.msra.mxu0 %v537_v15  ;;  %1174 = vmatpush3.bf16.xpose.msra.mxu1 %v537_v15 }
  0x39   : > { %1190 = vmatprep.subr.msk.bf16.mxu0 %vm469_vm0, %v1223_v16  ;;  %1191 = vmatprep.subr.msk.bf16.mxu1 %vm469_vm0, %v1223_v16 }
  0x40   : > { %1127 = vmatpush3.bf16.xpose.msra.mxu0 %v540_v17  ;;  %1175 = vmatpush3.bf16.xpose.msra.mxu1 %v540_v17 }
  0x47   : > { %1129 = vmatmul.mubr.msk.bf16.vlgmr.msra.gmra.mrb[0].mxu0 %vm469_vm0, %v1226_v18  ;;  %1145 = vmatmul.mubr.msk.bf16.vlgmr.msra.gmra.mrb[0].mxu1 %vm469_vm0, %v1227_v19 }
  0x48   : > { %1132 = vmatprep.mubr.msk.bf16.mxu0 %vm469_vm0, %v1228_v20  ;;  %1148 = vmatprep.mubr.msk.bf16.mxu1 %vm469_vm0, %v1229_v21 }
  0x4f   : > { %1133 = vmatmul.mubr.msk.bf16.gmra.mrb[4].mxu0 %vm469_vm0, %v1230_v22  ;;  %1149 = vmatmul.mubr.msk.bf16.gmra.mrb[4].mxu1 %vm469_vm0, %v1231_v23 }
  0x50   : > { %1136 = vmatprep.mubr.msk.bf16.mxu0 %vm469_vm0, %v1232_v24  ;;  %1152 = vmatprep.mubr.msk.bf16.mxu1 %vm469_vm0, %v1233_v25 }
  0x57   : > { %1137 = vmatmul.mubr.msk.bf16.gmra.mrb[8].mxu0 %vm469_vm0, %v1234_v26  ;;  %1153 = vmatmul.mubr.msk.bf16.gmra.mrb[8].mxu1 %vm469_vm0, %v1235_v27 }
  0x58   : > { %1140 = vmatprep.mubr.msk.bf16.mxu0 %vm469_vm0, %v1236_v28  ;;  %1156 = vmatprep.mubr.msk.bf16.mxu1 %vm469_vm0, %v1237_v29 }
  0x5f   : > { %1141 = vmatmul.mubr.msk.bf16.gmra.mrb[12].mxu0 %vm469_vm0, %v1238_v30  ;;  %1157 = vmatmul.mubr.msk.bf16.gmra.mrb[12].mxu1 %vm469_vm0, %v1239_v31 }
 0x11a   : > { %v1130_v33 = vpop.f32.mrb[0].mxu0  ;;  %v1146_v35 = vpop.f32.mrb[0].mxu1 }
 0x11b   : > { %v712_v36 = vmul.f32 %v1130_v33, %v1398_v32  ;;  %v728_v37 = vmul.f32 %v1146_v35, %v1398_v32  ;;  %v576_v38 = vpop.f32.mrb[1].mxu0  ;;  %v640_v39 = vpop.f32.mrb[1].mxu1 }
 0x11c   : > { %v710_v40 = vmul.f32 %v1398_v32, %v576_v38  ;;  %v726_v41 = vmul.f32 %v1398_v32, %v640_v39  ;;  %v1131_v42 = vpop.f32.mrb[2].mxu0  ;;  %v1147_v43 = vpop.f32.mrb[2].mxu1 }
 0x11d   : > { %v751_v44 = vadd.f32 %v1403_v34, %v712_v36  ;;  %v767_v45 = vadd.f32 %v1403_v34, %v728_v37  ;;  %v713_v46 = vmul.f32 %v1131_v42, %v1398_v32  ;;  %v729_v47 = vmul.f32 %v1147_v43, %v1398_v32  ;;  %v579_v48 = vpop.f32.mrb[3].mxu0  ;;  %v643_v49 = vpop.f32.mrb[3].mxu1 }
 0x11e   : > { %v749_v50 = vadd.f32 %v1403_v34, %v710_v40  ;;  %v765_v51 = vadd.f32 %v1403_v34, %v726_v41  ;;  %v711_v52 = vmul.f32 %v1398_v32, %v579_v48  ;;  %v727_v53 = vmul.f32 %v1398_v32, %v643_v49 }
 0x11f   : > { %vm783_vm1 = vcmp.gt.f32.partialorder %v751_v44, 0.0  ;;  %v815_v54 = vmul.f32 0.2, %v751_v44  ;;  %vm799_vm2 = vcmp.gt.f32.partialorder %v767_v45, 0.0  ;;  %v831_v55 = vmul.f32 0.2, %v767_v45 }
 0x120   : > { %vm781_vm3 = vcmp.gt.f32.partialorder %v749_v50, 0.0  ;;  %v813_v56 = vmul.f32 0.2, %v749_v50  ;;  %vm797_vm4 = vcmp.gt.f32.partialorder %v765_v51, 0.0  ;;  %v829_v57 = vmul.f32 0.2, %v765_v51 }
 0x121   : > { %v847_v58 = vsel %vm783_vm1, %v751_v44, %v815_v54  ;;  %v863_v59 = vsel %vm799_vm2, %v767_v45, %v831_v55  ;;  %v752_v60 = vadd.f32 %v1403_v34, %v713_v46  ;;  %v768_v61 = vadd.f32 %v1403_v34, %v729_v47 }
 0x122   : > { %879 = vst [vmem:[%s1421_s24 + $0x10] sm:$0xff] %v847_v58  ;;  %895 = vst [vmem:[%s1421_s24 + $0x90] sm:$0xff] %v863_v59  ;;  %v845_v62 = vsel %vm781_vm3, %v749_v50, %v813_v56  ;;  %v861_v63 = vsel %vm797_vm4, %v765_v51, %v829_v57  ;;  %v750_v0 = vadd.f32 %v1403_v34, %v711_v52  ;;  %v1134_v2 = vpop.f32.mrb[4].mxu0  ;;  %v1150_v3 = vpop.f32.mrb[4].mxu1 }
 0x123   : > { %v766_v1 = vadd.f32 %v1403_v34, %v727_v53  ;;  %877 = vst [vmem:[%s1421_s24] sm:$0xff] %v845_v62  ;;  %893 = vst [vmem:[%s1421_s24 + $0x80] sm:$0xff] %v861_v63  ;;  %vm784_vm5 = vcmp.gt.f32.partialorder %v752_v60, 0.0  ;;  %v816_v4 = vmul.f32 0.2, %v752_v60  ;;  %vm800_vm6 = vcmp.gt.f32.partialorder %v768_v61, 0.0  ;;  %v592_v12 = vpop.f32.mrb[5].mxu0 }
 0x124   : > { %v832_v5 = vmul.f32 0.2, %v768_v61  ;;  %vm782_vm7 = vcmp.gt.f32.partialorder %v750_v0, 0.0  ;;  %v814_v6 = vmul.f32 0.2, %v750_v0  ;;  %v716_v10 = vmul.f32 %v1134_v2, %v1398_v32  ;;  %v656_v13 = vpop.f32.mrb[5].mxu1 }
 0x125   : > { %vm798_vm8 = vcmp.gt.f32.partialorder %v766_v1, 0.0  ;;  %v830_v7 = vmul.f32 0.2, %v766_v1  ;;  %v848_v8 = vsel %vm784_vm5, %v752_v60, %v816_v4  ;;  %v732_v11 = vmul.f32 %v1150_v3, %v1398_v32  ;;  %v1135_v18 = vpop.f32.mrb[6].mxu0  ;;  %v1151_v19 = vpop.f32.mrb[6].mxu1 }
 0x126   : > { %v864_v9 = vsel %vm800_vm6, %v768_v61, %v832_v5  ;;  %880 = vst [vmem:[%s1421_s24 + $0x18] sm:$0xff] %v848_v8  ;;  %v846_v14 = vsel %vm782_vm7, %v750_v0, %v814_v6  ;;  %v714_v16 = vmul.f32 %v1398_v32, %v592_v12  ;;  %v730_v17 = vmul.f32 %v1398_v32, %v656_v13  ;;  %v595_v24 = vpop.f32.mrb[7].mxu0  ;;  %v659_v25 = vpop.f32.mrb[7].mxu1 }
 0x127   : > { %896 = vst [vmem:[%s1421_s24 + $0x98] sm:$0xff] %v864_v9  ;;  %v862_v15 = vsel %vm798_vm8, %v766_v1, %v830_v7  ;;  %878 = vst [vmem:[%s1421_s24 + $0x8] sm:$0xff] %v846_v14  ;;  %v755_v20 = vadd.f32 %v1403_v34, %v716_v10  ;;  %v771_v21 = vadd.f32 %v1403_v34, %v732_v11 }
 0x128   : > { %894 = vst [vmem:[%s1421_s24 + $0x88] sm:$0xff] %v862_v15  ;;  %v717_v22 = vmul.f32 %v1135_v18, %v1398_v32  ;;  %v733_v23 = vmul.f32 %v1151_v19, %v1398_v32  ;;  %v753_v26 = vadd.f32 %v1403_v34, %v714_v16  ;;  %v769_v27 = vadd.f32 %v1403_v34, %v730_v17 }
 0x129   : > { %v715_v28 = vmul.f32 %v1398_v32, %v595_v24  ;;  %v731_v29 = vmul.f32 %v1398_v32, %v659_v25  ;;  %vm787_vm9 = vcmp.gt.f32.partialorder %v755_v20, 0.0  ;;  %v819_v30 = vmul.f32 0.2, %v755_v20 }
 0x12a   : > { %vm803_vm10 = vcmp.gt.f32.partialorder %v771_v21, 0.0  ;;  %v835_v31 = vmul.f32 0.2, %v771_v21  ;;  %vm785_vm11 = vcmp.gt.f32.partialorder %v753_v26, 0.0  ;;  %v817_v33 = vmul.f32 0.2, %v753_v26 }
 0x12b   : > { %vm801_vm12 = vcmp.gt.f32.partialorder %v769_v27, 0.0  ;;  %v833_v35 = vmul.f32 0.2, %v769_v27  ;;  %v851_v36 = vsel %vm787_vm9, %v755_v20, %v819_v30  ;;  %v756_v38 = vadd.f32 %v1403_v34, %v717_v22  ;;  %v1138_v40 = vpop.f32.mrb[8].mxu0  ;;  %v1154_v41 = vpop.f32.mrb[8].mxu1 }
 0x12c   : > { %v867_v37 = vsel %vm803_vm10, %v771_v21, %v835_v31  ;;  %v772_v39 = vadd.f32 %v1403_v34, %v733_v23  ;;  %883 = vst [vmem:[%s1421_s24 + $0x30] sm:$0xff] %v851_v36  ;;  %v849_v42 = vsel %vm785_vm11, %v753_v26, %v817_v33  ;;  %v754_v44 = vadd.f32 %v1403_v34, %v715_v28  ;;  %v608_v46 = vpop.f32.mrb[9].mxu0  ;;  %v672_v47 = vpop.f32.mrb[9].mxu1 }
 0x12d   : > { %899 = vst [vmem:[%s1421_s24 + $0xb0] sm:$0xff] %v867_v37  ;;  %v865_v43 = vsel %vm801_vm12, %v769_v27, %v833_v35  ;;  %v770_v45 = vadd.f32 %v1403_v34, %v731_v29  ;;  %881 = vst [vmem:[%s1421_s24 + $0x20] sm:$0xff] %v849_v42  ;;  %vm788_vm13 = vcmp.gt.f32.partialorder %v756_v38, 0.0  ;;  %v820_v48 = vmul.f32 0.2, %v756_v38  ;;  %v1139_v56 = vpop.f32.mrb[10].mxu0 }
 0x12e   : > { %897 = vst [vmem:[%s1421_s24 + $0xa0] sm:$0xff] %v865_v43  ;;  %vm804_vm14 = vcmp.gt.f32.partialorder %v772_v39, 0.0  ;;  %v836_v49 = vmul.f32 0.2, %v772_v39  ;;  %vm786_vm15 = vcmp.gt.f32.partialorder %v754_v44, 0.0  ;;  %v720_v54 = vmul.f32 %v1138_v40, %v1398_v32  ;;  %v1155_v57 = vpop.f32.mrb[10].mxu1 }
 0x12f   : > { %v818_v50 = vmul.f32 0.2, %v754_v44  ;;  %vm802_vm0 = vcmp.gt.f32.partialorder %v770_v45, 0.0  ;;  %v834_v51 = vmul.f32 0.2, %v770_v45  ;;  %v852_v52 = vsel %vm788_vm13, %v756_v38, %v820_v48  ;;  %v611_v62 = vpop.f32.mrb[11].mxu0 }
 0x130   : > { %v868_v53 = vsel %vm804_vm14, %v772_v39, %v836_v49  ;;  %v736_v55 = vmul.f32 %v1154_v41, %v1398_v32  ;;  %884 = vst [vmem:[%s1421_s24 + $0x38] sm:$0xff] %v852_v52  ;;  %v718_v60 = vmul.f32 %v1398_v32, %v608_v46  ;;  %v734_v61 = vmul.f32 %v1398_v32, %v672_v47  ;;  %v675_v63 = vpop.f32.mrb[11].mxu1 }
 0x131   : > { %900 = vst [vmem:[%s1421_s24 + $0xb8] sm:$0xff] %v868_v53  ;;  %v850_v58 = vsel %vm786_vm15, %v754_v44, %v818_v50  ;;  %v866_v59 = vsel %vm802_vm0, %v770_v45, %v834_v51  ;;  %v759_v0 = vadd.f32 %v1403_v34, %v720_v54  ;;  %v721_v2 = vmul.f32 %v1139_v56, %v1398_v32 }
 0x132   : > { %882 = vst [vmem:[%s1421_s24 + $0x28] sm:$0xff] %v850_v58  ;;  %898 = vst [vmem:[%s1421_s24 + $0xa8] sm:$0xff] %v866_v59  ;;  %v775_v1 = vadd.f32 %v1403_v34, %v736_v55  ;;  %v737_v3 = vmul.f32 %v1155_v57, %v1398_v32  ;;  %v757_v4 = vadd.f32 %v1403_v34, %v718_v60  ;;  %v1142_v8 = vpop.f32.mrb[12].mxu0  ;;  %v1158_v9 = vpop.f32.mrb[12].mxu1 }
 0x133   : > { %v773_v5 = vadd.f32 %v1403_v34, %v734_v61  ;;  %v719_v6 = vmul.f32 %v1398_v32, %v611_v62  ;;  %v735_v7 = vmul.f32 %v1398_v32, %v675_v63  ;;  %vm791_vm1 = vcmp.gt.f32.partialorder %v759_v0, 0.0  ;;  %v624_v18 = vpop.f32.mrb[13].mxu0  ;;  %v688_v19 = vpop.f32.mrb[13].mxu1 }
 0x134   : > { %v823_v10 = vmul.f32 0.2, %v759_v0  ;;  %vm807_vm2 = vcmp.gt.f32.partialorder %v775_v1, 0.0  ;;  %v839_v11 = vmul.f32 0.2, %v775_v1  ;;  %vm789_vm3 = vcmp.gt.f32.partialorder %v757_v4, 0.0 }
 0x135   : > { %v821_v12 = vmul.f32 0.2, %v757_v4  ;;  %vm805_vm4 = vcmp.gt.f32.partialorder %v773_v5, 0.0  ;;  %v837_v13 = vmul.f32 0.2, %v773_v5  ;;  %v760_v16 = vadd.f32 %v1403_v34, %v721_v2  ;;  %v1143_v24 = vpop.f32.mrb[14].mxu0 }
 0x136   : > { %v855_v14 = vsel %vm791_vm1, %v759_v0, %v823_v10  ;;  %v871_v15 = vsel %vm807_vm2, %v775_v1, %v839_v11  ;;  %v776_v17 = vadd.f32 %v1403_v34, %v737_v3  ;;  %v758_v22 = vadd.f32 %v1403_v34, %v719_v6  ;;  %v1159_v25 = vpop.f32.mrb[14].mxu1  ;;  %v627_v36 = vpop.f32.mrb[15].mxu0 }
 0x137   : > { %887 = vst [vmem:[%s1421_s24 + $0x50] sm:$0xff] %v855_v14  ;;  %903 = vst [vmem:[%s1421_s24 + $0xd0] sm:$0xff] %v871_v15  ;;  %v853_v20 = vsel %vm789_vm3, %v757_v4, %v821_v12  ;;  %v869_v21 = vsel %vm805_vm4, %v773_v5, %v837_v13  ;;  %v774_v23 = vadd.f32 %v1403_v34, %v735_v7  ;;  %vm792_vm5 = vcmp.gt.f32.partialorder %v760_v16, 0.0  ;;  %v691_v37 = vpop.f32.mrb[15].mxu1 }
 0x138   : > { %885 = vst [vmem:[%s1421_s24 + $0x40] sm:$0xff] %v853_v20  ;;  %901 = vst [vmem:[%s1421_s24 + $0xc0] sm:$0xff] %v869_v21  ;;  %v824_v26 = vmul.f32 0.2, %v760_v16  ;;  %vm808_vm6 = vcmp.gt.f32.partialorder %v776_v17, 0.0  ;;  %vm790_vm7 = vcmp.gt.f32.partialorder %v758_v22, 0.0  ;;  %v724_v33 = vmul.f32 %v1142_v8, %v1398_v32 }
 0x139   : > { %v840_v27 = vmul.f32 0.2, %v776_v17  ;;  %v822_v28 = vmul.f32 0.2, %v758_v22  ;;  %vm806_vm8 = vcmp.gt.f32.partialorder %v774_v23, 0.0  ;;  %v740_v35 = vmul.f32 %v1158_v9, %v1398_v32 }
 0x13a   : > { %v838_v29 = vmul.f32 0.2, %v774_v23  ;;  %v856_v30 = vsel %vm792_vm5, %v760_v16, %v824_v26  ;;  %v722_v40 = vmul.f32 %v1398_v32, %v624_v18  ;;  %v738_v41 = vmul.f32 %v1398_v32, %v688_v19 }
 0x13b   : > { %v872_v31 = vsel %vm808_vm6, %v776_v17, %v840_v27  ;;  %888 = vst [vmem:[%s1421_s24 + $0x58] sm:$0xff] %v856_v30  ;;  %v854_v38 = vsel %vm790_vm7, %v758_v22, %v822_v28  ;;  %v763_v42 = vadd.f32 %v1403_v34, %v724_v33  ;;  %v779_v43 = vadd.f32 %v1403_v34, %v740_v35 }
 0x13c   : > { %904 = vst [vmem:[%s1421_s24 + $0xd8] sm:$0xff] %v872_v31  ;;  %v870_v39 = vsel %vm806_vm8, %v774_v23, %v838_v29  ;;  %886 = vst [vmem:[%s1421_s24 + $0x48] sm:$0xff] %v854_v38  ;;  %v725_v44 = vmul.f32 %v1143_v24, %v1398_v32  ;;  %v741_v45 = vmul.f32 %v1159_v25, %v1398_v32 }
 0x13d   : > { %902 = vst [vmem:[%s1421_s24 + $0xc8] sm:$0xff] %v870_v39  ;;  %v761_v46 = vadd.f32 %v1403_v34, %v722_v40  ;;  %v777_v47 = vadd.f32 %v1403_v34, %v738_v41  ;;  %v723_v48 = vmul.f32 %v1398_v32, %v627_v36  ;;  %v739_v49 = vmul.f32 %v1398_v32, %v691_v37 }
 0x13e   : > { %vm795_vm9 = vcmp.gt.f32.partialorder %v763_v42, 0.0  ;;  %v827_v50 = vmul.f32 0.2, %v763_v42  ;;  %vm811_vm10 = vcmp.gt.f32.partialorder %v779_v43, 0.0  ;;  %v843_v51 = vmul.f32 0.2, %v779_v43 }
 0x13f   : > { %vm793_vm11 = vcmp.gt.f32.partialorder %v761_v46, 0.0  ;;  %v825_v52 = vmul.f32 0.2, %v761_v46  ;;  %vm809_vm12 = vcmp.gt.f32.partialorder %v777_v47, 0.0  ;;  %v841_v53 = vmul.f32 0.2, %v777_v47 }
 0x140   : > { %v859_v54 = vsel %vm795_vm9, %v763_v42, %v827_v50  ;;  %v875_v55 = vsel %vm811_vm10, %v779_v43, %v843_v51  ;;  %v764_v56 = vadd.f32 %v1403_v34, %v725_v44  ;;  %v780_v57 = vadd.f32 %v1403_v34, %v741_v45 }
 0x141   : > { %891 = vst [vmem:[%s1421_s24 + $0x70] sm:$0xff] %v859_v54  ;;  %907 = vst [vmem:[%s1421_s24 + $0xf0] sm:$0xff] %v875_v55  ;;  %v857_v58 = vsel %vm793_vm11, %v761_v46, %v825_v52  ;;  %v873_v32 = vsel %vm809_vm12, %v777_v47, %v841_v53  ;;  %v762_v59 = vadd.f32 %v1403_v34, %v723_v48 }
 0x142   : > { %v778_v60 = vadd.f32 %v1403_v34, %v739_v49  ;;  %889 = vst [vmem:[%s1421_s24 + $0x60] sm:$0xff] %v857_v58  ;;  %905 = vst [vmem:[%s1421_s24 + $0xe0] sm:$0xff] %v873_v32  ;;  %vm796_vm13 = vcmp.gt.f32.partialorder %v764_v56, 0.0  ;;  %v828_v61 = vmul.f32 0.2, %v764_v56  ;;  %vm812_vm14 = vcmp.gt.f32.partialorder %v780_v57, 0.0 }
 0x143   : > { %v844_v62 = vmul.f32 0.2, %v780_v57  ;;  %vm794_vm15 = vcmp.gt.f32.partialorder %v762_v59, 0.0  ;;  %v826_v63 = vmul.f32 0.2, %v762_v59 }
 0x144   : > { %vm810_vm0 = vcmp.gt.f32.partialorder %v778_v60, 0.0  ;;  %v842_v0 = vmul.f32 0.2, %v778_v60  ;;  %v860_v1 = vsel %vm796_vm13, %v764_v56, %v828_v61 }
 0x145   : > { %v876_v2 = vsel %vm812_vm14, %v780_v57, %v844_v62  ;;  %892 = vst [vmem:[%s1421_s24 + $0x78] sm:$0xff] %v860_v1  ;;  %v858_v3 = vsel %vm794_vm15, %v762_v59, %v826_v63 }
 0x146   : > { %908 = vst [vmem:[%s1421_s24 + $0xf8] sm:$0xff] %v876_v2  ;;  %v874_v4 = vsel %vm810_vm0, %v778_v60, %v842_v0  ;;  %890 = vst [vmem:[%s1421_s24 + $0x68] sm:$0xff] %v858_v3 }
 0x147   : > { %906 = vst [vmem:[%s1421_s24 + $0xe8] sm:$0xff] %v874_v4 }
 0x148 PF: > { %s14_s17 = sadd.s32 1, %s1262_s17   ;;  %s1521_s15 = smov %s1258_s16 }
 0x149   : > { %p11_p5 = scmp.ge.s32.totalorder %s14_s17, 4   ;;  %s1522_s16 = smov %s1524_s18 }
 0x14b   :  { %13 = sbr.rel (!%p11_p5) target bundleno = 2 (0x2), region = 75 }

// kernel: discriminator_forward.11
= control target key start
LH: loop header
LB: loop body
LE: loop exit
PB: predicated region body
PF: predicated region fallthrough
CT: control target
= control target key end

     0   :  { %s1600_s1 = inlined_call_operand.vmem [shape: bf16[128,640], index: 1, kind: input, shape index: {}]   ;;  %s1601_s0 = inlined_call_operand.vmem [shape: bf16[128,640], index: 0, kind: input, shape index: {}]   ;;  %s1602_s2 = inlined_call_operand.vmem [shape: f32[1,128], index: 2, kind: input, shape index: {}]   ;;  %s1603_s3 = inlined_call_operand.vmem [shape: f32[1,128], index: 3, kind: input, shape index: {}]   ;;  %s1604_s4 = inlined_call_operand.vmem [shape: f32[128,128], index: 4, kind: output, shape index: {}]  }
   0x1   :  { %v1097_v0 = vld [vmem:[%s1600_s1 + $0x4] ss:$20 sps:$4 sm:$0xff]   ;;  %v1099_v1 = vld [vmem:[%s1600_s1 + $0xc] ss:$20 sps:$4 sm:$0xff]   ;;  %v1102_v3 = vld [vmem:[%s1600_s1 + $0x8] ss:$20 sps:$4 sm:$0xff]  }
   0x2   :  { %530 = vmatprep.subr.bf16.mxu1 %v1097_v0  ;;  %v1101_v2 = vld [vmem:[%s1600_s1] ss:$20 sps:$4 sm:$0xff]   ;;  %627 = vmatprep.subr.bf16.mxu0 %v1099_v1  ;;  %v1107_v6 = vld [vmem:[%s1600_s1 + $0x28] ss:$20 sps:$4 sm:$0xff]   ;;  %v1108_v7 = vld [vmem:[%s1600_s1 + $0x30] ss:$20 sps:$4 sm:$0xff]  }
   0x3   :  { %v1103_v4 = vld [vmem:[%s1600_s1 + $0x2c] ss:$20 sps:$4 sm:$0xff]   ;;  %531 = vmatpush1.bf16.xpose.msra.mxu1 %v1101_v2  ;;  %628 = vmatpush1.bf16.xpose.msra.mxu0 %v1102_v3  ;;  %v1105_v5 = vld [vmem:[%s1600_s1 + $0x34] ss:$20 sps:$4 sm:$0xff]   ;;  %v1111_v9 = vld [vmem:[%s1600_s1 + $0x5c] ss:$20 sps:$4 sm:$0xff]  }
   0x4   :  { %532 = vmatprep.subr.bf16.mxu1 %v1103_v4  ;;  %629 = vmatprep.subr.bf16.mxu0 %v1105_v5  ;;  %v1109_v8 = vld [vmem:[%s1600_s1 + $0x54] ss:$20 sps:$4 sm:$0xff]   ;;  %v1113_v10 = vld [vmem:[%s1600_s1 + $0x50] ss:$20 sps:$4 sm:$0xff]   ;;  %v1114_v11 = vld [vmem:[%s1600_s1 + $0x58] ss:$20 sps:$4 sm:$0xff]  }
   0x5   :  { %v1115_v12 = vld [vmem:[%s1600_s1 + $0x7c] ss:$20 sps:$4 sm:$0xff]   ;;  %v1117_v13 = vld [vmem:[%s1600_s1 + $0x84] ss:$20 sps:$4 sm:$0xff]   ;;  %v1120_v16 = vld [vmem:[%s1600_s1 + $0x80] ss:$20 sps:$4 sm:$0xff]  }
   0x6   :  { %v1119_v14 = vld [vmem:[%s1600_s1 + $0x78] ss:$20 sps:$4 sm:$0xff]   ;;  %v1125_v20 = vld [vmem:[%s1600_s1 + $0xa0] ss:$20 sps:$4 sm:$0xff]   ;;  %v1126_v21 = vld [vmem:[%s1600_s1 + $0xa8] ss:$20 sps:$4 sm:$0xff]  }
   0x7   :  { %v1147_v15 = vld [vmem:[%s1601_s0 + $0x4] ss:$20 sps:$4 sm:$0xff]   ;;  %v1150_v17 = vld [vmem:[%s1601_s0 + $0xc] ss:$20 sps:$4 sm:$0xff]   ;;  %v1129_v23 = vld [vmem:[%s1600_s1 + $0xd4] ss:$20 sps:$4 sm:$0xff]  }
   0x8   :  { %v1121_v18 = vld [vmem:[%s1600_s1 + $0xa4] ss:$20 sps:$4 sm:$0xff]   ;;  %562 = vmatprep.mubr.bf16.mxu1 %v1147_v15  ;;  %v1123_v19 = vld [vmem:[%s1600_s1 + $0xac] ss:$20 sps:$4 sm:$0xff]   ;;  %659 = vmatprep.mubr.bf16.mxu0 %v1150_v17  ;;  %v1131_v24 = vld [vmem:[%s1600_s1 + $0xc8] ss:$20 sps:$4 sm:$0xff]  }
   0x9   :  { %v1127_v22 = vld [vmem:[%s1600_s1 + $0xcc] ss:$20 sps:$4 sm:$0xff]   ;;  %v1132_v25 = vld [vmem:[%s1600_s1 + $0xd0] ss:$20 sps:$4 sm:$0xff]   ;;  %v1133_v26 = vld [vmem:[%s1600_s1 + $0xf4] ss:$20 sps:$4 sm:$0xff]  }
   0xa   :  { %v1135_v27 = vld [vmem:[%s1600_s1 + $0xfc] ss:$20 sps:$4 sm:$0xff]   ;;  %v1138_v29 = vld [vmem:[%s1600_s1 + $0xf8] ss:$20 sps:$4 sm:$0xff]   ;;  %v1144_v33 = vld [vmem:[%s1600_s1 + $0x120] ss:$20 sps:$4 sm:$0xff]  }
   0xb   :  { %533 = vmatpush1.bf16.xpose.msra.mxu1 %v1107_v6  ;;  %630 = vmatpush1.bf16.xpose.msra.mxu0 %v1108_v7  ;;  %v1137_v28 = vld [vmem:[%s1600_s1 + $0xf0] ss:$20 sps:$4 sm:$0xff]   ;;  %v1143_v32 = vld [vmem:[%s1600_s1 + $0x118] ss:$20 sps:$4 sm:$0xff]   ;;  %v1145_v35 = vld [vmem:[%s1601_s0] ss:$20 sps:$4 sm:$0xff]  }
   0xc   :  { %534 = vmatprep.subr.bf16.mxu1 %v1109_v8  ;;  %631 = vmatprep.subr.bf16.mxu0 %v1111_v9  ;;  %v1139_v30 = vld [vmem:[%s1600_s1 + $0x11c] ss:$20 sps:$4 sm:$0xff]   ;;  %v1141_v31 = vld [vmem:[%s1600_s1 + $0x124] ss:$20 sps:$4 sm:$0xff]   ;;  %v1152_v37 = vld [vmem:[%s1601_s0 + $0x2c] ss:$20 sps:$4 sm:$0xff]  }
   0xd   :  { %v1151_v34 = vld [vmem:[%s1600_s1 + $0x10] ss:$20 sps:$4 sm:$0xff]   ;;  %v1148_v36 = vld [vmem:[%s1601_s0 + $0x8] ss:$20 sps:$4 sm:$0xff]   ;;  %v1158_v39 = vld [vmem:[%s1600_s1 + $0x38] ss:$20 sps:$4 sm:$0xff]  }
   0xe   :  { %v1154_v38 = vld [vmem:[%s1601_s0 + $0x34] ss:$20 sps:$4 sm:$0xff]   ;;  %v1157_v41 = vld [vmem:[%s1601_s0 + $0x30] ss:$20 sps:$4 sm:$0xff]   ;;  %v1164_v46 = vld [vmem:[%s1601_s0 + $0x58] ss:$20 sps:$4 sm:$0xff]  }
   0xf   :  { %v1156_v40 = vld [vmem:[%s1601_s0 + $0x28] ss:$20 sps:$4 sm:$0xff]   ;;  %v1165_v44 = vld [vmem:[%s1600_s1 + $0x60] ss:$20 sps:$4 sm:$0xff]   ;;  %v1163_v45 = vld [vmem:[%s1601_s0 + $0x50] ss:$20 sps:$4 sm:$0xff]  }
  0x10   :  { %v1159_v42 = vld [vmem:[%s1601_s0 + $0x54] ss:$20 sps:$4 sm:$0xff]   ;;  %v1161_v43 = vld [vmem:[%s1601_s0 + $0x5c] ss:$20 sps:$4 sm:$0xff]   ;;  %v1168_v48 = vld [vmem:[%s1601_s0 + $0x84] ss:$20 sps:$4 sm:$0xff]  }
  0x11   :  { %v1166_v47 = vld [vmem:[%s1601_s0 + $0x7c] ss:$20 sps:$4 sm:$0xff]   ;;  %v1170_v50 = vld [vmem:[%s1601_s0 + $0x78] ss:$20 sps:$4 sm:$0xff]   ;;  %v1171_v51 = vld [vmem:[%s1601_s0 + $0x80] ss:$20 sps:$4 sm:$0xff]  }
  0x12   :  { %v1172_v49 = vld [vmem:[%s1600_s1 + $0x88] ss:$20 sps:$4 sm:$0xff]   ;;  %v1173_v52 = vld [vmem:[%s1601_s0 + $0xa4] ss:$20 sps:$4 sm:$0xff]   ;;  %v1175_v53 = vld [vmem:[%s1601_s0 + $0xac] ss:$20 sps:$4 sm:$0xff]  }
  0x13   :  { %535 = vmatpush1.bf16.xpose.msra.mxu1 %v1113_v10  ;;  %632 = vmatpush1.bf16.xpose.msra.mxu0 %v1114_v11  ;;  %v1179_v54 = vld [vmem:[%s1600_s1 + $0xb0] ss:$20 sps:$4 sm:$0xff]   ;;  %v1177_v55 = vld [vmem:[%s1601_s0 + $0xa0] ss:$20 sps:$4 sm:$0xff]   ;;  %v1178_v56 = vld [vmem:[%s1601_s0 + $0xa8] ss:$20 sps:$4 sm:$0xff]  }
  0x14   :  { %536 = vmatprep.subr.bf16.mxu1 %v1115_v12  ;;  %633 = vmatprep.subr.bf16.mxu0 %v1117_v13  ;;  %v1180_v57 = vld [vmem:[%s1601_s0 + $0xcc] ss:$20 sps:$4 sm:$0xff]   ;;  %v1182_v58 = vld [vmem:[%s1601_s0 + $0xd4] ss:$20 sps:$4 sm:$0xff]   ;;  %v1185_v61 = vld [vmem:[%s1601_s0 + $0xd0] ss:$20 sps:$4 sm:$0xff]  }
  0x15   :  { %v1186_v59 = vld [vmem:[%s1600_s1 + $0xd8] ss:$20 sps:$4 sm:$0xff]   ;;  %v1184_v60 = vld [vmem:[%s1601_s0 + $0xc8] ss:$20 sps:$4 sm:$0xff]   ;;  %v1193_v0 = vld [vmem:[%s1600_s1 + $0x100] ss:$20 sps:$4 sm:$0xff]  }
  0x16   :  { %v1187_v62 = vld [vmem:[%s1601_s0 + $0xf4] ss:$20 sps:$4 sm:$0xff]   ;;  %v1189_v63 = vld [vmem:[%s1601_s0 + $0xfc] ss:$20 sps:$4 sm:$0xff]   ;;  %v1192_v2 = vld [vmem:[%s1601_s0 + $0xf8] ss:$20 sps:$4 sm:$0xff]  }
  0x17   :  { %v1191_v1 = vld [vmem:[%s1601_s0 + $0xf0] ss:$20 sps:$4 sm:$0xff]   ;;  %v1200_v5 = vld [vmem:[%s1600_s1 + $0x128] ss:$20 sps:$4 sm:$0xff]   ;;  %v1198_v6 = vld [vmem:[%s1601_s0 + $0x118] ss:$20 sps:$4 sm:$0xff]  }
  0x18   :  { %v1194_v3 = vld [vmem:[%s1601_s0 + $0x11c] ss:$20 sps:$4 sm:$0xff]   ;;  %v1196_v4 = vld [vmem:[%s1601_s0 + $0x124] ss:$20 sps:$4 sm:$0xff]   ;;  %v1199_v7 = vld [vmem:[%s1601_s0 + $0x120] ss:$20 sps:$4 sm:$0xff]  }
  0x19   :  { %v1201_v8 = vld [vmem:[%s1601_s0 + $0x10] ss:$20 sps:$4 sm:$0xff]   ;;  %v1203_v10 = vld [vmem:[%s1601_s0 + $0x38] ss:$20 sps:$4 sm:$0xff]   ;;  %v1205_v12 = vld [vmem:[%s1601_s0 + $0x60] ss:$20 sps:$4 sm:$0xff]  }
  0x1a   :  { %v1202_v9 = vld [vmem:[%s1601_s0 + $0xb0] ss:$20 sps:$4 sm:$0xff]   ;;  %v1204_v11 = vld [vmem:[%s1601_s0 + $0xd8] ss:$20 sps:$4 sm:$0xff]   ;;  %v1206_v13 = vld [vmem:[%s1601_s0 + $0x100] ss:$20 sps:$4 sm:$0xff]  }
  0x1b   :  { %537 = vmatpush1.bf16.xpose.msra.mxu1 %v1119_v14  ;;  %634 = vmatpush1.bf16.xpose.msra.mxu0 %v1120_v16  ;;  %v1207_v14 = vld [vmem:[%s1601_s0 + $0x88] ss:$20 sps:$4 sm:$0xff]  }
  0x1c   :  { %538 = vmatprep.subr.bf16.mxu1 %v1121_v18  ;;  %635 = vmatprep.subr.bf16.mxu0 %v1123_v19  ;;  %v1208_v15 = vld [vmem:[%s1601_s0 + $0x128] ss:$20 sps:$4 sm:$0xff]  }
  0x23   :  { %539 = vmatpush1.bf16.xpose.msra.mxu1 %v1125_v20  ;;  %636 = vmatpush1.bf16.xpose.msra.mxu0 %v1126_v21 }
  0x24   :  { %540 = vmatprep.subr.bf16.mxu1 %v1127_v22  ;;  %637 = vmatprep.subr.bf16.mxu0 %v1129_v23 }
  0x2b   :  { %541 = vmatpush1.bf16.xpose.msra.mxu1 %v1131_v24  ;;  %638 = vmatpush1.bf16.xpose.msra.mxu0 %v1132_v25 }
  0x2c   :  { %542 = vmatprep.subr.bf16.mxu1 %v1133_v26  ;;  %639 = vmatprep.subr.bf16.mxu0 %v1135_v27 }
  0x33   :  { %543 = vmatpush1.bf16.xpose.msra.mxu1 %v1137_v28  ;;  %640 = vmatpush1.bf16.xpose.msra.mxu0 %v1138_v29 }
  0x34   :  { %544 = vmatprep.subr.bf16.mxu1 %v1139_v30  ;;  %641 = vmatprep.subr.bf16.mxu0 %v1141_v31 }
  0x3b   :  { %545 = vmatpush1.bf16.xpose.msra.mxu1 %v1143_v32  ;;  %642 = vmatpush1.bf16.xpose.msra.mxu0 %v1144_v33 }
  0x3c   :  { %1033 = vmatprep.subr.bf16.mxu0 %v1151_v34  ;;  %1065 = vmatprep.subr.bf16.mxu1 %v1151_v34 }
  0x42   :  { %563 = vmatmul.mubr.bf16.vlgmr.msra.gmra.mrb[0].mxu1 %v1145_v35  ;;  %660 = vmatmul.mubr.bf16.vlgmr.msra.gmra.mrb[0].mxu0 %v1148_v36 }
  0x43   :  { %1034 = vmatpush3.bf16.xpose.msra.mxu0 %v1151_v34  ;;  %1073 = vmatpush3.bf16.xpose.msra.mxu1 %v1151_v34 }
  0x44   :  { %570 = vmatprep.mubr.bf16.mxu1 %v1152_v37  ;;  %667 = vmatprep.mubr.bf16.mxu0 %v1154_v38 }
  0x45   :  { %1035 = vmatprep.subr.bf16.mxu0 %v1158_v39  ;;  %1066 = vmatprep.subr.bf16.mxu1 %v1158_v39 }
  0x4a   :  { %571 = vmatmul.mubr.bf16.gmra.mrb[4].mxu1 %v1156_v40  ;;  %668 = vmatmul.mubr.bf16.gmra.mrb[4].mxu0 %v1157_v41 }
  0x4b   :  { %1036 = vmatpush3.bf16.xpose.msra.mxu0 %v1158_v39  ;;  %1074 = vmatpush3.bf16.xpose.msra.mxu1 %v1158_v39 }
  0x4c   :  { %578 = vmatprep.mubr.bf16.mxu1 %v1159_v42  ;;  %675 = vmatprep.mubr.bf16.mxu0 %v1161_v43 }
  0x4d   :  { %1037 = vmatprep.subr.bf16.mxu0 %v1165_v44  ;;  %1067 = vmatprep.subr.bf16.mxu1 %v1165_v44 }
  0x52   :  { %579 = vmatmul.mubr.bf16.gmra.mrb[8].mxu1 %v1163_v45  ;;  %676 = vmatmul.mubr.bf16.gmra.mrb[8].mxu0 %v1164_v46 }
  0x53   :  { %1038 = vmatpush3.bf16.xpose.msra.mxu0 %v1165_v44  ;;  %1075 = vmatpush3.bf16.xpose.msra.mxu1 %v1165_v44 }
  0x54   :  { %586 = vmatprep.mubr.bf16.mxu1 %v1166_v47  ;;  %683 = vmatprep.mubr.bf16.mxu0 %v1168_v48 }
  0x55   :  { %1039 = vmatprep.subr.bf16.mxu0 %v1172_v49  ;;  %1068 = vmatprep.subr.bf16.mxu1 %v1172_v49 }
  0x5a   :  { %587 = vmatmul.mubr.bf16.gmra.mrb[12].mxu1 %v1170_v50  ;;  %684 = vmatmul.mubr.bf16.gmra.mrb[12].mxu0 %v1171_v51 }
  0x5b   :  { %1040 = vmatpush3.bf16.xpose.msra.mxu0 %v1172_v49  ;;  %1076 = vmatpush3.bf16.xpose.msra.mxu1 %v1172_v49 }
  0x5c   :  { %594 = vmatprep.mubr.bf16.mxu1 %v1173_v52  ;;  %691 = vmatprep.mubr.bf16.mxu0 %v1175_v53 }
  0x5d   :  { %1041 = vmatprep.subr.bf16.mxu0 %v1179_v54  ;;  %1069 = vmatprep.subr.bf16.mxu1 %v1179_v54 }
  0x62   :  { %595 = vmatmul.mubr.bf16.gmra.mrb[16].mxu1 %v1177_v55  ;;  %692 = vmatmul.mubr.bf16.gmra.mrb[16].mxu0 %v1178_v56 }
  0x63   :  { %1042 = vmatpush3.bf16.xpose.msra.mxu0 %v1179_v54  ;;  %1077 = vmatpush3.bf16.xpose.msra.mxu1 %v1179_v54 }
  0x64   :  { %602 = vmatprep.mubr.bf16.mxu1 %v1180_v57  ;;  %699 = vmatprep.mubr.bf16.mxu0 %v1182_v58 }
  0x65   :  { %1043 = vmatprep.subr.bf16.mxu0 %v1186_v59  ;;  %1070 = vmatprep.subr.bf16.mxu1 %v1186_v59 }
  0x6a   :  { %603 = vmatmul.mubr.bf16.gmra.mrb[20].mxu1 %v1184_v60  ;;  %700 = vmatmul.mubr.bf16.gmra.mrb[20].mxu0 %v1185_v61 }
  0x6b   :  { %1044 = vmatpush3.bf16.xpose.msra.mxu0 %v1186_v59  ;;  %1078 = vmatpush3.bf16.xpose.msra.mxu1 %v1186_v59 }
  0x6c   :  { %610 = vmatprep.mubr.bf16.mxu1 %v1187_v62  ;;  %707 = vmatprep.mubr.bf16.mxu0 %v1189_v63 }
  0x6d   :  { %1045 = vmatprep.subr.bf16.mxu0 %v1193_v0  ;;  %1071 = vmatprep.subr.bf16.mxu1 %v1193_v0 }
  0x72   :  { %611 = vmatmul.mubr.bf16.gmra.mrb[24].mxu1 %v1191_v1  ;;  %708 = vmatmul.mubr.bf16.gmra.mrb[24].mxu0 %v1192_v2 }
  0x73   :  { %1046 = vmatpush3.bf16.xpose.msra.mxu0 %v1193_v0  ;;  %1079 = vmatpush3.bf16.xpose.msra.mxu1 %v1193_v0 }
  0x74   :  { %618 = vmatprep.mubr.bf16.mxu1 %v1194_v3  ;;  %715 = vmatprep.mubr.bf16.mxu0 %v1196_v4 }
  0x75   :  { %1047 = vmatprep.subr.bf16.mxu0 %v1200_v5  ;;  %1072 = vmatprep.subr.bf16.mxu1 %v1200_v5 }
  0x7a   :  { %619 = vmatmul.mubr.bf16.gmra.mrb[28].mxu1 %v1198_v6  ;;  %716 = vmatmul.mubr.bf16.gmra.mrb[28].mxu0 %v1199_v7 }
  0x7b   :  { %1048 = vmatpush3.bf16.xpose.msra.mxu0 %v1200_v5  ;;  %1080 = vmatpush3.bf16.xpose.msra.mxu1 %v1200_v5 }
  0x7c   :  { %1049 = vmatprep.mubr.bf16.mxu0 %v1201_v8  ;;  %1057 = vmatprep.mubr.bf16.mxu1 %v1202_v9 }
  0x82   :  { %1050 = vmatmul.mubr.bf16.vlgmr.msra.gmra.mrb[32].mxu0 %v1203_v10  ;;  %1058 = vmatmul.mubr.bf16.vlgmr.msra.gmra.mrb[32].mxu1 %v1204_v11 }
  0x83   :  { %1053 = vmatprep.mubr.bf16.mxu0 %v1205_v12  ;;  %1061 = vmatprep.mubr.bf16.mxu1 %v1206_v13 }
  0x8a   :  { %1054 = vmatmul.mubr.bf16.gmra.mrb[36].mxu0 %v1207_v14  ;;  %1062 = vmatmul.mubr.bf16.gmra.mrb[36].mxu1 %v1208_v15 }
 0x115   :  { %v564_v16 = vpop.f32.mrb[0].mxu1  ;;  %v661_v17 = vpop.f32.mrb[0].mxu0 }
 0x116   :  { %v1474_v18 = vadd.f32 %v661_v17, %v564_v16  ;;  %v566_v19 = vpop.f32.mrb[1].mxu1  ;;  %v663_v20 = vpop.f32.mrb[1].mxu0 }
 0x117   :  { %v567_v21 = vpop.f32.mrb[2].mxu1  ;;  %v664_v22 = vpop.f32.mrb[2].mxu0 }
 0x118   :  { %v1476_v23 = vadd.f32 %v664_v22, %v567_v21  ;;  %v569_v24 = vpop.f32.mrb[3].mxu1  ;;  %v666_v25 = vpop.f32.mrb[3].mxu0 }
 0x11d   :  { %v572_v26 = vpop.f32.mrb[4].mxu1  ;;  %v669_v27 = vpop.f32.mrb[4].mxu0 }
 0x11e   :  { %v1478_v28 = vadd.f32 %v669_v27, %v572_v26  ;;  %v574_v29 = vpop.f32.mrb[5].mxu1  ;;  %v671_v30 = vpop.f32.mrb[5].mxu0 }
 0x11f   :  { %v575_v31 = vpop.f32.mrb[6].mxu1  ;;  %v672_v32 = vpop.f32.mrb[6].mxu0 }
 0x120   :  { %v1480_v33 = vadd.f32 %v672_v32, %v575_v31  ;;  %v577_v34 = vpop.f32.mrb[7].mxu1  ;;  %v674_v35 = vpop.f32.mrb[7].mxu0 }
 0x125   :  { %v580_v36 = vpop.f32.mrb[8].mxu1  ;;  %v677_v37 = vpop.f32.mrb[8].mxu0 }
 0x126   :  { %v1482_v38 = vadd.f32 %v677_v37, %v580_v36  ;;  %v582_v39 = vpop.f32.mrb[9].mxu1  ;;  %v679_v40 = vpop.f32.mrb[9].mxu0  ;;  %v1501_v37 = vld [vmem:[%s1602_s2] ss:$0 sm:$0xff] }
 0x127   :  { %v583_v41 = vpop.f32.mrb[10].mxu1  ;;  %v680_v42 = vpop.f32.mrb[10].mxu0 }
 0x128   :  { %v1484_v43 = vadd.f32 %v680_v42, %v583_v41  ;;  %v585_v44 = vpop.f32.mrb[11].mxu1  ;;  %v682_v45 = vpop.f32.mrb[11].mxu0 }
 0x129   :  { %v1507_v45 = vld [vmem:[%s1603_s3] ss:$0 sm:$0xff] }
 0x12d   :  { %v588_v46 = vpop.f32.mrb[12].mxu1  ;;  %v685_v47 = vpop.f32.mrb[12].mxu0 }
 0x12e   :  { %v1486_v48 = vadd.f32 %v685_v47, %v588_v46  ;;  %v590_v49 = vpop.f32.mrb[13].mxu1  ;;  %v687_v50 = vpop.f32.mrb[13].mxu0 }
 0x12f   :  { %v591_v51 = vpop.f32.mrb[14].mxu1  ;;  %v688_v52 = vpop.f32.mrb[14].mxu0 }
 0x130   :  { %v1488_v53 = vadd.f32 %v688_v52, %v591_v51  ;;  %v593_v54 = vpop.f32.mrb[15].mxu1  ;;  %v690_v55 = vpop.f32.mrb[15].mxu0 }
 0x135   :  { %v596_v56 = vpop.f32.mrb[16].mxu1  ;;  %v693_v57 = vpop.f32.mrb[16].mxu0 }
 0x136   :  { %v694_v58 = vadd.f32 %v693_v57, %v596_v56  ;;  %v598_v59 = vpop.f32.mrb[17].mxu1  ;;  %v695_v60 = vpop.f32.mrb[17].mxu0 }
 0x137   :  { %v599_v61 = vpop.f32.mrb[18].mxu1  ;;  %v696_v62 = vpop.f32.mrb[18].mxu0 }
 0x138   :  { %v697_v63 = vadd.f32 %v696_v62, %v599_v61  ;;  %v601_v0 = vpop.f32.mrb[19].mxu1  ;;  %v698_v1 = vpop.f32.mrb[19].mxu0 }
 0x13d   :  { %v604_v2 = vpop.f32.mrb[20].mxu1  ;;  %v701_v3 = vpop.f32.mrb[20].mxu0 }
 0x13e   :  { %v702_v4 = vadd.f32 %v701_v3, %v604_v2  ;;  %v606_v5 = vpop.f32.mrb[21].mxu1  ;;  %v703_v6 = vpop.f32.mrb[21].mxu0 }
 0x13f   :  { %v607_v7 = vpop.f32.mrb[22].mxu1  ;;  %v704_v8 = vpop.f32.mrb[22].mxu0 }
 0x140   :  { %v705_v9 = vadd.f32 %v704_v8, %v607_v7  ;;  %v609_v10 = vpop.f32.mrb[23].mxu1  ;;  %v706_v11 = vpop.f32.mrb[23].mxu0 }
 0x145   :  { %v612_v12 = vpop.f32.mrb[24].mxu1  ;;  %v709_v13 = vpop.f32.mrb[24].mxu0 }
 0x146   :  { %v1490_v14 = vadd.f32 %v709_v13, %v612_v12  ;;  %v614_v15 = vpop.f32.mrb[25].mxu1  ;;  %v711_v16 = vpop.f32.mrb[25].mxu0 }
 0x147   :  { %v615_v17 = vpop.f32.mrb[26].mxu1  ;;  %v712_v19 = vpop.f32.mrb[26].mxu0 }
 0x148   :  { %v1492_v20 = vadd.f32 %v712_v19, %v615_v17  ;;  %v617_v21 = vpop.f32.mrb[27].mxu1  ;;  %v714_v22 = vpop.f32.mrb[27].mxu0 }
 0x14d   :  { %v620_v24 = vpop.f32.mrb[28].mxu1  ;;  %v717_v25 = vpop.f32.mrb[28].mxu0 }
 0x14e   :  { %v1494_v26 = vadd.f32 %v717_v25, %v620_v24  ;;  %v622_v27 = vpop.f32.mrb[29].mxu1  ;;  %v719_v29 = vpop.f32.mrb[29].mxu0 }
 0x14f   :  { %v623_v30 = vpop.f32.mrb[30].mxu1  ;;  %v720_v31 = vpop.f32.mrb[30].mxu0 }
 0x150   :  { %v1496_v32 = vadd.f32 %v720_v31, %v623_v30  ;;  %v625_v34 = vpop.f32.mrb[31].mxu1  ;;  %v722_v35 = vpop.f32.mrb[31].mxu0 }
 0x155   :  { %v1051_v36 = vpop.f32.mrb[32].mxu0  ;;  %v1059_v39 = vpop.f32.mrb[32].mxu1 }
 0x156   :  { %v767_v40 = vadd.f32 %v1051_v36, %v1478_v28  ;;  %v799_v41 = vadd.f32 %v1059_v39, %v702_v4  ;;  %v758_v42 = vpop.f32.mrb[33].mxu0  ;;  %v790_v44 = vpop.f32.mrb[33].mxu1 }
 0x157   :  { %v759_v46 = vadd.f32 %v758_v42, %v1474_v18  ;;  %v791_v47 = vadd.f32 %v790_v44, %v694_v58  ;;  %v1052_v49 = vpop.f32.mrb[34].mxu0  ;;  %v1060_v50 = vpop.f32.mrb[34].mxu1 }
 0x158   :  { %v830_v51 = vmul.f32 %v1501_v37, %v767_v40  ;;  %v838_v52 = vmul.f32 %v1501_v37, %v799_v41  ;;  %v770_v54 = vadd.f32 %v1052_v49, %v1480_v33  ;;  %v802_v28 = vadd.f32 %v1060_v50, %v705_v9  ;;  %v761_v55 = vpop.f32.mrb[35].mxu0  ;;  %v793_v56 = vpop.f32.mrb[35].mxu1 }
 0x159   :  { %v828_v57 = vmul.f32 %v1501_v37, %v759_v46  ;;  %v836_v59 = vmul.f32 %v1501_v37, %v791_v47  ;;  %v762_v60 = vadd.f32 %v761_v55, %v1476_v23  ;;  %v794_v61 = vadd.f32 %v793_v56, %v697_v63 }
 0x15a   :  { %v853_v18 = vadd.f32 %v1507_v45, %v830_v51  ;;  %v861_v58 = vadd.f32 %v1507_v45, %v838_v52  ;;  %v831_v62 = vmul.f32 %v1501_v37, %v770_v54  ;;  %v839_v0 = vmul.f32 %v1501_v37, %v802_v28 }
 0x15b   :  { %v851_v33 = vadd.f32 %v1507_v45, %v828_v57  ;;  %v859_v1 = vadd.f32 %v1507_v45, %v836_v59  ;;  %v829_v2 = vmul.f32 %v1501_v37, %v762_v60  ;;  %v837_v3 = vmul.f32 %v1501_v37, %v794_v61 }
 0x15c   :  { %vm869_vm0 = vcmp.gt.f32.partialorder %v853_v18, 0.0  ;;  %v885_v4 = vmul.f32 0.2, %v853_v18  ;;  %vm877_vm1 = vcmp.gt.f32.partialorder %v861_v58, 0.0  ;;  %v893_v23 = vmul.f32 0.2, %v861_v58 }
 0x15d   :  { %vm867_vm2 = vcmp.gt.f32.partialorder %v851_v33, 0.0  ;;  %v883_v63 = vmul.f32 0.2, %v851_v33  ;;  %vm875_vm3 = vcmp.gt.f32.partialorder %v859_v1, 0.0  ;;  %v891_v5 = vmul.f32 0.2, %v859_v1 }
 0x15e   :  { %v901_v6 = vsel %vm869_vm0, %v853_v18, %v885_v4  ;;  %v909_v7 = vsel %vm877_vm1, %v861_v58, %v893_v23  ;;  %v854_v8 = vadd.f32 %v1507_v45, %v831_v62  ;;  %v862_v9 = vadd.f32 %v1507_v45, %v839_v0  ;;  %v1055_v10 = vpop.f32.mrb[36].mxu0  ;;  %v1063_v11 = vpop.f32.mrb[36].mxu1 }
 0x15f   :  { %917 = vst [vmem:[%s1604_s4 + $0x10] sm:$0xff] %v901_v6  ;;  %925 = vst [vmem:[%s1604_s4 + $0x50] sm:$0xff] %v909_v7  ;;  %v899_v12 = vsel %vm867_vm2, %v851_v33, %v883_v63  ;;  %v907_v13 = vsel %vm875_vm3, %v859_v1, %v891_v5  ;;  %v852_v15 = vadd.f32 %v1507_v45, %v829_v2  ;;  %v774_v17 = vpop.f32.mrb[37].mxu0  ;;  %v806_v19 = vpop.f32.mrb[37].mxu1 }
 0x160   :  { %v860_v16 = vadd.f32 %v1507_v45, %v837_v3  ;;  %915 = vst [vmem:[%s1604_s4] sm:$0xff] %v899_v12  ;;  %923 = vst [vmem:[%s1604_s4 + $0x40] sm:$0xff] %v907_v13  ;;  %vm870_vm4 = vcmp.gt.f32.partialorder %v854_v8, 0.0  ;;  %v886_v21 = vmul.f32 0.2, %v854_v8  ;;  %vm878_vm5 = vcmp.gt.f32.partialorder %v862_v9, 0.0  ;;  %v1056_v34 = vpop.f32.mrb[38].mxu0 }
 0x161   :  { %v894_v22 = vmul.f32 0.2, %v862_v9  ;;  %vm868_vm6 = vcmp.gt.f32.partialorder %v852_v15, 0.0  ;;  %v884_v24 = vmul.f32 0.2, %v852_v15  ;;  %v783_v30 = vadd.f32 %v1055_v10, %v1486_v48  ;;  %v1064_v35 = vpop.f32.mrb[38].mxu1 }
 0x162   :  { %vm876_vm7 = vcmp.gt.f32.partialorder %v860_v16, 0.0  ;;  %v892_v25 = vmul.f32 0.2, %v860_v16  ;;  %v902_v27 = vsel %vm870_vm4, %v854_v8, %v886_v21  ;;  %v815_v31 = vadd.f32 %v1063_v11, %v1494_v26  ;;  %v777_v42 = vpop.f32.mrb[39].mxu0  ;;  %v809_v48 = vpop.f32.mrb[39].mxu1 }
 0x163   :  { %v910_v29 = vsel %vm878_vm5, %v862_v9, %v894_v22  ;;  %918 = vst [vmem:[%s1604_s4 + $0x18] sm:$0xff] %v902_v27  ;;  %v900_v36 = vsel %vm868_vm6, %v852_v15, %v884_v24  ;;  %v775_v40 = vadd.f32 %v774_v17, %v1482_v38  ;;  %v807_v41 = vadd.f32 %v806_v19, %v1490_v14 }
 0x164   :  { %926 = vst [vmem:[%s1604_s4 + $0x58] sm:$0xff] %v910_v29  ;;  %v908_v39 = vsel %vm876_vm7, %v860_v16, %v892_v25  ;;  %916 = vst [vmem:[%s1604_s4 + $0x8] sm:$0xff] %v900_v36  ;;  %v834_v26 = vmul.f32 %v1501_v37, %v783_v30  ;;  %v842_v44 = vmul.f32 %v1501_v37, %v815_v31 }
 0x165   :  { %924 = vst [vmem:[%s1604_s4 + $0x48] sm:$0xff] %v908_v39  ;;  %v786_v46 = vadd.f32 %v1056_v34, %v1488_v53  ;;  %v818_v38 = vadd.f32 %v1064_v35, %v1496_v32  ;;  %v832_v14 = vmul.f32 %v1501_v37, %v775_v40  ;;  %v840_v47 = vmul.f32 %v1501_v37, %v807_v41 }
 0x166   :  { %v778_v49 = vadd.f32 %v777_v42, %v1484_v43  ;;  %v810_v50 = vadd.f32 %v809_v48, %v1492_v20  ;;  %v857_v51 = vadd.f32 %v1507_v45, %v834_v26  ;;  %v865_v52 = vadd.f32 %v1507_v45, %v842_v44 }
 0x167   :  { %v835_v54 = vmul.f32 %v1501_v37, %v786_v46  ;;  %v843_v28 = vmul.f32 %v1501_v37, %v818_v38  ;;  %v855_v53 = vadd.f32 %v1507_v45, %v832_v14  ;;  %v863_v32 = vadd.f32 %v1507_v45, %v840_v47 }
 0x168   :  { %v833_v55 = vmul.f32 %v1501_v37, %v778_v49  ;;  %v841_v56 = vmul.f32 %v1501_v37, %v810_v50  ;;  %vm873_vm8 = vcmp.gt.f32.partialorder %v857_v51, 0.0  ;;  %v889_v43 = vmul.f32 0.2, %v857_v51 }
 0x169   :  { %vm881_vm9 = vcmp.gt.f32.partialorder %v865_v52, 0.0  ;;  %v897_v20 = vmul.f32 0.2, %v865_v52  ;;  %vm871_vm10 = vcmp.gt.f32.partialorder %v855_v53, 0.0  ;;  %v887_v57 = vmul.f32 0.2, %v855_v53 }
 0x16a   :  { %vm879_vm11 = vcmp.gt.f32.partialorder %v863_v32, 0.0  ;;  %v895_v59 = vmul.f32 0.2, %v863_v32  ;;  %v905_v60 = vsel %vm873_vm8, %v857_v51, %v889_v43  ;;  %v858_v18 = vadd.f32 %v1507_v45, %v835_v54 }
 0x16b   :  { %v913_v61 = vsel %vm881_vm9, %v865_v52, %v897_v20  ;;  %v866_v58 = vadd.f32 %v1507_v45, %v843_v28  ;;  %921 = vst [vmem:[%s1604_s4 + $0x30] sm:$0xff] %v905_v60  ;;  %v903_v37 = vsel %vm871_vm10, %v855_v53, %v887_v57  ;;  %v856_v0 = vadd.f32 %v1507_v45, %v833_v55 }
 0x16c   :  { %929 = vst [vmem:[%s1604_s4 + $0x70] sm:$0xff] %v913_v61  ;;  %v911_v62 = vsel %vm879_vm11, %v863_v32, %v895_v59  ;;  %v864_v33 = vadd.f32 %v1507_v45, %v841_v56  ;;  %919 = vst [vmem:[%s1604_s4 + $0x20] sm:$0xff] %v903_v37  ;;  %vm874_vm12 = vcmp.gt.f32.partialorder %v858_v18, 0.0  ;;  %v890_v1 = vmul.f32 0.2, %v858_v18 }
 0x16d   :  { %927 = vst [vmem:[%s1604_s4 + $0x60] sm:$0xff] %v911_v62  ;;  %vm882_vm13 = vcmp.gt.f32.partialorder %v866_v58, 0.0  ;;  %v898_v2 = vmul.f32 0.2, %v866_v58  ;;  %vm872_vm14 = vcmp.gt.f32.partialorder %v856_v0, 0.0 }
 0x16e   :  { %v888_v3 = vmul.f32 0.2, %v856_v0  ;;  %vm880_vm15 = vcmp.gt.f32.partialorder %v864_v33, 0.0  ;;  %v896_v4 = vmul.f32 0.2, %v864_v33  ;;  %v906_v23 = vsel %vm874_vm12, %v858_v18, %v890_v1 }
 0x16f   :  { %v914_v63 = vsel %vm882_vm13, %v866_v58, %v898_v2  ;;  %922 = vst [vmem:[%s1604_s4 + $0x38] sm:$0xff] %v906_v23 }
 0x170   :  { %930 = vst [vmem:[%s1604_s4 + $0x78] sm:$0xff] %v914_v63  ;;  %v904_v45 = vsel %vm872_vm14, %v856_v0, %v888_v3  ;;  %v912_v5 = vsel %vm880_vm15, %v864_v33, %v896_v4 }
 0x171   :  { %920 = vst [vmem:[%s1604_s4 + $0x28] sm:$0xff] %v904_v45  ;;  %928 = vst [vmem:[%s1604_s4 + $0x68] sm:$0xff] %v912_v5 }

// kernel: discriminator_forward.13
= control target key start
LH: loop header
LB: loop body
LE: loop exit
PB: predicated region body
PF: predicated region fallthrough
CT: control target
= control target key end

     0   :  { %s1450_s1 = inlined_call_operand.vmem [shape: bf16[128,1152], index: 1, kind: input, shape index: {}]   ;;  %s1451_s0 = inlined_call_operand.vmem [shape: bf16[32,1152], index: 0, kind: input, shape index: {}]   ;;  %s1452_s2 = inlined_call_operand.vmem [shape: f32[1,128], index: 2, kind: input, shape index: {}]   ;;  %s1453_s3 = inlined_call_operand.vmem [shape: f32[1,128], index: 3, kind: input, shape index: {}]   ;;  %s1454_s4 = inlined_call_operand.vmem [shape: f32[32,128], index: 4, kind: output, shape index: {}]  }
   0x1   :  { %v1007_v0 = vld [vmem:[%s1450_s1 + $0x4] ss:$36 sps:$4 sm:$0xff]   ;;  %v1009_v1 = vld [vmem:[%s1450_s1 + $0x14] ss:$36 sps:$4 sm:$0xff]   ;;  %v1013_v4 = vld [vmem:[%s1450_s1 + $0x4c] ss:$36 sps:$4 sm:$0xff]  }
   0x2   :  { %578 = vmatprep.subr.bf16.mxu1 %v1007_v0  ;;  %v1011_v2 = vld [vmem:[%s1450_s1] ss:$36 sps:$4 sm:$0xff]   ;;  %v1012_v3 = vld [vmem:[%s1450_s1 + $0x10] ss:$36 sps:$4 sm:$0xff]   ;;  %676 = vmatprep.subr.bf16.mxu0 %v1009_v1  ;;  %v1017_v6 = vld [vmem:[%s1450_s1 + $0x48] ss:$36 sps:$4 sm:$0xff]  }
   0x3   :  { %579 = vmatpush1.bf16.xpose.msra.mxu1 %v1011_v2  ;;  %677 = vmatpush1.bf16.xpose.msra.mxu0 %v1012_v3  ;;  %v1015_v5 = vld [vmem:[%s1450_s1 + $0x5c] ss:$36 sps:$4 sm:$0xff]   ;;  %v1019_v8 = vld [vmem:[%s1450_s1 + $0x94] ss:$36 sps:$4 sm:$0xff]   ;;  %v1021_v9 = vld [vmem:[%s1450_s1 + $0xa4] ss:$36 sps:$4 sm:$0xff]  }
   0x4   :  { %580 = vmatprep.subr.bf16.mxu1 %v1013_v4  ;;  %678 = vmatprep.subr.bf16.mxu0 %v1015_v5  ;;  %v1018_v7 = vld [vmem:[%s1450_s1 + $0x58] ss:$36 sps:$4 sm:$0xff]   ;;  %v1023_v10 = vld [vmem:[%s1450_s1 + $0x90] ss:$36 sps:$4 sm:$0xff]   ;;  %v1024_v11 = vld [vmem:[%s1450_s1 + $0xa0] ss:$36 sps:$4 sm:$0xff]  }
   0x5   :  { %v1025_v12 = vld [vmem:[%s1450_s1 + $0xdc] ss:$36 sps:$4 sm:$0xff]   ;;  %v1027_v13 = vld [vmem:[%s1450_s1 + $0xec] ss:$36 sps:$4 sm:$0xff]   ;;  %v1057_v15 = vld [vmem:[%s1451_s0 + $0x4] ss:$36 sps:$4 sm:$0xff]  }
   0x6   :  { %v1029_v14 = vld [vmem:[%s1450_s1 + $0xd8] ss:$36 sps:$4 sm:$0xff]   ;;  %v1030_v16 = vld [vmem:[%s1450_s1 + $0xe8] ss:$36 sps:$4 sm:$0xff]   ;;  %610 = vmatprep.mubr.bf16.mxu1 %v1057_v15  ;;  %v1035_v20 = vld [vmem:[%s1450_s1 + $0x120] ss:$36 sps:$4 sm:$0xff]  }
   0x7   :  { %v1031_v17 = vld [vmem:[%s1450_s1 + $0x124] ss:$36 sps:$4 sm:$0xff]   ;;  %v1033_v18 = vld [vmem:[%s1450_s1 + $0x134] ss:$36 sps:$4 sm:$0xff]   ;;  %v1037_v22 = vld [vmem:[%s1450_s1 + $0x16c] ss:$36 sps:$4 sm:$0xff]  }
   0x8   :  { %v1063_v19 = vld [vmem:[%s1451_s0 + $0x14] ss:$36 sps:$4 sm:$0xff]   ;;  %v1039_v23 = vld [vmem:[%s1450_s1 + $0x17c] ss:$36 sps:$4 sm:$0xff]   ;;  %v1041_v24 = vld [vmem:[%s1450_s1 + $0x168] ss:$36 sps:$4 sm:$0xff]  }
   0x9   :  { %708 = vmatprep.mubr.bf16.mxu0 %v1063_v19  ;;  %v1036_v21 = vld [vmem:[%s1450_s1 + $0x130] ss:$36 sps:$4 sm:$0xff]   ;;  %v1042_v25 = vld [vmem:[%s1450_s1 + $0x178] ss:$36 sps:$4 sm:$0xff]   ;;  %v1045_v27 = vld [vmem:[%s1450_s1 + $0x1c4] ss:$36 sps:$4 sm:$0xff]  }
   0xa   :  { %v1043_v26 = vld [vmem:[%s1450_s1 + $0x1b4] ss:$36 sps:$4 sm:$0xff]   ;;  %v1048_v29 = vld [vmem:[%s1450_s1 + $0x1c0] ss:$36 sps:$4 sm:$0xff]   ;;  %v1051_v31 = vld [vmem:[%s1450_s1 + $0x20c] ss:$36 sps:$4 sm:$0xff]  }
   0xb   :  { %581 = vmatpush1.bf16.xpose.msra.mxu1 %v1017_v6  ;;  %679 = vmatpush1.bf16.xpose.msra.mxu0 %v1018_v7  ;;  %v1047_v28 = vld [vmem:[%s1450_s1 + $0x1b0] ss:$36 sps:$4 sm:$0xff]   ;;  %v1049_v30 = vld [vmem:[%s1450_s1 + $0x1fc] ss:$36 sps:$4 sm:$0xff]   ;;  %v1054_v33 = vld [vmem:[%s1450_s1 + $0x208] ss:$36 sps:$4 sm:$0xff]  }
   0xc   :  { %582 = vmatprep.subr.bf16.mxu1 %v1019_v8  ;;  %680 = vmatprep.subr.bf16.mxu0 %v1021_v9  ;;  %v1053_v32 = vld [vmem:[%s1450_s1 + $0x1f8] ss:$36 sps:$4 sm:$0xff]   ;;  %v1060_v34 = vld [vmem:[%s1450_s1 + $0xc] ss:$36 sps:$4 sm:$0xff]   ;;  %v1055_v36 = vld [vmem:[%s1451_s0] ss:$36 sps:$4 sm:$0xff]  }
   0xd   :  { %v1066_v35 = vld [vmem:[%s1450_s1 + $0x1c] ss:$36 sps:$4 sm:$0xff]   ;;  %v1061_v37 = vld [vmem:[%s1451_s0 + $0x10] ss:$36 sps:$4 sm:$0xff]   ;;  %v1058_v38 = vld [vmem:[%s1450_s1 + $0x8] ss:$36 sps:$4 sm:$0xff]  }
   0xe   :  { %v1064_v39 = vld [vmem:[%s1450_s1 + $0x18] ss:$36 sps:$4 sm:$0xff]   ;;  %v1072_v41 = vld [vmem:[%s1450_s1 + $0x64] ss:$36 sps:$4 sm:$0xff]   ;;  %v1103_v42 = vld [vmem:[%s1451_s0 + $0x4c] ss:$36 sps:$4 sm:$0xff]  }
   0xf   :  { %v1069_v40 = vld [vmem:[%s1450_s1 + $0x54] ss:$36 sps:$4 sm:$0xff]   ;;  %v1105_v43 = vld [vmem:[%s1451_s0 + $0x5c] ss:$36 sps:$4 sm:$0xff]   ;;  %v1107_v44 = vld [vmem:[%s1451_s0 + $0x48] ss:$36 sps:$4 sm:$0xff]  }
  0x10   :  { %v1111_v45 = vld [vmem:[%s1451_s0 + $0x58] ss:$36 sps:$4 sm:$0xff]   ;;  %v1067_v46 = vld [vmem:[%s1450_s1 + $0x50] ss:$36 sps:$4 sm:$0xff]   ;;  %v1070_v47 = vld [vmem:[%s1450_s1 + $0x60] ss:$36 sps:$4 sm:$0xff]  }
  0x11   :  { %v1075_v48 = vld [vmem:[%s1450_s1 + $0x9c] ss:$36 sps:$4 sm:$0xff]   ;;  %v1078_v49 = vld [vmem:[%s1450_s1 + $0xac] ss:$36 sps:$4 sm:$0xff]   ;;  %v1081_v54 = vld [vmem:[%s1450_s1 + $0xe4] ss:$36 sps:$4 sm:$0xff]  }
  0x12   :  { %v1117_v50 = vld [vmem:[%s1451_s0 + $0xc] ss:$36 sps:$4 sm:$0xff]   ;;  %v1120_v51 = vld [vmem:[%s1451_s0 + $0x1c] ss:$36 sps:$4 sm:$0xff]   ;;  %v1084_v55 = vld [vmem:[%s1450_s1 + $0xf4] ss:$36 sps:$4 sm:$0xff]  }
  0x13   :  { %583 = vmatpush1.bf16.xpose.msra.mxu1 %v1023_v10  ;;  %681 = vmatpush1.bf16.xpose.msra.mxu0 %v1024_v11  ;;  %v1073_v52 = vld [vmem:[%s1450_s1 + $0x98] ss:$36 sps:$4 sm:$0xff]   ;;  %v1076_v53 = vld [vmem:[%s1450_s1 + $0xa8] ss:$36 sps:$4 sm:$0xff]   ;;  %v1079_v56 = vld [vmem:[%s1450_s1 + $0xe0] ss:$36 sps:$4 sm:$0xff]  }
  0x14   :  { %584 = vmatprep.subr.bf16.mxu1 %v1025_v12  ;;  %682 = vmatprep.subr.bf16.mxu0 %v1027_v13  ;;  %v1082_v57 = vld [vmem:[%s1450_s1 + $0xf0] ss:$36 sps:$4 sm:$0xff]   ;;  %v1090_v59 = vld [vmem:[%s1450_s1 + $0x13c] ss:$36 sps:$4 sm:$0xff]   ;;  %v1085_v60 = vld [vmem:[%s1450_s1 + $0x128] ss:$36 sps:$4 sm:$0xff]  }
  0x15   :  { %v1087_v58 = vld [vmem:[%s1450_s1 + $0x12c] ss:$36 sps:$4 sm:$0xff]   ;;  %v1088_v61 = vld [vmem:[%s1450_s1 + $0x138] ss:$36 sps:$4 sm:$0xff]   ;;  %v1096_v63 = vld [vmem:[%s1450_s1 + $0x184] ss:$36 sps:$4 sm:$0xff]  }
  0x16   :  { %v1093_v62 = vld [vmem:[%s1450_s1 + $0x174] ss:$36 sps:$4 sm:$0xff]   ;;  %v1094_v1 = vld [vmem:[%s1450_s1 + $0x180] ss:$36 sps:$4 sm:$0xff]   ;;  %v1102_v3 = vld [vmem:[%s1450_s1 + $0x1cc] ss:$36 sps:$4 sm:$0xff]  }
  0x17   :  { %v1091_v0 = vld [vmem:[%s1450_s1 + $0x170] ss:$36 sps:$4 sm:$0xff]   ;;  %v1099_v2 = vld [vmem:[%s1450_s1 + $0x1bc] ss:$36 sps:$4 sm:$0xff]   ;;  %v1100_v5 = vld [vmem:[%s1450_s1 + $0x1c8] ss:$36 sps:$4 sm:$0xff]  }
  0x18   :  { %v1097_v4 = vld [vmem:[%s1450_s1 + $0x1b8] ss:$36 sps:$4 sm:$0xff]   ;;  %v1110_v6 = vld [vmem:[%s1450_s1 + $0x204] ss:$36 sps:$4 sm:$0xff]   ;;  %v1112_v9 = vld [vmem:[%s1450_s1 + $0x210] ss:$36 sps:$4 sm:$0xff]  }
  0x19   :  { %v1114_v7 = vld [vmem:[%s1450_s1 + $0x214] ss:$36 sps:$4 sm:$0xff]   ;;  %v1108_v8 = vld [vmem:[%s1450_s1 + $0x200] ss:$36 sps:$4 sm:$0xff]   ;;  %v1115_v11 = vld [vmem:[%s1451_s0 + $0x8] ss:$36 sps:$4 sm:$0xff]  }
  0x1a   :  { %v1121_v10 = vld [vmem:[%s1450_s1 + $0x20] ss:$36 sps:$4 sm:$0xff]   ;;  %v1118_v12 = vld [vmem:[%s1451_s0 + $0x18] ss:$36 sps:$4 sm:$0xff]   ;;  %v1128_v15 = vld [vmem:[%s1450_s1 + $0x68] ss:$36 sps:$4 sm:$0xff]  }
  0x1b   :  { %585 = vmatpush1.bf16.xpose.msra.mxu1 %v1029_v14  ;;  %683 = vmatpush1.bf16.xpose.msra.mxu0 %v1030_v16  ;;  %v1122_v13 = vld [vmem:[%s1451_s0 + $0x54] ss:$36 sps:$4 sm:$0xff]   ;;  %v1124_v14 = vld [vmem:[%s1451_s0 + $0x64] ss:$36 sps:$4 sm:$0xff]  }
  0x1c   :  { %586 = vmatprep.subr.bf16.mxu1 %v1031_v17  ;;  %684 = vmatprep.subr.bf16.mxu0 %v1033_v18  ;;  %v1126_v16 = vld [vmem:[%s1451_s0 + $0x50] ss:$36 sps:$4 sm:$0xff]   ;;  %v1127_v17 = vld [vmem:[%s1451_s0 + $0x60] ss:$36 sps:$4 sm:$0xff]  }
  0x1d   :  { %v1135_v18 = vld [vmem:[%s1451_s0 + $0x20] ss:$36 sps:$4 sm:$0xff]   ;;  %v1129_v19 = vld [vmem:[%s1450_s1 + $0xb0] ss:$36 sps:$4 sm:$0xff]  }
  0x23   :  { %587 = vmatpush1.bf16.xpose.msra.mxu1 %v1035_v20  ;;  %685 = vmatpush1.bf16.xpose.msra.mxu0 %v1036_v21  ;;  %v1130_v20 = vld [vmem:[%s1450_s1 + $0xf8] ss:$36 sps:$4 sm:$0xff]   ;;  %v1131_v21 = vld [vmem:[%s1450_s1 + $0x140] ss:$36 sps:$4 sm:$0xff]  }
  0x24   :  { %588 = vmatprep.subr.bf16.mxu1 %v1037_v22  ;;  %686 = vmatprep.subr.bf16.mxu0 %v1039_v23  ;;  %v1132_v22 = vld [vmem:[%s1450_s1 + $0x188] ss:$36 sps:$4 sm:$0xff]   ;;  %v1133_v23 = vld [vmem:[%s1450_s1 + $0x1d0] ss:$36 sps:$4 sm:$0xff]  }
  0x2b   :  { %589 = vmatpush1.bf16.xpose.msra.mxu1 %v1041_v24  ;;  %687 = vmatpush1.bf16.xpose.msra.mxu0 %v1042_v25  ;;  %v1134_v24 = vld [vmem:[%s1450_s1 + $0x218] ss:$36 sps:$4 sm:$0xff]   ;;  %v1136_v25 = vld [vmem:[%s1451_s0 + $0x68] ss:$36 sps:$4 sm:$0xff]  }
  0x2c   :  { %590 = vmatprep.subr.bf16.mxu1 %v1043_v26  ;;  %688 = vmatprep.subr.bf16.mxu0 %v1045_v27 }
  0x33   :  { %591 = vmatpush1.bf16.xpose.msra.mxu1 %v1047_v28  ;;  %689 = vmatpush1.bf16.xpose.msra.mxu0 %v1048_v29 }
  0x34   :  { %592 = vmatprep.subr.bf16.mxu1 %v1049_v30  ;;  %690 = vmatprep.subr.bf16.mxu0 %v1051_v31 }
  0x3b   :  { %593 = vmatpush1.bf16.xpose.msra.mxu1 %v1053_v32  ;;  %691 = vmatpush1.bf16.xpose.msra.mxu0 %v1054_v33 }
  0x3c   :  { %627 = vmatprep.subr.bf16.mxu1 %v1060_v34  ;;  %725 = vmatprep.subr.bf16.mxu0 %v1066_v35 }
  0x42   :  { %611 = vmatmul.mubr.bf16.vlgmr.msra.gmra.mrb[0].mxu1 %v1055_v36  ;;  %709 = vmatmul.mubr.bf16.vlgmr.msra.gmra.mrb[0].mxu0 %v1061_v37 }
  0x43   :  { %628 = vmatpush1.bf16.xpose.msra.mxu1 %v1058_v38  ;;  %726 = vmatpush1.bf16.xpose.msra.mxu0 %v1064_v39 }
  0x44   :  { %629 = vmatprep.subr.bf16.mxu1 %v1069_v40  ;;  %727 = vmatprep.subr.bf16.mxu0 %v1072_v41 }
  0x45   :  { %618 = vmatprep.mubr.bf16.mxu1 %v1103_v42  ;;  %716 = vmatprep.mubr.bf16.mxu0 %v1105_v43 }
  0x4a   :  { %619 = vmatmul.mubr.bf16.gmra.mrb[4].mxu1 %v1107_v44  ;;  %717 = vmatmul.mubr.bf16.gmra.mrb[4].mxu0 %v1111_v45 }
  0x4b   :  { %630 = vmatpush1.bf16.xpose.msra.mxu1 %v1067_v46  ;;  %728 = vmatpush1.bf16.xpose.msra.mxu0 %v1070_v47  ;;  %v955_v47 = vld [vmem:[%s1452_s2] ss:$0 sm:$0xff] }
  0x4c   :  { %631 = vmatprep.subr.bf16.mxu1 %v1075_v48  ;;  %729 = vmatprep.subr.bf16.mxu0 %v1078_v49 }
  0x4d   :  { %659 = vmatprep.mubr.bf16.mxu1 %v1117_v50  ;;  %757 = vmatprep.mubr.bf16.mxu0 %v1120_v51  ;;  %v956_v50 = vld [vmem:[%s1453_s3] ss:$0 sm:$0xff] }
  0x53   :  { %632 = vmatpush1.bf16.xpose.msra.mxu1 %v1073_v52  ;;  %730 = vmatpush1.bf16.xpose.msra.mxu0 %v1076_v53 }
  0x54   :  { %633 = vmatprep.subr.bf16.mxu1 %v1081_v54  ;;  %731 = vmatprep.subr.bf16.mxu0 %v1084_v55 }
  0x5b   :  { %634 = vmatpush1.bf16.xpose.msra.mxu1 %v1079_v56  ;;  %732 = vmatpush1.bf16.xpose.msra.mxu0 %v1082_v57 }
  0x5c   :  { %635 = vmatprep.subr.bf16.mxu1 %v1087_v58  ;;  %733 = vmatprep.subr.bf16.mxu0 %v1090_v59 }
  0x63   :  { %636 = vmatpush1.bf16.xpose.msra.mxu1 %v1085_v60  ;;  %734 = vmatpush1.bf16.xpose.msra.mxu0 %v1088_v61 }
  0x64   :  { %637 = vmatprep.subr.bf16.mxu1 %v1093_v62  ;;  %735 = vmatprep.subr.bf16.mxu0 %v1096_v63 }
  0x6b   :  { %638 = vmatpush1.bf16.xpose.msra.mxu1 %v1091_v0  ;;  %736 = vmatpush1.bf16.xpose.msra.mxu0 %v1094_v1 }
  0x6c   :  { %639 = vmatprep.subr.bf16.mxu1 %v1099_v2  ;;  %737 = vmatprep.subr.bf16.mxu0 %v1102_v3 }
  0x73   :  { %640 = vmatpush1.bf16.xpose.msra.mxu1 %v1097_v4  ;;  %738 = vmatpush1.bf16.xpose.msra.mxu0 %v1100_v5 }
  0x74   :  { %641 = vmatprep.subr.bf16.mxu1 %v1110_v6  ;;  %739 = vmatprep.subr.bf16.mxu0 %v1114_v7 }
  0x7b   :  { %642 = vmatpush1.bf16.xpose.msra.mxu1 %v1108_v8  ;;  %740 = vmatpush1.bf16.xpose.msra.mxu0 %v1112_v9 }
  0x7c   :  { %967 = vmatprep.subr.bf16.mxu1 %v1121_v10 }
  0x82   :  { %660 = vmatmul.mubr.bf16.vlgmr.msra.gmra.mrb[0].mxu1 %v1115_v11  ;;  %758 = vmatmul.mubr.bf16.vlgmr.msra.gmra.mrb[0].mxu0 %v1118_v12 }
  0x83   :  { %968 = vmatpush3.bf16.xpose.msra.mxu1 %v1121_v10  ;;  %667 = vmatprep.mubr.bf16.mxu1 %v1122_v13 }
  0x84   :  { %765 = vmatprep.mubr.bf16.mxu0 %v1124_v14  ;;  %969 = vmatprep.subr.bf16.mxu1 %v1128_v15 }
  0x8a   :  { %668 = vmatmul.mubr.bf16.gmra.mrb[4].mxu1 %v1126_v16  ;;  %766 = vmatmul.mubr.bf16.gmra.mrb[4].mxu0 %v1127_v17 }
  0x8b   :  { %970 = vmatpush3.bf16.xpose.msra.mxu1 %v1128_v15  ;;  %983 = vmatprep.mubr.bf16.mxu1 %v1135_v18 }
  0x8c   :  { %971 = vmatprep.subr.bf16.mxu1 %v1129_v19 }
  0x93   :  { %972 = vmatpush3.bf16.xpose.msra.mxu1 %v1129_v19 }
  0x94   :  { %973 = vmatprep.subr.bf16.mxu1 %v1130_v20 }
  0x9b   :  { %974 = vmatpush3.bf16.xpose.msra.mxu1 %v1130_v20 }
  0x9c   :  { %975 = vmatprep.subr.bf16.mxu1 %v1131_v21 }
  0xa3   :  { %976 = vmatpush3.bf16.xpose.msra.mxu1 %v1131_v21 }
  0xa4   :  { %977 = vmatprep.subr.bf16.mxu1 %v1132_v22 }
  0xab   :  { %978 = vmatpush3.bf16.xpose.msra.mxu1 %v1132_v22 }
  0xac   :  { %979 = vmatprep.subr.bf16.mxu1 %v1133_v23 }
  0xb3   :  { %980 = vmatpush3.bf16.xpose.msra.mxu1 %v1133_v23 }
  0xb4   :  { %981 = vmatprep.subr.bf16.mxu1 %v1134_v24 }
  0xbb   :  { %982 = vmatpush3.bf16.xpose.msra.mxu1 %v1134_v24 }
  0xc2   :  { %984 = vmatmul.mubr.bf16.vlgmr.msra.gmra.mrb[8].mxu1 %v1136_v25 }
 0x155   :  { %v661_v26 = vpop.f32.mrb[0].mxu1  ;;  %v759_v27 = vpop.f32.mrb[0].mxu0 }
 0x156   :  { %v987_v28 = vadd.f32 %v759_v27, %v661_v26  ;;  %v663_v29 = vpop.f32.mrb[1].mxu1  ;;  %v761_v30 = vpop.f32.mrb[1].mxu0 }
 0x157   :  { %v664_v31 = vpop.f32.mrb[2].mxu1  ;;  %v762_v32 = vpop.f32.mrb[2].mxu0 }
 0x158   :  { %v988_v33 = vadd.f32 %v762_v32, %v664_v31  ;;  %v666_v34 = vpop.f32.mrb[3].mxu1  ;;  %v764_v35 = vpop.f32.mrb[3].mxu0 }
 0x15d   :  { %v669_v36 = vpop.f32.mrb[4].mxu1  ;;  %v767_v37 = vpop.f32.mrb[4].mxu0 }
 0x15e   :  { %v989_v38 = vadd.f32 %v767_v37, %v669_v36  ;;  %v671_v39 = vpop.f32.mrb[5].mxu1  ;;  %v769_v40 = vpop.f32.mrb[5].mxu0 }
 0x15f   :  { %v672_v41 = vpop.f32.mrb[6].mxu1  ;;  %v770_v42 = vpop.f32.mrb[6].mxu0 }
 0x160   :  { %v990_v43 = vadd.f32 %v770_v42, %v672_v41  ;;  %v674_v44 = vpop.f32.mrb[7].mxu1  ;;  %v772_v45 = vpop.f32.mrb[7].mxu0 }
 0x195   :  { %v985_v46 = vpop.f32.mrb[8].mxu1 }
 0x196   :  { %v817_v48 = vadd.f32 %v989_v38, %v985_v46  ;;  %v808_v49 = vpop.f32.mrb[9].mxu1 }
 0x197   :  { %v809_v51 = vadd.f32 %v987_v28, %v808_v49  ;;  %v986_v52 = vpop.f32.mrb[10].mxu1 }
 0x198   :  { %v832_v53 = vmul.f32 %v955_v47, %v817_v48  ;;  %v820_v54 = vadd.f32 %v990_v43, %v986_v52  ;;  %v811_v55 = vpop.f32.mrb[11].mxu1 }
 0x199   :  { %v830_v56 = vmul.f32 %v955_v47, %v809_v51  ;;  %v812_v57 = vadd.f32 %v988_v33, %v811_v55 }
 0x19a   :  { %v843_v58 = vadd.f32 %v956_v50, %v832_v53  ;;  %v833_v59 = vmul.f32 %v955_v47, %v820_v54 }
 0x19b   :  { %v841_v60 = vadd.f32 %v956_v50, %v830_v56  ;;  %v831_v61 = vmul.f32 %v955_v47, %v812_v57 }
 0x19c   :  { %vm847_vm0 = vcmp.gt.f32.partialorder %v843_v58, 0.0  ;;  %v851_v62 = vmul.f32 0.2, %v843_v58  ;;  %v844_v63 = vadd.f32 %v956_v50, %v833_v59 }
 0x19d   :  { %vm845_vm1 = vcmp.gt.f32.partialorder %v841_v60, 0.0  ;;  %v849_v0 = vmul.f32 0.2, %v841_v60  ;;  %v842_v1 = vadd.f32 %v956_v50, %v831_v61 }
 0x19e   :  { %v855_v2 = vsel %vm847_vm0, %v843_v58, %v851_v62  ;;  %vm848_vm2 = vcmp.gt.f32.partialorder %v844_v63, 0.0  ;;  %v852_v3 = vmul.f32 0.2, %v844_v63 }
 0x19f   :  { %859 = vst [vmem:[%s1454_s4 + $0x10] sm:$0xff] %v855_v2  ;;  %v853_v4 = vsel %vm845_vm1, %v841_v60, %v849_v0  ;;  %vm846_vm3 = vcmp.gt.f32.partialorder %v842_v1, 0.0  ;;  %v850_v5 = vmul.f32 0.2, %v842_v1 }
 0x1a0   :  { %857 = vst [vmem:[%s1454_s4] sm:$0xff] %v853_v4  ;;  %v856_v6 = vsel %vm848_vm2, %v844_v63, %v852_v3 }
 0x1a1   :  { %860 = vst [vmem:[%s1454_s4 + $0x18] sm:$0xff] %v856_v6  ;;  %v854_v7 = vsel %vm846_vm3, %v842_v1, %v850_v5 }
 0x1a2   :  { %858 = vst [vmem:[%s1454_s4 + $0x8] sm:$0xff] %v854_v7 }

// kernel: discriminator_forward.14
= control target key start
LH: loop header
LB: loop body
LE: loop exit
PB: predicated region body
PF: predicated region fallthrough
CT: control target
= control target key end

     0   :  { %s2372_s1 = inlined_call_operand.vmem [shape: bf16[256,1152], index: 1, kind: input, shape index: {}]   ;;  %s2373_s0 = inlined_call_operand.vmem [shape: bf16[32,1152], index: 0, kind: input, shape index: {}]   ;;  %s2374_s2 = inlined_call_operand.vmem [shape: f32[1,256], index: 2, kind: input, shape index: {}]   ;;  %s2375_s3 = inlined_call_operand.vmem [shape: f32[1,256], index: 3, kind: input, shape index: {}]   ;;  %s2376_s4 = inlined_call_operand.vmem [shape: f32[32,256], index: 4, kind: output, shape index: {}]  }
   0x1   :  { %v1597_v0 = vld [vmem:[%s2372_s1 + $0x4] ss:$36 sps:$4 sm:$0xff]   ;;  %v1599_v1 = vld [vmem:[%s2372_s1 + $0x14] ss:$36 sps:$4 sm:$0xff]   ;;  %v1603_v4 = vld [vmem:[%s2372_s1 + $0x4c] ss:$36 sps:$4 sm:$0xff]  }
   0x2   :  { %1026 = vmatprep.subr.bf16.mxu1 %v1597_v0  ;;  %v1601_v2 = vld [vmem:[%s2372_s1] ss:$36 sps:$4 sm:$0xff]   ;;  %v1602_v3 = vld [vmem:[%s2372_s1 + $0x10] ss:$36 sps:$4 sm:$0xff]   ;;  %1132 = vmatprep.subr.bf16.mxu0 %v1599_v1  ;;  %v1607_v6 = vld [vmem:[%s2372_s1 + $0x48] ss:$36 sps:$4 sm:$0xff]  }
   0x3   :  { %1027 = vmatpush1.bf16.xpose.msra.mxu1 %v1601_v2  ;;  %1133 = vmatpush1.bf16.xpose.msra.mxu0 %v1602_v3  ;;  %v1605_v5 = vld [vmem:[%s2372_s1 + $0x5c] ss:$36 sps:$4 sm:$0xff]   ;;  %v1609_v8 = vld [vmem:[%s2372_s1 + $0x94] ss:$36 sps:$4 sm:$0xff]   ;;  %v1611_v9 = vld [vmem:[%s2372_s1 + $0xa4] ss:$36 sps:$4 sm:$0xff]  }
   0x4   :  { %1028 = vmatprep.subr.bf16.mxu1 %v1603_v4  ;;  %1134 = vmatprep.subr.bf16.mxu0 %v1605_v5  ;;  %v1608_v7 = vld [vmem:[%s2372_s1 + $0x58] ss:$36 sps:$4 sm:$0xff]   ;;  %v1613_v10 = vld [vmem:[%s2372_s1 + $0x90] ss:$36 sps:$4 sm:$0xff]   ;;  %v1614_v11 = vld [vmem:[%s2372_s1 + $0xa0] ss:$36 sps:$4 sm:$0xff]  }
   0x5   :  { %v1615_v12 = vld [vmem:[%s2372_s1 + $0xdc] ss:$36 sps:$4 sm:$0xff]   ;;  %v1617_v13 = vld [vmem:[%s2372_s1 + $0xec] ss:$36 sps:$4 sm:$0xff]   ;;  %v1621_v16 = vld [vmem:[%s2372_s1 + $0x124] ss:$36 sps:$4 sm:$0xff]  }
   0x6   :  { %v1619_v14 = vld [vmem:[%s2372_s1 + $0xd8] ss:$36 sps:$4 sm:$0xff]   ;;  %v1620_v15 = vld [vmem:[%s2372_s1 + $0xe8] ss:$36 sps:$4 sm:$0xff]   ;;  %v1625_v18 = vld [vmem:[%s2372_s1 + $0x120] ss:$36 sps:$4 sm:$0xff]  }
   0x7   :  { %v1623_v17 = vld [vmem:[%s2372_s1 + $0x134] ss:$36 sps:$4 sm:$0xff]   ;;  %v1627_v20 = vld [vmem:[%s2372_s1 + $0x16c] ss:$36 sps:$4 sm:$0xff]   ;;  %v1629_v21 = vld [vmem:[%s2372_s1 + $0x17c] ss:$36 sps:$4 sm:$0xff]  }
   0x8   :  { %v1626_v19 = vld [vmem:[%s2372_s1 + $0x130] ss:$36 sps:$4 sm:$0xff]   ;;  %v1631_v22 = vld [vmem:[%s2372_s1 + $0x168] ss:$36 sps:$4 sm:$0xff]   ;;  %v1632_v23 = vld [vmem:[%s2372_s1 + $0x178] ss:$36 sps:$4 sm:$0xff]  }
   0x9   :  { %v1633_v24 = vld [vmem:[%s2372_s1 + $0x1b4] ss:$36 sps:$4 sm:$0xff]   ;;  %v1635_v25 = vld [vmem:[%s2372_s1 + $0x1c4] ss:$36 sps:$4 sm:$0xff]   ;;  %v1639_v30 = vld [vmem:[%s2372_s1 + $0x1fc] ss:$36 sps:$4 sm:$0xff]  }
   0xa   :  { %v1695_v26 = vld [vmem:[%s2373_s0 + $0x4] ss:$36 sps:$4 sm:$0xff]   ;;  %v1701_v27 = vld [vmem:[%s2373_s0 + $0x14] ss:$36 sps:$4 sm:$0xff]   ;;  %v1641_v31 = vld [vmem:[%s2372_s1 + $0x20c] ss:$36 sps:$4 sm:$0xff]  }
   0xb   :  { %1029 = vmatpush1.bf16.xpose.msra.mxu1 %v1607_v6  ;;  %1135 = vmatpush1.bf16.xpose.msra.mxu0 %v1608_v7  ;;  %v1637_v28 = vld [vmem:[%s2372_s1 + $0x1b0] ss:$36 sps:$4 sm:$0xff]   ;;  %v1638_v29 = vld [vmem:[%s2372_s1 + $0x1c0] ss:$36 sps:$4 sm:$0xff]   ;;  %v1643_v32 = vld [vmem:[%s2372_s1 + $0x1f8] ss:$36 sps:$4 sm:$0xff]  }
   0xc   :  { %1030 = vmatprep.subr.bf16.mxu1 %v1609_v8  ;;  %1136 = vmatprep.subr.bf16.mxu0 %v1611_v9  ;;  %v1644_v33 = vld [vmem:[%s2372_s1 + $0x208] ss:$36 sps:$4 sm:$0xff]   ;;  %v1647_v35 = vld [vmem:[%s2372_s1 + $0x254] ss:$36 sps:$4 sm:$0xff]   ;;  %v1649_v36 = vld [vmem:[%s2372_s1 + $0x240] ss:$36 sps:$4 sm:$0xff]  }
   0xd   :  { %1058 = vmatprep.mubr.bf16.mxu1 %v1695_v26  ;;  %1164 = vmatprep.mubr.bf16.mxu0 %v1701_v27  ;;  %v1645_v34 = vld [vmem:[%s2372_s1 + $0x244] ss:$36 sps:$4 sm:$0xff]   ;;  %v1650_v37 = vld [vmem:[%s2372_s1 + $0x250] ss:$36 sps:$4 sm:$0xff]   ;;  %v1653_v39 = vld [vmem:[%s2372_s1 + $0x29c] ss:$36 sps:$4 sm:$0xff]  }
   0xe   :  { %v1651_v38 = vld [vmem:[%s2372_s1 + $0x28c] ss:$36 sps:$4 sm:$0xff]   ;;  %v1656_v41 = vld [vmem:[%s2372_s1 + $0x298] ss:$36 sps:$4 sm:$0xff]   ;;  %v1659_v43 = vld [vmem:[%s2372_s1 + $0x2e4] ss:$36 sps:$4 sm:$0xff]  }
   0xf   :  { %v1655_v40 = vld [vmem:[%s2372_s1 + $0x288] ss:$36 sps:$4 sm:$0xff]   ;;  %v1657_v42 = vld [vmem:[%s2372_s1 + $0x2d4] ss:$36 sps:$4 sm:$0xff]   ;;  %v1662_v45 = vld [vmem:[%s2372_s1 + $0x2e0] ss:$36 sps:$4 sm:$0xff]  }
  0x10   :  { %v1661_v44 = vld [vmem:[%s2372_s1 + $0x2d0] ss:$36 sps:$4 sm:$0xff]   ;;  %v1663_v46 = vld [vmem:[%s2372_s1 + $0x31c] ss:$36 sps:$4 sm:$0xff]   ;;  %v1668_v49 = vld [vmem:[%s2372_s1 + $0x328] ss:$36 sps:$4 sm:$0xff]  }
  0x11   :  { %v1665_v47 = vld [vmem:[%s2372_s1 + $0x32c] ss:$36 sps:$4 sm:$0xff]   ;;  %v1667_v48 = vld [vmem:[%s2372_s1 + $0x318] ss:$36 sps:$4 sm:$0xff]   ;;  %v1669_v50 = vld [vmem:[%s2372_s1 + $0x364] ss:$36 sps:$4 sm:$0xff]  }
  0x12   :  { %v1671_v51 = vld [vmem:[%s2372_s1 + $0x374] ss:$36 sps:$4 sm:$0xff]   ;;  %v1673_v52 = vld [vmem:[%s2372_s1 + $0x360] ss:$36 sps:$4 sm:$0xff]   ;;  %v1675_v54 = vld [vmem:[%s2372_s1 + $0x3ac] ss:$36 sps:$4 sm:$0xff]  }
  0x13   :  { %1031 = vmatpush1.bf16.xpose.msra.mxu1 %v1613_v10  ;;  %1137 = vmatpush1.bf16.xpose.msra.mxu0 %v1614_v11  ;;  %v1674_v53 = vld [vmem:[%s2372_s1 + $0x370] ss:$36 sps:$4 sm:$0xff]   ;;  %v1677_v55 = vld [vmem:[%s2372_s1 + $0x3bc] ss:$36 sps:$4 sm:$0xff]   ;;  %v1679_v56 = vld [vmem:[%s2372_s1 + $0x3a8] ss:$36 sps:$4 sm:$0xff]  }
  0x14   :  { %1032 = vmatprep.subr.bf16.mxu1 %v1615_v12  ;;  %1138 = vmatprep.subr.bf16.mxu0 %v1617_v13  ;;  %v1680_v57 = vld [vmem:[%s2372_s1 + $0x3b8] ss:$36 sps:$4 sm:$0xff]   ;;  %v1683_v59 = vld [vmem:[%s2372_s1 + $0x404] ss:$36 sps:$4 sm:$0xff]   ;;  %v1685_v60 = vld [vmem:[%s2372_s1 + $0x3f0] ss:$36 sps:$4 sm:$0xff]  }
  0x15   :  { %v1681_v58 = vld [vmem:[%s2372_s1 + $0x3f4] ss:$36 sps:$4 sm:$0xff]   ;;  %v1686_v61 = vld [vmem:[%s2372_s1 + $0x400] ss:$36 sps:$4 sm:$0xff]   ;;  %v1689_v63 = vld [vmem:[%s2372_s1 + $0x44c] ss:$36 sps:$4 sm:$0xff]  }
  0x16   :  { %v1687_v62 = vld [vmem:[%s2372_s1 + $0x43c] ss:$36 sps:$4 sm:$0xff]   ;;  %v1692_v1 = vld [vmem:[%s2372_s1 + $0x448] ss:$36 sps:$4 sm:$0xff]   ;;  %v1699_v5 = vld [vmem:[%s2373_s0 + $0x10] ss:$36 sps:$4 sm:$0xff]  }
  0x17   :  { %v1691_v0 = vld [vmem:[%s2372_s1 + $0x438] ss:$36 sps:$4 sm:$0xff]   ;;  %v1698_v2 = vld [vmem:[%s2372_s1 + $0xc] ss:$36 sps:$4 sm:$0xff]   ;;  %v1693_v4 = vld [vmem:[%s2373_s0] ss:$36 sps:$4 sm:$0xff]  }
  0x18   :  { %v1704_v3 = vld [vmem:[%s2372_s1 + $0x1c] ss:$36 sps:$4 sm:$0xff]   ;;  %v1696_v6 = vld [vmem:[%s2372_s1 + $0x8] ss:$36 sps:$4 sm:$0xff]   ;;  %v1707_v8 = vld [vmem:[%s2372_s1 + $0x54] ss:$36 sps:$4 sm:$0xff]  }
  0x19   :  { %v1702_v7 = vld [vmem:[%s2372_s1 + $0x18] ss:$36 sps:$4 sm:$0xff]   ;;  %v1710_v9 = vld [vmem:[%s2372_s1 + $0x64] ss:$36 sps:$4 sm:$0xff]   ;;  %v1789_v10 = vld [vmem:[%s2373_s0 + $0x4c] ss:$36 sps:$4 sm:$0xff]  }
  0x1a   :  { %v1791_v11 = vld [vmem:[%s2373_s0 + $0x5c] ss:$36 sps:$4 sm:$0xff]   ;;  %v1793_v12 = vld [vmem:[%s2373_s0 + $0x48] ss:$36 sps:$4 sm:$0xff]  }
  0x1b   :  { %1033 = vmatpush1.bf16.xpose.msra.mxu1 %v1619_v14  ;;  %1139 = vmatpush1.bf16.xpose.msra.mxu0 %v1620_v15  ;;  %v1797_v13 = vld [vmem:[%s2373_s0 + $0x58] ss:$36 sps:$4 sm:$0xff]   ;;  %v1705_v14 = vld [vmem:[%s2372_s1 + $0x50] ss:$36 sps:$4 sm:$0xff]   ;;  %v1708_v15 = vld [vmem:[%s2372_s1 + $0x60] ss:$36 sps:$4 sm:$0xff]  }
  0x1c   :  { %1034 = vmatprep.subr.bf16.mxu1 %v1621_v16  ;;  %1140 = vmatprep.subr.bf16.mxu0 %v1623_v17  ;;  %v1713_v16 = vld [vmem:[%s2372_s1 + $0x9c] ss:$36 sps:$4 sm:$0xff]   ;;  %v1716_v17 = vld [vmem:[%s2372_s1 + $0xac] ss:$36 sps:$4 sm:$0xff]  }
  0x1d   :  { %v1725_v26 = vld [vmem:[%s2372_s1 + $0x12c] ss:$36 sps:$4 sm:$0xff]   ;;  %v1728_v27 = vld [vmem:[%s2372_s1 + $0x13c] ss:$36 sps:$4 sm:$0xff]  }
  0x23   :  { %1035 = vmatpush1.bf16.xpose.msra.mxu1 %v1625_v18  ;;  %1141 = vmatpush1.bf16.xpose.msra.mxu0 %v1626_v19  ;;  %v1803_v18 = vld [vmem:[%s2373_s0 + $0xc] ss:$36 sps:$4 sm:$0xff]   ;;  %v1806_v19 = vld [vmem:[%s2373_s0 + $0x1c] ss:$36 sps:$4 sm:$0xff]  }
  0x24   :  { %1036 = vmatprep.subr.bf16.mxu1 %v1627_v20  ;;  %1142 = vmatprep.subr.bf16.mxu0 %v1629_v21  ;;  %v1711_v20 = vld [vmem:[%s2372_s1 + $0x98] ss:$36 sps:$4 sm:$0xff]   ;;  %v1714_v21 = vld [vmem:[%s2372_s1 + $0xa8] ss:$36 sps:$4 sm:$0xff]  }
  0x2b   :  { %1037 = vmatpush1.bf16.xpose.msra.mxu1 %v1631_v22  ;;  %1143 = vmatpush1.bf16.xpose.msra.mxu0 %v1632_v23  ;;  %v1719_v22 = vld [vmem:[%s2372_s1 + $0xe4] ss:$36 sps:$4 sm:$0xff]   ;;  %v1722_v23 = vld [vmem:[%s2372_s1 + $0xf4] ss:$36 sps:$4 sm:$0xff]  }
  0x2c   :  { %1038 = vmatprep.subr.bf16.mxu1 %v1633_v24  ;;  %1144 = vmatprep.subr.bf16.mxu0 %v1635_v25  ;;  %v1717_v24 = vld [vmem:[%s2372_s1 + $0xe0] ss:$36 sps:$4 sm:$0xff]   ;;  %v1720_v25 = vld [vmem:[%s2372_s1 + $0xf0] ss:$36 sps:$4 sm:$0xff]  }
  0x33   :  { %1039 = vmatpush1.bf16.xpose.msra.mxu1 %v1637_v28  ;;  %1145 = vmatpush1.bf16.xpose.msra.mxu0 %v1638_v29  ;;  %v1723_v28 = vld [vmem:[%s2372_s1 + $0x128] ss:$36 sps:$4 sm:$0xff]   ;;  %v1726_v29 = vld [vmem:[%s2372_s1 + $0x138] ss:$36 sps:$4 sm:$0xff]  }
  0x34   :  { %1040 = vmatprep.subr.bf16.mxu1 %v1639_v30  ;;  %1146 = vmatprep.subr.bf16.mxu0 %v1641_v31  ;;  %v1731_v30 = vld [vmem:[%s2372_s1 + $0x174] ss:$36 sps:$4 sm:$0xff]   ;;  %v1734_v31 = vld [vmem:[%s2372_s1 + $0x184] ss:$36 sps:$4 sm:$0xff]  }
  0x3b   :  { %1041 = vmatpush1.bf16.xpose.msra.mxu1 %v1643_v32  ;;  %1147 = vmatpush1.bf16.xpose.msra.mxu0 %v1644_v33  ;;  %v1729_v32 = vld [vmem:[%s2372_s1 + $0x170] ss:$36 sps:$4 sm:$0xff]   ;;  %v1732_v33 = vld [vmem:[%s2372_s1 + $0x180] ss:$36 sps:$4 sm:$0xff]  }
  0x3c   :  { %1042 = vmatprep.subr.bf16.mxu1 %v1645_v34  ;;  %1148 = vmatprep.subr.bf16.mxu0 %v1647_v35  ;;  %v1737_v34 = vld [vmem:[%s2372_s1 + $0x1bc] ss:$36 sps:$4 sm:$0xff]   ;;  %v1740_v35 = vld [vmem:[%s2372_s1 + $0x1cc] ss:$36 sps:$4 sm:$0xff]  }
  0x43   :  { %1043 = vmatpush1.bf16.xpose.msra.mxu1 %v1649_v36  ;;  %1149 = vmatpush1.bf16.xpose.msra.mxu0 %v1650_v37  ;;  %v1735_v36 = vld [vmem:[%s2372_s1 + $0x1b8] ss:$36 sps:$4 sm:$0xff]   ;;  %v1738_v37 = vld [vmem:[%s2372_s1 + $0x1c8] ss:$36 sps:$4 sm:$0xff]  }
  0x44   :  { %1044 = vmatprep.subr.bf16.mxu1 %v1651_v38  ;;  %1150 = vmatprep.subr.bf16.mxu0 %v1653_v39  ;;  %v1743_v38 = vld [vmem:[%s2372_s1 + $0x204] ss:$36 sps:$4 sm:$0xff]   ;;  %v1746_v39 = vld [vmem:[%s2372_s1 + $0x214] ss:$36 sps:$4 sm:$0xff]  }
  0x4b   :  { %1045 = vmatpush1.bf16.xpose.msra.mxu1 %v1655_v40  ;;  %1151 = vmatpush1.bf16.xpose.msra.mxu0 %v1656_v41  ;;  %v1741_v40 = vld [vmem:[%s2372_s1 + $0x200] ss:$36 sps:$4 sm:$0xff]   ;;  %v1744_v41 = vld [vmem:[%s2372_s1 + $0x210] ss:$36 sps:$4 sm:$0xff]  }
  0x4c   :  { %1046 = vmatprep.subr.bf16.mxu1 %v1657_v42  ;;  %1152 = vmatprep.subr.bf16.mxu0 %v1659_v43  ;;  %v1749_v42 = vld [vmem:[%s2372_s1 + $0x24c] ss:$36 sps:$4 sm:$0xff]   ;;  %v1752_v43 = vld [vmem:[%s2372_s1 + $0x25c] ss:$36 sps:$4 sm:$0xff]  }
  0x53   :  { %1047 = vmatpush1.bf16.xpose.msra.mxu1 %v1661_v44  ;;  %1153 = vmatpush1.bf16.xpose.msra.mxu0 %v1662_v45  ;;  %v1747_v44 = vld [vmem:[%s2372_s1 + $0x248] ss:$36 sps:$4 sm:$0xff]   ;;  %v1750_v45 = vld [vmem:[%s2372_s1 + $0x258] ss:$36 sps:$4 sm:$0xff]  }
  0x54   :  { %1048 = vmatprep.subr.bf16.mxu1 %v1663_v46  ;;  %1154 = vmatprep.subr.bf16.mxu0 %v1665_v47  ;;  %v1755_v46 = vld [vmem:[%s2372_s1 + $0x294] ss:$36 sps:$4 sm:$0xff]   ;;  %v1758_v47 = vld [vmem:[%s2372_s1 + $0x2a4] ss:$36 sps:$4 sm:$0xff]  }
  0x5b   :  { %1049 = vmatpush1.bf16.xpose.msra.mxu1 %v1667_v48  ;;  %1155 = vmatpush1.bf16.xpose.msra.mxu0 %v1668_v49  ;;  %v1753_v48 = vld [vmem:[%s2372_s1 + $0x290] ss:$36 sps:$4 sm:$0xff]   ;;  %v1756_v49 = vld [vmem:[%s2372_s1 + $0x2a0] ss:$36 sps:$4 sm:$0xff]  }
  0x5c   :  { %1050 = vmatprep.subr.bf16.mxu1 %v1669_v50  ;;  %1156 = vmatprep.subr.bf16.mxu0 %v1671_v51  ;;  %v1761_v50 = vld [vmem:[%s2372_s1 + $0x2dc] ss:$36 sps:$4 sm:$0xff]   ;;  %v1764_v51 = vld [vmem:[%s2372_s1 + $0x2ec] ss:$36 sps:$4 sm:$0xff]  }
  0x63   :  { %1051 = vmatpush1.bf16.xpose.msra.mxu1 %v1673_v52  ;;  %1157 = vmatpush1.bf16.xpose.msra.mxu0 %v1674_v53  ;;  %v1759_v52 = vld [vmem:[%s2372_s1 + $0x2d8] ss:$36 sps:$4 sm:$0xff]   ;;  %v1762_v53 = vld [vmem:[%s2372_s1 + $0x2e8] ss:$36 sps:$4 sm:$0xff]  }
  0x64   :  { %1052 = vmatprep.subr.bf16.mxu1 %v1675_v54  ;;  %1158 = vmatprep.subr.bf16.mxu0 %v1677_v55  ;;  %v1767_v54 = vld [vmem:[%s2372_s1 + $0x324] ss:$36 sps:$4 sm:$0xff]   ;;  %v1770_v55 = vld [vmem:[%s2372_s1 + $0x334] ss:$36 sps:$4 sm:$0xff]  }
  0x6b   :  { %1053 = vmatpush1.bf16.xpose.msra.mxu1 %v1679_v56  ;;  %1159 = vmatpush1.bf16.xpose.msra.mxu0 %v1680_v57  ;;  %v1765_v56 = vld [vmem:[%s2372_s1 + $0x320] ss:$36 sps:$4 sm:$0xff]   ;;  %v1768_v57 = vld [vmem:[%s2372_s1 + $0x330] ss:$36 sps:$4 sm:$0xff]  }
  0x6c   :  { %1054 = vmatprep.subr.bf16.mxu1 %v1681_v58  ;;  %1160 = vmatprep.subr.bf16.mxu0 %v1683_v59  ;;  %v1773_v58 = vld [vmem:[%s2372_s1 + $0x36c] ss:$36 sps:$4 sm:$0xff]   ;;  %v1776_v59 = vld [vmem:[%s2372_s1 + $0x37c] ss:$36 sps:$4 sm:$0xff]  }
  0x73   :  { %1055 = vmatpush1.bf16.xpose.msra.mxu1 %v1685_v60  ;;  %1161 = vmatpush1.bf16.xpose.msra.mxu0 %v1686_v61  ;;  %v1771_v60 = vld [vmem:[%s2372_s1 + $0x368] ss:$36 sps:$4 sm:$0xff]   ;;  %v1774_v61 = vld [vmem:[%s2372_s1 + $0x378] ss:$36 sps:$4 sm:$0xff]  }
  0x74   :  { %1056 = vmatprep.subr.bf16.mxu1 %v1687_v62  ;;  %1162 = vmatprep.subr.bf16.mxu0 %v1689_v63  ;;  %v1779_v62 = vld [vmem:[%s2372_s1 + $0x3b4] ss:$36 sps:$4 sm:$0xff]   ;;  %v1782_v63 = vld [vmem:[%s2372_s1 + $0x3c4] ss:$36 sps:$4 sm:$0xff]  }
  0x7b   :  { %1057 = vmatpush1.bf16.xpose.msra.mxu1 %v1691_v0  ;;  %1163 = vmatpush1.bf16.xpose.msra.mxu0 %v1692_v1  ;;  %v1777_v0 = vld [vmem:[%s2372_s1 + $0x3b0] ss:$36 sps:$4 sm:$0xff]   ;;  %v1780_v1 = vld [vmem:[%s2372_s1 + $0x3c0] ss:$36 sps:$4 sm:$0xff]  }
  0x7c   :  { %1079 = vmatprep.subr.bf16.mxu1 %v1698_v2  ;;  %1185 = vmatprep.subr.bf16.mxu0 %v1704_v3  ;;  %v1785_v2 = vld [vmem:[%s2372_s1 + $0x3fc] ss:$36 sps:$4 sm:$0xff]   ;;  %v1788_v3 = vld [vmem:[%s2372_s1 + $0x40c] ss:$36 sps:$4 sm:$0xff]  }
  0x82   :  { %1059 = vmatmul.mubr.bf16.vlgmr.msra.gmra.mrb[0].mxu1 %v1693_v4  ;;  %1165 = vmatmul.mubr.bf16.vlgmr.msra.gmra.mrb[0].mxu0 %v1699_v5  ;;  %v1783_v4 = vld [vmem:[%s2372_s1 + $0x3f8] ss:$36 sps:$4 sm:$0xff]   ;;  %v1786_v5 = vld [vmem:[%s2372_s1 + $0x408] ss:$36 sps:$4 sm:$0xff]  }
  0x83   :  { %1080 = vmatpush1.bf16.xpose.msra.mxu1 %v1696_v6  ;;  %1186 = vmatpush1.bf16.xpose.msra.mxu0 %v1702_v7  ;;  %v1796_v6 = vld [vmem:[%s2372_s1 + $0x444] ss:$36 sps:$4 sm:$0xff]   ;;  %v1800_v7 = vld [vmem:[%s2372_s1 + $0x454] ss:$36 sps:$4 sm:$0xff]  }
  0x84   :  { %1081 = vmatprep.subr.bf16.mxu1 %v1707_v8  ;;  %1187 = vmatprep.subr.bf16.mxu0 %v1710_v9  ;;  %v1794_v8 = vld [vmem:[%s2372_s1 + $0x440] ss:$36 sps:$4 sm:$0xff]   ;;  %v1798_v9 = vld [vmem:[%s2372_s1 + $0x450] ss:$36 sps:$4 sm:$0xff]  }
  0x85   :  { %1068 = vmatprep.mubr.bf16.mxu1 %v1789_v10  ;;  %1174 = vmatprep.mubr.bf16.mxu0 %v1791_v11  ;;  %v1807_v10 = vld [vmem:[%s2372_s1 + $0x260] ss:$36 sps:$4 sm:$0xff]   ;;  %v1801_v11 = vld [vmem:[%s2373_s0 + $0x8] ss:$36 sps:$4 sm:$0xff]  }
  0x8a   :  { %1069 = vmatmul.mubr.bf16.gmra.mrb[4].mxu1 %v1793_v12  ;;  %1175 = vmatmul.mubr.bf16.gmra.mrb[4].mxu0 %v1797_v13  ;;  %v1804_v12 = vld [vmem:[%s2373_s0 + $0x18] ss:$36 sps:$4 sm:$0xff]   ;;  %v1808_v13 = vld [vmem:[%s2372_s1 + $0x20] ss:$36 sps:$4 sm:$0xff]  }
  0x8b   :  { %1082 = vmatpush1.bf16.xpose.msra.mxu1 %v1705_v14  ;;  %1188 = vmatpush1.bf16.xpose.msra.mxu0 %v1708_v15  ;;  %v1809_v14 = vld [vmem:[%s2373_s0 + $0x54] ss:$36 sps:$4 sm:$0xff]   ;;  %v1811_v15 = vld [vmem:[%s2373_s0 + $0x64] ss:$36 sps:$4 sm:$0xff]  }
  0x8c   :  { %1083 = vmatprep.subr.bf16.mxu1 %v1713_v16  ;;  %1189 = vmatprep.subr.bf16.mxu0 %v1716_v17  ;;  %v1815_v16 = vld [vmem:[%s2372_s1 + $0x2a8] ss:$36 sps:$4 sm:$0xff]   ;;  %v1813_v17 = vld [vmem:[%s2373_s0 + $0x50] ss:$36 sps:$4 sm:$0xff]  }
  0x8d   :  { %1111 = vmatprep.mubr.bf16.mxu1 %v1803_v18  ;;  %1217 = vmatprep.mubr.bf16.mxu0 %v1806_v19  ;;  %v1814_v18 = vld [vmem:[%s2373_s0 + $0x60] ss:$36 sps:$4 sm:$0xff]   ;;  %v1816_v19 = vld [vmem:[%s2372_s1 + $0x68] ss:$36 sps:$4 sm:$0xff]  }
  0x93   :  { %1084 = vmatpush1.bf16.xpose.msra.mxu1 %v1711_v20  ;;  %1190 = vmatpush1.bf16.xpose.msra.mxu0 %v1714_v21  ;;  %v1817_v20 = vld [vmem:[%s2372_s1 + $0x2f0] ss:$36 sps:$4 sm:$0xff]   ;;  %v1829_v21 = vld [vmem:[%s2373_s0 + $0x20] ss:$36 sps:$4 sm:$0xff]  }
  0x94   :  { %1085 = vmatprep.subr.bf16.mxu1 %v1719_v22  ;;  %1191 = vmatprep.subr.bf16.mxu0 %v1722_v23  ;;  %v1830_v22 = vld [vmem:[%s2373_s0 + $0x68] ss:$36 sps:$4 sm:$0xff]   ;;  %v1818_v23 = vld [vmem:[%s2372_s1 + $0xb0] ss:$36 sps:$4 sm:$0xff]  }
  0x9b   :  { %1086 = vmatpush1.bf16.xpose.msra.mxu1 %v1717_v24  ;;  %1192 = vmatpush1.bf16.xpose.msra.mxu0 %v1720_v25  ;;  %v1819_v24 = vld [vmem:[%s2372_s1 + $0x338] ss:$36 sps:$4 sm:$0xff]  }
  0x9c   :  { %1087 = vmatprep.subr.bf16.mxu1 %v1725_v26  ;;  %1193 = vmatprep.subr.bf16.mxu0 %v1728_v27  ;;  %v1820_v25 = vld [vmem:[%s2372_s1 + $0xf8] ss:$36 sps:$4 sm:$0xff]   ;;  %v1821_v26 = vld [vmem:[%s2372_s1 + $0x380] ss:$36 sps:$4 sm:$0xff]  }
  0x9d   :  { %v1822_v27 = vld [vmem:[%s2372_s1 + $0x140] ss:$36 sps:$4 sm:$0xff]  }
  0xa3   :  { %1088 = vmatpush1.bf16.xpose.msra.mxu1 %v1723_v28  ;;  %1194 = vmatpush1.bf16.xpose.msra.mxu0 %v1726_v29  ;;  %v1823_v28 = vld [vmem:[%s2372_s1 + $0x3c8] ss:$36 sps:$4 sm:$0xff]  }
  0xa4   :  { %1089 = vmatprep.subr.bf16.mxu1 %v1731_v30  ;;  %1195 = vmatprep.subr.bf16.mxu0 %v1734_v31  ;;  %v1824_v29 = vld [vmem:[%s2372_s1 + $0x188] ss:$36 sps:$4 sm:$0xff]   ;;  %v1825_v30 = vld [vmem:[%s2372_s1 + $0x410] ss:$36 sps:$4 sm:$0xff]  }
  0xa5   :  { %v1826_v31 = vld [vmem:[%s2372_s1 + $0x1d0] ss:$36 sps:$4 sm:$0xff]  }
  0xab   :  { %1090 = vmatpush1.bf16.xpose.msra.mxu1 %v1729_v32  ;;  %1196 = vmatpush1.bf16.xpose.msra.mxu0 %v1732_v33  ;;  %v1827_v32 = vld [vmem:[%s2372_s1 + $0x458] ss:$36 sps:$4 sm:$0xff]  }
  0xac   :  { %1091 = vmatprep.subr.bf16.mxu1 %v1737_v34  ;;  %1197 = vmatprep.subr.bf16.mxu0 %v1740_v35  ;;  %v1828_v33 = vld [vmem:[%s2372_s1 + $0x218] ss:$36 sps:$4 sm:$0xff]  }
  0xb3   :  { %1092 = vmatpush1.bf16.xpose.msra.mxu1 %v1735_v36  ;;  %1198 = vmatpush1.bf16.xpose.msra.mxu0 %v1738_v37 }
  0xb4   :  { %1093 = vmatprep.subr.bf16.mxu1 %v1743_v38  ;;  %1199 = vmatprep.subr.bf16.mxu0 %v1746_v39 }
  0xbb   :  { %1094 = vmatpush1.bf16.xpose.msra.mxu1 %v1741_v40  ;;  %1200 = vmatpush1.bf16.xpose.msra.mxu0 %v1744_v41 }
  0xbc   :  { %1095 = vmatprep.subr.bf16.mxu1 %v1749_v42  ;;  %1201 = vmatprep.subr.bf16.mxu0 %v1752_v43 }
  0xc3   :  { %1096 = vmatpush1.bf16.xpose.msra.mxu1 %v1747_v44  ;;  %1202 = vmatpush1.bf16.xpose.msra.mxu0 %v1750_v45 }
  0xc4   :  { %1097 = vmatprep.subr.bf16.mxu1 %v1755_v46  ;;  %1203 = vmatprep.subr.bf16.mxu0 %v1758_v47 }
  0xcb   :  { %1098 = vmatpush1.bf16.xpose.msra.mxu1 %v1753_v48  ;;  %1204 = vmatpush1.bf16.xpose.msra.mxu0 %v1756_v49 }
  0xcc   :  { %1099 = vmatprep.subr.bf16.mxu1 %v1761_v50  ;;  %1205 = vmatprep.subr.bf16.mxu0 %v1764_v51  ;;  %v1293_v50 = vlaneseq }
  0xce   :  { %v1294_v51 = vshrl.u32 %v1293_v50, 7 }
  0xd3   :  { %1100 = vmatpush1.bf16.xpose.msra.mxu1 %v1759_v52  ;;  %1206 = vmatpush1.bf16.xpose.msra.mxu0 %v1762_v53  ;;  %v1295_v52 = vsub.s32 0, %v1294_v51  ;;  %v1291_v53 = vld [vmem:[%s2374_s2] sm:$0x3] }
  0xd4   :  { %1101 = vmatprep.subr.bf16.mxu1 %v1767_v54  ;;  %1207 = vmatprep.subr.bf16.mxu0 %v1770_v55  ;;  %v1299_v54 = vsub.s32 1, %v1294_v51  ;;  %v1311_v55 = vld [vmem:[%s2375_s3] sm:$0x3] }
  0xdb   :  { %1102 = vmatpush1.bf16.xpose.msra.mxu1 %v1765_v56  ;;  %1208 = vmatpush1.bf16.xpose.msra.mxu0 %v1768_v57  ;;  %v1296_v56 = vrot.slane %v1291_v53, %v1295_v52 }
  0xdc   :  { %1103 = vmatprep.subr.bf16.mxu1 %v1773_v58  ;;  %1209 = vmatprep.subr.bf16.mxu0 %v1776_v59  ;;  %v1300_v59 = vrot.slane %v1291_v53, %v1299_v54 }
  0xe3   :  { %1104 = vmatpush1.bf16.xpose.msra.mxu1 %v1771_v60  ;;  %1210 = vmatpush1.bf16.xpose.msra.mxu0 %v1774_v61  ;;  %v1316_v61 = vrot.slane %v1311_v55, %v1295_v52 }
  0xe4   :  { %1105 = vmatprep.subr.bf16.mxu1 %v1779_v62  ;;  %1211 = vmatprep.subr.bf16.mxu0 %v1782_v63 }
  0xeb   :  { %1106 = vmatpush1.bf16.xpose.msra.mxu1 %v1777_v0  ;;  %1212 = vmatpush1.bf16.xpose.msra.mxu0 %v1780_v1 }
  0xec   :  { %1107 = vmatprep.subr.bf16.mxu1 %v1785_v2  ;;  %1213 = vmatprep.subr.bf16.mxu0 %v1788_v3  ;;  %v1320_v2 = vrot.slane %v1311_v55, %v1299_v54 }
  0xf3   :  { %1108 = vmatpush1.bf16.xpose.msra.mxu1 %v1783_v4  ;;  %1214 = vmatpush1.bf16.xpose.msra.mxu0 %v1786_v5 }
  0xf4   :  { %1109 = vmatprep.subr.bf16.mxu1 %v1796_v6  ;;  %1215 = vmatprep.subr.bf16.mxu0 %v1800_v7 }
  0xfb   :  { %1110 = vmatpush1.bf16.xpose.msra.mxu1 %v1794_v8  ;;  %1216 = vmatpush1.bf16.xpose.msra.mxu0 %v1798_v9 }
  0xfc   :  { %1529 = vmatprep.subr.bf16.mxu0 %v1807_v10  ;;  %1549 = vmatprep.subr.bf16.mxu1 %v1807_v10 }
 0x102   :  { %1112 = vmatmul.mubr.bf16.vlgmr.msra.gmra.mrb[0].mxu1 %v1801_v11  ;;  %1218 = vmatmul.mubr.bf16.vlgmr.msra.gmra.mrb[0].mxu0 %v1804_v12 }
 0x103   :  { %1530 = vmatpush3.bf16.xpose.msra.mxu0 %v1808_v13  ;;  %1557 = vmatpush3.bf16.xpose.msra.mxu1 %v1808_v13 }
 0x104   :  { %1121 = vmatprep.mubr.bf16.mxu1 %v1809_v14  ;;  %1227 = vmatprep.mubr.bf16.mxu0 %v1811_v15 }
 0x105   :  { %1531 = vmatprep.subr.bf16.mxu0 %v1815_v16  ;;  %1550 = vmatprep.subr.bf16.mxu1 %v1815_v16 }
 0x10a   :  { %1122 = vmatmul.mubr.bf16.gmra.mrb[4].mxu1 %v1813_v17  ;;  %1228 = vmatmul.mubr.bf16.gmra.mrb[4].mxu0 %v1814_v18 }
 0x10b   :  { %1532 = vmatpush3.bf16.xpose.msra.mxu0 %v1816_v19  ;;  %1558 = vmatpush3.bf16.xpose.msra.mxu1 %v1816_v19 }
 0x10c   :  { %1533 = vmatprep.subr.bf16.mxu0 %v1817_v20  ;;  %1551 = vmatprep.subr.bf16.mxu1 %v1817_v20 }
 0x10d   :  { %1545 = vmatprep.mubr.bf16.mxu0 %v1829_v21  ;;  %1547 = vmatprep.mubr.bf16.mxu1 %v1830_v22 }
 0x113   :  { %1534 = vmatpush3.bf16.xpose.msra.mxu0 %v1818_v23  ;;  %1559 = vmatpush3.bf16.xpose.msra.mxu1 %v1818_v23 }
 0x114   :  { %1535 = vmatprep.subr.bf16.mxu0 %v1819_v24  ;;  %1552 = vmatprep.subr.bf16.mxu1 %v1819_v24 }
 0x11b   :  { %1536 = vmatpush3.bf16.xpose.msra.mxu0 %v1820_v25  ;;  %1560 = vmatpush3.bf16.xpose.msra.mxu1 %v1820_v25 }
 0x11c   :  { %1537 = vmatprep.subr.bf16.mxu0 %v1821_v26  ;;  %1553 = vmatprep.subr.bf16.mxu1 %v1821_v26 }
 0x123   :  { %1538 = vmatpush3.bf16.xpose.msra.mxu0 %v1822_v27  ;;  %1561 = vmatpush3.bf16.xpose.msra.mxu1 %v1822_v27 }
 0x124   :  { %1539 = vmatprep.subr.bf16.mxu0 %v1823_v28  ;;  %1554 = vmatprep.subr.bf16.mxu1 %v1823_v28 }
 0x12b   :  { %1540 = vmatpush3.bf16.xpose.msra.mxu0 %v1824_v29  ;;  %1562 = vmatpush3.bf16.xpose.msra.mxu1 %v1824_v29 }
 0x12c   :  { %1541 = vmatprep.subr.bf16.mxu0 %v1825_v30  ;;  %1555 = vmatprep.subr.bf16.mxu1 %v1825_v30 }
 0x133   :  { %1542 = vmatpush3.bf16.xpose.msra.mxu0 %v1826_v31  ;;  %1563 = vmatpush3.bf16.xpose.msra.mxu1 %v1826_v31 }
 0x134   :  { %1543 = vmatprep.subr.bf16.mxu0 %v1827_v32  ;;  %1556 = vmatprep.subr.bf16.mxu1 %v1827_v32 }
 0x13b   :  { %1544 = vmatpush3.bf16.xpose.msra.mxu0 %v1828_v33  ;;  %1564 = vmatpush3.bf16.xpose.msra.mxu1 %v1828_v33 }
 0x142   :  { %1546 = vmatmul.mubr.bf16.vlgmr.msra.gmra.mrb[0].mxu0 %v1829_v21  ;;  %1548 = vmatmul.mubr.bf16.vlgmr.msra.gmra.mrb[8].mxu1 %v1830_v22 }
 0x1d5   :  { %v1113_v34 = vpop.f32.mrb[0].mxu1 }
 0x1d6   :  { %v1115_v35 = vpop.f32.mrb[1].mxu1 }
 0x1d7   :  { %v1117_v36 = vpop.f32.mrb[2].mxu1 }
 0x1d8   :  { %v1119_v37 = vpop.f32.mrb[3].mxu1 }
 0x1dd   :  { %v1123_v38 = vpop.f32.mrb[4].mxu1  ;;  %v1229_v39 = vpop.f32.mrb[4].mxu0 }
 0x1de   :  { %v1569_v40 = vadd.f32 %v1229_v39, %v1123_v38  ;;  %v1125_v41 = vpop.f32.mrb[5].mxu1  ;;  %v1231_v42 = vpop.f32.mrb[5].mxu0 }
 0x1df   :  { %v1571_v43 = vadd.f32 %v1231_v42, %v1125_v41  ;;  %v1127_v44 = vpop.f32.mrb[6].mxu1  ;;  %v1233_v45 = vpop.f32.mrb[6].mxu0 }
 0x1e0   :  { %v1573_v46 = vadd.f32 %v1233_v45, %v1127_v44  ;;  %v1129_v47 = vpop.f32.mrb[7].mxu1  ;;  %v1235_v48 = vpop.f32.mrb[7].mxu0 }
 0x1e1   :  { %v1575_v49 = vadd.f32 %v1235_v48, %v1129_v47 }
 0x215   :  { %v1272_v57 = vpop.f32.mrb[0].mxu0  ;;  %v1282_v58 = vpop.f32.mrb[8].mxu1 }
 0x216   :  { %v1565_v60 = vadd.f32 %v1272_v57, %v1113_v34  ;;  %v1570_v62 = vadd.f32 %v1569_v40, %v1282_v58  ;;  %v1274_v63 = vpop.f32.mrb[1].mxu0  ;;  %v1284_v0 = vpop.f32.mrb[9].mxu1 }
 0x217   :  { %v1566_v1 = vadd.f32 %v1274_v63, %v1115_v35  ;;  %v1572_v3 = vadd.f32 %v1571_v43, %v1284_v0  ;;  %v1276_v4 = vpop.f32.mrb[2].mxu0  ;;  %v1286_v5 = vpop.f32.mrb[10].mxu1 }
 0x218   :  { %v1303_v6 = vmul.f32 %v1565_v60, %v1296_v56  ;;  %v1307_v7 = vmul.f32 %v1570_v62, %v1296_v56  ;;  %v1567_v8 = vadd.f32 %v1276_v4, %v1117_v36  ;;  %v1574_v9 = vadd.f32 %v1573_v46, %v1286_v5  ;;  %v1278_v10 = vpop.f32.mrb[3].mxu0  ;;  %v1288_v11 = vpop.f32.mrb[11].mxu1 }
 0x219   :  { %v1304_v12 = vmul.f32 %v1566_v1, %v1300_v59  ;;  %v1308_v13 = vmul.f32 %v1572_v3, %v1300_v59  ;;  %v1568_v14 = vadd.f32 %v1278_v10, %v1119_v37  ;;  %v1576_v15 = vadd.f32 %v1575_v49, %v1288_v11 }
 0x21a   :  { %v1323_v16 = vadd.f32 %v1316_v61, %v1303_v6  ;;  %v1327_v17 = vadd.f32 %v1316_v61, %v1307_v7  ;;  %v1305_v18 = vmul.f32 %v1567_v8, %v1296_v56  ;;  %v1309_v19 = vmul.f32 %v1574_v9, %v1296_v56 }
 0x21b   :  { %v1324_v20 = vadd.f32 %v1320_v2, %v1304_v12  ;;  %v1328_v21 = vadd.f32 %v1320_v2, %v1308_v13  ;;  %v1306_v22 = vmul.f32 %v1568_v14, %v1300_v59  ;;  %v1310_v23 = vmul.f32 %v1576_v15, %v1300_v59 }
 0x21c   :  { %vm1331_vm0 = vcmp.gt.f32.partialorder %v1323_v16, 0.0  ;;  %v1339_v24 = vmul.f32 0.2, %v1323_v16  ;;  %vm1335_vm1 = vcmp.gt.f32.partialorder %v1327_v17, 0.0  ;;  %v1343_v25 = vmul.f32 0.2, %v1327_v17 }
 0x21d   :  { %vm1332_vm2 = vcmp.gt.f32.partialorder %v1324_v20, 0.0  ;;  %v1340_v26 = vmul.f32 0.2, %v1324_v20  ;;  %vm1336_vm3 = vcmp.gt.f32.partialorder %v1328_v21, 0.0  ;;  %v1344_v27 = vmul.f32 0.2, %v1328_v21 }
 0x21e   :  { %v1347_v28 = vsel %vm1331_vm0, %v1323_v16, %v1339_v24  ;;  %v1351_v29 = vsel %vm1335_vm1, %v1327_v17, %v1343_v25  ;;  %v1325_v30 = vadd.f32 %v1316_v61, %v1305_v18  ;;  %v1329_v31 = vadd.f32 %v1316_v61, %v1309_v19 }
 0x21f   :  { %1355 = vst [vmem:[%s2376_s4] sm:$0xff] %v1347_v28  ;;  %1359 = vst [vmem:[%s2376_s4 + $0x20] sm:$0xff] %v1351_v29  ;;  %v1348_v32 = vsel %vm1332_vm2, %v1324_v20, %v1340_v26  ;;  %v1352_v33 = vsel %vm1336_vm3, %v1328_v21, %v1344_v27  ;;  %v1326_v34 = vadd.f32 %v1320_v2, %v1306_v22 }
 0x220   :  { %v1330_v35 = vadd.f32 %v1320_v2, %v1310_v23  ;;  %1356 = vst [vmem:[%s2376_s4 + $0x8] sm:$0xff] %v1348_v32  ;;  %1360 = vst [vmem:[%s2376_s4 + $0x28] sm:$0xff] %v1352_v33  ;;  %vm1333_vm4 = vcmp.gt.f32.partialorder %v1325_v30, 0.0  ;;  %v1341_v36 = vmul.f32 0.2, %v1325_v30  ;;  %vm1337_vm5 = vcmp.gt.f32.partialorder %v1329_v31, 0.0 }
 0x221   :  { %v1345_v37 = vmul.f32 0.2, %v1329_v31  ;;  %vm1334_vm6 = vcmp.gt.f32.partialorder %v1326_v34, 0.0  ;;  %v1342_v38 = vmul.f32 0.2, %v1326_v34 }
 0x222   :  { %vm1338_vm7 = vcmp.gt.f32.partialorder %v1330_v35, 0.0  ;;  %v1346_v39 = vmul.f32 0.2, %v1330_v35  ;;  %v1349_v40 = vsel %vm1333_vm4, %v1325_v30, %v1341_v36 }
 0x223   :  { %v1353_v41 = vsel %vm1337_vm5, %v1329_v31, %v1345_v37  ;;  %1357 = vst [vmem:[%s2376_s4 + $0x10] sm:$0xff] %v1349_v40  ;;  %v1350_v42 = vsel %vm1334_vm6, %v1326_v34, %v1342_v38 }
 0x224   :  { %1361 = vst [vmem:[%s2376_s4 + $0x30] sm:$0xff] %v1353_v41  ;;  %v1354_v43 = vsel %vm1338_vm7, %v1330_v35, %v1346_v39  ;;  %1358 = vst [vmem:[%s2376_s4 + $0x18] sm:$0xff] %v1350_v42 }
 0x225   :  { %1362 = vst [vmem:[%s2376_s4 + $0x38] sm:$0xff] %v1354_v43 }

// kernel: discriminator_forward.15
= control target key start
LH: loop header
LB: loop body
LE: loop exit
PB: predicated region body
PF: predicated region fallthrough
CT: control target
= control target key end

     0   :  { %s4050_s1 = inlined_call_operand.vmem [shape: bf16[256,2304], index: 1, kind: input, shape index: {}]   ;;  %s4051_s0 = inlined_call_operand.vmem [shape: bf16[16,2304], index: 0, kind: input, shape index: {}]   ;;  %s4052_s2 = inlined_call_operand.vmem [shape: f32[1,256], index: 2, kind: input, shape index: {}]   ;;  %s4053_s3 = inlined_call_operand.vmem [shape: f32[1,256], index: 3, kind: input, shape index: {}]   ;;  %s4054_s4 = inlined_call_operand.vmem [shape: f32[16,256], index: 4, kind: output, shape index: {}]  }
   0x1   :  { %v2630_v0 = vld [vmem:[%s4050_s1 + $0x4] ss:$72 sps:$4 sm:$0xff]   ;;  %v2634_v2 = vld [vmem:[%s4050_s1] ss:$72 sps:$4 sm:$0xff]   ;;  %v2636_v4 = vld [vmem:[%s4050_s1 + $0x94] ss:$72 sps:$4 sm:$0xff]  }
   0x2   :  { %v2632_v1 = vld [vmem:[%s4050_s1 + $0x24] ss:$72 sps:$4 sm:$0xff]   ;;  %1853 = vmatprep.subr.bf16.mxu1 %v2630_v0  ;;  %v2635_v3 = vld [vmem:[%s4050_s1 + $0x20] ss:$72 sps:$4 sm:$0xff]   ;;  %v2638_v5 = vld [vmem:[%s4050_s1 + $0xb4] ss:$72 sps:$4 sm:$0xff]  }
   0x3   :  { %2025 = vmatprep.subr.bf16.mxu0 %v2632_v1  ;;  %1854 = vmatpush1.bf16.xpose.msra.mxu1 %v2634_v2  ;;  %v2640_v6 = vld [vmem:[%s4050_s1 + $0x90] ss:$72 sps:$4 sm:$0xff]   ;;  %v2642_v8 = vld [vmem:[%s4050_s1 + $0x124] ss:$72 sps:$4 sm:$0xff]   ;;  %v2646_v10 = vld [vmem:[%s4050_s1 + $0x120] ss:$72 sps:$4 sm:$0xff]  }
   0x4   :  { %2026 = vmatpush1.bf16.xpose.msra.mxu0 %v2635_v3  ;;  %1855 = vmatprep.subr.bf16.mxu1 %v2636_v4  ;;  %v2641_v7 = vld [vmem:[%s4050_s1 + $0xb0] ss:$72 sps:$4 sm:$0xff]   ;;  %v2644_v9 = vld [vmem:[%s4050_s1 + $0x144] ss:$72 sps:$4 sm:$0xff]   ;;  %v2647_v11 = vld [vmem:[%s4050_s1 + $0x140] ss:$72 sps:$4 sm:$0xff]  }
   0x5   :  { %2027 = vmatprep.subr.bf16.mxu0 %v2638_v5  ;;  %v2648_v12 = vld [vmem:[%s4050_s1 + $0x1b4] ss:$72 sps:$4 sm:$0xff]   ;;  %v2652_v14 = vld [vmem:[%s4050_s1 + $0x1b0] ss:$72 sps:$4 sm:$0xff]   ;;  %v2654_v16 = vld [vmem:[%s4050_s1 + $0x244] ss:$72 sps:$4 sm:$0xff]  }
   0x6   :  { %v2650_v13 = vld [vmem:[%s4050_s1 + $0x1d4] ss:$72 sps:$4 sm:$0xff]   ;;  %v2653_v15 = vld [vmem:[%s4050_s1 + $0x1d0] ss:$72 sps:$4 sm:$0xff]   ;;  %v2656_v17 = vld [vmem:[%s4050_s1 + $0x264] ss:$72 sps:$4 sm:$0xff]  }
   0x7   :  { %v2658_v18 = vld [vmem:[%s4050_s1 + $0x240] ss:$72 sps:$4 sm:$0xff]   ;;  %v2660_v20 = vld [vmem:[%s4050_s1 + $0x2d4] ss:$72 sps:$4 sm:$0xff]   ;;  %v2664_v22 = vld [vmem:[%s4050_s1 + $0x2d0] ss:$72 sps:$4 sm:$0xff]  }
   0x8   :  { %v2659_v19 = vld [vmem:[%s4050_s1 + $0x260] ss:$72 sps:$4 sm:$0xff]   ;;  %v2662_v21 = vld [vmem:[%s4050_s1 + $0x2f4] ss:$72 sps:$4 sm:$0xff]   ;;  %v2665_v23 = vld [vmem:[%s4050_s1 + $0x2f0] ss:$72 sps:$4 sm:$0xff]  }
   0x9   :  { %v2666_v24 = vld [vmem:[%s4050_s1 + $0x364] ss:$72 sps:$4 sm:$0xff]   ;;  %v2670_v28 = vld [vmem:[%s4050_s1 + $0x360] ss:$72 sps:$4 sm:$0xff]   ;;  %v2672_v30 = vld [vmem:[%s4050_s1 + $0x3f4] ss:$72 sps:$4 sm:$0xff]  }
   0xa   :  { %v2668_v25 = vld [vmem:[%s4050_s1 + $0x384] ss:$72 sps:$4 sm:$0xff]   ;;  %v2671_v29 = vld [vmem:[%s4050_s1 + $0x380] ss:$72 sps:$4 sm:$0xff]   ;;  %v2674_v31 = vld [vmem:[%s4050_s1 + $0x414] ss:$72 sps:$4 sm:$0xff]  }
   0xb   :  { %1856 = vmatpush1.bf16.xpose.msra.mxu1 %v2640_v6  ;;  %v2728_v26 = vld [vmem:[%s4051_s0 + $0x4] ss:$72 sps:$4 sm:$0xff]   ;;  %v2676_v32 = vld [vmem:[%s4050_s1 + $0x3f0] ss:$72 sps:$4 sm:$0xff]   ;;  %v2682_v36 = vld [vmem:[%s4050_s1 + $0x480] ss:$72 sps:$4 sm:$0xff]  }
   0xc   :  { %2028 = vmatpush1.bf16.xpose.msra.mxu0 %v2641_v7  ;;  %1857 = vmatprep.subr.bf16.mxu1 %v2642_v8  ;;  %v2734_v27 = vld [vmem:[%s4051_s0 + $0x24] ss:$72 sps:$4 sm:$0xff]   ;;  %v2677_v33 = vld [vmem:[%s4050_s1 + $0x410] ss:$72 sps:$4 sm:$0xff]   ;;  %v2683_v37 = vld [vmem:[%s4050_s1 + $0x4a0] ss:$72 sps:$4 sm:$0xff]  }
   0xd   :  { %2029 = vmatprep.subr.bf16.mxu0 %v2644_v9  ;;  %1885 = vmatprep.mubr.bf16.mxu1 %v2728_v26  ;;  %v2678_v34 = vld [vmem:[%s4050_s1 + $0x484] ss:$72 sps:$4 sm:$0xff]   ;;  %v2684_v38 = vld [vmem:[%s4050_s1 + $0x514] ss:$72 sps:$4 sm:$0xff]   ;;  %v2688_v40 = vld [vmem:[%s4050_s1 + $0x510] ss:$72 sps:$4 sm:$0xff]  }
   0xe   :  { %2057 = vmatprep.mubr.bf16.mxu0 %v2734_v27  ;;  %v2680_v35 = vld [vmem:[%s4050_s1 + $0x4a4] ss:$72 sps:$4 sm:$0xff]   ;;  %v2686_v39 = vld [vmem:[%s4050_s1 + $0x534] ss:$72 sps:$4 sm:$0xff]   ;;  %v2689_v41 = vld [vmem:[%s4050_s1 + $0x530] ss:$72 sps:$4 sm:$0xff]  }
   0xf   :  { %v2690_v42 = vld [vmem:[%s4050_s1 + $0x5a4] ss:$72 sps:$4 sm:$0xff]   ;;  %v2694_v44 = vld [vmem:[%s4050_s1 + $0x5a0] ss:$72 sps:$4 sm:$0xff]   ;;  %v2696_v46 = vld [vmem:[%s4050_s1 + $0x634] ss:$72 sps:$4 sm:$0xff]  }
  0x10   :  { %v2692_v43 = vld [vmem:[%s4050_s1 + $0x5c4] ss:$72 sps:$4 sm:$0xff]   ;;  %v2695_v45 = vld [vmem:[%s4050_s1 + $0x5c0] ss:$72 sps:$4 sm:$0xff]   ;;  %v2698_v47 = vld [vmem:[%s4050_s1 + $0x654] ss:$72 sps:$4 sm:$0xff]  }
  0x11   :  { %v2700_v48 = vld [vmem:[%s4050_s1 + $0x630] ss:$72 sps:$4 sm:$0xff]   ;;  %v2702_v50 = vld [vmem:[%s4050_s1 + $0x6c4] ss:$72 sps:$4 sm:$0xff]   ;;  %v2706_v52 = vld [vmem:[%s4050_s1 + $0x6c0] ss:$72 sps:$4 sm:$0xff]  }
  0x12   :  { %v2701_v49 = vld [vmem:[%s4050_s1 + $0x650] ss:$72 sps:$4 sm:$0xff]   ;;  %v2704_v51 = vld [vmem:[%s4050_s1 + $0x6e4] ss:$72 sps:$4 sm:$0xff]   ;;  %v2707_v53 = vld [vmem:[%s4050_s1 + $0x6e0] ss:$72 sps:$4 sm:$0xff]  }
  0x13   :  { %1858 = vmatpush1.bf16.xpose.msra.mxu1 %v2646_v10  ;;  %v2708_v54 = vld [vmem:[%s4050_s1 + $0x754] ss:$72 sps:$4 sm:$0xff]   ;;  %v2712_v56 = vld [vmem:[%s4050_s1 + $0x750] ss:$72 sps:$4 sm:$0xff]   ;;  %v2714_v58 = vld [vmem:[%s4050_s1 + $0x7e4] ss:$72 sps:$4 sm:$0xff]  }
  0x14   :  { %2030 = vmatpush1.bf16.xpose.msra.mxu0 %v2647_v11  ;;  %1859 = vmatprep.subr.bf16.mxu1 %v2648_v12  ;;  %v2710_v55 = vld [vmem:[%s4050_s1 + $0x774] ss:$72 sps:$4 sm:$0xff]   ;;  %v2713_v57 = vld [vmem:[%s4050_s1 + $0x770] ss:$72 sps:$4 sm:$0xff]   ;;  %v2716_v59 = vld [vmem:[%s4050_s1 + $0x804] ss:$72 sps:$4 sm:$0xff]  }
  0x15   :  { %2031 = vmatprep.subr.bf16.mxu0 %v2650_v13  ;;  %v2718_v60 = vld [vmem:[%s4050_s1 + $0x7e0] ss:$72 sps:$4 sm:$0xff]   ;;  %v2720_v62 = vld [vmem:[%s4050_s1 + $0x874] ss:$72 sps:$4 sm:$0xff]   ;;  %v2724_v0 = vld [vmem:[%s4050_s1 + $0x870] ss:$72 sps:$4 sm:$0xff]  }
  0x16   :  { %v2719_v61 = vld [vmem:[%s4050_s1 + $0x800] ss:$72 sps:$4 sm:$0xff]   ;;  %v2722_v63 = vld [vmem:[%s4050_s1 + $0x894] ss:$72 sps:$4 sm:$0xff]   ;;  %v2725_v1 = vld [vmem:[%s4050_s1 + $0x890] ss:$72 sps:$4 sm:$0xff]  }
  0x17   :  { %v2731_v2 = vld [vmem:[%s4050_s1 + $0xc] ss:$72 sps:$4 sm:$0xff]   ;;  %v2726_v4 = vld [vmem:[%s4051_s0] ss:$72 sps:$4 sm:$0xff]   ;;  %v2740_v8 = vld [vmem:[%s4050_s1 + $0x9c] ss:$72 sps:$4 sm:$0xff]  }
  0x18   :  { %v2737_v3 = vld [vmem:[%s4050_s1 + $0x2c] ss:$72 sps:$4 sm:$0xff]   ;;  %v2729_v5 = vld [vmem:[%s4050_s1 + $0x8] ss:$72 sps:$4 sm:$0xff]   ;;  %v2743_v9 = vld [vmem:[%s4050_s1 + $0xbc] ss:$72 sps:$4 sm:$0xff]  }
  0x19   :  { %v2732_v6 = vld [vmem:[%s4051_s0 + $0x20] ss:$72 sps:$4 sm:$0xff]   ;;  %v2830_v10 = vld [vmem:[%s4051_s0 + $0xc] ss:$72 sps:$4 sm:$0xff]   ;;  %v2764_v26 = vld [vmem:[%s4050_s1 + $0x2dc] ss:$72 sps:$4 sm:$0xff]  }
  0x1a   :  { %v2735_v7 = vld [vmem:[%s4050_s1 + $0x28] ss:$72 sps:$4 sm:$0xff]   ;;  %v2836_v11 = vld [vmem:[%s4051_s0 + $0x2c] ss:$72 sps:$4 sm:$0xff]   ;;  %v2738_v12 = vld [vmem:[%s4050_s1 + $0x98] ss:$72 sps:$4 sm:$0xff]  }
  0x1b   :  { %1860 = vmatpush1.bf16.xpose.msra.mxu1 %v2652_v14  ;;  %v2741_v13 = vld [vmem:[%s4050_s1 + $0xb8] ss:$72 sps:$4 sm:$0xff]   ;;  %v2746_v14 = vld [vmem:[%s4050_s1 + $0x12c] ss:$72 sps:$4 sm:$0xff]   ;;  %v2767_v27 = vld [vmem:[%s4050_s1 + $0x2fc] ss:$72 sps:$4 sm:$0xff]  }
  0x1c   :  { %2032 = vmatpush1.bf16.xpose.msra.mxu0 %v2653_v15  ;;  %1861 = vmatprep.subr.bf16.mxu1 %v2654_v16  ;;  %v2749_v15 = vld [vmem:[%s4050_s1 + $0x14c] ss:$72 sps:$4 sm:$0xff]   ;;  %v2744_v16 = vld [vmem:[%s4050_s1 + $0x128] ss:$72 sps:$4 sm:$0xff]  }
  0x1d   :  { %2033 = vmatprep.subr.bf16.mxu0 %v2656_v17  ;;  %v2747_v17 = vld [vmem:[%s4050_s1 + $0x148] ss:$72 sps:$4 sm:$0xff]  }
  0x23   :  { %1862 = vmatpush1.bf16.xpose.msra.mxu1 %v2658_v18  ;;  %v2752_v18 = vld [vmem:[%s4050_s1 + $0x1bc] ss:$72 sps:$4 sm:$0xff]  }
  0x24   :  { %2034 = vmatpush1.bf16.xpose.msra.mxu0 %v2659_v19  ;;  %1863 = vmatprep.subr.bf16.mxu1 %v2660_v20  ;;  %v2755_v19 = vld [vmem:[%s4050_s1 + $0x1dc] ss:$72 sps:$4 sm:$0xff]   ;;  %v2750_v20 = vld [vmem:[%s4050_s1 + $0x1b8] ss:$72 sps:$4 sm:$0xff]  }
  0x25   :  { %2035 = vmatprep.subr.bf16.mxu0 %v2662_v21  ;;  %v2753_v21 = vld [vmem:[%s4050_s1 + $0x1d8] ss:$72 sps:$4 sm:$0xff]  }
  0x2b   :  { %1864 = vmatpush1.bf16.xpose.msra.mxu1 %v2664_v22  ;;  %v2758_v22 = vld [vmem:[%s4050_s1 + $0x24c] ss:$72 sps:$4 sm:$0xff]  }
  0x2c   :  { %2036 = vmatpush1.bf16.xpose.msra.mxu0 %v2665_v23  ;;  %1865 = vmatprep.subr.bf16.mxu1 %v2666_v24  ;;  %v2761_v23 = vld [vmem:[%s4050_s1 + $0x26c] ss:$72 sps:$4 sm:$0xff]   ;;  %v2756_v24 = vld [vmem:[%s4050_s1 + $0x248] ss:$72 sps:$4 sm:$0xff]  }
  0x2d   :  { %2037 = vmatprep.subr.bf16.mxu0 %v2668_v25  ;;  %v2759_v25 = vld [vmem:[%s4050_s1 + $0x268] ss:$72 sps:$4 sm:$0xff]  }
  0x33   :  { %1866 = vmatpush1.bf16.xpose.msra.mxu1 %v2670_v28  ;;  %v2762_v28 = vld [vmem:[%s4050_s1 + $0x2d8] ss:$72 sps:$4 sm:$0xff]  }
  0x34   :  { %2038 = vmatpush1.bf16.xpose.msra.mxu0 %v2671_v29  ;;  %1867 = vmatprep.subr.bf16.mxu1 %v2672_v30  ;;  %v2765_v29 = vld [vmem:[%s4050_s1 + $0x2f8] ss:$72 sps:$4 sm:$0xff]   ;;  %v2770_v30 = vld [vmem:[%s4050_s1 + $0x36c] ss:$72 sps:$4 sm:$0xff]  }
  0x35   :  { %2039 = vmatprep.subr.bf16.mxu0 %v2674_v31  ;;  %v2773_v31 = vld [vmem:[%s4050_s1 + $0x38c] ss:$72 sps:$4 sm:$0xff]  }
  0x3b   :  { %1868 = vmatpush1.bf16.xpose.msra.mxu1 %v2676_v32  ;;  %v2768_v32 = vld [vmem:[%s4050_s1 + $0x368] ss:$72 sps:$4 sm:$0xff]  }
  0x3c   :  { %2040 = vmatpush1.bf16.xpose.msra.mxu0 %v2677_v33  ;;  %1869 = vmatprep.subr.bf16.mxu1 %v2678_v34  ;;  %v2771_v33 = vld [vmem:[%s4050_s1 + $0x388] ss:$72 sps:$4 sm:$0xff]   ;;  %v2776_v34 = vld [vmem:[%s4050_s1 + $0x3fc] ss:$72 sps:$4 sm:$0xff]  }
  0x3d   :  { %2041 = vmatprep.subr.bf16.mxu0 %v2680_v35  ;;  %v2779_v35 = vld [vmem:[%s4050_s1 + $0x41c] ss:$72 sps:$4 sm:$0xff]  }
  0x43   :  { %1870 = vmatpush1.bf16.xpose.msra.mxu1 %v2682_v36  ;;  %v2774_v36 = vld [vmem:[%s4050_s1 + $0x3f8] ss:$72 sps:$4 sm:$0xff]  }
  0x44   :  { %2042 = vmatpush1.bf16.xpose.msra.mxu0 %v2683_v37  ;;  %1871 = vmatprep.subr.bf16.mxu1 %v2684_v38  ;;  %v2777_v37 = vld [vmem:[%s4050_s1 + $0x418] ss:$72 sps:$4 sm:$0xff]   ;;  %v2782_v38 = vld [vmem:[%s4050_s1 + $0x48c] ss:$72 sps:$4 sm:$0xff]  }
  0x45   :  { %2043 = vmatprep.subr.bf16.mxu0 %v2686_v39  ;;  %v2785_v39 = vld [vmem:[%s4050_s1 + $0x4ac] ss:$72 sps:$4 sm:$0xff]  }
  0x4b   :  { %1872 = vmatpush1.bf16.xpose.msra.mxu1 %v2688_v40  ;;  %v2780_v40 = vld [vmem:[%s4050_s1 + $0x488] ss:$72 sps:$4 sm:$0xff]  }
  0x4c   :  { %2044 = vmatpush1.bf16.xpose.msra.mxu0 %v2689_v41  ;;  %1873 = vmatprep.subr.bf16.mxu1 %v2690_v42  ;;  %v2783_v41 = vld [vmem:[%s4050_s1 + $0x4a8] ss:$72 sps:$4 sm:$0xff]   ;;  %v2788_v42 = vld [vmem:[%s4050_s1 + $0x51c] ss:$72 sps:$4 sm:$0xff]  }
  0x4d   :  { %2045 = vmatprep.subr.bf16.mxu0 %v2692_v43  ;;  %v2791_v43 = vld [vmem:[%s4050_s1 + $0x53c] ss:$72 sps:$4 sm:$0xff]  }
  0x53   :  { %1874 = vmatpush1.bf16.xpose.msra.mxu1 %v2694_v44  ;;  %v2786_v44 = vld [vmem:[%s4050_s1 + $0x518] ss:$72 sps:$4 sm:$0xff]  }
  0x54   :  { %2046 = vmatpush1.bf16.xpose.msra.mxu0 %v2695_v45  ;;  %1875 = vmatprep.subr.bf16.mxu1 %v2696_v46  ;;  %v2789_v45 = vld [vmem:[%s4050_s1 + $0x538] ss:$72 sps:$4 sm:$0xff]   ;;  %v2794_v46 = vld [vmem:[%s4050_s1 + $0x5ac] ss:$72 sps:$4 sm:$0xff]  }
  0x55   :  { %2047 = vmatprep.subr.bf16.mxu0 %v2698_v47  ;;  %v2797_v47 = vld [vmem:[%s4050_s1 + $0x5cc] ss:$72 sps:$4 sm:$0xff]  }
  0x5b   :  { %1876 = vmatpush1.bf16.xpose.msra.mxu1 %v2700_v48  ;;  %v2792_v48 = vld [vmem:[%s4050_s1 + $0x5a8] ss:$72 sps:$4 sm:$0xff]  }
  0x5c   :  { %2048 = vmatpush1.bf16.xpose.msra.mxu0 %v2701_v49  ;;  %1877 = vmatprep.subr.bf16.mxu1 %v2702_v50  ;;  %v2795_v49 = vld [vmem:[%s4050_s1 + $0x5c8] ss:$72 sps:$4 sm:$0xff]   ;;  %v2800_v50 = vld [vmem:[%s4050_s1 + $0x63c] ss:$72 sps:$4 sm:$0xff]  }
  0x5d   :  { %2049 = vmatprep.subr.bf16.mxu0 %v2704_v51  ;;  %v2803_v51 = vld [vmem:[%s4050_s1 + $0x65c] ss:$72 sps:$4 sm:$0xff]  }
  0x63   :  { %1878 = vmatpush1.bf16.xpose.msra.mxu1 %v2706_v52  ;;  %v2798_v52 = vld [vmem:[%s4050_s1 + $0x638] ss:$72 sps:$4 sm:$0xff]  }
  0x64   :  { %2050 = vmatpush1.bf16.xpose.msra.mxu0 %v2707_v53  ;;  %1879 = vmatprep.subr.bf16.mxu1 %v2708_v54  ;;  %v2801_v53 = vld [vmem:[%s4050_s1 + $0x658] ss:$72 sps:$4 sm:$0xff]   ;;  %v2806_v54 = vld [vmem:[%s4050_s1 + $0x6cc] ss:$72 sps:$4 sm:$0xff]  }
  0x65   :  { %2051 = vmatprep.subr.bf16.mxu0 %v2710_v55  ;;  %v2809_v55 = vld [vmem:[%s4050_s1 + $0x6ec] ss:$72 sps:$4 sm:$0xff]  }
  0x6b   :  { %1880 = vmatpush1.bf16.xpose.msra.mxu1 %v2712_v56  ;;  %v2804_v56 = vld [vmem:[%s4050_s1 + $0x6c8] ss:$72 sps:$4 sm:$0xff]  }
  0x6c   :  { %2052 = vmatpush1.bf16.xpose.msra.mxu0 %v2713_v57  ;;  %1881 = vmatprep.subr.bf16.mxu1 %v2714_v58  ;;  %v2807_v57 = vld [vmem:[%s4050_s1 + $0x6e8] ss:$72 sps:$4 sm:$0xff]   ;;  %v2812_v58 = vld [vmem:[%s4050_s1 + $0x75c] ss:$72 sps:$4 sm:$0xff]  }
  0x6d   :  { %2053 = vmatprep.subr.bf16.mxu0 %v2716_v59  ;;  %v2815_v59 = vld [vmem:[%s4050_s1 + $0x77c] ss:$72 sps:$4 sm:$0xff]  }
  0x73   :  { %1882 = vmatpush1.bf16.xpose.msra.mxu1 %v2718_v60  ;;  %v2810_v60 = vld [vmem:[%s4050_s1 + $0x758] ss:$72 sps:$4 sm:$0xff]  }
  0x74   :  { %2054 = vmatpush1.bf16.xpose.msra.mxu0 %v2719_v61  ;;  %1883 = vmatprep.subr.bf16.mxu1 %v2720_v62  ;;  %v2813_v61 = vld [vmem:[%s4050_s1 + $0x778] ss:$72 sps:$4 sm:$0xff]   ;;  %v2818_v62 = vld [vmem:[%s4050_s1 + $0x7ec] ss:$72 sps:$4 sm:$0xff]  }
  0x75   :  { %2055 = vmatprep.subr.bf16.mxu0 %v2722_v63  ;;  %v2821_v63 = vld [vmem:[%s4050_s1 + $0x80c] ss:$72 sps:$4 sm:$0xff]  }
  0x7b   :  { %1884 = vmatpush1.bf16.xpose.msra.mxu1 %v2724_v0  ;;  %v2816_v0 = vld [vmem:[%s4050_s1 + $0x7e8] ss:$72 sps:$4 sm:$0xff]  }
  0x7c   :  { %2056 = vmatpush1.bf16.xpose.msra.mxu0 %v2725_v1  ;;  %1896 = vmatprep.subr.bf16.mxu1 %v2731_v2  ;;  %v2819_v1 = vld [vmem:[%s4050_s1 + $0x808] ss:$72 sps:$4 sm:$0xff]   ;;  %v2824_v2 = vld [vmem:[%s4050_s1 + $0x87c] ss:$72 sps:$4 sm:$0xff]  }
  0x7d   :  { %2068 = vmatprep.subr.bf16.mxu0 %v2737_v3  ;;  %v2827_v3 = vld [vmem:[%s4050_s1 + $0x89c] ss:$72 sps:$4 sm:$0xff]  }
  0x82   :  { %1886 = vmatmul.mubr.bf16.vlgmr.msra.gmra.mrb[0].mxu1 %v2726_v4  ;;  %v2822_v4 = vld [vmem:[%s4050_s1 + $0x878] ss:$72 sps:$4 sm:$0xff]  }
  0x83   :  { %2058 = vmatmul.mubr.bf16.vlgmr.msra.gmra.mrb[0].mxu0 %v2732_v6  ;;  %1897 = vmatpush1.bf16.xpose.msra.mxu1 %v2729_v5  ;;  %v2825_v5 = vld [vmem:[%s4050_s1 + $0x898] ss:$72 sps:$4 sm:$0xff]   ;;  %v2833_v6 = vld [vmem:[%s4050_s1 + $0x14] ss:$72 sps:$4 sm:$0xff]  }
  0x84   :  { %2069 = vmatpush1.bf16.xpose.msra.mxu0 %v2735_v7  ;;  %1898 = vmatprep.subr.bf16.mxu1 %v2740_v8  ;;  %v2839_v7 = vld [vmem:[%s4050_s1 + $0x34] ss:$72 sps:$4 sm:$0xff]   ;;  %v2828_v8 = vld [vmem:[%s4051_s0 + $0x8] ss:$72 sps:$4 sm:$0xff]  }
  0x85   :  { %2070 = vmatprep.subr.bf16.mxu0 %v2743_v9  ;;  %1928 = vmatprep.mubr.bf16.mxu1 %v2830_v10  ;;  %v2834_v9 = vld [vmem:[%s4051_s0 + $0x28] ss:$72 sps:$4 sm:$0xff]  }
  0x86   :  { %2100 = vmatprep.mubr.bf16.mxu0 %v2836_v11  ;;  %v2831_v10 = vld [vmem:[%s4050_s1 + $0x10] ss:$72 sps:$4 sm:$0xff]  }
  0x87   :  { %v2837_v11 = vld [vmem:[%s4050_s1 + $0x30] ss:$72 sps:$4 sm:$0xff]  }
  0x8b   :  { %1899 = vmatpush1.bf16.xpose.msra.mxu1 %v2738_v12  ;;  %v2842_v12 = vld [vmem:[%s4050_s1 + $0xa4] ss:$72 sps:$4 sm:$0xff]  }
  0x8c   :  { %2071 = vmatpush1.bf16.xpose.msra.mxu0 %v2741_v13  ;;  %1900 = vmatprep.subr.bf16.mxu1 %v2746_v14  ;;  %v2845_v13 = vld [vmem:[%s4050_s1 + $0xc4] ss:$72 sps:$4 sm:$0xff]   ;;  %v2932_v14 = vld [vmem:[%s4051_s0 + $0x14] ss:$72 sps:$4 sm:$0xff]  }
  0x8d   :  { %2072 = vmatprep.subr.bf16.mxu0 %v2749_v15  ;;  %v2938_v15 = vld [vmem:[%s4051_s0 + $0x34] ss:$72 sps:$4 sm:$0xff]  }
  0x93   :  { %1901 = vmatpush1.bf16.xpose.msra.mxu1 %v2744_v16  ;;  %v2840_v16 = vld [vmem:[%s4050_s1 + $0xa0] ss:$72 sps:$4 sm:$0xff]  }
  0x94   :  { %2073 = vmatpush1.bf16.xpose.msra.mxu0 %v2747_v17  ;;  %1902 = vmatprep.subr.bf16.mxu1 %v2752_v18  ;;  %v2843_v17 = vld [vmem:[%s4050_s1 + $0xc0] ss:$72 sps:$4 sm:$0xff]   ;;  %v2848_v18 = vld [vmem:[%s4050_s1 + $0x134] ss:$72 sps:$4 sm:$0xff]  }
  0x95   :  { %2074 = vmatprep.subr.bf16.mxu0 %v2755_v19  ;;  %v2851_v19 = vld [vmem:[%s4050_s1 + $0x154] ss:$72 sps:$4 sm:$0xff]  }
  0x9b   :  { %1903 = vmatpush1.bf16.xpose.msra.mxu1 %v2750_v20  ;;  %v2846_v20 = vld [vmem:[%s4050_s1 + $0x130] ss:$72 sps:$4 sm:$0xff]  }
  0x9c   :  { %2075 = vmatpush1.bf16.xpose.msra.mxu0 %v2753_v21  ;;  %1904 = vmatprep.subr.bf16.mxu1 %v2758_v22  ;;  %v2849_v21 = vld [vmem:[%s4050_s1 + $0x150] ss:$72 sps:$4 sm:$0xff]   ;;  %v2854_v22 = vld [vmem:[%s4050_s1 + $0x1c4] ss:$72 sps:$4 sm:$0xff]  }
  0x9d   :  { %2076 = vmatprep.subr.bf16.mxu0 %v2761_v23  ;;  %v2857_v23 = vld [vmem:[%s4050_s1 + $0x1e4] ss:$72 sps:$4 sm:$0xff]  }
  0xa3   :  { %1905 = vmatpush1.bf16.xpose.msra.mxu1 %v2756_v24  ;;  %v2852_v24 = vld [vmem:[%s4050_s1 + $0x1c0] ss:$72 sps:$4 sm:$0xff]  }
  0xa4   :  { %2077 = vmatpush1.bf16.xpose.msra.mxu0 %v2759_v25  ;;  %1906 = vmatprep.subr.bf16.mxu1 %v2764_v26  ;;  %v2855_v25 = vld [vmem:[%s4050_s1 + $0x1e0] ss:$72 sps:$4 sm:$0xff]   ;;  %v2860_v26 = vld [vmem:[%s4050_s1 + $0x254] ss:$72 sps:$4 sm:$0xff]  }
  0xa5   :  { %2078 = vmatprep.subr.bf16.mxu0 %v2767_v27  ;;  %v2863_v27 = vld [vmem:[%s4050_s1 + $0x274] ss:$72 sps:$4 sm:$0xff]  }
  0xab   :  { %1907 = vmatpush1.bf16.xpose.msra.mxu1 %v2762_v28  ;;  %v2858_v28 = vld [vmem:[%s4050_s1 + $0x250] ss:$72 sps:$4 sm:$0xff]  }
  0xac   :  { %2079 = vmatpush1.bf16.xpose.msra.mxu0 %v2765_v29  ;;  %1908 = vmatprep.subr.bf16.mxu1 %v2770_v30  ;;  %v2861_v29 = vld [vmem:[%s4050_s1 + $0x270] ss:$72 sps:$4 sm:$0xff]   ;;  %v2866_v30 = vld [vmem:[%s4050_s1 + $0x2e4] ss:$72 sps:$4 sm:$0xff]  }
  0xad   :  { %2080 = vmatprep.subr.bf16.mxu0 %v2773_v31  ;;  %v2869_v31 = vld [vmem:[%s4050_s1 + $0x304] ss:$72 sps:$4 sm:$0xff]  }
  0xb3   :  { %1909 = vmatpush1.bf16.xpose.msra.mxu1 %v2768_v32  ;;  %v2864_v32 = vld [vmem:[%s4050_s1 + $0x2e0] ss:$72 sps:$4 sm:$0xff]  }
  0xb4   :  { %2081 = vmatpush1.bf16.xpose.msra.mxu0 %v2771_v33  ;;  %1910 = vmatprep.subr.bf16.mxu1 %v2776_v34  ;;  %v2867_v33 = vld [vmem:[%s4050_s1 + $0x300] ss:$72 sps:$4 sm:$0xff]   ;;  %v2872_v34 = vld [vmem:[%s4050_s1 + $0x374] ss:$72 sps:$4 sm:$0xff]  }
  0xb5   :  { %2082 = vmatprep.subr.bf16.mxu0 %v2779_v35  ;;  %v2875_v35 = vld [vmem:[%s4050_s1 + $0x394] ss:$72 sps:$4 sm:$0xff]  }
  0xbb   :  { %1911 = vmatpush1.bf16.xpose.msra.mxu1 %v2774_v36  ;;  %v2870_v36 = vld [vmem:[%s4050_s1 + $0x370] ss:$72 sps:$4 sm:$0xff]  }
  0xbc   :  { %2083 = vmatpush1.bf16.xpose.msra.mxu0 %v2777_v37  ;;  %1912 = vmatprep.subr.bf16.mxu1 %v2782_v38  ;;  %v2873_v37 = vld [vmem:[%s4050_s1 + $0x390] ss:$72 sps:$4 sm:$0xff]   ;;  %v2878_v38 = vld [vmem:[%s4050_s1 + $0x404] ss:$72 sps:$4 sm:$0xff]  }
  0xbd   :  { %2084 = vmatprep.subr.bf16.mxu0 %v2785_v39  ;;  %v2881_v39 = vld [vmem:[%s4050_s1 + $0x424] ss:$72 sps:$4 sm:$0xff]  }
  0xc3   :  { %1913 = vmatpush1.bf16.xpose.msra.mxu1 %v2780_v40  ;;  %v2876_v40 = vld [vmem:[%s4050_s1 + $0x400] ss:$72 sps:$4 sm:$0xff]  }
  0xc4   :  { %2085 = vmatpush1.bf16.xpose.msra.mxu0 %v2783_v41  ;;  %1914 = vmatprep.subr.bf16.mxu1 %v2788_v42  ;;  %v2879_v41 = vld [vmem:[%s4050_s1 + $0x420] ss:$72 sps:$4 sm:$0xff]   ;;  %v2884_v42 = vld [vmem:[%s4050_s1 + $0x494] ss:$72 sps:$4 sm:$0xff]  }
  0xc5   :  { %2086 = vmatprep.subr.bf16.mxu0 %v2791_v43  ;;  %v2887_v43 = vld [vmem:[%s4050_s1 + $0x4b4] ss:$72 sps:$4 sm:$0xff]  }
  0xcb   :  { %1915 = vmatpush1.bf16.xpose.msra.mxu1 %v2786_v44  ;;  %v2882_v44 = vld [vmem:[%s4050_s1 + $0x490] ss:$72 sps:$4 sm:$0xff]  }
  0xcc   :  { %2087 = vmatpush1.bf16.xpose.msra.mxu0 %v2789_v45  ;;  %1916 = vmatprep.subr.bf16.mxu1 %v2794_v46  ;;  %v2885_v45 = vld [vmem:[%s4050_s1 + $0x4b0] ss:$72 sps:$4 sm:$0xff]   ;;  %v2890_v46 = vld [vmem:[%s4050_s1 + $0x524] ss:$72 sps:$4 sm:$0xff]  }
  0xcd   :  { %2088 = vmatprep.subr.bf16.mxu0 %v2797_v47  ;;  %v2893_v47 = vld [vmem:[%s4050_s1 + $0x544] ss:$72 sps:$4 sm:$0xff]  }
  0xd3   :  { %1917 = vmatpush1.bf16.xpose.msra.mxu1 %v2792_v48  ;;  %v2888_v48 = vld [vmem:[%s4050_s1 + $0x520] ss:$72 sps:$4 sm:$0xff]  }
  0xd4   :  { %2089 = vmatpush1.bf16.xpose.msra.mxu0 %v2795_v49  ;;  %1918 = vmatprep.subr.bf16.mxu1 %v2800_v50  ;;  %v2891_v49 = vld [vmem:[%s4050_s1 + $0x540] ss:$72 sps:$4 sm:$0xff]   ;;  %v2896_v50 = vld [vmem:[%s4050_s1 + $0x5b4] ss:$72 sps:$4 sm:$0xff]  }
  0xd5   :  { %2090 = vmatprep.subr.bf16.mxu0 %v2803_v51  ;;  %v2899_v51 = vld [vmem:[%s4050_s1 + $0x5d4] ss:$72 sps:$4 sm:$0xff]  }
  0xdb   :  { %1919 = vmatpush1.bf16.xpose.msra.mxu1 %v2798_v52  ;;  %v2894_v52 = vld [vmem:[%s4050_s1 + $0x5b0] ss:$72 sps:$4 sm:$0xff]  }
  0xdc   :  { %2091 = vmatpush1.bf16.xpose.msra.mxu0 %v2801_v53  ;;  %1920 = vmatprep.subr.bf16.mxu1 %v2806_v54  ;;  %v2897_v53 = vld [vmem:[%s4050_s1 + $0x5d0] ss:$72 sps:$4 sm:$0xff]   ;;  %v2902_v54 = vld [vmem:[%s4050_s1 + $0x644] ss:$72 sps:$4 sm:$0xff]  }
  0xdd   :  { %2092 = vmatprep.subr.bf16.mxu0 %v2809_v55  ;;  %v2905_v55 = vld [vmem:[%s4050_s1 + $0x664] ss:$72 sps:$4 sm:$0xff]  }
  0xe3   :  { %1921 = vmatpush1.bf16.xpose.msra.mxu1 %v2804_v56  ;;  %v2900_v56 = vld [vmem:[%s4050_s1 + $0x640] ss:$72 sps:$4 sm:$0xff]  }
  0xe4   :  { %2093 = vmatpush1.bf16.xpose.msra.mxu0 %v2807_v57  ;;  %1922 = vmatprep.subr.bf16.mxu1 %v2812_v58  ;;  %v2903_v57 = vld [vmem:[%s4050_s1 + $0x660] ss:$72 sps:$4 sm:$0xff]   ;;  %v2908_v58 = vld [vmem:[%s4050_s1 + $0x6d4] ss:$72 sps:$4 sm:$0xff]  }
  0xe5   :  { %2094 = vmatprep.subr.bf16.mxu0 %v2815_v59  ;;  %v2911_v59 = vld [vmem:[%s4050_s1 + $0x6f4] ss:$72 sps:$4 sm:$0xff]  }
  0xeb   :  { %1923 = vmatpush1.bf16.xpose.msra.mxu1 %v2810_v60  ;;  %v2906_v60 = vld [vmem:[%s4050_s1 + $0x6d0] ss:$72 sps:$4 sm:$0xff]  }
  0xec   :  { %2095 = vmatpush1.bf16.xpose.msra.mxu0 %v2813_v61  ;;  %1924 = vmatprep.subr.bf16.mxu1 %v2818_v62  ;;  %v2909_v61 = vld [vmem:[%s4050_s1 + $0x6f0] ss:$72 sps:$4 sm:$0xff]   ;;  %v2914_v62 = vld [vmem:[%s4050_s1 + $0x764] ss:$72 sps:$4 sm:$0xff]  }
  0xed   :  { %2096 = vmatprep.subr.bf16.mxu0 %v2821_v63  ;;  %v2917_v63 = vld [vmem:[%s4050_s1 + $0x784] ss:$72 sps:$4 sm:$0xff]  }
  0xf3   :  { %1925 = vmatpush1.bf16.xpose.msra.mxu1 %v2816_v0  ;;  %v2912_v0 = vld [vmem:[%s4050_s1 + $0x760] ss:$72 sps:$4 sm:$0xff]  }
  0xf4   :  { %2097 = vmatpush1.bf16.xpose.msra.mxu0 %v2819_v1  ;;  %1926 = vmatprep.subr.bf16.mxu1 %v2824_v2  ;;  %v2915_v1 = vld [vmem:[%s4050_s1 + $0x780] ss:$72 sps:$4 sm:$0xff]   ;;  %v2920_v2 = vld [vmem:[%s4050_s1 + $0x7f4] ss:$72 sps:$4 sm:$0xff]  }
  0xf5   :  { %2098 = vmatprep.subr.bf16.mxu0 %v2827_v3  ;;  %v2923_v3 = vld [vmem:[%s4050_s1 + $0x814] ss:$72 sps:$4 sm:$0xff]  }
  0xfb   :  { %1927 = vmatpush1.bf16.xpose.msra.mxu1 %v2822_v4  ;;  %v2918_v4 = vld [vmem:[%s4050_s1 + $0x7f0] ss:$72 sps:$4 sm:$0xff]  }
  0xfc   :  { %2099 = vmatpush1.bf16.xpose.msra.mxu0 %v2825_v5  ;;  %1939 = vmatprep.subr.bf16.mxu1 %v2833_v6  ;;  %v2921_v5 = vld [vmem:[%s4050_s1 + $0x810] ss:$72 sps:$4 sm:$0xff]   ;;  %v2926_v6 = vld [vmem:[%s4050_s1 + $0x884] ss:$72 sps:$4 sm:$0xff]  }
  0xfd   :  { %2111 = vmatprep.subr.bf16.mxu0 %v2839_v7  ;;  %v2929_v7 = vld [vmem:[%s4050_s1 + $0x8a4] ss:$72 sps:$4 sm:$0xff]  }
 0x102   :  { %1929 = vmatmul.mubr.bf16.vlgmr.msra.gmra.mrb[0].mxu1 %v2828_v8  ;;  %v2924_v8 = vld [vmem:[%s4050_s1 + $0x880] ss:$72 sps:$4 sm:$0xff]  }
 0x103   :  { %2101 = vmatmul.mubr.bf16.vlgmr.msra.gmra.mrb[0].mxu0 %v2834_v9  ;;  %1940 = vmatpush1.bf16.xpose.msra.mxu1 %v2831_v10  ;;  %v2927_v9 = vld [vmem:[%s4050_s1 + $0x8a0] ss:$72 sps:$4 sm:$0xff]   ;;  %v2935_v10 = vld [vmem:[%s4050_s1 + $0x1c] ss:$72 sps:$4 sm:$0xff]  }
 0x104   :  { %2112 = vmatpush1.bf16.xpose.msra.mxu0 %v2837_v11  ;;  %1941 = vmatprep.subr.bf16.mxu1 %v2842_v12  ;;  %v2941_v11 = vld [vmem:[%s4050_s1 + $0x3c] ss:$72 sps:$4 sm:$0xff]   ;;  %v2930_v12 = vld [vmem:[%s4051_s0 + $0x10] ss:$72 sps:$4 sm:$0xff]  }
 0x105   :  { %2113 = vmatprep.subr.bf16.mxu0 %v2845_v13  ;;  %1971 = vmatprep.mubr.bf16.mxu1 %v2932_v14  ;;  %v2936_v13 = vld [vmem:[%s4051_s0 + $0x30] ss:$72 sps:$4 sm:$0xff]  }
 0x106   :  { %2143 = vmatprep.mubr.bf16.mxu0 %v2938_v15  ;;  %v2933_v14 = vld [vmem:[%s4050_s1 + $0x18] ss:$72 sps:$4 sm:$0xff]  }
 0x107   :  { %v2939_v15 = vld [vmem:[%s4050_s1 + $0x38] ss:$72 sps:$4 sm:$0xff]  }
 0x10b   :  { %1942 = vmatpush1.bf16.xpose.msra.mxu1 %v2840_v16  ;;  %v2944_v16 = vld [vmem:[%s4050_s1 + $0xac] ss:$72 sps:$4 sm:$0xff]  }
 0x10c   :  { %2114 = vmatpush1.bf16.xpose.msra.mxu0 %v2843_v17  ;;  %1943 = vmatprep.subr.bf16.mxu1 %v2848_v18  ;;  %v2947_v17 = vld [vmem:[%s4050_s1 + $0xcc] ss:$72 sps:$4 sm:$0xff]   ;;  %v3034_v18 = vld [vmem:[%s4051_s0 + $0x1c] ss:$72 sps:$4 sm:$0xff]  }
 0x10d   :  { %2115 = vmatprep.subr.bf16.mxu0 %v2851_v19  ;;  %v3037_v19 = vld [vmem:[%s4051_s0 + $0x3c] ss:$72 sps:$4 sm:$0xff]  }
 0x113   :  { %1944 = vmatpush1.bf16.xpose.msra.mxu1 %v2846_v20  ;;  %v2942_v20 = vld [vmem:[%s4050_s1 + $0xa8] ss:$72 sps:$4 sm:$0xff]  }
 0x114   :  { %2116 = vmatpush1.bf16.xpose.msra.mxu0 %v2849_v21  ;;  %1945 = vmatprep.subr.bf16.mxu1 %v2854_v22  ;;  %v2945_v21 = vld [vmem:[%s4050_s1 + $0xc8] ss:$72 sps:$4 sm:$0xff]   ;;  %v2950_v22 = vld [vmem:[%s4050_s1 + $0x13c] ss:$72 sps:$4 sm:$0xff]  }
 0x115   :  { %2117 = vmatprep.subr.bf16.mxu0 %v2857_v23  ;;  %v2953_v23 = vld [vmem:[%s4050_s1 + $0x15c] ss:$72 sps:$4 sm:$0xff]  }
 0x11b   :  { %1946 = vmatpush1.bf16.xpose.msra.mxu1 %v2852_v24  ;;  %v2948_v24 = vld [vmem:[%s4050_s1 + $0x138] ss:$72 sps:$4 sm:$0xff]  }
 0x11c   :  { %2118 = vmatpush1.bf16.xpose.msra.mxu0 %v2855_v25  ;;  %1947 = vmatprep.subr.bf16.mxu1 %v2860_v26  ;;  %v2951_v25 = vld [vmem:[%s4050_s1 + $0x158] ss:$72 sps:$4 sm:$0xff]   ;;  %v2956_v26 = vld [vmem:[%s4050_s1 + $0x1cc] ss:$72 sps:$4 sm:$0xff]  }
 0x11d   :  { %2119 = vmatprep.subr.bf16.mxu0 %v2863_v27  ;;  %v2959_v27 = vld [vmem:[%s4050_s1 + $0x1ec] ss:$72 sps:$4 sm:$0xff]  }
 0x123   :  { %1948 = vmatpush1.bf16.xpose.msra.mxu1 %v2858_v28  ;;  %v2954_v28 = vld [vmem:[%s4050_s1 + $0x1c8] ss:$72 sps:$4 sm:$0xff]  }
 0x124   :  { %2120 = vmatpush1.bf16.xpose.msra.mxu0 %v2861_v29  ;;  %1949 = vmatprep.subr.bf16.mxu1 %v2866_v30  ;;  %v2957_v29 = vld [vmem:[%s4050_s1 + $0x1e8] ss:$72 sps:$4 sm:$0xff]   ;;  %v2962_v30 = vld [vmem:[%s4050_s1 + $0x25c] ss:$72 sps:$4 sm:$0xff]  }
 0x125   :  { %2121 = vmatprep.subr.bf16.mxu0 %v2869_v31  ;;  %v2965_v31 = vld [vmem:[%s4050_s1 + $0x27c] ss:$72 sps:$4 sm:$0xff]  }
 0x12b   :  { %1950 = vmatpush1.bf16.xpose.msra.mxu1 %v2864_v32  ;;  %v2960_v32 = vld [vmem:[%s4050_s1 + $0x258] ss:$72 sps:$4 sm:$0xff]  }
 0x12c   :  { %2122 = vmatpush1.bf16.xpose.msra.mxu0 %v2867_v33  ;;  %1951 = vmatprep.subr.bf16.mxu1 %v2872_v34  ;;  %v2963_v33 = vld [vmem:[%s4050_s1 + $0x278] ss:$72 sps:$4 sm:$0xff]   ;;  %v2968_v34 = vld [vmem:[%s4050_s1 + $0x2ec] ss:$72 sps:$4 sm:$0xff]  }
 0x12d   :  { %2123 = vmatprep.subr.bf16.mxu0 %v2875_v35  ;;  %v2971_v35 = vld [vmem:[%s4050_s1 + $0x30c] ss:$72 sps:$4 sm:$0xff]  }
 0x133   :  { %1952 = vmatpush1.bf16.xpose.msra.mxu1 %v2870_v36  ;;  %v2966_v36 = vld [vmem:[%s4050_s1 + $0x2e8] ss:$72 sps:$4 sm:$0xff]  }
 0x134   :  { %2124 = vmatpush1.bf16.xpose.msra.mxu0 %v2873_v37  ;;  %1953 = vmatprep.subr.bf16.mxu1 %v2878_v38  ;;  %v2969_v37 = vld [vmem:[%s4050_s1 + $0x308] ss:$72 sps:$4 sm:$0xff]   ;;  %v2974_v38 = vld [vmem:[%s4050_s1 + $0x37c] ss:$72 sps:$4 sm:$0xff]  }
 0x135   :  { %2125 = vmatprep.subr.bf16.mxu0 %v2881_v39  ;;  %v2977_v39 = vld [vmem:[%s4050_s1 + $0x39c] ss:$72 sps:$4 sm:$0xff]  }
 0x13b   :  { %1954 = vmatpush1.bf16.xpose.msra.mxu1 %v2876_v40  ;;  %v2972_v40 = vld [vmem:[%s4050_s1 + $0x378] ss:$72 sps:$4 sm:$0xff]  }
 0x13c   :  { %2126 = vmatpush1.bf16.xpose.msra.mxu0 %v2879_v41  ;;  %1955 = vmatprep.subr.bf16.mxu1 %v2884_v42  ;;  %v2975_v41 = vld [vmem:[%s4050_s1 + $0x398] ss:$72 sps:$4 sm:$0xff]   ;;  %v2980_v42 = vld [vmem:[%s4050_s1 + $0x40c] ss:$72 sps:$4 sm:$0xff]  }
 0x13d   :  { %2127 = vmatprep.subr.bf16.mxu0 %v2887_v43  ;;  %v2983_v43 = vld [vmem:[%s4050_s1 + $0x42c] ss:$72 sps:$4 sm:$0xff]  }
 0x143   :  { %1956 = vmatpush1.bf16.xpose.msra.mxu1 %v2882_v44  ;;  %v2978_v44 = vld [vmem:[%s4050_s1 + $0x408] ss:$72 sps:$4 sm:$0xff]  }
 0x144   :  { %2128 = vmatpush1.bf16.xpose.msra.mxu0 %v2885_v45  ;;  %1957 = vmatprep.subr.bf16.mxu1 %v2890_v46  ;;  %v2981_v45 = vld [vmem:[%s4050_s1 + $0x428] ss:$72 sps:$4 sm:$0xff]   ;;  %v2986_v46 = vld [vmem:[%s4050_s1 + $0x49c] ss:$72 sps:$4 sm:$0xff]  }
 0x145   :  { %2129 = vmatprep.subr.bf16.mxu0 %v2893_v47  ;;  %v2989_v47 = vld [vmem:[%s4050_s1 + $0x4bc] ss:$72 sps:$4 sm:$0xff]  }
 0x14b   :  { %1958 = vmatpush1.bf16.xpose.msra.mxu1 %v2888_v48  ;;  %v2984_v48 = vld [vmem:[%s4050_s1 + $0x498] ss:$72 sps:$4 sm:$0xff]  }
 0x14c   :  { %2130 = vmatpush1.bf16.xpose.msra.mxu0 %v2891_v49  ;;  %1959 = vmatprep.subr.bf16.mxu1 %v2896_v50  ;;  %v2987_v49 = vld [vmem:[%s4050_s1 + $0x4b8] ss:$72 sps:$4 sm:$0xff]   ;;  %v2992_v50 = vld [vmem:[%s4050_s1 + $0x52c] ss:$72 sps:$4 sm:$0xff]  }
 0x14d   :  { %2131 = vmatprep.subr.bf16.mxu0 %v2899_v51  ;;  %v2995_v51 = vld [vmem:[%s4050_s1 + $0x54c] ss:$72 sps:$4 sm:$0xff]  }
 0x153   :  { %1960 = vmatpush1.bf16.xpose.msra.mxu1 %v2894_v52  ;;  %v2990_v52 = vld [vmem:[%s4050_s1 + $0x528] ss:$72 sps:$4 sm:$0xff]  }
 0x154   :  { %2132 = vmatpush1.bf16.xpose.msra.mxu0 %v2897_v53  ;;  %1961 = vmatprep.subr.bf16.mxu1 %v2902_v54  ;;  %v2993_v53 = vld [vmem:[%s4050_s1 + $0x548] ss:$72 sps:$4 sm:$0xff]   ;;  %v2998_v54 = vld [vmem:[%s4050_s1 + $0x5bc] ss:$72 sps:$4 sm:$0xff]  }
 0x155   :  { %2133 = vmatprep.subr.bf16.mxu0 %v2905_v55  ;;  %v3001_v55 = vld [vmem:[%s4050_s1 + $0x5dc] ss:$72 sps:$4 sm:$0xff]  }
 0x15b   :  { %1962 = vmatpush1.bf16.xpose.msra.mxu1 %v2900_v56  ;;  %v2996_v56 = vld [vmem:[%s4050_s1 + $0x5b8] ss:$72 sps:$4 sm:$0xff]  }
 0x15c   :  { %2134 = vmatpush1.bf16.xpose.msra.mxu0 %v2903_v57  ;;  %1963 = vmatprep.subr.bf16.mxu1 %v2908_v58  ;;  %v2999_v57 = vld [vmem:[%s4050_s1 + $0x5d8] ss:$72 sps:$4 sm:$0xff]   ;;  %v3004_v58 = vld [vmem:[%s4050_s1 + $0x64c] ss:$72 sps:$4 sm:$0xff]  }
 0x15d   :  { %2135 = vmatprep.subr.bf16.mxu0 %v2911_v59  ;;  %v3007_v59 = vld [vmem:[%s4050_s1 + $0x66c] ss:$72 sps:$4 sm:$0xff]  }
 0x163   :  { %1964 = vmatpush1.bf16.xpose.msra.mxu1 %v2906_v60  ;;  %v3002_v60 = vld [vmem:[%s4050_s1 + $0x648] ss:$72 sps:$4 sm:$0xff]  }
 0x164   :  { %2136 = vmatpush1.bf16.xpose.msra.mxu0 %v2909_v61  ;;  %1965 = vmatprep.subr.bf16.mxu1 %v2914_v62  ;;  %v3005_v61 = vld [vmem:[%s4050_s1 + $0x668] ss:$72 sps:$4 sm:$0xff]   ;;  %v3010_v62 = vld [vmem:[%s4050_s1 + $0x6dc] ss:$72 sps:$4 sm:$0xff]  }
 0x165   :  { %2137 = vmatprep.subr.bf16.mxu0 %v2917_v63  ;;  %v3013_v63 = vld [vmem:[%s4050_s1 + $0x6fc] ss:$72 sps:$4 sm:$0xff]  }
 0x16b   :  { %1966 = vmatpush1.bf16.xpose.msra.mxu1 %v2912_v0  ;;  %v3008_v0 = vld [vmem:[%s4050_s1 + $0x6d8] ss:$72 sps:$4 sm:$0xff]  }
 0x16c   :  { %2138 = vmatpush1.bf16.xpose.msra.mxu0 %v2915_v1  ;;  %1967 = vmatprep.subr.bf16.mxu1 %v2920_v2  ;;  %v3011_v1 = vld [vmem:[%s4050_s1 + $0x6f8] ss:$72 sps:$4 sm:$0xff]   ;;  %v3016_v2 = vld [vmem:[%s4050_s1 + $0x76c] ss:$72 sps:$4 sm:$0xff]  }
 0x16d   :  { %2139 = vmatprep.subr.bf16.mxu0 %v2923_v3  ;;  %v3019_v3 = vld [vmem:[%s4050_s1 + $0x78c] ss:$72 sps:$4 sm:$0xff]  }
 0x173   :  { %1968 = vmatpush1.bf16.xpose.msra.mxu1 %v2918_v4  ;;  %v3014_v4 = vld [vmem:[%s4050_s1 + $0x768] ss:$72 sps:$4 sm:$0xff]  }
 0x174   :  { %2140 = vmatpush1.bf16.xpose.msra.mxu0 %v2921_v5  ;;  %1969 = vmatprep.subr.bf16.mxu1 %v2926_v6  ;;  %v3017_v5 = vld [vmem:[%s4050_s1 + $0x788] ss:$72 sps:$4 sm:$0xff]   ;;  %v3022_v6 = vld [vmem:[%s4050_s1 + $0x7fc] ss:$72 sps:$4 sm:$0xff]  }
 0x175   :  { %2141 = vmatprep.subr.bf16.mxu0 %v2929_v7  ;;  %v3025_v7 = vld [vmem:[%s4050_s1 + $0x81c] ss:$72 sps:$4 sm:$0xff]  }
 0x17b   :  { %1970 = vmatpush1.bf16.xpose.msra.mxu1 %v2924_v8  ;;  %v3020_v8 = vld [vmem:[%s4050_s1 + $0x7f8] ss:$72 sps:$4 sm:$0xff]  }
 0x17c   :  { %2142 = vmatpush1.bf16.xpose.msra.mxu0 %v2927_v9  ;;  %1982 = vmatprep.subr.bf16.mxu1 %v2935_v10  ;;  %v3023_v9 = vld [vmem:[%s4050_s1 + $0x818] ss:$72 sps:$4 sm:$0xff]   ;;  %v3028_v10 = vld [vmem:[%s4050_s1 + $0x88c] ss:$72 sps:$4 sm:$0xff]  }
 0x17d   :  { %2154 = vmatprep.subr.bf16.mxu0 %v2941_v11  ;;  %v3031_v11 = vld [vmem:[%s4050_s1 + $0x8ac] ss:$72 sps:$4 sm:$0xff]  }
 0x182   :  { %1972 = vmatmul.mubr.bf16.vlgmr.msra.gmra.mrb[0].mxu1 %v2930_v12  ;;  %v3026_v12 = vld [vmem:[%s4050_s1 + $0x888] ss:$72 sps:$4 sm:$0xff]  }
 0x183   :  { %2144 = vmatmul.mubr.bf16.vlgmr.msra.gmra.mrb[0].mxu0 %v2936_v13  ;;  %1983 = vmatpush1.bf16.xpose.msra.mxu1 %v2933_v14  ;;  %v3029_v13 = vld [vmem:[%s4050_s1 + $0x8a8] ss:$72 sps:$4 sm:$0xff]   ;;  %v3040_v14 = vld [vmem:[%s4050_s1 + $0x44] ss:$72 sps:$4 sm:$0xff]  }
 0x184   :  { %2155 = vmatpush1.bf16.xpose.msra.mxu0 %v2939_v15  ;;  %1984 = vmatprep.subr.bf16.mxu1 %v2944_v16  ;;  %v3032_v15 = vld [vmem:[%s4051_s0 + $0x18] ss:$72 sps:$4 sm:$0xff]  }
 0x185   :  { %2156 = vmatprep.subr.bf16.mxu0 %v2947_v17  ;;  %2014 = vmatprep.mubr.bf16.mxu1 %v3034_v18  ;;  %v3035_v16 = vld [vmem:[%s4051_s0 + $0x38] ss:$72 sps:$4 sm:$0xff]   ;;  %v3088_v18 = vld [vmem:[%s4051_s0 + $0x44] ss:$72 sps:$4 sm:$0xff]  }
 0x186   :  { %2186 = vmatprep.mubr.bf16.mxu0 %v3037_v19  ;;  %v3038_v17 = vld [vmem:[%s4050_s1 + $0x40] ss:$72 sps:$4 sm:$0xff]   ;;  %v3043_v19 = vld [vmem:[%s4050_s1 + $0xd4] ss:$72 sps:$4 sm:$0xff]  }
 0x18b   :  { %1985 = vmatpush1.bf16.xpose.msra.mxu1 %v2942_v20  ;;  %v3041_v20 = vld [vmem:[%s4050_s1 + $0xd0] ss:$72 sps:$4 sm:$0xff]  }
 0x18c   :  { %2157 = vmatpush1.bf16.xpose.msra.mxu0 %v2945_v21  ;;  %1986 = vmatprep.subr.bf16.mxu1 %v2950_v22  ;;  %v3046_v21 = vld [vmem:[%s4050_s1 + $0x164] ss:$72 sps:$4 sm:$0xff]   ;;  %v3044_v22 = vld [vmem:[%s4050_s1 + $0x160] ss:$72 sps:$4 sm:$0xff]  }
 0x18d   :  { %2158 = vmatprep.subr.bf16.mxu0 %v2953_v23  ;;  %v3049_v23 = vld [vmem:[%s4050_s1 + $0x1f4] ss:$72 sps:$4 sm:$0xff]  }
 0x193   :  { %1987 = vmatpush1.bf16.xpose.msra.mxu1 %v2948_v24  ;;  %v3047_v24 = vld [vmem:[%s4050_s1 + $0x1f0] ss:$72 sps:$4 sm:$0xff]  }
 0x194   :  { %2159 = vmatpush1.bf16.xpose.msra.mxu0 %v2951_v25  ;;  %1988 = vmatprep.subr.bf16.mxu1 %v2956_v26  ;;  %v3052_v25 = vld [vmem:[%s4050_s1 + $0x284] ss:$72 sps:$4 sm:$0xff]   ;;  %v3050_v26 = vld [vmem:[%s4050_s1 + $0x280] ss:$72 sps:$4 sm:$0xff]  }
 0x195   :  { %2160 = vmatprep.subr.bf16.mxu0 %v2959_v27  ;;  %v3055_v27 = vld [vmem:[%s4050_s1 + $0x314] ss:$72 sps:$4 sm:$0xff]  }
 0x19b   :  { %1989 = vmatpush1.bf16.xpose.msra.mxu1 %v2954_v28  ;;  %v3053_v28 = vld [vmem:[%s4050_s1 + $0x310] ss:$72 sps:$4 sm:$0xff]  }
 0x19c   :  { %2161 = vmatpush1.bf16.xpose.msra.mxu0 %v2957_v29  ;;  %1990 = vmatprep.subr.bf16.mxu1 %v2962_v30  ;;  %v3058_v29 = vld [vmem:[%s4050_s1 + $0x3a4] ss:$72 sps:$4 sm:$0xff]   ;;  %v3056_v30 = vld [vmem:[%s4050_s1 + $0x3a0] ss:$72 sps:$4 sm:$0xff]  }
 0x19d   :  { %2162 = vmatprep.subr.bf16.mxu0 %v2965_v31  ;;  %v3061_v31 = vld [vmem:[%s4050_s1 + $0x434] ss:$72 sps:$4 sm:$0xff]  }
 0x1a3   :  { %1991 = vmatpush1.bf16.xpose.msra.mxu1 %v2960_v32  ;;  %v3059_v32 = vld [vmem:[%s4050_s1 + $0x430] ss:$72 sps:$4 sm:$0xff]  }
 0x1a4   :  { %2163 = vmatpush1.bf16.xpose.msra.mxu0 %v2963_v33  ;;  %1992 = vmatprep.subr.bf16.mxu1 %v2968_v34  ;;  %v3064_v33 = vld [vmem:[%s4050_s1 + $0x4c4] ss:$72 sps:$4 sm:$0xff]   ;;  %v3062_v34 = vld [vmem:[%s4050_s1 + $0x4c0] ss:$72 sps:$4 sm:$0xff]  }
 0x1a5   :  { %2164 = vmatprep.subr.bf16.mxu0 %v2971_v35  ;;  %v3067_v35 = vld [vmem:[%s4050_s1 + $0x554] ss:$72 sps:$4 sm:$0xff]  }
 0x1ab   :  { %1993 = vmatpush1.bf16.xpose.msra.mxu1 %v2966_v36  ;;  %v3065_v36 = vld [vmem:[%s4050_s1 + $0x550] ss:$72 sps:$4 sm:$0xff]  }
 0x1ac   :  { %2165 = vmatpush1.bf16.xpose.msra.mxu0 %v2969_v37  ;;  %1994 = vmatprep.subr.bf16.mxu1 %v2974_v38  ;;  %v3070_v37 = vld [vmem:[%s4050_s1 + $0x5e4] ss:$72 sps:$4 sm:$0xff]   ;;  %v3068_v38 = vld [vmem:[%s4050_s1 + $0x5e0] ss:$72 sps:$4 sm:$0xff]  }
 0x1ad   :  { %2166 = vmatprep.subr.bf16.mxu0 %v2977_v39  ;;  %v3073_v39 = vld [vmem:[%s4050_s1 + $0x674] ss:$72 sps:$4 sm:$0xff]  }
 0x1b3   :  { %1995 = vmatpush1.bf16.xpose.msra.mxu1 %v2972_v40  ;;  %v3071_v40 = vld [vmem:[%s4050_s1 + $0x670] ss:$72 sps:$4 sm:$0xff]  }
 0x1b4   :  { %2167 = vmatpush1.bf16.xpose.msra.mxu0 %v2975_v41  ;;  %1996 = vmatprep.subr.bf16.mxu1 %v2980_v42  ;;  %v3076_v41 = vld [vmem:[%s4050_s1 + $0x704] ss:$72 sps:$4 sm:$0xff]   ;;  %v3074_v42 = vld [vmem:[%s4050_s1 + $0x700] ss:$72 sps:$4 sm:$0xff]  }
 0x1b5   :  { %2168 = vmatprep.subr.bf16.mxu0 %v2983_v43  ;;  %v3079_v43 = vld [vmem:[%s4050_s1 + $0x794] ss:$72 sps:$4 sm:$0xff]  }
 0x1bb   :  { %1997 = vmatpush1.bf16.xpose.msra.mxu1 %v2978_v44  ;;  %v3077_v44 = vld [vmem:[%s4050_s1 + $0x790] ss:$72 sps:$4 sm:$0xff]  }
 0x1bc   :  { %2169 = vmatpush1.bf16.xpose.msra.mxu0 %v2981_v45  ;;  %1998 = vmatprep.subr.bf16.mxu1 %v2986_v46  ;;  %v3082_v45 = vld [vmem:[%s4050_s1 + $0x824] ss:$72 sps:$4 sm:$0xff]   ;;  %v3080_v46 = vld [vmem:[%s4050_s1 + $0x820] ss:$72 sps:$4 sm:$0xff]  }
 0x1bd   :  { %2170 = vmatprep.subr.bf16.mxu0 %v2989_v47  ;;  %v3085_v47 = vld [vmem:[%s4050_s1 + $0x8b4] ss:$72 sps:$4 sm:$0xff]  }
 0x1c3   :  { %1999 = vmatpush1.bf16.xpose.msra.mxu1 %v2984_v48  ;;  %v3083_v48 = vld [vmem:[%s4050_s1 + $0x8b0] ss:$72 sps:$4 sm:$0xff]  }
 0x1c4   :  { %2171 = vmatpush1.bf16.xpose.msra.mxu0 %v2987_v49  ;;  %2000 = vmatprep.subr.bf16.mxu1 %v2992_v50  ;;  %v3086_v49 = vld [vmem:[%s4051_s0 + $0x40] ss:$72 sps:$4 sm:$0xff]  }
 0x1c5   :  { %2172 = vmatprep.subr.bf16.mxu0 %v2995_v51 }
 0x1cb   :  { %2001 = vmatpush1.bf16.xpose.msra.mxu1 %v2990_v52 }
 0x1cc   :  { %2173 = vmatpush1.bf16.xpose.msra.mxu0 %v2993_v53  ;;  %2002 = vmatprep.subr.bf16.mxu1 %v2998_v54  ;;  %v2242_v54 = vlaneseq }
 0x1cd   :  { %2174 = vmatprep.subr.bf16.mxu0 %v3001_v55 }
 0x1ce   :  { %v2243_v55 = vshrl.u32 %v2242_v54, 7 }
 0x1d3   :  { %2003 = vmatpush1.bf16.xpose.msra.mxu1 %v2996_v56  ;;  %v2244_v56 = vsub.s32 0, %v2243_v55 }
 0x1d4   :  { %2175 = vmatpush1.bf16.xpose.msra.mxu0 %v2999_v57  ;;  %2004 = vmatprep.subr.bf16.mxu1 %v3004_v58  ;;  %v2240_v57 = vld [vmem:[%s4052_s2] sm:$0x3]  ;;  %v2248_v58 = vsub.s32 1, %v2243_v55 }
 0x1d5   :  { %2176 = vmatprep.subr.bf16.mxu0 %v3007_v59  ;;  %v2256_v59 = vld [vmem:[%s4053_s3] sm:$0x3] }
 0x1db   :  { %2005 = vmatpush1.bf16.xpose.msra.mxu1 %v3002_v60  ;;  %v2245_v60 = vrot.slane %v2240_v57, %v2244_v56 }
 0x1dc   :  { %2177 = vmatpush1.bf16.xpose.msra.mxu0 %v3005_v61  ;;  %2006 = vmatprep.subr.bf16.mxu1 %v3010_v62  ;;  %v2249_v62 = vrot.slane %v2240_v57, %v2248_v58 }
 0x1dd   :  { %2178 = vmatprep.subr.bf16.mxu0 %v3013_v63 }
 0x1e3   :  { %2007 = vmatpush1.bf16.xpose.msra.mxu1 %v3008_v0  ;;  %v2261_v0 = vrot.slane %v2256_v59, %v2244_v56 }
 0x1e4   :  { %2179 = vmatpush1.bf16.xpose.msra.mxu0 %v3011_v1  ;;  %2008 = vmatprep.subr.bf16.mxu1 %v3016_v2 }
 0x1e5   :  { %2180 = vmatprep.subr.bf16.mxu0 %v3019_v3  ;;  %v2265_v3 = vrot.slane %v2256_v59, %v2248_v58 }
 0x1eb   :  { %2009 = vmatpush1.bf16.xpose.msra.mxu1 %v3014_v4 }
 0x1ec   :  { %2181 = vmatpush1.bf16.xpose.msra.mxu0 %v3017_v5  ;;  %2010 = vmatprep.subr.bf16.mxu1 %v3022_v6 }
 0x1ed   :  { %2182 = vmatprep.subr.bf16.mxu0 %v3025_v7 }
 0x1f3   :  { %2011 = vmatpush1.bf16.xpose.msra.mxu1 %v3020_v8 }
 0x1f4   :  { %2183 = vmatpush1.bf16.xpose.msra.mxu0 %v3023_v9  ;;  %2012 = vmatprep.subr.bf16.mxu1 %v3028_v10 }
 0x1f5   :  { %2184 = vmatprep.subr.bf16.mxu0 %v3031_v11 }
 0x1fb   :  { %2013 = vmatpush1.bf16.xpose.msra.mxu1 %v3026_v12 }
 0x1fc   :  { %2185 = vmatpush1.bf16.xpose.msra.mxu0 %v3029_v13 }
 0x1fd   :  { %2197 = vmatprep.subr.bf16.mxu0 %v3040_v14 }
 0x202   :  { %2015 = vmatmul.mubr.bf16.vlgmr.msra.gmra.mrb[0].mxu1 %v3032_v15 }
 0x203   :  { %2187 = vmatmul.mubr.bf16.vlgmr.msra.gmra.mrb[0].mxu0 %v3035_v16 }
 0x204   :  { %2198 = vmatpush1.bf16.xpose.msra.mxu0 %v3038_v17  ;;  %2229 = vmatprep.mubr.bf16.mxu0 %v3088_v18 }
 0x205   :  { %2199 = vmatprep.subr.bf16.mxu0 %v3043_v19 }
 0x20c   :  { %2200 = vmatpush1.bf16.xpose.msra.mxu0 %v3041_v20 }
 0x20d   :  { %2201 = vmatprep.subr.bf16.mxu0 %v3046_v21 }
 0x214   :  { %2202 = vmatpush1.bf16.xpose.msra.mxu0 %v3044_v22 }
 0x215   :  { %2203 = vmatprep.subr.bf16.mxu0 %v3049_v23 }
 0x21c   :  { %2204 = vmatpush1.bf16.xpose.msra.mxu0 %v3047_v24 }
 0x21d   :  { %2205 = vmatprep.subr.bf16.mxu0 %v3052_v25 }
 0x224   :  { %2206 = vmatpush1.bf16.xpose.msra.mxu0 %v3050_v26 }
 0x225   :  { %2207 = vmatprep.subr.bf16.mxu0 %v3055_v27 }
 0x22c   :  { %2208 = vmatpush1.bf16.xpose.msra.mxu0 %v3053_v28 }
 0x22d   :  { %2209 = vmatprep.subr.bf16.mxu0 %v3058_v29 }
 0x234   :  { %2210 = vmatpush1.bf16.xpose.msra.mxu0 %v3056_v30 }
 0x235   :  { %2211 = vmatprep.subr.bf16.mxu0 %v3061_v31 }
 0x23c   :  { %2212 = vmatpush1.bf16.xpose.msra.mxu0 %v3059_v32 }
 0x23d   :  { %2213 = vmatprep.subr.bf16.mxu0 %v3064_v33 }
 0x244   :  { %2214 = vmatpush1.bf16.xpose.msra.mxu0 %v3062_v34 }
 0x245   :  { %2215 = vmatprep.subr.bf16.mxu0 %v3067_v35 }
 0x24c   :  { %2216 = vmatpush1.bf16.xpose.msra.mxu0 %v3065_v36 }
 0x24d   :  { %2217 = vmatprep.subr.bf16.mxu0 %v3070_v37 }
 0x254   :  { %2218 = vmatpush1.bf16.xpose.msra.mxu0 %v3068_v38 }
 0x255   :  { %2219 = vmatprep.subr.bf16.mxu0 %v3073_v39 }
 0x25c   :  { %2220 = vmatpush1.bf16.xpose.msra.mxu0 %v3071_v40 }
 0x25d   :  { %2221 = vmatprep.subr.bf16.mxu0 %v3076_v41 }
 0x264   :  { %2222 = vmatpush1.bf16.xpose.msra.mxu0 %v3074_v42 }
 0x265   :  { %2223 = vmatprep.subr.bf16.mxu0 %v3079_v43 }
 0x26c   :  { %2224 = vmatpush1.bf16.xpose.msra.mxu0 %v3077_v44 }
 0x26d   :  { %2225 = vmatprep.subr.bf16.mxu0 %v3082_v45 }
 0x274   :  { %2226 = vmatpush1.bf16.xpose.msra.mxu0 %v3080_v46 }
 0x275   :  { %2227 = vmatprep.subr.bf16.mxu0 %v3085_v47 }
 0x27c   :  { %2228 = vmatpush1.bf16.xpose.msra.mxu0 %v3083_v48 }
 0x283   :  { %2230 = vmatmul.mubr.bf16.vlgmr.msra.gmra.mrb[0].mxu0 %v3086_v49 }
 0x2d5   :  { %v2016_v50 = vpop.f32.mrb[0].mxu1 }
 0x2d6   :  { %v2018_v51 = vpop.f32.mrb[1].mxu1 }
 0x2d7   :  { %v2020_v52 = vpop.f32.mrb[2].mxu1 }
 0x2d8   :  { %v2022_v53 = vpop.f32.mrb[3].mxu1 }
 0x356   :  { %v2231_v61 = vpop.f32.mrb[0].mxu0 }
 0x357   :  { %v2598_v63 = vadd.f32 %v2231_v61, %v2016_v50  ;;  %v2233_v1 = vpop.f32.mrb[1].mxu0 }
 0x358   :  { %v2599_v2 = vadd.f32 %v2233_v1, %v2018_v51  ;;  %v2235_v4 = vpop.f32.mrb[2].mxu0 }
 0x359   :  { %v2252_v5 = vmul.f32 %v2598_v63, %v2245_v60  ;;  %v2600_v6 = vadd.f32 %v2235_v4, %v2020_v52  ;;  %v2237_v7 = vpop.f32.mrb[3].mxu0 }
 0x35a   :  { %v2253_v8 = vmul.f32 %v2599_v2, %v2249_v62  ;;  %v2601_v9 = vadd.f32 %v2237_v7, %v2022_v53 }
 0x35b   :  { %v2268_v10 = vadd.f32 %v2261_v0, %v2252_v5  ;;  %v2254_v11 = vmul.f32 %v2600_v6, %v2245_v60 }
 0x35c   :  { %v2269_v12 = vadd.f32 %v2265_v3, %v2253_v8  ;;  %v2255_v13 = vmul.f32 %v2601_v9, %v2249_v62 }
 0x35d   :  { %vm2272_vm0 = vcmp.gt.f32.partialorder %v2268_v10, 0.0  ;;  %v2276_v14 = vmul.f32 0.2, %v2268_v10  ;;  %v2270_v15 = vadd.f32 %v2261_v0, %v2254_v11 }
 0x35e   :  { %vm2273_vm1 = vcmp.gt.f32.partialorder %v2269_v12, 0.0  ;;  %v2277_v16 = vmul.f32 0.2, %v2269_v12  ;;  %v2271_v17 = vadd.f32 %v2265_v3, %v2255_v13 }
 0x35f   :  { %v2280_v18 = vsel %vm2272_vm0, %v2268_v10, %v2276_v14  ;;  %vm2274_vm2 = vcmp.gt.f32.partialorder %v2270_v15, 0.0  ;;  %v2278_v19 = vmul.f32 0.2, %v2270_v15 }
 0x360   :  { %2284 = vst [vmem:[%s4054_s4] sm:$0xff] %v2280_v18  ;;  %v2281_v20 = vsel %vm2273_vm1, %v2269_v12, %v2277_v16  ;;  %vm2275_vm3 = vcmp.gt.f32.partialorder %v2271_v17, 0.0  ;;  %v2279_v21 = vmul.f32 0.2, %v2271_v17 }
 0x361   :  { %2285 = vst [vmem:[%s4054_s4 + $0x8] sm:$0xff] %v2281_v20  ;;  %v2282_v22 = vsel %vm2274_vm2, %v2270_v15, %v2278_v19 }
 0x362   :  { %2286 = vst [vmem:[%s4054_s4 + $0x10] sm:$0xff] %v2282_v22  ;;  %v2283_v23 = vsel %vm2275_vm3, %v2271_v17, %v2279_v21 }
 0x363   :  { %2287 = vst [vmem:[%s4054_s4 + $0x18] sm:$0xff] %v2283_v23 }

// kernel: discriminator_forward.16
= control target key start
LH: loop header
LB: loop body
LE: loop exit
PB: predicated region body
PF: predicated region fallthrough
CT: control target
= control target key end

     0   :  { %s7837_s1 = inlined_call_operand.vmem [shape: bf16[512,2304], index: 1, kind: input, shape index: {}]   ;;  %s7838_s0 = inlined_call_operand.vmem [shape: bf16[16,2304], index: 0, kind: input, shape index: {}]   ;;  %s7839_s2 = inlined_call_operand.vmem [shape: f32[1,512], index: 2, kind: input, shape index: {}]   ;;  %s7840_s3 = inlined_call_operand.vmem [shape: f32[1,512], index: 3, kind: input, shape index: {}]   ;;  %s7841_s4 = inlined_call_operand.vmem [shape: f32[16,512], index: 4, kind: output, shape index: {}]  }
   0x1   :  { %v5109_v0 = vld [vmem:[%s7837_s1 + $0x4] ss:$72 sps:$4 sm:$0xff]   ;;  %v5113_v2 = vld [vmem:[%s7837_s1] ss:$72 sps:$4 sm:$0xff]   ;;  %v5115_v4 = vld [vmem:[%s7837_s1 + $0x94] ss:$72 sps:$4 sm:$0xff]  }
   0x2   :  { %v5111_v1 = vld [vmem:[%s7837_s1 + $0x904] ss:$72 sps:$4 sm:$0xff]   ;;  %3581 = vmatprep.subr.bf16.mxu0 %v5109_v0  ;;  %v5114_v3 = vld [vmem:[%s7837_s1 + $0x900] ss:$72 sps:$4 sm:$0xff]   ;;  %v5117_v5 = vld [vmem:[%s7837_s1 + $0x994] ss:$72 sps:$4 sm:$0xff]  }
   0x3   :  { %3968 = vmatprep.subr.bf16.mxu1 %v5111_v1  ;;  %3582 = vmatpush1.bf16.xpose.msra.mxu0 %v5113_v2  ;;  %v5119_v6 = vld [vmem:[%s7837_s1 + $0x90] ss:$72 sps:$4 sm:$0xff]   ;;  %v5121_v8 = vld [vmem:[%s7837_s1 + $0x124] ss:$72 sps:$4 sm:$0xff]   ;;  %v5125_v10 = vld [vmem:[%s7837_s1 + $0x120] ss:$72 sps:$4 sm:$0xff]  }
   0x4   :  { %3969 = vmatpush1.bf16.xpose.msra.mxu1 %v5114_v3  ;;  %3583 = vmatprep.subr.bf16.mxu0 %v5115_v4  ;;  %v5120_v7 = vld [vmem:[%s7837_s1 + $0x990] ss:$72 sps:$4 sm:$0xff]   ;;  %v5123_v9 = vld [vmem:[%s7837_s1 + $0xa24] ss:$72 sps:$4 sm:$0xff]   ;;  %v5126_v11 = vld [vmem:[%s7837_s1 + $0xa20] ss:$72 sps:$4 sm:$0xff]  }
   0x5   :  { %3970 = vmatprep.subr.bf16.mxu1 %v5117_v5  ;;  %v5127_v12 = vld [vmem:[%s7837_s1 + $0x1b4] ss:$72 sps:$4 sm:$0xff]   ;;  %v5131_v14 = vld [vmem:[%s7837_s1 + $0x1b0] ss:$72 sps:$4 sm:$0xff]   ;;  %v5133_v16 = vld [vmem:[%s7837_s1 + $0x244] ss:$72 sps:$4 sm:$0xff]  }
   0x6   :  { %v5129_v13 = vld [vmem:[%s7837_s1 + $0xab4] ss:$72 sps:$4 sm:$0xff]   ;;  %v5132_v15 = vld [vmem:[%s7837_s1 + $0xab0] ss:$72 sps:$4 sm:$0xff]   ;;  %v5135_v17 = vld [vmem:[%s7837_s1 + $0xb44] ss:$72 sps:$4 sm:$0xff]  }
   0x7   :  { %v5137_v18 = vld [vmem:[%s7837_s1 + $0x240] ss:$72 sps:$4 sm:$0xff]   ;;  %v5139_v20 = vld [vmem:[%s7837_s1 + $0x2d4] ss:$72 sps:$4 sm:$0xff]   ;;  %v5143_v22 = vld [vmem:[%s7837_s1 + $0x2d0] ss:$72 sps:$4 sm:$0xff]  }
   0x8   :  { %v5138_v19 = vld [vmem:[%s7837_s1 + $0xb40] ss:$72 sps:$4 sm:$0xff]   ;;  %v5141_v21 = vld [vmem:[%s7837_s1 + $0xbd4] ss:$72 sps:$4 sm:$0xff]   ;;  %v5144_v23 = vld [vmem:[%s7837_s1 + $0xbd0] ss:$72 sps:$4 sm:$0xff]  }
   0x9   :  { %v5145_v24 = vld [vmem:[%s7837_s1 + $0x364] ss:$72 sps:$4 sm:$0xff]   ;;  %v5149_v27 = vld [vmem:[%s7837_s1 + $0x360] ss:$72 sps:$4 sm:$0xff]   ;;  %v5151_v29 = vld [vmem:[%s7837_s1 + $0x3f4] ss:$72 sps:$4 sm:$0xff]  }
   0xa   :  { %v5147_v25 = vld [vmem:[%s7837_s1 + $0xc64] ss:$72 sps:$4 sm:$0xff]   ;;  %v5150_v28 = vld [vmem:[%s7837_s1 + $0xc60] ss:$72 sps:$4 sm:$0xff]   ;;  %v5153_v30 = vld [vmem:[%s7837_s1 + $0xcf4] ss:$72 sps:$4 sm:$0xff]  }
   0xb   :  { %3584 = vmatpush1.bf16.xpose.msra.mxu0 %v5119_v6  ;;  %v5207_v26 = vld [vmem:[%s7838_s0 + $0x4] ss:$72 sps:$4 sm:$0xff]   ;;  %v5155_v31 = vld [vmem:[%s7837_s1 + $0x3f0] ss:$72 sps:$4 sm:$0xff]   ;;  %v5161_v35 = vld [vmem:[%s7837_s1 + $0x480] ss:$72 sps:$4 sm:$0xff]  }
   0xc   :  { %3971 = vmatpush1.bf16.xpose.msra.mxu1 %v5120_v7  ;;  %3585 = vmatprep.subr.bf16.mxu0 %v5121_v8  ;;  %v5156_v32 = vld [vmem:[%s7837_s1 + $0xcf0] ss:$72 sps:$4 sm:$0xff]   ;;  %v5157_v33 = vld [vmem:[%s7837_s1 + $0x484] ss:$72 sps:$4 sm:$0xff]   ;;  %v5162_v36 = vld [vmem:[%s7837_s1 + $0xd80] ss:$72 sps:$4 sm:$0xff]  }
   0xd   :  { %3972 = vmatprep.subr.bf16.mxu1 %v5123_v9  ;;  %3613 = vmatprep.mubr.bf16.mxu0 %v5207_v26  ;;  %v5159_v34 = vld [vmem:[%s7837_s1 + $0xd84] ss:$72 sps:$4 sm:$0xff]   ;;  %v5163_v37 = vld [vmem:[%s7837_s1 + $0x514] ss:$72 sps:$4 sm:$0xff]   ;;  %v5167_v39 = vld [vmem:[%s7837_s1 + $0x510] ss:$72 sps:$4 sm:$0xff]  }
   0xe   :  { %4000 = vmatprep.mubr.bf16.mxu1 %v5207_v26  ;;  %v5165_v38 = vld [vmem:[%s7837_s1 + $0xe14] ss:$72 sps:$4 sm:$0xff]   ;;  %v5168_v40 = vld [vmem:[%s7837_s1 + $0xe10] ss:$72 sps:$4 sm:$0xff]   ;;  %v5169_v41 = vld [vmem:[%s7837_s1 + $0x5a4] ss:$72 sps:$4 sm:$0xff]  }
   0xf   :  { %v5171_v42 = vld [vmem:[%s7837_s1 + $0xea4] ss:$72 sps:$4 sm:$0xff]   ;;  %v5173_v43 = vld [vmem:[%s7837_s1 + $0x5a0] ss:$72 sps:$4 sm:$0xff]   ;;  %v5175_v45 = vld [vmem:[%s7837_s1 + $0x634] ss:$72 sps:$4 sm:$0xff]  }
  0x10   :  { %v5174_v44 = vld [vmem:[%s7837_s1 + $0xea0] ss:$72 sps:$4 sm:$0xff]   ;;  %v5177_v46 = vld [vmem:[%s7837_s1 + $0xf34] ss:$72 sps:$4 sm:$0xff]   ;;  %v5179_v47 = vld [vmem:[%s7837_s1 + $0x630] ss:$72 sps:$4 sm:$0xff]  }
  0x11   :  { %v5180_v48 = vld [vmem:[%s7837_s1 + $0xf30] ss:$72 sps:$4 sm:$0xff]   ;;  %v5181_v49 = vld [vmem:[%s7837_s1 + $0x6c4] ss:$72 sps:$4 sm:$0xff]   ;;  %v5185_v51 = vld [vmem:[%s7837_s1 + $0x6c0] ss:$72 sps:$4 sm:$0xff]  }
  0x12   :  { %v5183_v50 = vld [vmem:[%s7837_s1 + $0xfc4] ss:$72 sps:$4 sm:$0xff]   ;;  %v5186_v52 = vld [vmem:[%s7837_s1 + $0xfc0] ss:$72 sps:$4 sm:$0xff]   ;;  %v5187_v53 = vld [vmem:[%s7837_s1 + $0x754] ss:$72 sps:$4 sm:$0xff]  }
  0x13   :  { %3586 = vmatpush1.bf16.xpose.msra.mxu0 %v5125_v10  ;;  %v5189_v54 = vld [vmem:[%s7837_s1 + $0x1054] ss:$72 sps:$4 sm:$0xff]   ;;  %v5191_v55 = vld [vmem:[%s7837_s1 + $0x750] ss:$72 sps:$4 sm:$0xff]   ;;  %v5193_v57 = vld [vmem:[%s7837_s1 + $0x7e4] ss:$72 sps:$4 sm:$0xff]  }
  0x14   :  { %3973 = vmatpush1.bf16.xpose.msra.mxu1 %v5126_v11  ;;  %3587 = vmatprep.subr.bf16.mxu0 %v5127_v12  ;;  %v5192_v56 = vld [vmem:[%s7837_s1 + $0x1050] ss:$72 sps:$4 sm:$0xff]   ;;  %v5195_v58 = vld [vmem:[%s7837_s1 + $0x10e4] ss:$72 sps:$4 sm:$0xff]   ;;  %v5197_v59 = vld [vmem:[%s7837_s1 + $0x7e0] ss:$72 sps:$4 sm:$0xff]  }
  0x15   :  { %3974 = vmatprep.subr.bf16.mxu1 %v5129_v13  ;;  %v5198_v60 = vld [vmem:[%s7837_s1 + $0x10e0] ss:$72 sps:$4 sm:$0xff]   ;;  %v5199_v61 = vld [vmem:[%s7837_s1 + $0x874] ss:$72 sps:$4 sm:$0xff]   ;;  %v5203_v63 = vld [vmem:[%s7837_s1 + $0x870] ss:$72 sps:$4 sm:$0xff]  }
  0x16   :  { %v5201_v62 = vld [vmem:[%s7837_s1 + $0x1174] ss:$72 sps:$4 sm:$0xff]   ;;  %v5204_v0 = vld [vmem:[%s7837_s1 + $0x1170] ss:$72 sps:$4 sm:$0xff]   ;;  %v5205_v3 = vld [vmem:[%s7838_s0] ss:$72 sps:$4 sm:$0xff]  }
  0x17   :  { %v5210_v1 = vld [vmem:[%s7837_s1 + $0xc] ss:$72 sps:$4 sm:$0xff]   ;;  %v5208_v4 = vld [vmem:[%s7837_s1 + $0x8] ss:$72 sps:$4 sm:$0xff]   ;;  %v5216_v6 = vld [vmem:[%s7837_s1 + $0x9c] ss:$72 sps:$4 sm:$0xff]  }
  0x18   :  { %v5213_v2 = vld [vmem:[%s7837_s1 + $0x90c] ss:$72 sps:$4 sm:$0xff]   ;;  %v5211_v5 = vld [vmem:[%s7837_s1 + $0x908] ss:$72 sps:$4 sm:$0xff]   ;;  %v5219_v7 = vld [vmem:[%s7837_s1 + $0x99c] ss:$72 sps:$4 sm:$0xff]  }
  0x19   :  { %v5306_v8 = vld [vmem:[%s7838_s0 + $0xc] ss:$72 sps:$4 sm:$0xff]   ;;  %v5214_v9 = vld [vmem:[%s7837_s1 + $0x98] ss:$72 sps:$4 sm:$0xff]   ;;  %v5220_v13 = vld [vmem:[%s7837_s1 + $0x128] ss:$72 sps:$4 sm:$0xff]  }
  0x1a   :  { %v5217_v10 = vld [vmem:[%s7837_s1 + $0x998] ss:$72 sps:$4 sm:$0xff]   ;;  %v5222_v11 = vld [vmem:[%s7837_s1 + $0x12c] ss:$72 sps:$4 sm:$0xff]  }
  0x1b   :  { %3588 = vmatpush1.bf16.xpose.msra.mxu0 %v5131_v14  ;;  %v5225_v12 = vld [vmem:[%s7837_s1 + $0xa2c] ss:$72 sps:$4 sm:$0xff]   ;;  %v5223_v14 = vld [vmem:[%s7837_s1 + $0xa28] ss:$72 sps:$4 sm:$0xff]   ;;  %v5241_v26 = vld [vmem:[%s7837_s1 + $0xbd8] ss:$72 sps:$4 sm:$0xff]  }
  0x1c   :  { %3975 = vmatpush1.bf16.xpose.msra.mxu1 %v5132_v15  ;;  %3589 = vmatprep.subr.bf16.mxu0 %v5133_v16  ;;  %v5228_v15 = vld [vmem:[%s7837_s1 + $0x1bc] ss:$72 sps:$4 sm:$0xff]  }
  0x1d   :  { %3976 = vmatprep.subr.bf16.mxu1 %v5135_v17  ;;  %v5231_v16 = vld [vmem:[%s7837_s1 + $0xabc] ss:$72 sps:$4 sm:$0xff]   ;;  %v5226_v17 = vld [vmem:[%s7837_s1 + $0x1b8] ss:$72 sps:$4 sm:$0xff]  }
  0x23   :  { %3590 = vmatpush1.bf16.xpose.msra.mxu0 %v5137_v18  ;;  %v5229_v18 = vld [vmem:[%s7837_s1 + $0xab8] ss:$72 sps:$4 sm:$0xff]  }
  0x24   :  { %3977 = vmatpush1.bf16.xpose.msra.mxu1 %v5138_v19  ;;  %3591 = vmatprep.subr.bf16.mxu0 %v5139_v20  ;;  %v5234_v19 = vld [vmem:[%s7837_s1 + $0x24c] ss:$72 sps:$4 sm:$0xff]  }
  0x25   :  { %3978 = vmatprep.subr.bf16.mxu1 %v5141_v21  ;;  %v5237_v20 = vld [vmem:[%s7837_s1 + $0xb4c] ss:$72 sps:$4 sm:$0xff]   ;;  %v5232_v21 = vld [vmem:[%s7837_s1 + $0x248] ss:$72 sps:$4 sm:$0xff]  }
  0x2b   :  { %3592 = vmatpush1.bf16.xpose.msra.mxu0 %v5143_v22  ;;  %v5235_v22 = vld [vmem:[%s7837_s1 + $0xb48] ss:$72 sps:$4 sm:$0xff]  }
  0x2c   :  { %3979 = vmatpush1.bf16.xpose.msra.mxu1 %v5144_v23  ;;  %3593 = vmatprep.subr.bf16.mxu0 %v5145_v24  ;;  %v5240_v23 = vld [vmem:[%s7837_s1 + $0x2dc] ss:$72 sps:$4 sm:$0xff]  }
  0x2d   :  { %3980 = vmatprep.subr.bf16.mxu1 %v5147_v25  ;;  %v5243_v24 = vld [vmem:[%s7837_s1 + $0xbdc] ss:$72 sps:$4 sm:$0xff]   ;;  %v5238_v25 = vld [vmem:[%s7837_s1 + $0x2d8] ss:$72 sps:$4 sm:$0xff]  }
  0x33   :  { %3594 = vmatpush1.bf16.xpose.msra.mxu0 %v5149_v27  ;;  %v5246_v27 = vld [vmem:[%s7837_s1 + $0x36c] ss:$72 sps:$4 sm:$0xff]  }
  0x34   :  { %3981 = vmatpush1.bf16.xpose.msra.mxu1 %v5150_v28  ;;  %3595 = vmatprep.subr.bf16.mxu0 %v5151_v29  ;;  %v5249_v28 = vld [vmem:[%s7837_s1 + $0xc6c] ss:$72 sps:$4 sm:$0xff]   ;;  %v5244_v29 = vld [vmem:[%s7837_s1 + $0x368] ss:$72 sps:$4 sm:$0xff]  }
  0x35   :  { %3982 = vmatprep.subr.bf16.mxu1 %v5153_v30  ;;  %v5247_v30 = vld [vmem:[%s7837_s1 + $0xc68] ss:$72 sps:$4 sm:$0xff]  }
  0x3b   :  { %3596 = vmatpush1.bf16.xpose.msra.mxu0 %v5155_v31  ;;  %v5252_v31 = vld [vmem:[%s7837_s1 + $0x3fc] ss:$72 sps:$4 sm:$0xff]  }
  0x3c   :  { %3983 = vmatpush1.bf16.xpose.msra.mxu1 %v5156_v32  ;;  %3597 = vmatprep.subr.bf16.mxu0 %v5157_v33  ;;  %v5255_v32 = vld [vmem:[%s7837_s1 + $0xcfc] ss:$72 sps:$4 sm:$0xff]   ;;  %v5250_v33 = vld [vmem:[%s7837_s1 + $0x3f8] ss:$72 sps:$4 sm:$0xff]  }
  0x3d   :  { %3984 = vmatprep.subr.bf16.mxu1 %v5159_v34  ;;  %v5253_v34 = vld [vmem:[%s7837_s1 + $0xcf8] ss:$72 sps:$4 sm:$0xff]  }
  0x43   :  { %3598 = vmatpush1.bf16.xpose.msra.mxu0 %v5161_v35  ;;  %v5258_v35 = vld [vmem:[%s7837_s1 + $0x48c] ss:$72 sps:$4 sm:$0xff]  }
  0x44   :  { %3985 = vmatpush1.bf16.xpose.msra.mxu1 %v5162_v36  ;;  %3599 = vmatprep.subr.bf16.mxu0 %v5163_v37  ;;  %v5261_v36 = vld [vmem:[%s7837_s1 + $0xd8c] ss:$72 sps:$4 sm:$0xff]   ;;  %v5256_v37 = vld [vmem:[%s7837_s1 + $0x488] ss:$72 sps:$4 sm:$0xff]  }
  0x45   :  { %3986 = vmatprep.subr.bf16.mxu1 %v5165_v38  ;;  %v5259_v38 = vld [vmem:[%s7837_s1 + $0xd88] ss:$72 sps:$4 sm:$0xff]  }
  0x4b   :  { %3600 = vmatpush1.bf16.xpose.msra.mxu0 %v5167_v39  ;;  %v5264_v39 = vld [vmem:[%s7837_s1 + $0x51c] ss:$72 sps:$4 sm:$0xff]  }
  0x4c   :  { %3987 = vmatpush1.bf16.xpose.msra.mxu1 %v5168_v40  ;;  %3601 = vmatprep.subr.bf16.mxu0 %v5169_v41  ;;  %v5267_v40 = vld [vmem:[%s7837_s1 + $0xe1c] ss:$72 sps:$4 sm:$0xff]   ;;  %v5262_v41 = vld [vmem:[%s7837_s1 + $0x518] ss:$72 sps:$4 sm:$0xff]  }
  0x4d   :  { %3988 = vmatprep.subr.bf16.mxu1 %v5171_v42  ;;  %v5265_v42 = vld [vmem:[%s7837_s1 + $0xe18] ss:$72 sps:$4 sm:$0xff]  }
  0x53   :  { %3602 = vmatpush1.bf16.xpose.msra.mxu0 %v5173_v43  ;;  %v5270_v43 = vld [vmem:[%s7837_s1 + $0x5ac] ss:$72 sps:$4 sm:$0xff]  }
  0x54   :  { %3989 = vmatpush1.bf16.xpose.msra.mxu1 %v5174_v44  ;;  %3603 = vmatprep.subr.bf16.mxu0 %v5175_v45  ;;  %v5273_v44 = vld [vmem:[%s7837_s1 + $0xeac] ss:$72 sps:$4 sm:$0xff]   ;;  %v5268_v45 = vld [vmem:[%s7837_s1 + $0x5a8] ss:$72 sps:$4 sm:$0xff]  }
  0x55   :  { %3990 = vmatprep.subr.bf16.mxu1 %v5177_v46  ;;  %v5271_v46 = vld [vmem:[%s7837_s1 + $0xea8] ss:$72 sps:$4 sm:$0xff]  }
  0x5b   :  { %3604 = vmatpush1.bf16.xpose.msra.mxu0 %v5179_v47  ;;  %v5276_v47 = vld [vmem:[%s7837_s1 + $0x63c] ss:$72 sps:$4 sm:$0xff]  }
  0x5c   :  { %3991 = vmatpush1.bf16.xpose.msra.mxu1 %v5180_v48  ;;  %3605 = vmatprep.subr.bf16.mxu0 %v5181_v49  ;;  %v5279_v48 = vld [vmem:[%s7837_s1 + $0xf3c] ss:$72 sps:$4 sm:$0xff]   ;;  %v5274_v49 = vld [vmem:[%s7837_s1 + $0x638] ss:$72 sps:$4 sm:$0xff]  }
  0x5d   :  { %3992 = vmatprep.subr.bf16.mxu1 %v5183_v50  ;;  %v5277_v50 = vld [vmem:[%s7837_s1 + $0xf38] ss:$72 sps:$4 sm:$0xff]  }
  0x63   :  { %3606 = vmatpush1.bf16.xpose.msra.mxu0 %v5185_v51  ;;  %v5282_v51 = vld [vmem:[%s7837_s1 + $0x6cc] ss:$72 sps:$4 sm:$0xff]  }
  0x64   :  { %3993 = vmatpush1.bf16.xpose.msra.mxu1 %v5186_v52  ;;  %3607 = vmatprep.subr.bf16.mxu0 %v5187_v53  ;;  %v5285_v52 = vld [vmem:[%s7837_s1 + $0xfcc] ss:$72 sps:$4 sm:$0xff]   ;;  %v5280_v53 = vld [vmem:[%s7837_s1 + $0x6c8] ss:$72 sps:$4 sm:$0xff]  }
  0x65   :  { %3994 = vmatprep.subr.bf16.mxu1 %v5189_v54  ;;  %v5283_v54 = vld [vmem:[%s7837_s1 + $0xfc8] ss:$72 sps:$4 sm:$0xff]  }
  0x6b   :  { %3608 = vmatpush1.bf16.xpose.msra.mxu0 %v5191_v55  ;;  %v5288_v55 = vld [vmem:[%s7837_s1 + $0x75c] ss:$72 sps:$4 sm:$0xff]  }
  0x6c   :  { %3995 = vmatpush1.bf16.xpose.msra.mxu1 %v5192_v56  ;;  %3609 = vmatprep.subr.bf16.mxu0 %v5193_v57  ;;  %v5291_v56 = vld [vmem:[%s7837_s1 + $0x105c] ss:$72 sps:$4 sm:$0xff]   ;;  %v5286_v57 = vld [vmem:[%s7837_s1 + $0x758] ss:$72 sps:$4 sm:$0xff]  }
  0x6d   :  { %3996 = vmatprep.subr.bf16.mxu1 %v5195_v58  ;;  %v5289_v58 = vld [vmem:[%s7837_s1 + $0x1058] ss:$72 sps:$4 sm:$0xff]  }
  0x73   :  { %3610 = vmatpush1.bf16.xpose.msra.mxu0 %v5197_v59  ;;  %v5294_v59 = vld [vmem:[%s7837_s1 + $0x7ec] ss:$72 sps:$4 sm:$0xff]  }
  0x74   :  { %3997 = vmatpush1.bf16.xpose.msra.mxu1 %v5198_v60  ;;  %3611 = vmatprep.subr.bf16.mxu0 %v5199_v61  ;;  %v5297_v60 = vld [vmem:[%s7837_s1 + $0x10ec] ss:$72 sps:$4 sm:$0xff]   ;;  %v5292_v61 = vld [vmem:[%s7837_s1 + $0x7e8] ss:$72 sps:$4 sm:$0xff]  }
  0x75   :  { %3998 = vmatprep.subr.bf16.mxu1 %v5201_v62  ;;  %v5295_v62 = vld [vmem:[%s7837_s1 + $0x10e8] ss:$72 sps:$4 sm:$0xff]  }
  0x7b   :  { %3612 = vmatpush1.bf16.xpose.msra.mxu0 %v5203_v63  ;;  %v5300_v63 = vld [vmem:[%s7837_s1 + $0x87c] ss:$72 sps:$4 sm:$0xff]  }
  0x7c   :  { %3999 = vmatpush1.bf16.xpose.msra.mxu1 %v5204_v0  ;;  %3624 = vmatprep.subr.bf16.mxu0 %v5210_v1  ;;  %v5303_v0 = vld [vmem:[%s7837_s1 + $0x117c] ss:$72 sps:$4 sm:$0xff]   ;;  %v5298_v1 = vld [vmem:[%s7837_s1 + $0x878] ss:$72 sps:$4 sm:$0xff]  }
  0x7d   :  { %4011 = vmatprep.subr.bf16.mxu1 %v5213_v2  ;;  %v5301_v2 = vld [vmem:[%s7837_s1 + $0x1178] ss:$72 sps:$4 sm:$0xff]  }
  0x82   :  { %3614 = vmatmul.mubr.bf16.vlgmr.msra.gmra.mrb[0].mxu0 %v5205_v3 }
  0x83   :  { %4001 = vmatmul.mubr.bf16.vlgmr.msra.gmra.mrb[0].mxu1 %v5205_v3  ;;  %3625 = vmatpush1.bf16.xpose.msra.mxu0 %v5208_v4  ;;  %v5309_v3 = vld [vmem:[%s7837_s1 + $0x14] ss:$72 sps:$4 sm:$0xff]  }
  0x84   :  { %4012 = vmatpush1.bf16.xpose.msra.mxu1 %v5211_v5  ;;  %3626 = vmatprep.subr.bf16.mxu0 %v5216_v6  ;;  %v5312_v4 = vld [vmem:[%s7837_s1 + $0x914] ss:$72 sps:$4 sm:$0xff]   ;;  %v5304_v5 = vld [vmem:[%s7838_s0 + $0x8] ss:$72 sps:$4 sm:$0xff]  }
  0x85   :  { %4013 = vmatprep.subr.bf16.mxu1 %v5219_v7  ;;  %3656 = vmatprep.mubr.bf16.mxu0 %v5306_v8  ;;  %v5307_v6 = vld [vmem:[%s7837_s1 + $0x10] ss:$72 sps:$4 sm:$0xff]  }
  0x86   :  { %4043 = vmatprep.mubr.bf16.mxu1 %v5306_v8  ;;  %v5310_v7 = vld [vmem:[%s7837_s1 + $0x910] ss:$72 sps:$4 sm:$0xff]   ;;  %v5315_v8 = vld [vmem:[%s7837_s1 + $0xa4] ss:$72 sps:$4 sm:$0xff]  }
  0x8b   :  { %3627 = vmatpush1.bf16.xpose.msra.mxu0 %v5214_v9  ;;  %v5318_v9 = vld [vmem:[%s7837_s1 + $0x9a4] ss:$72 sps:$4 sm:$0xff]  }
  0x8c   :  { %4014 = vmatpush1.bf16.xpose.msra.mxu1 %v5217_v10  ;;  %3628 = vmatprep.subr.bf16.mxu0 %v5222_v11  ;;  %v5405_v10 = vld [vmem:[%s7838_s0 + $0x14] ss:$72 sps:$4 sm:$0xff]   ;;  %v5313_v11 = vld [vmem:[%s7837_s1 + $0xa0] ss:$72 sps:$4 sm:$0xff]  }
  0x8d   :  { %4015 = vmatprep.subr.bf16.mxu1 %v5225_v12  ;;  %v5316_v12 = vld [vmem:[%s7837_s1 + $0x9a0] ss:$72 sps:$4 sm:$0xff]  }
  0x93   :  { %3629 = vmatpush1.bf16.xpose.msra.mxu0 %v5220_v13  ;;  %v5321_v13 = vld [vmem:[%s7837_s1 + $0x134] ss:$72 sps:$4 sm:$0xff]  }
  0x94   :  { %4016 = vmatpush1.bf16.xpose.msra.mxu1 %v5223_v14  ;;  %3630 = vmatprep.subr.bf16.mxu0 %v5228_v15  ;;  %v5324_v14 = vld [vmem:[%s7837_s1 + $0xa34] ss:$72 sps:$4 sm:$0xff]   ;;  %v5319_v15 = vld [vmem:[%s7837_s1 + $0x130] ss:$72 sps:$4 sm:$0xff]  }
  0x95   :  { %4017 = vmatprep.subr.bf16.mxu1 %v5231_v16  ;;  %v5322_v16 = vld [vmem:[%s7837_s1 + $0xa30] ss:$72 sps:$4 sm:$0xff]  }
  0x9b   :  { %3631 = vmatpush1.bf16.xpose.msra.mxu0 %v5226_v17  ;;  %v5327_v17 = vld [vmem:[%s7837_s1 + $0x1c4] ss:$72 sps:$4 sm:$0xff]  }
  0x9c   :  { %4018 = vmatpush1.bf16.xpose.msra.mxu1 %v5229_v18  ;;  %3632 = vmatprep.subr.bf16.mxu0 %v5234_v19  ;;  %v5330_v18 = vld [vmem:[%s7837_s1 + $0xac4] ss:$72 sps:$4 sm:$0xff]   ;;  %v5325_v19 = vld [vmem:[%s7837_s1 + $0x1c0] ss:$72 sps:$4 sm:$0xff]  }
  0x9d   :  { %4019 = vmatprep.subr.bf16.mxu1 %v5237_v20  ;;  %v5328_v20 = vld [vmem:[%s7837_s1 + $0xac0] ss:$72 sps:$4 sm:$0xff]  }
  0xa3   :  { %3633 = vmatpush1.bf16.xpose.msra.mxu0 %v5232_v21  ;;  %v5333_v21 = vld [vmem:[%s7837_s1 + $0x254] ss:$72 sps:$4 sm:$0xff]  }
  0xa4   :  { %4020 = vmatpush1.bf16.xpose.msra.mxu1 %v5235_v22  ;;  %3634 = vmatprep.subr.bf16.mxu0 %v5240_v23  ;;  %v5336_v22 = vld [vmem:[%s7837_s1 + $0xb54] ss:$72 sps:$4 sm:$0xff]   ;;  %v5331_v23 = vld [vmem:[%s7837_s1 + $0x250] ss:$72 sps:$4 sm:$0xff]  }
  0xa5   :  { %4021 = vmatprep.subr.bf16.mxu1 %v5243_v24  ;;  %v5334_v24 = vld [vmem:[%s7837_s1 + $0xb50] ss:$72 sps:$4 sm:$0xff]  }
  0xab   :  { %3635 = vmatpush1.bf16.xpose.msra.mxu0 %v5238_v25  ;;  %v5339_v25 = vld [vmem:[%s7837_s1 + $0x2e4] ss:$72 sps:$4 sm:$0xff]  }
  0xac   :  { %4022 = vmatpush1.bf16.xpose.msra.mxu1 %v5241_v26  ;;  %3636 = vmatprep.subr.bf16.mxu0 %v5246_v27  ;;  %v5342_v26 = vld [vmem:[%s7837_s1 + $0xbe4] ss:$72 sps:$4 sm:$0xff]   ;;  %v5337_v27 = vld [vmem:[%s7837_s1 + $0x2e0] ss:$72 sps:$4 sm:$0xff]  }
  0xad   :  { %4023 = vmatprep.subr.bf16.mxu1 %v5249_v28  ;;  %v5340_v28 = vld [vmem:[%s7837_s1 + $0xbe0] ss:$72 sps:$4 sm:$0xff]  }
  0xb3   :  { %3637 = vmatpush1.bf16.xpose.msra.mxu0 %v5244_v29  ;;  %v5345_v29 = vld [vmem:[%s7837_s1 + $0x374] ss:$72 sps:$4 sm:$0xff]  }
  0xb4   :  { %4024 = vmatpush1.bf16.xpose.msra.mxu1 %v5247_v30  ;;  %3638 = vmatprep.subr.bf16.mxu0 %v5252_v31  ;;  %v5348_v30 = vld [vmem:[%s7837_s1 + $0xc74] ss:$72 sps:$4 sm:$0xff]   ;;  %v5343_v31 = vld [vmem:[%s7837_s1 + $0x370] ss:$72 sps:$4 sm:$0xff]  }
  0xb5   :  { %4025 = vmatprep.subr.bf16.mxu1 %v5255_v32  ;;  %v5346_v32 = vld [vmem:[%s7837_s1 + $0xc70] ss:$72 sps:$4 sm:$0xff]  }
  0xbb   :  { %3639 = vmatpush1.bf16.xpose.msra.mxu0 %v5250_v33  ;;  %v5351_v33 = vld [vmem:[%s7837_s1 + $0x404] ss:$72 sps:$4 sm:$0xff]  }
  0xbc   :  { %4026 = vmatpush1.bf16.xpose.msra.mxu1 %v5253_v34  ;;  %3640 = vmatprep.subr.bf16.mxu0 %v5258_v35  ;;  %v5354_v34 = vld [vmem:[%s7837_s1 + $0xd04] ss:$72 sps:$4 sm:$0xff]   ;;  %v5349_v35 = vld [vmem:[%s7837_s1 + $0x400] ss:$72 sps:$4 sm:$0xff]  }
  0xbd   :  { %4027 = vmatprep.subr.bf16.mxu1 %v5261_v36  ;;  %v5352_v36 = vld [vmem:[%s7837_s1 + $0xd00] ss:$72 sps:$4 sm:$0xff]  }
  0xc3   :  { %3641 = vmatpush1.bf16.xpose.msra.mxu0 %v5256_v37  ;;  %v5357_v37 = vld [vmem:[%s7837_s1 + $0x494] ss:$72 sps:$4 sm:$0xff]  }
  0xc4   :  { %4028 = vmatpush1.bf16.xpose.msra.mxu1 %v5259_v38  ;;  %3642 = vmatprep.subr.bf16.mxu0 %v5264_v39  ;;  %v5360_v38 = vld [vmem:[%s7837_s1 + $0xd94] ss:$72 sps:$4 sm:$0xff]   ;;  %v5355_v39 = vld [vmem:[%s7837_s1 + $0x490] ss:$72 sps:$4 sm:$0xff]  }
  0xc5   :  { %4029 = vmatprep.subr.bf16.mxu1 %v5267_v40  ;;  %v5358_v40 = vld [vmem:[%s7837_s1 + $0xd90] ss:$72 sps:$4 sm:$0xff]  }
  0xcb   :  { %3643 = vmatpush1.bf16.xpose.msra.mxu0 %v5262_v41  ;;  %v5363_v41 = vld [vmem:[%s7837_s1 + $0x524] ss:$72 sps:$4 sm:$0xff]  }
  0xcc   :  { %4030 = vmatpush1.bf16.xpose.msra.mxu1 %v5265_v42  ;;  %3644 = vmatprep.subr.bf16.mxu0 %v5270_v43  ;;  %v5366_v42 = vld [vmem:[%s7837_s1 + $0xe24] ss:$72 sps:$4 sm:$0xff]   ;;  %v5361_v43 = vld [vmem:[%s7837_s1 + $0x520] ss:$72 sps:$4 sm:$0xff]  }
  0xcd   :  { %4031 = vmatprep.subr.bf16.mxu1 %v5273_v44  ;;  %v5364_v44 = vld [vmem:[%s7837_s1 + $0xe20] ss:$72 sps:$4 sm:$0xff]  }
  0xd3   :  { %3645 = vmatpush1.bf16.xpose.msra.mxu0 %v5268_v45  ;;  %v5369_v45 = vld [vmem:[%s7837_s1 + $0x5b4] ss:$72 sps:$4 sm:$0xff]  }
  0xd4   :  { %4032 = vmatpush1.bf16.xpose.msra.mxu1 %v5271_v46  ;;  %3646 = vmatprep.subr.bf16.mxu0 %v5276_v47  ;;  %v5372_v46 = vld [vmem:[%s7837_s1 + $0xeb4] ss:$72 sps:$4 sm:$0xff]   ;;  %v5367_v47 = vld [vmem:[%s7837_s1 + $0x5b0] ss:$72 sps:$4 sm:$0xff]  }
  0xd5   :  { %4033 = vmatprep.subr.bf16.mxu1 %v5279_v48  ;;  %v5370_v48 = vld [vmem:[%s7837_s1 + $0xeb0] ss:$72 sps:$4 sm:$0xff]  }
  0xdb   :  { %3647 = vmatpush1.bf16.xpose.msra.mxu0 %v5274_v49  ;;  %v5375_v49 = vld [vmem:[%s7837_s1 + $0x644] ss:$72 sps:$4 sm:$0xff]  }
  0xdc   :  { %4034 = vmatpush1.bf16.xpose.msra.mxu1 %v5277_v50  ;;  %3648 = vmatprep.subr.bf16.mxu0 %v5282_v51  ;;  %v5378_v50 = vld [vmem:[%s7837_s1 + $0xf44] ss:$72 sps:$4 sm:$0xff]   ;;  %v5373_v51 = vld [vmem:[%s7837_s1 + $0x640] ss:$72 sps:$4 sm:$0xff]  }
  0xdd   :  { %4035 = vmatprep.subr.bf16.mxu1 %v5285_v52  ;;  %v5376_v52 = vld [vmem:[%s7837_s1 + $0xf40] ss:$72 sps:$4 sm:$0xff]  }
  0xe3   :  { %3649 = vmatpush1.bf16.xpose.msra.mxu0 %v5280_v53  ;;  %v5381_v53 = vld [vmem:[%s7837_s1 + $0x6d4] ss:$72 sps:$4 sm:$0xff]  }
  0xe4   :  { %4036 = vmatpush1.bf16.xpose.msra.mxu1 %v5283_v54  ;;  %3650 = vmatprep.subr.bf16.mxu0 %v5288_v55  ;;  %v5384_v54 = vld [vmem:[%s7837_s1 + $0xfd4] ss:$72 sps:$4 sm:$0xff]   ;;  %v5379_v55 = vld [vmem:[%s7837_s1 + $0x6d0] ss:$72 sps:$4 sm:$0xff]  }
  0xe5   :  { %4037 = vmatprep.subr.bf16.mxu1 %v5291_v56  ;;  %v5382_v56 = vld [vmem:[%s7837_s1 + $0xfd0] ss:$72 sps:$4 sm:$0xff]  }
  0xeb   :  { %3651 = vmatpush1.bf16.xpose.msra.mxu0 %v5286_v57  ;;  %v5387_v57 = vld [vmem:[%s7837_s1 + $0x764] ss:$72 sps:$4 sm:$0xff]  }
  0xec   :  { %4038 = vmatpush1.bf16.xpose.msra.mxu1 %v5289_v58  ;;  %3652 = vmatprep.subr.bf16.mxu0 %v5294_v59  ;;  %v5390_v58 = vld [vmem:[%s7837_s1 + $0x1064] ss:$72 sps:$4 sm:$0xff]   ;;  %v5385_v59 = vld [vmem:[%s7837_s1 + $0x760] ss:$72 sps:$4 sm:$0xff]  }
  0xed   :  { %4039 = vmatprep.subr.bf16.mxu1 %v5297_v60  ;;  %v5388_v60 = vld [vmem:[%s7837_s1 + $0x1060] ss:$72 sps:$4 sm:$0xff]  }
  0xf3   :  { %3653 = vmatpush1.bf16.xpose.msra.mxu0 %v5292_v61  ;;  %v5393_v61 = vld [vmem:[%s7837_s1 + $0x7f4] ss:$72 sps:$4 sm:$0xff]  }
  0xf4   :  { %4040 = vmatpush1.bf16.xpose.msra.mxu1 %v5295_v62  ;;  %3654 = vmatprep.subr.bf16.mxu0 %v5300_v63  ;;  %v5396_v62 = vld [vmem:[%s7837_s1 + $0x10f4] ss:$72 sps:$4 sm:$0xff]   ;;  %v5391_v63 = vld [vmem:[%s7837_s1 + $0x7f0] ss:$72 sps:$4 sm:$0xff]  }
  0xf5   :  { %4041 = vmatprep.subr.bf16.mxu1 %v5303_v0  ;;  %v5394_v0 = vld [vmem:[%s7837_s1 + $0x10f0] ss:$72 sps:$4 sm:$0xff]  }
  0xfb   :  { %3655 = vmatpush1.bf16.xpose.msra.mxu0 %v5298_v1  ;;  %v5399_v1 = vld [vmem:[%s7837_s1 + $0x884] ss:$72 sps:$4 sm:$0xff]  }
  0xfc   :  { %4042 = vmatpush1.bf16.xpose.msra.mxu1 %v5301_v2  ;;  %3667 = vmatprep.subr.bf16.mxu0 %v5309_v3  ;;  %v5402_v2 = vld [vmem:[%s7837_s1 + $0x1184] ss:$72 sps:$4 sm:$0xff]   ;;  %v5397_v3 = vld [vmem:[%s7837_s1 + $0x880] ss:$72 sps:$4 sm:$0xff]  }
  0xfd   :  { %4054 = vmatprep.subr.bf16.mxu1 %v5312_v4  ;;  %v5400_v4 = vld [vmem:[%s7837_s1 + $0x1180] ss:$72 sps:$4 sm:$0xff]  }
 0x102   :  { %3657 = vmatmul.mubr.bf16.vlgmr.msra.gmra.mrb[0].mxu0 %v5304_v5 }
 0x103   :  { %4044 = vmatmul.mubr.bf16.vlgmr.msra.gmra.mrb[0].mxu1 %v5304_v5  ;;  %3668 = vmatpush1.bf16.xpose.msra.mxu0 %v5307_v6  ;;  %v5408_v5 = vld [vmem:[%s7837_s1 + $0x1c] ss:$72 sps:$4 sm:$0xff]  }
 0x104   :  { %4055 = vmatpush1.bf16.xpose.msra.mxu1 %v5310_v7  ;;  %3669 = vmatprep.subr.bf16.mxu0 %v5315_v8  ;;  %v5411_v6 = vld [vmem:[%s7837_s1 + $0x91c] ss:$72 sps:$4 sm:$0xff]   ;;  %v5403_v7 = vld [vmem:[%s7838_s0 + $0x10] ss:$72 sps:$4 sm:$0xff]  }
 0x105   :  { %4056 = vmatprep.subr.bf16.mxu1 %v5318_v9  ;;  %3699 = vmatprep.mubr.bf16.mxu0 %v5405_v10  ;;  %v5406_v8 = vld [vmem:[%s7837_s1 + $0x18] ss:$72 sps:$4 sm:$0xff]  }
 0x106   :  { %4086 = vmatprep.mubr.bf16.mxu1 %v5405_v10  ;;  %v5409_v9 = vld [vmem:[%s7837_s1 + $0x918] ss:$72 sps:$4 sm:$0xff]   ;;  %v5414_v10 = vld [vmem:[%s7837_s1 + $0xac] ss:$72 sps:$4 sm:$0xff]  }
 0x10b   :  { %3670 = vmatpush1.bf16.xpose.msra.mxu0 %v5313_v11  ;;  %v5417_v11 = vld [vmem:[%s7837_s1 + $0x9ac] ss:$72 sps:$4 sm:$0xff]  }
 0x10c   :  { %4057 = vmatpush1.bf16.xpose.msra.mxu1 %v5316_v12  ;;  %3671 = vmatprep.subr.bf16.mxu0 %v5321_v13  ;;  %v5504_v12 = vld [vmem:[%s7838_s0 + $0x1c] ss:$72 sps:$4 sm:$0xff]   ;;  %v5412_v13 = vld [vmem:[%s7837_s1 + $0xa8] ss:$72 sps:$4 sm:$0xff]  }
 0x10d   :  { %4058 = vmatprep.subr.bf16.mxu1 %v5324_v14  ;;  %v5415_v14 = vld [vmem:[%s7837_s1 + $0x9a8] ss:$72 sps:$4 sm:$0xff]  }
 0x113   :  { %3672 = vmatpush1.bf16.xpose.msra.mxu0 %v5319_v15  ;;  %v5420_v15 = vld [vmem:[%s7837_s1 + $0x13c] ss:$72 sps:$4 sm:$0xff]  }
 0x114   :  { %4059 = vmatpush1.bf16.xpose.msra.mxu1 %v5322_v16  ;;  %3673 = vmatprep.subr.bf16.mxu0 %v5327_v17  ;;  %v5423_v16 = vld [vmem:[%s7837_s1 + $0xa3c] ss:$72 sps:$4 sm:$0xff]   ;;  %v5418_v17 = vld [vmem:[%s7837_s1 + $0x138] ss:$72 sps:$4 sm:$0xff]  }
 0x115   :  { %4060 = vmatprep.subr.bf16.mxu1 %v5330_v18  ;;  %v5421_v18 = vld [vmem:[%s7837_s1 + $0xa38] ss:$72 sps:$4 sm:$0xff]  }
 0x11b   :  { %3674 = vmatpush1.bf16.xpose.msra.mxu0 %v5325_v19  ;;  %v5426_v19 = vld [vmem:[%s7837_s1 + $0x1cc] ss:$72 sps:$4 sm:$0xff]  }
 0x11c   :  { %4061 = vmatpush1.bf16.xpose.msra.mxu1 %v5328_v20  ;;  %3675 = vmatprep.subr.bf16.mxu0 %v5333_v21  ;;  %v5429_v20 = vld [vmem:[%s7837_s1 + $0xacc] ss:$72 sps:$4 sm:$0xff]   ;;  %v5424_v21 = vld [vmem:[%s7837_s1 + $0x1c8] ss:$72 sps:$4 sm:$0xff]  }
 0x11d   :  { %4062 = vmatprep.subr.bf16.mxu1 %v5336_v22  ;;  %v5427_v22 = vld [vmem:[%s7837_s1 + $0xac8] ss:$72 sps:$4 sm:$0xff]  }
 0x123   :  { %3676 = vmatpush1.bf16.xpose.msra.mxu0 %v5331_v23  ;;  %v5432_v23 = vld [vmem:[%s7837_s1 + $0x25c] ss:$72 sps:$4 sm:$0xff]  }
 0x124   :  { %4063 = vmatpush1.bf16.xpose.msra.mxu1 %v5334_v24  ;;  %3677 = vmatprep.subr.bf16.mxu0 %v5339_v25  ;;  %v5435_v24 = vld [vmem:[%s7837_s1 + $0xb5c] ss:$72 sps:$4 sm:$0xff]   ;;  %v5430_v25 = vld [vmem:[%s7837_s1 + $0x258] ss:$72 sps:$4 sm:$0xff]  }
 0x125   :  { %4064 = vmatprep.subr.bf16.mxu1 %v5342_v26  ;;  %v5433_v26 = vld [vmem:[%s7837_s1 + $0xb58] ss:$72 sps:$4 sm:$0xff]  }
 0x12b   :  { %3678 = vmatpush1.bf16.xpose.msra.mxu0 %v5337_v27  ;;  %v5438_v27 = vld [vmem:[%s7837_s1 + $0x2ec] ss:$72 sps:$4 sm:$0xff]  }
 0x12c   :  { %4065 = vmatpush1.bf16.xpose.msra.mxu1 %v5340_v28  ;;  %3679 = vmatprep.subr.bf16.mxu0 %v5345_v29  ;;  %v5441_v28 = vld [vmem:[%s7837_s1 + $0xbec] ss:$72 sps:$4 sm:$0xff]   ;;  %v5436_v29 = vld [vmem:[%s7837_s1 + $0x2e8] ss:$72 sps:$4 sm:$0xff]  }
 0x12d   :  { %4066 = vmatprep.subr.bf16.mxu1 %v5348_v30  ;;  %v5439_v30 = vld [vmem:[%s7837_s1 + $0xbe8] ss:$72 sps:$4 sm:$0xff]  }
 0x133   :  { %3680 = vmatpush1.bf16.xpose.msra.mxu0 %v5343_v31  ;;  %v5444_v31 = vld [vmem:[%s7837_s1 + $0x37c] ss:$72 sps:$4 sm:$0xff]  }
 0x134   :  { %4067 = vmatpush1.bf16.xpose.msra.mxu1 %v5346_v32  ;;  %3681 = vmatprep.subr.bf16.mxu0 %v5351_v33  ;;  %v5447_v32 = vld [vmem:[%s7837_s1 + $0xc7c] ss:$72 sps:$4 sm:$0xff]   ;;  %v5442_v33 = vld [vmem:[%s7837_s1 + $0x378] ss:$72 sps:$4 sm:$0xff]  }
 0x135   :  { %4068 = vmatprep.subr.bf16.mxu1 %v5354_v34  ;;  %v5445_v34 = vld [vmem:[%s7837_s1 + $0xc78] ss:$72 sps:$4 sm:$0xff]  }
 0x13b   :  { %3682 = vmatpush1.bf16.xpose.msra.mxu0 %v5349_v35  ;;  %v5450_v35 = vld [vmem:[%s7837_s1 + $0x40c] ss:$72 sps:$4 sm:$0xff]  }
 0x13c   :  { %4069 = vmatpush1.bf16.xpose.msra.mxu1 %v5352_v36  ;;  %3683 = vmatprep.subr.bf16.mxu0 %v5357_v37  ;;  %v5453_v36 = vld [vmem:[%s7837_s1 + $0xd0c] ss:$72 sps:$4 sm:$0xff]   ;;  %v5448_v37 = vld [vmem:[%s7837_s1 + $0x408] ss:$72 sps:$4 sm:$0xff]  }
 0x13d   :  { %4070 = vmatprep.subr.bf16.mxu1 %v5360_v38  ;;  %v5451_v38 = vld [vmem:[%s7837_s1 + $0xd08] ss:$72 sps:$4 sm:$0xff]  }
 0x143   :  { %3684 = vmatpush1.bf16.xpose.msra.mxu0 %v5355_v39  ;;  %v5456_v39 = vld [vmem:[%s7837_s1 + $0x49c] ss:$72 sps:$4 sm:$0xff]  }
 0x144   :  { %4071 = vmatpush1.bf16.xpose.msra.mxu1 %v5358_v40  ;;  %3685 = vmatprep.subr.bf16.mxu0 %v5363_v41  ;;  %v5459_v40 = vld [vmem:[%s7837_s1 + $0xd9c] ss:$72 sps:$4 sm:$0xff]   ;;  %v5454_v41 = vld [vmem:[%s7837_s1 + $0x498] ss:$72 sps:$4 sm:$0xff]  }
 0x145   :  { %4072 = vmatprep.subr.bf16.mxu1 %v5366_v42  ;;  %v5457_v42 = vld [vmem:[%s7837_s1 + $0xd98] ss:$72 sps:$4 sm:$0xff]  }
 0x14b   :  { %3686 = vmatpush1.bf16.xpose.msra.mxu0 %v5361_v43  ;;  %v5462_v43 = vld [vmem:[%s7837_s1 + $0x52c] ss:$72 sps:$4 sm:$0xff]  }
 0x14c   :  { %4073 = vmatpush1.bf16.xpose.msra.mxu1 %v5364_v44  ;;  %3687 = vmatprep.subr.bf16.mxu0 %v5369_v45  ;;  %v5465_v44 = vld [vmem:[%s7837_s1 + $0xe2c] ss:$72 sps:$4 sm:$0xff]   ;;  %v5460_v45 = vld [vmem:[%s7837_s1 + $0x528] ss:$72 sps:$4 sm:$0xff]  }
 0x14d   :  { %4074 = vmatprep.subr.bf16.mxu1 %v5372_v46  ;;  %v5463_v46 = vld [vmem:[%s7837_s1 + $0xe28] ss:$72 sps:$4 sm:$0xff]  }
 0x153   :  { %3688 = vmatpush1.bf16.xpose.msra.mxu0 %v5367_v47  ;;  %v5468_v47 = vld [vmem:[%s7837_s1 + $0x5bc] ss:$72 sps:$4 sm:$0xff]  }
 0x154   :  { %4075 = vmatpush1.bf16.xpose.msra.mxu1 %v5370_v48  ;;  %3689 = vmatprep.subr.bf16.mxu0 %v5375_v49  ;;  %v5471_v48 = vld [vmem:[%s7837_s1 + $0xebc] ss:$72 sps:$4 sm:$0xff]   ;;  %v5466_v49 = vld [vmem:[%s7837_s1 + $0x5b8] ss:$72 sps:$4 sm:$0xff]  }
 0x155   :  { %4076 = vmatprep.subr.bf16.mxu1 %v5378_v50  ;;  %v5469_v50 = vld [vmem:[%s7837_s1 + $0xeb8] ss:$72 sps:$4 sm:$0xff]  }
 0x15b   :  { %3690 = vmatpush1.bf16.xpose.msra.mxu0 %v5373_v51  ;;  %v5474_v51 = vld [vmem:[%s7837_s1 + $0x64c] ss:$72 sps:$4 sm:$0xff]  }
 0x15c   :  { %4077 = vmatpush1.bf16.xpose.msra.mxu1 %v5376_v52  ;;  %3691 = vmatprep.subr.bf16.mxu0 %v5381_v53  ;;  %v5477_v52 = vld [vmem:[%s7837_s1 + $0xf4c] ss:$72 sps:$4 sm:$0xff]   ;;  %v5472_v53 = vld [vmem:[%s7837_s1 + $0x648] ss:$72 sps:$4 sm:$0xff]  }
 0x15d   :  { %4078 = vmatprep.subr.bf16.mxu1 %v5384_v54  ;;  %v5475_v54 = vld [vmem:[%s7837_s1 + $0xf48] ss:$72 sps:$4 sm:$0xff]  }
 0x163   :  { %3692 = vmatpush1.bf16.xpose.msra.mxu0 %v5379_v55  ;;  %v5480_v55 = vld [vmem:[%s7837_s1 + $0x6dc] ss:$72 sps:$4 sm:$0xff]  }
 0x164   :  { %4079 = vmatpush1.bf16.xpose.msra.mxu1 %v5382_v56  ;;  %3693 = vmatprep.subr.bf16.mxu0 %v5387_v57  ;;  %v5483_v56 = vld [vmem:[%s7837_s1 + $0xfdc] ss:$72 sps:$4 sm:$0xff]   ;;  %v5478_v57 = vld [vmem:[%s7837_s1 + $0x6d8] ss:$72 sps:$4 sm:$0xff]  }
 0x165   :  { %4080 = vmatprep.subr.bf16.mxu1 %v5390_v58  ;;  %v5481_v58 = vld [vmem:[%s7837_s1 + $0xfd8] ss:$72 sps:$4 sm:$0xff]  }
 0x16b   :  { %3694 = vmatpush1.bf16.xpose.msra.mxu0 %v5385_v59  ;;  %v5486_v59 = vld [vmem:[%s7837_s1 + $0x76c] ss:$72 sps:$4 sm:$0xff]  }
 0x16c   :  { %4081 = vmatpush1.bf16.xpose.msra.mxu1 %v5388_v60  ;;  %3695 = vmatprep.subr.bf16.mxu0 %v5393_v61  ;;  %v5489_v60 = vld [vmem:[%s7837_s1 + $0x106c] ss:$72 sps:$4 sm:$0xff]   ;;  %v5484_v61 = vld [vmem:[%s7837_s1 + $0x768] ss:$72 sps:$4 sm:$0xff]  }
 0x16d   :  { %4082 = vmatprep.subr.bf16.mxu1 %v5396_v62  ;;  %v5487_v62 = vld [vmem:[%s7837_s1 + $0x1068] ss:$72 sps:$4 sm:$0xff]  }
 0x173   :  { %3696 = vmatpush1.bf16.xpose.msra.mxu0 %v5391_v63  ;;  %v5492_v63 = vld [vmem:[%s7837_s1 + $0x7fc] ss:$72 sps:$4 sm:$0xff]  }
 0x174   :  { %4083 = vmatpush1.bf16.xpose.msra.mxu1 %v5394_v0  ;;  %3697 = vmatprep.subr.bf16.mxu0 %v5399_v1  ;;  %v5495_v0 = vld [vmem:[%s7837_s1 + $0x10fc] ss:$72 sps:$4 sm:$0xff]   ;;  %v5490_v1 = vld [vmem:[%s7837_s1 + $0x7f8] ss:$72 sps:$4 sm:$0xff]  }
 0x175   :  { %4084 = vmatprep.subr.bf16.mxu1 %v5402_v2  ;;  %v5493_v2 = vld [vmem:[%s7837_s1 + $0x10f8] ss:$72 sps:$4 sm:$0xff]  }
 0x17b   :  { %3698 = vmatpush1.bf16.xpose.msra.mxu0 %v5397_v3  ;;  %v5498_v3 = vld [vmem:[%s7837_s1 + $0x88c] ss:$72 sps:$4 sm:$0xff]  }
 0x17c   :  { %4085 = vmatpush1.bf16.xpose.msra.mxu1 %v5400_v4  ;;  %3710 = vmatprep.subr.bf16.mxu0 %v5408_v5  ;;  %v5501_v4 = vld [vmem:[%s7837_s1 + $0x118c] ss:$72 sps:$4 sm:$0xff]   ;;  %v5496_v5 = vld [vmem:[%s7837_s1 + $0x888] ss:$72 sps:$4 sm:$0xff]  }
 0x17d   :  { %4097 = vmatprep.subr.bf16.mxu1 %v5411_v6  ;;  %v5499_v6 = vld [vmem:[%s7837_s1 + $0x1188] ss:$72 sps:$4 sm:$0xff]  }
 0x182   :  { %3700 = vmatmul.mubr.bf16.vlgmr.msra.gmra.mrb[0].mxu0 %v5403_v7 }
 0x183   :  { %4087 = vmatmul.mubr.bf16.vlgmr.msra.gmra.mrb[0].mxu1 %v5403_v7  ;;  %3711 = vmatpush1.bf16.xpose.msra.mxu0 %v5406_v8  ;;  %v5507_v7 = vld [vmem:[%s7837_s1 + $0x24] ss:$72 sps:$4 sm:$0xff]  }
 0x184   :  { %4098 = vmatpush1.bf16.xpose.msra.mxu1 %v5409_v9  ;;  %3712 = vmatprep.subr.bf16.mxu0 %v5414_v10  ;;  %v5510_v8 = vld [vmem:[%s7837_s1 + $0x924] ss:$72 sps:$4 sm:$0xff]   ;;  %v5502_v9 = vld [vmem:[%s7838_s0 + $0x18] ss:$72 sps:$4 sm:$0xff]  }
 0x185   :  { %4099 = vmatprep.subr.bf16.mxu1 %v5417_v11  ;;  %3742 = vmatprep.mubr.bf16.mxu0 %v5504_v12  ;;  %v5505_v10 = vld [vmem:[%s7837_s1 + $0x20] ss:$72 sps:$4 sm:$0xff]  }
 0x186   :  { %4129 = vmatprep.mubr.bf16.mxu1 %v5504_v12  ;;  %v5508_v11 = vld [vmem:[%s7837_s1 + $0x920] ss:$72 sps:$4 sm:$0xff]   ;;  %v5513_v12 = vld [vmem:[%s7837_s1 + $0xb4] ss:$72 sps:$4 sm:$0xff]  }
 0x18b   :  { %3713 = vmatpush1.bf16.xpose.msra.mxu0 %v5412_v13  ;;  %v5516_v13 = vld [vmem:[%s7837_s1 + $0x9b4] ss:$72 sps:$4 sm:$0xff]  }
 0x18c   :  { %4100 = vmatpush1.bf16.xpose.msra.mxu1 %v5415_v14  ;;  %3714 = vmatprep.subr.bf16.mxu0 %v5420_v15  ;;  %v5603_v14 = vld [vmem:[%s7838_s0 + $0x24] ss:$72 sps:$4 sm:$0xff]   ;;  %v5511_v15 = vld [vmem:[%s7837_s1 + $0xb0] ss:$72 sps:$4 sm:$0xff]  }
 0x18d   :  { %4101 = vmatprep.subr.bf16.mxu1 %v5423_v16  ;;  %v5514_v16 = vld [vmem:[%s7837_s1 + $0x9b0] ss:$72 sps:$4 sm:$0xff]  }
 0x193   :  { %3715 = vmatpush1.bf16.xpose.msra.mxu0 %v5418_v17  ;;  %v5519_v17 = vld [vmem:[%s7837_s1 + $0x144] ss:$72 sps:$4 sm:$0xff]  }
 0x194   :  { %4102 = vmatpush1.bf16.xpose.msra.mxu1 %v5421_v18  ;;  %3716 = vmatprep.subr.bf16.mxu0 %v5426_v19  ;;  %v5522_v18 = vld [vmem:[%s7837_s1 + $0xa44] ss:$72 sps:$4 sm:$0xff]   ;;  %v5517_v19 = vld [vmem:[%s7837_s1 + $0x140] ss:$72 sps:$4 sm:$0xff]  }
 0x195   :  { %4103 = vmatprep.subr.bf16.mxu1 %v5429_v20  ;;  %v5520_v20 = vld [vmem:[%s7837_s1 + $0xa40] ss:$72 sps:$4 sm:$0xff]  }
 0x19b   :  { %3717 = vmatpush1.bf16.xpose.msra.mxu0 %v5424_v21  ;;  %v5525_v21 = vld [vmem:[%s7837_s1 + $0x1d4] ss:$72 sps:$4 sm:$0xff]  }
 0x19c   :  { %4104 = vmatpush1.bf16.xpose.msra.mxu1 %v5427_v22  ;;  %3718 = vmatprep.subr.bf16.mxu0 %v5432_v23  ;;  %v5528_v22 = vld [vmem:[%s7837_s1 + $0xad4] ss:$72 sps:$4 sm:$0xff]   ;;  %v5523_v23 = vld [vmem:[%s7837_s1 + $0x1d0] ss:$72 sps:$4 sm:$0xff]  }
 0x19d   :  { %4105 = vmatprep.subr.bf16.mxu1 %v5435_v24  ;;  %v5526_v24 = vld [vmem:[%s7837_s1 + $0xad0] ss:$72 sps:$4 sm:$0xff]  }
 0x1a3   :  { %3719 = vmatpush1.bf16.xpose.msra.mxu0 %v5430_v25  ;;  %v5531_v25 = vld [vmem:[%s7837_s1 + $0x264] ss:$72 sps:$4 sm:$0xff]  }
 0x1a4   :  { %4106 = vmatpush1.bf16.xpose.msra.mxu1 %v5433_v26  ;;  %3720 = vmatprep.subr.bf16.mxu0 %v5438_v27  ;;  %v5534_v26 = vld [vmem:[%s7837_s1 + $0xb64] ss:$72 sps:$4 sm:$0xff]   ;;  %v5529_v27 = vld [vmem:[%s7837_s1 + $0x260] ss:$72 sps:$4 sm:$0xff]  }
 0x1a5   :  { %4107 = vmatprep.subr.bf16.mxu1 %v5441_v28  ;;  %v5532_v28 = vld [vmem:[%s7837_s1 + $0xb60] ss:$72 sps:$4 sm:$0xff]  }
 0x1ab   :  { %3721 = vmatpush1.bf16.xpose.msra.mxu0 %v5436_v29  ;;  %v5537_v29 = vld [vmem:[%s7837_s1 + $0x2f4] ss:$72 sps:$4 sm:$0xff]  }
 0x1ac   :  { %4108 = vmatpush1.bf16.xpose.msra.mxu1 %v5439_v30  ;;  %3722 = vmatprep.subr.bf16.mxu0 %v5444_v31  ;;  %v5540_v30 = vld [vmem:[%s7837_s1 + $0xbf4] ss:$72 sps:$4 sm:$0xff]   ;;  %v5535_v31 = vld [vmem:[%s7837_s1 + $0x2f0] ss:$72 sps:$4 sm:$0xff]  }
 0x1ad   :  { %4109 = vmatprep.subr.bf16.mxu1 %v5447_v32  ;;  %v5538_v32 = vld [vmem:[%s7837_s1 + $0xbf0] ss:$72 sps:$4 sm:$0xff]  }
 0x1b3   :  { %3723 = vmatpush1.bf16.xpose.msra.mxu0 %v5442_v33  ;;  %v5543_v33 = vld [vmem:[%s7837_s1 + $0x384] ss:$72 sps:$4 sm:$0xff]  }
 0x1b4   :  { %4110 = vmatpush1.bf16.xpose.msra.mxu1 %v5445_v34  ;;  %3724 = vmatprep.subr.bf16.mxu0 %v5450_v35  ;;  %v5546_v34 = vld [vmem:[%s7837_s1 + $0xc84] ss:$72 sps:$4 sm:$0xff]   ;;  %v5541_v35 = vld [vmem:[%s7837_s1 + $0x380] ss:$72 sps:$4 sm:$0xff]  }
 0x1b5   :  { %4111 = vmatprep.subr.bf16.mxu1 %v5453_v36  ;;  %v5544_v36 = vld [vmem:[%s7837_s1 + $0xc80] ss:$72 sps:$4 sm:$0xff]  }
 0x1bb   :  { %3725 = vmatpush1.bf16.xpose.msra.mxu0 %v5448_v37  ;;  %v5549_v37 = vld [vmem:[%s7837_s1 + $0x414] ss:$72 sps:$4 sm:$0xff]  }
 0x1bc   :  { %4112 = vmatpush1.bf16.xpose.msra.mxu1 %v5451_v38  ;;  %3726 = vmatprep.subr.bf16.mxu0 %v5456_v39  ;;  %v5552_v38 = vld [vmem:[%s7837_s1 + $0xd14] ss:$72 sps:$4 sm:$0xff]   ;;  %v5547_v39 = vld [vmem:[%s7837_s1 + $0x410] ss:$72 sps:$4 sm:$0xff]  }
 0x1bd   :  { %4113 = vmatprep.subr.bf16.mxu1 %v5459_v40  ;;  %v5550_v40 = vld [vmem:[%s7837_s1 + $0xd10] ss:$72 sps:$4 sm:$0xff]  }
 0x1c3   :  { %3727 = vmatpush1.bf16.xpose.msra.mxu0 %v5454_v41  ;;  %v5555_v41 = vld [vmem:[%s7837_s1 + $0x4a4] ss:$72 sps:$4 sm:$0xff]  }
 0x1c4   :  { %4114 = vmatpush1.bf16.xpose.msra.mxu1 %v5457_v42  ;;  %3728 = vmatprep.subr.bf16.mxu0 %v5462_v43  ;;  %v5558_v42 = vld [vmem:[%s7837_s1 + $0xda4] ss:$72 sps:$4 sm:$0xff]   ;;  %v5553_v43 = vld [vmem:[%s7837_s1 + $0x4a0] ss:$72 sps:$4 sm:$0xff]  }
 0x1c5   :  { %4115 = vmatprep.subr.bf16.mxu1 %v5465_v44  ;;  %v5556_v44 = vld [vmem:[%s7837_s1 + $0xda0] ss:$72 sps:$4 sm:$0xff]  }
 0x1cb   :  { %3729 = vmatpush1.bf16.xpose.msra.mxu0 %v5460_v45  ;;  %v5561_v45 = vld [vmem:[%s7837_s1 + $0x534] ss:$72 sps:$4 sm:$0xff]  }
 0x1cc   :  { %4116 = vmatpush1.bf16.xpose.msra.mxu1 %v5463_v46  ;;  %3730 = vmatprep.subr.bf16.mxu0 %v5468_v47  ;;  %v5564_v46 = vld [vmem:[%s7837_s1 + $0xe34] ss:$72 sps:$4 sm:$0xff]   ;;  %v5559_v47 = vld [vmem:[%s7837_s1 + $0x530] ss:$72 sps:$4 sm:$0xff]  }
 0x1cd   :  { %4117 = vmatprep.subr.bf16.mxu1 %v5471_v48  ;;  %v5562_v48 = vld [vmem:[%s7837_s1 + $0xe30] ss:$72 sps:$4 sm:$0xff]  }
 0x1d3   :  { %3731 = vmatpush1.bf16.xpose.msra.mxu0 %v5466_v49  ;;  %v5567_v49 = vld [vmem:[%s7837_s1 + $0x5c4] ss:$72 sps:$4 sm:$0xff]  }
 0x1d4   :  { %4118 = vmatpush1.bf16.xpose.msra.mxu1 %v5469_v50  ;;  %3732 = vmatprep.subr.bf16.mxu0 %v5474_v51  ;;  %v5570_v50 = vld [vmem:[%s7837_s1 + $0xec4] ss:$72 sps:$4 sm:$0xff]   ;;  %v5565_v51 = vld [vmem:[%s7837_s1 + $0x5c0] ss:$72 sps:$4 sm:$0xff]  }
 0x1d5   :  { %4119 = vmatprep.subr.bf16.mxu1 %v5477_v52  ;;  %v5568_v52 = vld [vmem:[%s7837_s1 + $0xec0] ss:$72 sps:$4 sm:$0xff]  }
 0x1db   :  { %3733 = vmatpush1.bf16.xpose.msra.mxu0 %v5472_v53  ;;  %v5573_v53 = vld [vmem:[%s7837_s1 + $0x654] ss:$72 sps:$4 sm:$0xff]  }
 0x1dc   :  { %4120 = vmatpush1.bf16.xpose.msra.mxu1 %v5475_v54  ;;  %3734 = vmatprep.subr.bf16.mxu0 %v5480_v55  ;;  %v5576_v54 = vld [vmem:[%s7837_s1 + $0xf54] ss:$72 sps:$4 sm:$0xff]   ;;  %v5571_v55 = vld [vmem:[%s7837_s1 + $0x650] ss:$72 sps:$4 sm:$0xff]  }
 0x1dd   :  { %4121 = vmatprep.subr.bf16.mxu1 %v5483_v56  ;;  %v5574_v56 = vld [vmem:[%s7837_s1 + $0xf50] ss:$72 sps:$4 sm:$0xff]  }
 0x1e3   :  { %3735 = vmatpush1.bf16.xpose.msra.mxu0 %v5478_v57  ;;  %v5579_v57 = vld [vmem:[%s7837_s1 + $0x6e4] ss:$72 sps:$4 sm:$0xff]  }
 0x1e4   :  { %4122 = vmatpush1.bf16.xpose.msra.mxu1 %v5481_v58  ;;  %3736 = vmatprep.subr.bf16.mxu0 %v5486_v59  ;;  %v5582_v58 = vld [vmem:[%s7837_s1 + $0xfe4] ss:$72 sps:$4 sm:$0xff]   ;;  %v5577_v59 = vld [vmem:[%s7837_s1 + $0x6e0] ss:$72 sps:$4 sm:$0xff]  }
 0x1e5   :  { %4123 = vmatprep.subr.bf16.mxu1 %v5489_v60  ;;  %v5580_v60 = vld [vmem:[%s7837_s1 + $0xfe0] ss:$72 sps:$4 sm:$0xff]  }
 0x1eb   :  { %3737 = vmatpush1.bf16.xpose.msra.mxu0 %v5484_v61  ;;  %v5585_v61 = vld [vmem:[%s7837_s1 + $0x774] ss:$72 sps:$4 sm:$0xff]  }
 0x1ec   :  { %4124 = vmatpush1.bf16.xpose.msra.mxu1 %v5487_v62  ;;  %3738 = vmatprep.subr.bf16.mxu0 %v5492_v63  ;;  %v5588_v62 = vld [vmem:[%s7837_s1 + $0x1074] ss:$72 sps:$4 sm:$0xff]   ;;  %v5583_v63 = vld [vmem:[%s7837_s1 + $0x770] ss:$72 sps:$4 sm:$0xff]  }
 0x1ed   :  { %4125 = vmatprep.subr.bf16.mxu1 %v5495_v0  ;;  %v5586_v0 = vld [vmem:[%s7837_s1 + $0x1070] ss:$72 sps:$4 sm:$0xff]  }
 0x1f3   :  { %3739 = vmatpush1.bf16.xpose.msra.mxu0 %v5490_v1  ;;  %v5591_v1 = vld [vmem:[%s7837_s1 + $0x804] ss:$72 sps:$4 sm:$0xff]  }
 0x1f4   :  { %4126 = vmatpush1.bf16.xpose.msra.mxu1 %v5493_v2  ;;  %3740 = vmatprep.subr.bf16.mxu0 %v5498_v3  ;;  %v5594_v2 = vld [vmem:[%s7837_s1 + $0x1104] ss:$72 sps:$4 sm:$0xff]   ;;  %v5589_v3 = vld [vmem:[%s7837_s1 + $0x800] ss:$72 sps:$4 sm:$0xff]  }
 0x1f5   :  { %4127 = vmatprep.subr.bf16.mxu1 %v5501_v4  ;;  %v5592_v4 = vld [vmem:[%s7837_s1 + $0x1100] ss:$72 sps:$4 sm:$0xff]  }
 0x1fb   :  { %3741 = vmatpush1.bf16.xpose.msra.mxu0 %v5496_v5  ;;  %v5597_v5 = vld [vmem:[%s7837_s1 + $0x894] ss:$72 sps:$4 sm:$0xff]  }
 0x1fc   :  { %4128 = vmatpush1.bf16.xpose.msra.mxu1 %v5499_v6  ;;  %3753 = vmatprep.subr.bf16.mxu0 %v5507_v7  ;;  %v5600_v6 = vld [vmem:[%s7837_s1 + $0x1194] ss:$72 sps:$4 sm:$0xff]   ;;  %v5595_v7 = vld [vmem:[%s7837_s1 + $0x890] ss:$72 sps:$4 sm:$0xff]  }
 0x1fd   :  { %4140 = vmatprep.subr.bf16.mxu1 %v5510_v8  ;;  %v5598_v8 = vld [vmem:[%s7837_s1 + $0x1190] ss:$72 sps:$4 sm:$0xff]  }
 0x202   :  { %3743 = vmatmul.mubr.bf16.vlgmr.msra.gmra.mrb[0].mxu0 %v5502_v9 }
 0x203   :  { %4130 = vmatmul.mubr.bf16.vlgmr.msra.gmra.mrb[0].mxu1 %v5502_v9  ;;  %3754 = vmatpush1.bf16.xpose.msra.mxu0 %v5505_v10  ;;  %v5606_v9 = vld [vmem:[%s7837_s1 + $0x2c] ss:$72 sps:$4 sm:$0xff]  }
 0x204   :  { %4141 = vmatpush1.bf16.xpose.msra.mxu1 %v5508_v11  ;;  %3755 = vmatprep.subr.bf16.mxu0 %v5513_v12  ;;  %v5609_v10 = vld [vmem:[%s7837_s1 + $0x92c] ss:$72 sps:$4 sm:$0xff]   ;;  %v5601_v11 = vld [vmem:[%s7838_s0 + $0x20] ss:$72 sps:$4 sm:$0xff]  }
 0x205   :  { %4142 = vmatprep.subr.bf16.mxu1 %v5516_v13  ;;  %3785 = vmatprep.mubr.bf16.mxu0 %v5603_v14  ;;  %v5604_v12 = vld [vmem:[%s7837_s1 + $0x28] ss:$72 sps:$4 sm:$0xff]  }
 0x206   :  { %4172 = vmatprep.mubr.bf16.mxu1 %v5603_v14  ;;  %v5607_v13 = vld [vmem:[%s7837_s1 + $0x928] ss:$72 sps:$4 sm:$0xff]   ;;  %v5612_v14 = vld [vmem:[%s7837_s1 + $0xbc] ss:$72 sps:$4 sm:$0xff]  }
 0x20b   :  { %3756 = vmatpush1.bf16.xpose.msra.mxu0 %v5511_v15  ;;  %v5615_v15 = vld [vmem:[%s7837_s1 + $0x9bc] ss:$72 sps:$4 sm:$0xff]  }
 0x20c   :  { %4143 = vmatpush1.bf16.xpose.msra.mxu1 %v5514_v16  ;;  %3757 = vmatprep.subr.bf16.mxu0 %v5519_v17  ;;  %v5702_v16 = vld [vmem:[%s7838_s0 + $0x2c] ss:$72 sps:$4 sm:$0xff]   ;;  %v5610_v17 = vld [vmem:[%s7837_s1 + $0xb8] ss:$72 sps:$4 sm:$0xff]  }
 0x20d   :  { %4144 = vmatprep.subr.bf16.mxu1 %v5522_v18  ;;  %v5613_v18 = vld [vmem:[%s7837_s1 + $0x9b8] ss:$72 sps:$4 sm:$0xff]  }
 0x213   :  { %3758 = vmatpush1.bf16.xpose.msra.mxu0 %v5517_v19  ;;  %v5618_v19 = vld [vmem:[%s7837_s1 + $0x14c] ss:$72 sps:$4 sm:$0xff]  }
 0x214   :  { %4145 = vmatpush1.bf16.xpose.msra.mxu1 %v5520_v20  ;;  %3759 = vmatprep.subr.bf16.mxu0 %v5525_v21  ;;  %v5621_v20 = vld [vmem:[%s7837_s1 + $0xa4c] ss:$72 sps:$4 sm:$0xff]   ;;  %v5616_v21 = vld [vmem:[%s7837_s1 + $0x148] ss:$72 sps:$4 sm:$0xff]  }
 0x215   :  { %4146 = vmatprep.subr.bf16.mxu1 %v5528_v22  ;;  %v5619_v22 = vld [vmem:[%s7837_s1 + $0xa48] ss:$72 sps:$4 sm:$0xff]  }
 0x21b   :  { %3760 = vmatpush1.bf16.xpose.msra.mxu0 %v5523_v23  ;;  %v5624_v23 = vld [vmem:[%s7837_s1 + $0x1dc] ss:$72 sps:$4 sm:$0xff]  }
 0x21c   :  { %4147 = vmatpush1.bf16.xpose.msra.mxu1 %v5526_v24  ;;  %3761 = vmatprep.subr.bf16.mxu0 %v5531_v25  ;;  %v5627_v24 = vld [vmem:[%s7837_s1 + $0xadc] ss:$72 sps:$4 sm:$0xff]   ;;  %v5622_v25 = vld [vmem:[%s7837_s1 + $0x1d8] ss:$72 sps:$4 sm:$0xff]  }
 0x21d   :  { %4148 = vmatprep.subr.bf16.mxu1 %v5534_v26  ;;  %v5625_v26 = vld [vmem:[%s7837_s1 + $0xad8] ss:$72 sps:$4 sm:$0xff]  }
 0x223   :  { %3762 = vmatpush1.bf16.xpose.msra.mxu0 %v5529_v27  ;;  %v5630_v27 = vld [vmem:[%s7837_s1 + $0x26c] ss:$72 sps:$4 sm:$0xff]  }
 0x224   :  { %4149 = vmatpush1.bf16.xpose.msra.mxu1 %v5532_v28  ;;  %3763 = vmatprep.subr.bf16.mxu0 %v5537_v29  ;;  %v5633_v28 = vld [vmem:[%s7837_s1 + $0xb6c] ss:$72 sps:$4 sm:$0xff]   ;;  %v5628_v29 = vld [vmem:[%s7837_s1 + $0x268] ss:$72 sps:$4 sm:$0xff]  }
 0x225   :  { %4150 = vmatprep.subr.bf16.mxu1 %v5540_v30  ;;  %v5631_v30 = vld [vmem:[%s7837_s1 + $0xb68] ss:$72 sps:$4 sm:$0xff]  }
 0x22b   :  { %3764 = vmatpush1.bf16.xpose.msra.mxu0 %v5535_v31  ;;  %v5636_v31 = vld [vmem:[%s7837_s1 + $0x2fc] ss:$72 sps:$4 sm:$0xff]  }
 0x22c   :  { %4151 = vmatpush1.bf16.xpose.msra.mxu1 %v5538_v32  ;;  %3765 = vmatprep.subr.bf16.mxu0 %v5543_v33  ;;  %v5639_v32 = vld [vmem:[%s7837_s1 + $0xbfc] ss:$72 sps:$4 sm:$0xff]   ;;  %v5634_v33 = vld [vmem:[%s7837_s1 + $0x2f8] ss:$72 sps:$4 sm:$0xff]  }
 0x22d   :  { %4152 = vmatprep.subr.bf16.mxu1 %v5546_v34  ;;  %v5637_v34 = vld [vmem:[%s7837_s1 + $0xbf8] ss:$72 sps:$4 sm:$0xff]  }
 0x233   :  { %3766 = vmatpush1.bf16.xpose.msra.mxu0 %v5541_v35  ;;  %v5642_v35 = vld [vmem:[%s7837_s1 + $0x38c] ss:$72 sps:$4 sm:$0xff]  }
 0x234   :  { %4153 = vmatpush1.bf16.xpose.msra.mxu1 %v5544_v36  ;;  %3767 = vmatprep.subr.bf16.mxu0 %v5549_v37  ;;  %v5645_v36 = vld [vmem:[%s7837_s1 + $0xc8c] ss:$72 sps:$4 sm:$0xff]   ;;  %v5640_v37 = vld [vmem:[%s7837_s1 + $0x388] ss:$72 sps:$4 sm:$0xff]  }
 0x235   :  { %4154 = vmatprep.subr.bf16.mxu1 %v5552_v38  ;;  %v5643_v38 = vld [vmem:[%s7837_s1 + $0xc88] ss:$72 sps:$4 sm:$0xff]  }
 0x23b   :  { %3768 = vmatpush1.bf16.xpose.msra.mxu0 %v5547_v39  ;;  %v5648_v39 = vld [vmem:[%s7837_s1 + $0x41c] ss:$72 sps:$4 sm:$0xff]  }
 0x23c   :  { %4155 = vmatpush1.bf16.xpose.msra.mxu1 %v5550_v40  ;;  %3769 = vmatprep.subr.bf16.mxu0 %v5555_v41  ;;  %v5651_v40 = vld [vmem:[%s7837_s1 + $0xd1c] ss:$72 sps:$4 sm:$0xff]   ;;  %v5646_v41 = vld [vmem:[%s7837_s1 + $0x418] ss:$72 sps:$4 sm:$0xff]  }
 0x23d   :  { %4156 = vmatprep.subr.bf16.mxu1 %v5558_v42  ;;  %v5649_v42 = vld [vmem:[%s7837_s1 + $0xd18] ss:$72 sps:$4 sm:$0xff]  }
 0x243   :  { %3770 = vmatpush1.bf16.xpose.msra.mxu0 %v5553_v43  ;;  %v5654_v43 = vld [vmem:[%s7837_s1 + $0x4ac] ss:$72 sps:$4 sm:$0xff]  }
 0x244   :  { %4157 = vmatpush1.bf16.xpose.msra.mxu1 %v5556_v44  ;;  %3771 = vmatprep.subr.bf16.mxu0 %v5561_v45  ;;  %v5657_v44 = vld [vmem:[%s7837_s1 + $0xdac] ss:$72 sps:$4 sm:$0xff]   ;;  %v5652_v45 = vld [vmem:[%s7837_s1 + $0x4a8] ss:$72 sps:$4 sm:$0xff]  }
 0x245   :  { %4158 = vmatprep.subr.bf16.mxu1 %v5564_v46  ;;  %v5655_v46 = vld [vmem:[%s7837_s1 + $0xda8] ss:$72 sps:$4 sm:$0xff]  }
 0x24b   :  { %3772 = vmatpush1.bf16.xpose.msra.mxu0 %v5559_v47  ;;  %v5660_v47 = vld [vmem:[%s7837_s1 + $0x53c] ss:$72 sps:$4 sm:$0xff]  }
 0x24c   :  { %4159 = vmatpush1.bf16.xpose.msra.mxu1 %v5562_v48  ;;  %3773 = vmatprep.subr.bf16.mxu0 %v5567_v49  ;;  %v5663_v48 = vld [vmem:[%s7837_s1 + $0xe3c] ss:$72 sps:$4 sm:$0xff]   ;;  %v5658_v49 = vld [vmem:[%s7837_s1 + $0x538] ss:$72 sps:$4 sm:$0xff]  }
 0x24d   :  { %4160 = vmatprep.subr.bf16.mxu1 %v5570_v50  ;;  %v5661_v50 = vld [vmem:[%s7837_s1 + $0xe38] ss:$72 sps:$4 sm:$0xff]  }
 0x253   :  { %3774 = vmatpush1.bf16.xpose.msra.mxu0 %v5565_v51  ;;  %v5666_v51 = vld [vmem:[%s7837_s1 + $0x5cc] ss:$72 sps:$4 sm:$0xff]  }
 0x254   :  { %4161 = vmatpush1.bf16.xpose.msra.mxu1 %v5568_v52  ;;  %3775 = vmatprep.subr.bf16.mxu0 %v5573_v53  ;;  %v5669_v52 = vld [vmem:[%s7837_s1 + $0xecc] ss:$72 sps:$4 sm:$0xff]   ;;  %v5664_v53 = vld [vmem:[%s7837_s1 + $0x5c8] ss:$72 sps:$4 sm:$0xff]  }
 0x255   :  { %4162 = vmatprep.subr.bf16.mxu1 %v5576_v54  ;;  %v5667_v54 = vld [vmem:[%s7837_s1 + $0xec8] ss:$72 sps:$4 sm:$0xff]  }
 0x25b   :  { %3776 = vmatpush1.bf16.xpose.msra.mxu0 %v5571_v55  ;;  %v5672_v55 = vld [vmem:[%s7837_s1 + $0x65c] ss:$72 sps:$4 sm:$0xff]  }
 0x25c   :  { %4163 = vmatpush1.bf16.xpose.msra.mxu1 %v5574_v56  ;;  %3777 = vmatprep.subr.bf16.mxu0 %v5579_v57  ;;  %v5675_v56 = vld [vmem:[%s7837_s1 + $0xf5c] ss:$72 sps:$4 sm:$0xff]   ;;  %v5670_v57 = vld [vmem:[%s7837_s1 + $0x658] ss:$72 sps:$4 sm:$0xff]  }
 0x25d   :  { %4164 = vmatprep.subr.bf16.mxu1 %v5582_v58  ;;  %v5673_v58 = vld [vmem:[%s7837_s1 + $0xf58] ss:$72 sps:$4 sm:$0xff]  }
 0x263   :  { %3778 = vmatpush1.bf16.xpose.msra.mxu0 %v5577_v59  ;;  %v5678_v59 = vld [vmem:[%s7837_s1 + $0x6ec] ss:$72 sps:$4 sm:$0xff]  }
 0x264   :  { %4165 = vmatpush1.bf16.xpose.msra.mxu1 %v5580_v60  ;;  %3779 = vmatprep.subr.bf16.mxu0 %v5585_v61  ;;  %v5681_v60 = vld [vmem:[%s7837_s1 + $0xfec] ss:$72 sps:$4 sm:$0xff]   ;;  %v5676_v61 = vld [vmem:[%s7837_s1 + $0x6e8] ss:$72 sps:$4 sm:$0xff]  }
 0x265   :  { %4166 = vmatprep.subr.bf16.mxu1 %v5588_v62  ;;  %v5679_v62 = vld [vmem:[%s7837_s1 + $0xfe8] ss:$72 sps:$4 sm:$0xff]  }
 0x26b   :  { %3780 = vmatpush1.bf16.xpose.msra.mxu0 %v5583_v63  ;;  %v5684_v63 = vld [vmem:[%s7837_s1 + $0x77c] ss:$72 sps:$4 sm:$0xff]  }
 0x26c   :  { %4167 = vmatpush1.bf16.xpose.msra.mxu1 %v5586_v0  ;;  %3781 = vmatprep.subr.bf16.mxu0 %v5591_v1  ;;  %v5687_v0 = vld [vmem:[%s7837_s1 + $0x107c] ss:$72 sps:$4 sm:$0xff]   ;;  %v5682_v1 = vld [vmem:[%s7837_s1 + $0x778] ss:$72 sps:$4 sm:$0xff]  }
 0x26d   :  { %4168 = vmatprep.subr.bf16.mxu1 %v5594_v2  ;;  %v5685_v2 = vld [vmem:[%s7837_s1 + $0x1078] ss:$72 sps:$4 sm:$0xff]  }
 0x273   :  { %3782 = vmatpush1.bf16.xpose.msra.mxu0 %v5589_v3  ;;  %v5690_v3 = vld [vmem:[%s7837_s1 + $0x80c] ss:$72 sps:$4 sm:$0xff]  }
 0x274   :  { %4169 = vmatpush1.bf16.xpose.msra.mxu1 %v5592_v4  ;;  %3783 = vmatprep.subr.bf16.mxu0 %v5597_v5  ;;  %v5693_v4 = vld [vmem:[%s7837_s1 + $0x110c] ss:$72 sps:$4 sm:$0xff]   ;;  %v5688_v5 = vld [vmem:[%s7837_s1 + $0x808] ss:$72 sps:$4 sm:$0xff]  }
 0x275   :  { %4170 = vmatprep.subr.bf16.mxu1 %v5600_v6  ;;  %v5691_v6 = vld [vmem:[%s7837_s1 + $0x1108] ss:$72 sps:$4 sm:$0xff]  }
 0x27b   :  { %3784 = vmatpush1.bf16.xpose.msra.mxu0 %v5595_v7  ;;  %v5696_v7 = vld [vmem:[%s7837_s1 + $0x89c] ss:$72 sps:$4 sm:$0xff]  }
 0x27c   :  { %4171 = vmatpush1.bf16.xpose.msra.mxu1 %v5598_v8  ;;  %3796 = vmatprep.subr.bf16.mxu0 %v5606_v9  ;;  %v5699_v8 = vld [vmem:[%s7837_s1 + $0x119c] ss:$72 sps:$4 sm:$0xff]   ;;  %v5694_v9 = vld [vmem:[%s7837_s1 + $0x898] ss:$72 sps:$4 sm:$0xff]  }
 0x27d   :  { %4183 = vmatprep.subr.bf16.mxu1 %v5609_v10  ;;  %v5697_v10 = vld [vmem:[%s7837_s1 + $0x1198] ss:$72 sps:$4 sm:$0xff]  }
 0x282   :  { %3786 = vmatmul.mubr.bf16.vlgmr.msra.gmra.mrb[0].mxu0 %v5601_v11 }
 0x283   :  { %4173 = vmatmul.mubr.bf16.vlgmr.msra.gmra.mrb[0].mxu1 %v5601_v11  ;;  %3797 = vmatpush1.bf16.xpose.msra.mxu0 %v5604_v12  ;;  %v5705_v11 = vld [vmem:[%s7837_s1 + $0x34] ss:$72 sps:$4 sm:$0xff]  }
 0x284   :  { %4184 = vmatpush1.bf16.xpose.msra.mxu1 %v5607_v13  ;;  %3798 = vmatprep.subr.bf16.mxu0 %v5612_v14  ;;  %v5708_v12 = vld [vmem:[%s7837_s1 + $0x934] ss:$72 sps:$4 sm:$0xff]   ;;  %v5700_v13 = vld [vmem:[%s7838_s0 + $0x28] ss:$72 sps:$4 sm:$0xff]  }
 0x285   :  { %4185 = vmatprep.subr.bf16.mxu1 %v5615_v15  ;;  %3828 = vmatprep.mubr.bf16.mxu0 %v5702_v16  ;;  %v5703_v14 = vld [vmem:[%s7837_s1 + $0x30] ss:$72 sps:$4 sm:$0xff]  }
 0x286   :  { %4215 = vmatprep.mubr.bf16.mxu1 %v5702_v16  ;;  %v5706_v15 = vld [vmem:[%s7837_s1 + $0x930] ss:$72 sps:$4 sm:$0xff]   ;;  %v5711_v16 = vld [vmem:[%s7837_s1 + $0xc4] ss:$72 sps:$4 sm:$0xff]  }
 0x28b   :  { %3799 = vmatpush1.bf16.xpose.msra.mxu0 %v5610_v17  ;;  %v5714_v17 = vld [vmem:[%s7837_s1 + $0x9c4] ss:$72 sps:$4 sm:$0xff]  }
 0x28c   :  { %4186 = vmatpush1.bf16.xpose.msra.mxu1 %v5613_v18  ;;  %3800 = vmatprep.subr.bf16.mxu0 %v5618_v19  ;;  %v5801_v18 = vld [vmem:[%s7838_s0 + $0x34] ss:$72 sps:$4 sm:$0xff]   ;;  %v5709_v19 = vld [vmem:[%s7837_s1 + $0xc0] ss:$72 sps:$4 sm:$0xff]  }
 0x28d   :  { %4187 = vmatprep.subr.bf16.mxu1 %v5621_v20  ;;  %v5712_v20 = vld [vmem:[%s7837_s1 + $0x9c0] ss:$72 sps:$4 sm:$0xff]  }
 0x293   :  { %3801 = vmatpush1.bf16.xpose.msra.mxu0 %v5616_v21  ;;  %v5717_v21 = vld [vmem:[%s7837_s1 + $0x154] ss:$72 sps:$4 sm:$0xff]  }
 0x294   :  { %4188 = vmatpush1.bf16.xpose.msra.mxu1 %v5619_v22  ;;  %3802 = vmatprep.subr.bf16.mxu0 %v5624_v23  ;;  %v5720_v22 = vld [vmem:[%s7837_s1 + $0xa54] ss:$72 sps:$4 sm:$0xff]   ;;  %v5715_v23 = vld [vmem:[%s7837_s1 + $0x150] ss:$72 sps:$4 sm:$0xff]  }
 0x295   :  { %4189 = vmatprep.subr.bf16.mxu1 %v5627_v24  ;;  %v5718_v24 = vld [vmem:[%s7837_s1 + $0xa50] ss:$72 sps:$4 sm:$0xff]  }
 0x29b   :  { %3803 = vmatpush1.bf16.xpose.msra.mxu0 %v5622_v25  ;;  %v5723_v25 = vld [vmem:[%s7837_s1 + $0x1e4] ss:$72 sps:$4 sm:$0xff]  }
 0x29c   :  { %4190 = vmatpush1.bf16.xpose.msra.mxu1 %v5625_v26  ;;  %3804 = vmatprep.subr.bf16.mxu0 %v5630_v27  ;;  %v5726_v26 = vld [vmem:[%s7837_s1 + $0xae4] ss:$72 sps:$4 sm:$0xff]   ;;  %v5721_v27 = vld [vmem:[%s7837_s1 + $0x1e0] ss:$72 sps:$4 sm:$0xff]  }
 0x29d   :  { %4191 = vmatprep.subr.bf16.mxu1 %v5633_v28  ;;  %v5724_v28 = vld [vmem:[%s7837_s1 + $0xae0] ss:$72 sps:$4 sm:$0xff]  }
 0x2a3   :  { %3805 = vmatpush1.bf16.xpose.msra.mxu0 %v5628_v29  ;;  %v5729_v29 = vld [vmem:[%s7837_s1 + $0x274] ss:$72 sps:$4 sm:$0xff]  }
 0x2a4   :  { %4192 = vmatpush1.bf16.xpose.msra.mxu1 %v5631_v30  ;;  %3806 = vmatprep.subr.bf16.mxu0 %v5636_v31  ;;  %v5732_v30 = vld [vmem:[%s7837_s1 + $0xb74] ss:$72 sps:$4 sm:$0xff]   ;;  %v5727_v31 = vld [vmem:[%s7837_s1 + $0x270] ss:$72 sps:$4 sm:$0xff]  }
 0x2a5   :  { %4193 = vmatprep.subr.bf16.mxu1 %v5639_v32  ;;  %v5730_v32 = vld [vmem:[%s7837_s1 + $0xb70] ss:$72 sps:$4 sm:$0xff]  }
 0x2ab   :  { %3807 = vmatpush1.bf16.xpose.msra.mxu0 %v5634_v33  ;;  %v5735_v33 = vld [vmem:[%s7837_s1 + $0x304] ss:$72 sps:$4 sm:$0xff]  }
 0x2ac   :  { %4194 = vmatpush1.bf16.xpose.msra.mxu1 %v5637_v34  ;;  %3808 = vmatprep.subr.bf16.mxu0 %v5642_v35  ;;  %v5738_v34 = vld [vmem:[%s7837_s1 + $0xc04] ss:$72 sps:$4 sm:$0xff]   ;;  %v5733_v35 = vld [vmem:[%s7837_s1 + $0x300] ss:$72 sps:$4 sm:$0xff]  }
 0x2ad   :  { %4195 = vmatprep.subr.bf16.mxu1 %v5645_v36  ;;  %v5736_v36 = vld [vmem:[%s7837_s1 + $0xc00] ss:$72 sps:$4 sm:$0xff]  }
 0x2b3   :  { %3809 = vmatpush1.bf16.xpose.msra.mxu0 %v5640_v37  ;;  %v5741_v37 = vld [vmem:[%s7837_s1 + $0x394] ss:$72 sps:$4 sm:$0xff]  }
 0x2b4   :  { %4196 = vmatpush1.bf16.xpose.msra.mxu1 %v5643_v38  ;;  %3810 = vmatprep.subr.bf16.mxu0 %v5648_v39  ;;  %v5744_v38 = vld [vmem:[%s7837_s1 + $0xc94] ss:$72 sps:$4 sm:$0xff]   ;;  %v5739_v39 = vld [vmem:[%s7837_s1 + $0x390] ss:$72 sps:$4 sm:$0xff]  }
 0x2b5   :  { %4197 = vmatprep.subr.bf16.mxu1 %v5651_v40  ;;  %v5742_v40 = vld [vmem:[%s7837_s1 + $0xc90] ss:$72 sps:$4 sm:$0xff]  }
 0x2bb   :  { %3811 = vmatpush1.bf16.xpose.msra.mxu0 %v5646_v41  ;;  %v5747_v41 = vld [vmem:[%s7837_s1 + $0x424] ss:$72 sps:$4 sm:$0xff]  }
 0x2bc   :  { %4198 = vmatpush1.bf16.xpose.msra.mxu1 %v5649_v42  ;;  %3812 = vmatprep.subr.bf16.mxu0 %v5654_v43  ;;  %v5750_v42 = vld [vmem:[%s7837_s1 + $0xd24] ss:$72 sps:$4 sm:$0xff]   ;;  %v5745_v43 = vld [vmem:[%s7837_s1 + $0x420] ss:$72 sps:$4 sm:$0xff]  }
 0x2bd   :  { %4199 = vmatprep.subr.bf16.mxu1 %v5657_v44  ;;  %v5748_v44 = vld [vmem:[%s7837_s1 + $0xd20] ss:$72 sps:$4 sm:$0xff]  }
 0x2c3   :  { %3813 = vmatpush1.bf16.xpose.msra.mxu0 %v5652_v45  ;;  %v5753_v45 = vld [vmem:[%s7837_s1 + $0x4b4] ss:$72 sps:$4 sm:$0xff]  }
 0x2c4   :  { %4200 = vmatpush1.bf16.xpose.msra.mxu1 %v5655_v46  ;;  %3814 = vmatprep.subr.bf16.mxu0 %v5660_v47  ;;  %v5756_v46 = vld [vmem:[%s7837_s1 + $0xdb4] ss:$72 sps:$4 sm:$0xff]   ;;  %v5751_v47 = vld [vmem:[%s7837_s1 + $0x4b0] ss:$72 sps:$4 sm:$0xff]  }
 0x2c5   :  { %4201 = vmatprep.subr.bf16.mxu1 %v5663_v48  ;;  %v5754_v48 = vld [vmem:[%s7837_s1 + $0xdb0] ss:$72 sps:$4 sm:$0xff]  }
 0x2cb   :  { %3815 = vmatpush1.bf16.xpose.msra.mxu0 %v5658_v49  ;;  %v5759_v49 = vld [vmem:[%s7837_s1 + $0x544] ss:$72 sps:$4 sm:$0xff]  }
 0x2cc   :  { %4202 = vmatpush1.bf16.xpose.msra.mxu1 %v5661_v50  ;;  %3816 = vmatprep.subr.bf16.mxu0 %v5666_v51  ;;  %v5762_v50 = vld [vmem:[%s7837_s1 + $0xe44] ss:$72 sps:$4 sm:$0xff]   ;;  %v5757_v51 = vld [vmem:[%s7837_s1 + $0x540] ss:$72 sps:$4 sm:$0xff]  }
 0x2cd   :  { %4203 = vmatprep.subr.bf16.mxu1 %v5669_v52  ;;  %v5760_v52 = vld [vmem:[%s7837_s1 + $0xe40] ss:$72 sps:$4 sm:$0xff]  }
 0x2d3   :  { %3817 = vmatpush1.bf16.xpose.msra.mxu0 %v5664_v53  ;;  %v5765_v53 = vld [vmem:[%s7837_s1 + $0x5d4] ss:$72 sps:$4 sm:$0xff]  }
 0x2d4   :  { %4204 = vmatpush1.bf16.xpose.msra.mxu1 %v5667_v54  ;;  %3818 = vmatprep.subr.bf16.mxu0 %v5672_v55  ;;  %v5768_v54 = vld [vmem:[%s7837_s1 + $0xed4] ss:$72 sps:$4 sm:$0xff]   ;;  %v5763_v55 = vld [vmem:[%s7837_s1 + $0x5d0] ss:$72 sps:$4 sm:$0xff]  }
 0x2d5   :  { %4205 = vmatprep.subr.bf16.mxu1 %v5675_v56  ;;  %v5766_v56 = vld [vmem:[%s7837_s1 + $0xed0] ss:$72 sps:$4 sm:$0xff]  }
 0x2db   :  { %3819 = vmatpush1.bf16.xpose.msra.mxu0 %v5670_v57  ;;  %v5771_v57 = vld [vmem:[%s7837_s1 + $0x664] ss:$72 sps:$4 sm:$0xff]  }
 0x2dc   :  { %4206 = vmatpush1.bf16.xpose.msra.mxu1 %v5673_v58  ;;  %3820 = vmatprep.subr.bf16.mxu0 %v5678_v59  ;;  %v5774_v58 = vld [vmem:[%s7837_s1 + $0xf64] ss:$72 sps:$4 sm:$0xff]   ;;  %v5769_v59 = vld [vmem:[%s7837_s1 + $0x660] ss:$72 sps:$4 sm:$0xff]  }
 0x2dd   :  { %4207 = vmatprep.subr.bf16.mxu1 %v5681_v60  ;;  %v5772_v60 = vld [vmem:[%s7837_s1 + $0xf60] ss:$72 sps:$4 sm:$0xff]  }
 0x2e3   :  { %3821 = vmatpush1.bf16.xpose.msra.mxu0 %v5676_v61  ;;  %v5777_v61 = vld [vmem:[%s7837_s1 + $0x6f4] ss:$72 sps:$4 sm:$0xff]  }
 0x2e4   :  { %4208 = vmatpush1.bf16.xpose.msra.mxu1 %v5679_v62  ;;  %3822 = vmatprep.subr.bf16.mxu0 %v5684_v63  ;;  %v5780_v62 = vld [vmem:[%s7837_s1 + $0xff4] ss:$72 sps:$4 sm:$0xff]   ;;  %v5775_v63 = vld [vmem:[%s7837_s1 + $0x6f0] ss:$72 sps:$4 sm:$0xff]  }
 0x2e5   :  { %4209 = vmatprep.subr.bf16.mxu1 %v5687_v0  ;;  %v5778_v0 = vld [vmem:[%s7837_s1 + $0xff0] ss:$72 sps:$4 sm:$0xff]  }
 0x2eb   :  { %3823 = vmatpush1.bf16.xpose.msra.mxu0 %v5682_v1  ;;  %v5783_v1 = vld [vmem:[%s7837_s1 + $0x784] ss:$72 sps:$4 sm:$0xff]  }
 0x2ec   :  { %4210 = vmatpush1.bf16.xpose.msra.mxu1 %v5685_v2  ;;  %3824 = vmatprep.subr.bf16.mxu0 %v5690_v3  ;;  %v5786_v2 = vld [vmem:[%s7837_s1 + $0x1084] ss:$72 sps:$4 sm:$0xff]   ;;  %v5781_v3 = vld [vmem:[%s7837_s1 + $0x780] ss:$72 sps:$4 sm:$0xff]  }
 0x2ed   :  { %4211 = vmatprep.subr.bf16.mxu1 %v5693_v4  ;;  %v5784_v4 = vld [vmem:[%s7837_s1 + $0x1080] ss:$72 sps:$4 sm:$0xff]  }
 0x2f3   :  { %3825 = vmatpush1.bf16.xpose.msra.mxu0 %v5688_v5  ;;  %v5789_v5 = vld [vmem:[%s7837_s1 + $0x814] ss:$72 sps:$4 sm:$0xff]  }
 0x2f4   :  { %4212 = vmatpush1.bf16.xpose.msra.mxu1 %v5691_v6  ;;  %3826 = vmatprep.subr.bf16.mxu0 %v5696_v7  ;;  %v5792_v6 = vld [vmem:[%s7837_s1 + $0x1114] ss:$72 sps:$4 sm:$0xff]   ;;  %v5787_v7 = vld [vmem:[%s7837_s1 + $0x810] ss:$72 sps:$4 sm:$0xff]  }
 0x2f5   :  { %4213 = vmatprep.subr.bf16.mxu1 %v5699_v8  ;;  %v5790_v8 = vld [vmem:[%s7837_s1 + $0x1110] ss:$72 sps:$4 sm:$0xff]  }
 0x2fb   :  { %3827 = vmatpush1.bf16.xpose.msra.mxu0 %v5694_v9  ;;  %v5795_v9 = vld [vmem:[%s7837_s1 + $0x8a4] ss:$72 sps:$4 sm:$0xff]  }
 0x2fc   :  { %4214 = vmatpush1.bf16.xpose.msra.mxu1 %v5697_v10  ;;  %3839 = vmatprep.subr.bf16.mxu0 %v5705_v11  ;;  %v5798_v10 = vld [vmem:[%s7837_s1 + $0x11a4] ss:$72 sps:$4 sm:$0xff]   ;;  %v5793_v11 = vld [vmem:[%s7837_s1 + $0x8a0] ss:$72 sps:$4 sm:$0xff]  }
 0x2fd   :  { %4226 = vmatprep.subr.bf16.mxu1 %v5708_v12  ;;  %v5796_v12 = vld [vmem:[%s7837_s1 + $0x11a0] ss:$72 sps:$4 sm:$0xff]  }
 0x302   :  { %3829 = vmatmul.mubr.bf16.vlgmr.msra.gmra.mrb[0].mxu0 %v5700_v13 }
 0x303   :  { %4216 = vmatmul.mubr.bf16.vlgmr.msra.gmra.mrb[0].mxu1 %v5700_v13  ;;  %3840 = vmatpush1.bf16.xpose.msra.mxu0 %v5703_v14  ;;  %v5804_v13 = vld [vmem:[%s7837_s1 + $0x3c] ss:$72 sps:$4 sm:$0xff]  }
 0x304   :  { %4227 = vmatpush1.bf16.xpose.msra.mxu1 %v5706_v15  ;;  %3841 = vmatprep.subr.bf16.mxu0 %v5711_v16  ;;  %v5807_v14 = vld [vmem:[%s7837_s1 + $0x93c] ss:$72 sps:$4 sm:$0xff]   ;;  %v5799_v15 = vld [vmem:[%s7838_s0 + $0x30] ss:$72 sps:$4 sm:$0xff]  }
 0x305   :  { %4228 = vmatprep.subr.bf16.mxu1 %v5714_v17  ;;  %3871 = vmatprep.mubr.bf16.mxu0 %v5801_v18  ;;  %v5802_v16 = vld [vmem:[%s7837_s1 + $0x38] ss:$72 sps:$4 sm:$0xff]  }
 0x306   :  { %4258 = vmatprep.mubr.bf16.mxu1 %v5801_v18  ;;  %v5805_v17 = vld [vmem:[%s7837_s1 + $0x938] ss:$72 sps:$4 sm:$0xff]   ;;  %v5810_v18 = vld [vmem:[%s7837_s1 + $0xcc] ss:$72 sps:$4 sm:$0xff]  }
 0x30b   :  { %3842 = vmatpush1.bf16.xpose.msra.mxu0 %v5709_v19  ;;  %v5813_v19 = vld [vmem:[%s7837_s1 + $0x9cc] ss:$72 sps:$4 sm:$0xff]  }
 0x30c   :  { %4229 = vmatpush1.bf16.xpose.msra.mxu1 %v5712_v20  ;;  %3843 = vmatprep.subr.bf16.mxu0 %v5717_v21  ;;  %v5900_v20 = vld [vmem:[%s7838_s0 + $0x3c] ss:$72 sps:$4 sm:$0xff]   ;;  %v5808_v21 = vld [vmem:[%s7837_s1 + $0xc8] ss:$72 sps:$4 sm:$0xff]  }
 0x30d   :  { %4230 = vmatprep.subr.bf16.mxu1 %v5720_v22  ;;  %v5811_v22 = vld [vmem:[%s7837_s1 + $0x9c8] ss:$72 sps:$4 sm:$0xff]  }
 0x313   :  { %3844 = vmatpush1.bf16.xpose.msra.mxu0 %v5715_v23  ;;  %v5816_v23 = vld [vmem:[%s7837_s1 + $0x15c] ss:$72 sps:$4 sm:$0xff]  }
 0x314   :  { %4231 = vmatpush1.bf16.xpose.msra.mxu1 %v5718_v24  ;;  %3845 = vmatprep.subr.bf16.mxu0 %v5723_v25  ;;  %v5819_v24 = vld [vmem:[%s7837_s1 + $0xa5c] ss:$72 sps:$4 sm:$0xff]   ;;  %v5814_v25 = vld [vmem:[%s7837_s1 + $0x158] ss:$72 sps:$4 sm:$0xff]  }
 0x315   :  { %4232 = vmatprep.subr.bf16.mxu1 %v5726_v26  ;;  %v5817_v26 = vld [vmem:[%s7837_s1 + $0xa58] ss:$72 sps:$4 sm:$0xff]  }
 0x31b   :  { %3846 = vmatpush1.bf16.xpose.msra.mxu0 %v5721_v27  ;;  %v5822_v27 = vld [vmem:[%s7837_s1 + $0x1ec] ss:$72 sps:$4 sm:$0xff]  }
 0x31c   :  { %4233 = vmatpush1.bf16.xpose.msra.mxu1 %v5724_v28  ;;  %3847 = vmatprep.subr.bf16.mxu0 %v5729_v29  ;;  %v5825_v28 = vld [vmem:[%s7837_s1 + $0xaec] ss:$72 sps:$4 sm:$0xff]   ;;  %v5820_v29 = vld [vmem:[%s7837_s1 + $0x1e8] ss:$72 sps:$4 sm:$0xff]  }
 0x31d   :  { %4234 = vmatprep.subr.bf16.mxu1 %v5732_v30  ;;  %v5823_v30 = vld [vmem:[%s7837_s1 + $0xae8] ss:$72 sps:$4 sm:$0xff]  }
 0x323   :  { %3848 = vmatpush1.bf16.xpose.msra.mxu0 %v5727_v31  ;;  %v5828_v31 = vld [vmem:[%s7837_s1 + $0x27c] ss:$72 sps:$4 sm:$0xff]  }
 0x324   :  { %4235 = vmatpush1.bf16.xpose.msra.mxu1 %v5730_v32  ;;  %3849 = vmatprep.subr.bf16.mxu0 %v5735_v33  ;;  %v5831_v32 = vld [vmem:[%s7837_s1 + $0xb7c] ss:$72 sps:$4 sm:$0xff]   ;;  %v5826_v33 = vld [vmem:[%s7837_s1 + $0x278] ss:$72 sps:$4 sm:$0xff]  }
 0x325   :  { %4236 = vmatprep.subr.bf16.mxu1 %v5738_v34  ;;  %v5829_v34 = vld [vmem:[%s7837_s1 + $0xb78] ss:$72 sps:$4 sm:$0xff]  }
 0x32b   :  { %3850 = vmatpush1.bf16.xpose.msra.mxu0 %v5733_v35  ;;  %v5834_v35 = vld [vmem:[%s7837_s1 + $0x30c] ss:$72 sps:$4 sm:$0xff]  }
 0x32c   :  { %4237 = vmatpush1.bf16.xpose.msra.mxu1 %v5736_v36  ;;  %3851 = vmatprep.subr.bf16.mxu0 %v5741_v37  ;;  %v5837_v36 = vld [vmem:[%s7837_s1 + $0xc0c] ss:$72 sps:$4 sm:$0xff]   ;;  %v5832_v37 = vld [vmem:[%s7837_s1 + $0x308] ss:$72 sps:$4 sm:$0xff]  }
 0x32d   :  { %4238 = vmatprep.subr.bf16.mxu1 %v5744_v38  ;;  %v5835_v38 = vld [vmem:[%s7837_s1 + $0xc08] ss:$72 sps:$4 sm:$0xff]  }
 0x333   :  { %3852 = vmatpush1.bf16.xpose.msra.mxu0 %v5739_v39  ;;  %v5840_v39 = vld [vmem:[%s7837_s1 + $0x39c] ss:$72 sps:$4 sm:$0xff]  }
 0x334   :  { %4239 = vmatpush1.bf16.xpose.msra.mxu1 %v5742_v40  ;;  %3853 = vmatprep.subr.bf16.mxu0 %v5747_v41  ;;  %v5843_v40 = vld [vmem:[%s7837_s1 + $0xc9c] ss:$72 sps:$4 sm:$0xff]   ;;  %v5838_v41 = vld [vmem:[%s7837_s1 + $0x398] ss:$72 sps:$4 sm:$0xff]  }
 0x335   :  { %4240 = vmatprep.subr.bf16.mxu1 %v5750_v42  ;;  %v5841_v42 = vld [vmem:[%s7837_s1 + $0xc98] ss:$72 sps:$4 sm:$0xff]  }
 0x33b   :  { %3854 = vmatpush1.bf16.xpose.msra.mxu0 %v5745_v43  ;;  %v5846_v43 = vld [vmem:[%s7837_s1 + $0x42c] ss:$72 sps:$4 sm:$0xff]  }
 0x33c   :  { %4241 = vmatpush1.bf16.xpose.msra.mxu1 %v5748_v44  ;;  %3855 = vmatprep.subr.bf16.mxu0 %v5753_v45  ;;  %v5849_v44 = vld [vmem:[%s7837_s1 + $0xd2c] ss:$72 sps:$4 sm:$0xff]   ;;  %v5844_v45 = vld [vmem:[%s7837_s1 + $0x428] ss:$72 sps:$4 sm:$0xff]  }
 0x33d   :  { %4242 = vmatprep.subr.bf16.mxu1 %v5756_v46  ;;  %v5847_v46 = vld [vmem:[%s7837_s1 + $0xd28] ss:$72 sps:$4 sm:$0xff]  }
 0x343   :  { %3856 = vmatpush1.bf16.xpose.msra.mxu0 %v5751_v47  ;;  %v5852_v47 = vld [vmem:[%s7837_s1 + $0x4bc] ss:$72 sps:$4 sm:$0xff]  }
 0x344   :  { %4243 = vmatpush1.bf16.xpose.msra.mxu1 %v5754_v48  ;;  %3857 = vmatprep.subr.bf16.mxu0 %v5759_v49  ;;  %v5855_v48 = vld [vmem:[%s7837_s1 + $0xdbc] ss:$72 sps:$4 sm:$0xff]   ;;  %v5850_v49 = vld [vmem:[%s7837_s1 + $0x4b8] ss:$72 sps:$4 sm:$0xff]  }
 0x345   :  { %4244 = vmatprep.subr.bf16.mxu1 %v5762_v50  ;;  %v5853_v50 = vld [vmem:[%s7837_s1 + $0xdb8] ss:$72 sps:$4 sm:$0xff]  }
 0x34b   :  { %3858 = vmatpush1.bf16.xpose.msra.mxu0 %v5757_v51  ;;  %v5858_v51 = vld [vmem:[%s7837_s1 + $0x54c] ss:$72 sps:$4 sm:$0xff]  }
 0x34c   :  { %4245 = vmatpush1.bf16.xpose.msra.mxu1 %v5760_v52  ;;  %3859 = vmatprep.subr.bf16.mxu0 %v5765_v53  ;;  %v5861_v52 = vld [vmem:[%s7837_s1 + $0xe4c] ss:$72 sps:$4 sm:$0xff]   ;;  %v5856_v53 = vld [vmem:[%s7837_s1 + $0x548] ss:$72 sps:$4 sm:$0xff]  }
 0x34d   :  { %4246 = vmatprep.subr.bf16.mxu1 %v5768_v54  ;;  %v5859_v54 = vld [vmem:[%s7837_s1 + $0xe48] ss:$72 sps:$4 sm:$0xff]  }
 0x353   :  { %3860 = vmatpush1.bf16.xpose.msra.mxu0 %v5763_v55  ;;  %v5864_v55 = vld [vmem:[%s7837_s1 + $0x5dc] ss:$72 sps:$4 sm:$0xff]  }
 0x354   :  { %4247 = vmatpush1.bf16.xpose.msra.mxu1 %v5766_v56  ;;  %3861 = vmatprep.subr.bf16.mxu0 %v5771_v57  ;;  %v5867_v56 = vld [vmem:[%s7837_s1 + $0xedc] ss:$72 sps:$4 sm:$0xff]   ;;  %v5862_v57 = vld [vmem:[%s7837_s1 + $0x5d8] ss:$72 sps:$4 sm:$0xff]  }
 0x355   :  { %4248 = vmatprep.subr.bf16.mxu1 %v5774_v58  ;;  %v5865_v58 = vld [vmem:[%s7837_s1 + $0xed8] ss:$72 sps:$4 sm:$0xff]  }
 0x35b   :  { %3862 = vmatpush1.bf16.xpose.msra.mxu0 %v5769_v59  ;;  %v5870_v59 = vld [vmem:[%s7837_s1 + $0x66c] ss:$72 sps:$4 sm:$0xff]  }
 0x35c   :  { %4249 = vmatpush1.bf16.xpose.msra.mxu1 %v5772_v60  ;;  %3863 = vmatprep.subr.bf16.mxu0 %v5777_v61  ;;  %v5873_v60 = vld [vmem:[%s7837_s1 + $0xf6c] ss:$72 sps:$4 sm:$0xff]   ;;  %v5868_v61 = vld [vmem:[%s7837_s1 + $0x668] ss:$72 sps:$4 sm:$0xff]  }
 0x35d   :  { %4250 = vmatprep.subr.bf16.mxu1 %v5780_v62  ;;  %v5871_v62 = vld [vmem:[%s7837_s1 + $0xf68] ss:$72 sps:$4 sm:$0xff]  }
 0x363   :  { %3864 = vmatpush1.bf16.xpose.msra.mxu0 %v5775_v63  ;;  %v5876_v63 = vld [vmem:[%s7837_s1 + $0x6fc] ss:$72 sps:$4 sm:$0xff]  }
 0x364   :  { %4251 = vmatpush1.bf16.xpose.msra.mxu1 %v5778_v0  ;;  %3865 = vmatprep.subr.bf16.mxu0 %v5783_v1  ;;  %v5879_v0 = vld [vmem:[%s7837_s1 + $0xffc] ss:$72 sps:$4 sm:$0xff]   ;;  %v5874_v1 = vld [vmem:[%s7837_s1 + $0x6f8] ss:$72 sps:$4 sm:$0xff]  }
 0x365   :  { %4252 = vmatprep.subr.bf16.mxu1 %v5786_v2  ;;  %v5877_v2 = vld [vmem:[%s7837_s1 + $0xff8] ss:$72 sps:$4 sm:$0xff]  }
 0x36b   :  { %3866 = vmatpush1.bf16.xpose.msra.mxu0 %v5781_v3  ;;  %v5882_v3 = vld [vmem:[%s7837_s1 + $0x78c] ss:$72 sps:$4 sm:$0xff]  }
 0x36c   :  { %4253 = vmatpush1.bf16.xpose.msra.mxu1 %v5784_v4  ;;  %3867 = vmatprep.subr.bf16.mxu0 %v5789_v5  ;;  %v5885_v4 = vld [vmem:[%s7837_s1 + $0x108c] ss:$72 sps:$4 sm:$0xff]   ;;  %v5880_v5 = vld [vmem:[%s7837_s1 + $0x788] ss:$72 sps:$4 sm:$0xff]  }
 0x36d   :  { %4254 = vmatprep.subr.bf16.mxu1 %v5792_v6  ;;  %v5883_v6 = vld [vmem:[%s7837_s1 + $0x1088] ss:$72 sps:$4 sm:$0xff]  }
 0x373   :  { %3868 = vmatpush1.bf16.xpose.msra.mxu0 %v5787_v7  ;;  %v5888_v7 = vld [vmem:[%s7837_s1 + $0x81c] ss:$72 sps:$4 sm:$0xff]  }
 0x374   :  { %4255 = vmatpush1.bf16.xpose.msra.mxu1 %v5790_v8  ;;  %3869 = vmatprep.subr.bf16.mxu0 %v5795_v9  ;;  %v5891_v8 = vld [vmem:[%s7837_s1 + $0x111c] ss:$72 sps:$4 sm:$0xff]   ;;  %v5886_v9 = vld [vmem:[%s7837_s1 + $0x818] ss:$72 sps:$4 sm:$0xff]  }
 0x375   :  { %4256 = vmatprep.subr.bf16.mxu1 %v5798_v10  ;;  %v5889_v10 = vld [vmem:[%s7837_s1 + $0x1118] ss:$72 sps:$4 sm:$0xff]  }
 0x37b   :  { %3870 = vmatpush1.bf16.xpose.msra.mxu0 %v5793_v11  ;;  %v5894_v11 = vld [vmem:[%s7837_s1 + $0x8ac] ss:$72 sps:$4 sm:$0xff]  }
 0x37c   :  { %4257 = vmatpush1.bf16.xpose.msra.mxu1 %v5796_v12  ;;  %3882 = vmatprep.subr.bf16.mxu0 %v5804_v13  ;;  %v5897_v12 = vld [vmem:[%s7837_s1 + $0x11ac] ss:$72 sps:$4 sm:$0xff]   ;;  %v5892_v13 = vld [vmem:[%s7837_s1 + $0x8a8] ss:$72 sps:$4 sm:$0xff]  }
 0x37d   :  { %4269 = vmatprep.subr.bf16.mxu1 %v5807_v14  ;;  %v5895_v14 = vld [vmem:[%s7837_s1 + $0x11a8] ss:$72 sps:$4 sm:$0xff]  }
 0x382   :  { %3872 = vmatmul.mubr.bf16.vlgmr.msra.gmra.mrb[0].mxu0 %v5799_v15 }
 0x383   :  { %4259 = vmatmul.mubr.bf16.vlgmr.msra.gmra.mrb[0].mxu1 %v5799_v15  ;;  %3883 = vmatpush1.bf16.xpose.msra.mxu0 %v5802_v16  ;;  %v5903_v15 = vld [vmem:[%s7837_s1 + $0x44] ss:$72 sps:$4 sm:$0xff]  }
 0x384   :  { %4270 = vmatpush1.bf16.xpose.msra.mxu1 %v5805_v17  ;;  %3884 = vmatprep.subr.bf16.mxu0 %v5810_v18  ;;  %v5906_v16 = vld [vmem:[%s7837_s1 + $0x944] ss:$72 sps:$4 sm:$0xff]   ;;  %v5898_v17 = vld [vmem:[%s7838_s0 + $0x38] ss:$72 sps:$4 sm:$0xff]  }
 0x385   :  { %4271 = vmatprep.subr.bf16.mxu1 %v5813_v19  ;;  %3914 = vmatprep.mubr.bf16.mxu0 %v5900_v20  ;;  %v5901_v18 = vld [vmem:[%s7837_s1 + $0x40] ss:$72 sps:$4 sm:$0xff]  }
 0x386   :  { %4301 = vmatprep.mubr.bf16.mxu1 %v5900_v20  ;;  %v5904_v19 = vld [vmem:[%s7837_s1 + $0x940] ss:$72 sps:$4 sm:$0xff]   ;;  %v5909_v20 = vld [vmem:[%s7837_s1 + $0xd4] ss:$72 sps:$4 sm:$0xff]  }
 0x38b   :  { %3885 = vmatpush1.bf16.xpose.msra.mxu0 %v5808_v21  ;;  %v5912_v21 = vld [vmem:[%s7837_s1 + $0x9d4] ss:$72 sps:$4 sm:$0xff]  }
 0x38c   :  { %4272 = vmatpush1.bf16.xpose.msra.mxu1 %v5811_v22  ;;  %3886 = vmatprep.subr.bf16.mxu0 %v5816_v23  ;;  %v5999_v22 = vld [vmem:[%s7838_s0 + $0x44] ss:$72 sps:$4 sm:$0xff]   ;;  %v5907_v23 = vld [vmem:[%s7837_s1 + $0xd0] ss:$72 sps:$4 sm:$0xff]  }
 0x38d   :  { %4273 = vmatprep.subr.bf16.mxu1 %v5819_v24  ;;  %v5910_v24 = vld [vmem:[%s7837_s1 + $0x9d0] ss:$72 sps:$4 sm:$0xff]  }
 0x393   :  { %3887 = vmatpush1.bf16.xpose.msra.mxu0 %v5814_v25  ;;  %v5915_v25 = vld [vmem:[%s7837_s1 + $0x164] ss:$72 sps:$4 sm:$0xff]  }
 0x394   :  { %4274 = vmatpush1.bf16.xpose.msra.mxu1 %v5817_v26  ;;  %3888 = vmatprep.subr.bf16.mxu0 %v5822_v27  ;;  %v5918_v26 = vld [vmem:[%s7837_s1 + $0xa64] ss:$72 sps:$4 sm:$0xff]   ;;  %v5913_v27 = vld [vmem:[%s7837_s1 + $0x160] ss:$72 sps:$4 sm:$0xff]  }
 0x395   :  { %4275 = vmatprep.subr.bf16.mxu1 %v5825_v28  ;;  %v5916_v28 = vld [vmem:[%s7837_s1 + $0xa60] ss:$72 sps:$4 sm:$0xff]  }
 0x39b   :  { %3889 = vmatpush1.bf16.xpose.msra.mxu0 %v5820_v29  ;;  %v5921_v29 = vld [vmem:[%s7837_s1 + $0x1f4] ss:$72 sps:$4 sm:$0xff]  }
 0x39c   :  { %4276 = vmatpush1.bf16.xpose.msra.mxu1 %v5823_v30  ;;  %3890 = vmatprep.subr.bf16.mxu0 %v5828_v31  ;;  %v5924_v30 = vld [vmem:[%s7837_s1 + $0xaf4] ss:$72 sps:$4 sm:$0xff]   ;;  %v5919_v31 = vld [vmem:[%s7837_s1 + $0x1f0] ss:$72 sps:$4 sm:$0xff]  }
 0x39d   :  { %4277 = vmatprep.subr.bf16.mxu1 %v5831_v32  ;;  %v5922_v32 = vld [vmem:[%s7837_s1 + $0xaf0] ss:$72 sps:$4 sm:$0xff]  }
 0x3a3   :  { %3891 = vmatpush1.bf16.xpose.msra.mxu0 %v5826_v33  ;;  %v5927_v33 = vld [vmem:[%s7837_s1 + $0x284] ss:$72 sps:$4 sm:$0xff]  }
 0x3a4   :  { %4278 = vmatpush1.bf16.xpose.msra.mxu1 %v5829_v34  ;;  %3892 = vmatprep.subr.bf16.mxu0 %v5834_v35  ;;  %v5930_v34 = vld [vmem:[%s7837_s1 + $0xb84] ss:$72 sps:$4 sm:$0xff]   ;;  %v5925_v35 = vld [vmem:[%s7837_s1 + $0x280] ss:$72 sps:$4 sm:$0xff]  }
 0x3a5   :  { %4279 = vmatprep.subr.bf16.mxu1 %v5837_v36  ;;  %v5928_v36 = vld [vmem:[%s7837_s1 + $0xb80] ss:$72 sps:$4 sm:$0xff]  }
 0x3ab   :  { %3893 = vmatpush1.bf16.xpose.msra.mxu0 %v5832_v37  ;;  %v5933_v37 = vld [vmem:[%s7837_s1 + $0x314] ss:$72 sps:$4 sm:$0xff]  }
 0x3ac   :  { %4280 = vmatpush1.bf16.xpose.msra.mxu1 %v5835_v38  ;;  %3894 = vmatprep.subr.bf16.mxu0 %v5840_v39  ;;  %v5936_v38 = vld [vmem:[%s7837_s1 + $0xc14] ss:$72 sps:$4 sm:$0xff]   ;;  %v5931_v39 = vld [vmem:[%s7837_s1 + $0x310] ss:$72 sps:$4 sm:$0xff]  }
 0x3ad   :  { %4281 = vmatprep.subr.bf16.mxu1 %v5843_v40  ;;  %v5934_v40 = vld [vmem:[%s7837_s1 + $0xc10] ss:$72 sps:$4 sm:$0xff]  }
 0x3b3   :  { %3895 = vmatpush1.bf16.xpose.msra.mxu0 %v5838_v41  ;;  %v5939_v41 = vld [vmem:[%s7837_s1 + $0x3a4] ss:$72 sps:$4 sm:$0xff]  }
 0x3b4   :  { %4282 = vmatpush1.bf16.xpose.msra.mxu1 %v5841_v42  ;;  %3896 = vmatprep.subr.bf16.mxu0 %v5846_v43  ;;  %v5942_v42 = vld [vmem:[%s7837_s1 + $0xca4] ss:$72 sps:$4 sm:$0xff]   ;;  %v5937_v43 = vld [vmem:[%s7837_s1 + $0x3a0] ss:$72 sps:$4 sm:$0xff]  }
 0x3b5   :  { %4283 = vmatprep.subr.bf16.mxu1 %v5849_v44  ;;  %v5940_v44 = vld [vmem:[%s7837_s1 + $0xca0] ss:$72 sps:$4 sm:$0xff]  }
 0x3bb   :  { %3897 = vmatpush1.bf16.xpose.msra.mxu0 %v5844_v45  ;;  %v5945_v45 = vld [vmem:[%s7837_s1 + $0x434] ss:$72 sps:$4 sm:$0xff]  }
 0x3bc   :  { %4284 = vmatpush1.bf16.xpose.msra.mxu1 %v5847_v46  ;;  %3898 = vmatprep.subr.bf16.mxu0 %v5852_v47  ;;  %v5948_v46 = vld [vmem:[%s7837_s1 + $0xd34] ss:$72 sps:$4 sm:$0xff]   ;;  %v5943_v47 = vld [vmem:[%s7837_s1 + $0x430] ss:$72 sps:$4 sm:$0xff]  }
 0x3bd   :  { %4285 = vmatprep.subr.bf16.mxu1 %v5855_v48  ;;  %v5946_v48 = vld [vmem:[%s7837_s1 + $0xd30] ss:$72 sps:$4 sm:$0xff]  }
 0x3c3   :  { %3899 = vmatpush1.bf16.xpose.msra.mxu0 %v5850_v49  ;;  %v5951_v49 = vld [vmem:[%s7837_s1 + $0x4c4] ss:$72 sps:$4 sm:$0xff]  }
 0x3c4   :  { %4286 = vmatpush1.bf16.xpose.msra.mxu1 %v5853_v50  ;;  %3900 = vmatprep.subr.bf16.mxu0 %v5858_v51  ;;  %v5954_v50 = vld [vmem:[%s7837_s1 + $0xdc4] ss:$72 sps:$4 sm:$0xff]   ;;  %v5949_v51 = vld [vmem:[%s7837_s1 + $0x4c0] ss:$72 sps:$4 sm:$0xff]  }
 0x3c5   :  { %4287 = vmatprep.subr.bf16.mxu1 %v5861_v52  ;;  %v5952_v52 = vld [vmem:[%s7837_s1 + $0xdc0] ss:$72 sps:$4 sm:$0xff]  }
 0x3cb   :  { %3901 = vmatpush1.bf16.xpose.msra.mxu0 %v5856_v53  ;;  %v5957_v53 = vld [vmem:[%s7837_s1 + $0x554] ss:$72 sps:$4 sm:$0xff]  }
 0x3cc   :  { %4288 = vmatpush1.bf16.xpose.msra.mxu1 %v5859_v54  ;;  %3902 = vmatprep.subr.bf16.mxu0 %v5864_v55  ;;  %v5960_v54 = vld [vmem:[%s7837_s1 + $0xe54] ss:$72 sps:$4 sm:$0xff]   ;;  %v5955_v55 = vld [vmem:[%s7837_s1 + $0x550] ss:$72 sps:$4 sm:$0xff]  }
 0x3cd   :  { %4289 = vmatprep.subr.bf16.mxu1 %v5867_v56  ;;  %v5958_v56 = vld [vmem:[%s7837_s1 + $0xe50] ss:$72 sps:$4 sm:$0xff]  }
 0x3d3   :  { %3903 = vmatpush1.bf16.xpose.msra.mxu0 %v5862_v57  ;;  %v5963_v57 = vld [vmem:[%s7837_s1 + $0x5e4] ss:$72 sps:$4 sm:$0xff]  }
 0x3d4   :  { %4290 = vmatpush1.bf16.xpose.msra.mxu1 %v5865_v58  ;;  %3904 = vmatprep.subr.bf16.mxu0 %v5870_v59  ;;  %v5966_v58 = vld [vmem:[%s7837_s1 + $0xee4] ss:$72 sps:$4 sm:$0xff]   ;;  %v5961_v59 = vld [vmem:[%s7837_s1 + $0x5e0] ss:$72 sps:$4 sm:$0xff]  }
 0x3d5   :  { %4291 = vmatprep.subr.bf16.mxu1 %v5873_v60  ;;  %v5964_v60 = vld [vmem:[%s7837_s1 + $0xee0] ss:$72 sps:$4 sm:$0xff]  }
 0x3db   :  { %3905 = vmatpush1.bf16.xpose.msra.mxu0 %v5868_v61  ;;  %v5969_v61 = vld [vmem:[%s7837_s1 + $0x674] ss:$72 sps:$4 sm:$0xff]  }
 0x3dc   :  { %4292 = vmatpush1.bf16.xpose.msra.mxu1 %v5871_v62  ;;  %3906 = vmatprep.subr.bf16.mxu0 %v5876_v63  ;;  %v5972_v62 = vld [vmem:[%s7837_s1 + $0xf74] ss:$72 sps:$4 sm:$0xff]   ;;  %v5967_v63 = vld [vmem:[%s7837_s1 + $0x670] ss:$72 sps:$4 sm:$0xff]  }
 0x3dd   :  { %4293 = vmatprep.subr.bf16.mxu1 %v5879_v0  ;;  %v5970_v0 = vld [vmem:[%s7837_s1 + $0xf70] ss:$72 sps:$4 sm:$0xff]  }
 0x3e3   :  { %3907 = vmatpush1.bf16.xpose.msra.mxu0 %v5874_v1  ;;  %v5975_v1 = vld [vmem:[%s7837_s1 + $0x704] ss:$72 sps:$4 sm:$0xff]  }
 0x3e4   :  { %4294 = vmatpush1.bf16.xpose.msra.mxu1 %v5877_v2  ;;  %3908 = vmatprep.subr.bf16.mxu0 %v5882_v3  ;;  %v5978_v2 = vld [vmem:[%s7837_s1 + $0x1004] ss:$72 sps:$4 sm:$0xff]   ;;  %v5973_v3 = vld [vmem:[%s7837_s1 + $0x700] ss:$72 sps:$4 sm:$0xff]  }
 0x3e5   :  { %4295 = vmatprep.subr.bf16.mxu1 %v5885_v4  ;;  %v5976_v4 = vld [vmem:[%s7837_s1 + $0x1000] ss:$72 sps:$4 sm:$0xff]  }
 0x3eb   :  { %3909 = vmatpush1.bf16.xpose.msra.mxu0 %v5880_v5  ;;  %v5981_v5 = vld [vmem:[%s7837_s1 + $0x794] ss:$72 sps:$4 sm:$0xff]  }
 0x3ec   :  { %4296 = vmatpush1.bf16.xpose.msra.mxu1 %v5883_v6  ;;  %3910 = vmatprep.subr.bf16.mxu0 %v5888_v7  ;;  %v5984_v6 = vld [vmem:[%s7837_s1 + $0x1094] ss:$72 sps:$4 sm:$0xff]   ;;  %v5979_v7 = vld [vmem:[%s7837_s1 + $0x790] ss:$72 sps:$4 sm:$0xff]  }
 0x3ed   :  { %4297 = vmatprep.subr.bf16.mxu1 %v5891_v8  ;;  %v5982_v8 = vld [vmem:[%s7837_s1 + $0x1090] ss:$72 sps:$4 sm:$0xff]  }
 0x3f3   :  { %3911 = vmatpush1.bf16.xpose.msra.mxu0 %v5886_v9  ;;  %v5987_v9 = vld [vmem:[%s7837_s1 + $0x824] ss:$72 sps:$4 sm:$0xff]  }
 0x3f4   :  { %4298 = vmatpush1.bf16.xpose.msra.mxu1 %v5889_v10  ;;  %3912 = vmatprep.subr.bf16.mxu0 %v5894_v11  ;;  %v5990_v10 = vld [vmem:[%s7837_s1 + $0x1124] ss:$72 sps:$4 sm:$0xff]   ;;  %v5985_v11 = vld [vmem:[%s7837_s1 + $0x820] ss:$72 sps:$4 sm:$0xff]  }
 0x3f5   :  { %4299 = vmatprep.subr.bf16.mxu1 %v5897_v12  ;;  %v5988_v12 = vld [vmem:[%s7837_s1 + $0x1120] ss:$72 sps:$4 sm:$0xff]  }
 0x3fb   :  { %3913 = vmatpush1.bf16.xpose.msra.mxu0 %v5892_v13  ;;  %v5993_v13 = vld [vmem:[%s7837_s1 + $0x8b4] ss:$72 sps:$4 sm:$0xff]  }
 0x3fc   :  { %4300 = vmatpush1.bf16.xpose.msra.mxu1 %v5895_v14  ;;  %3925 = vmatprep.subr.bf16.mxu0 %v5903_v15  ;;  %v5996_v14 = vld [vmem:[%s7837_s1 + $0x11b4] ss:$72 sps:$4 sm:$0xff]   ;;  %v5991_v15 = vld [vmem:[%s7837_s1 + $0x8b0] ss:$72 sps:$4 sm:$0xff]  }
 0x3fd   :  { %4312 = vmatprep.subr.bf16.mxu1 %v5906_v16  ;;  %v5994_v16 = vld [vmem:[%s7837_s1 + $0x11b0] ss:$72 sps:$4 sm:$0xff]  }
 0x402   :  { %3915 = vmatmul.mubr.bf16.vlgmr.msra.gmra.mrb[0].mxu0 %v5898_v17 }
 0x403   :  { %4302 = vmatmul.mubr.bf16.vlgmr.msra.gmra.mrb[0].mxu1 %v5898_v17  ;;  %3926 = vmatpush1.bf16.xpose.msra.mxu0 %v5901_v18  ;;  %v5997_v17 = vld [vmem:[%s7838_s0 + $0x40] ss:$72 sps:$4 sm:$0xff]   ;;  %v4357_v18 = vlaneseq }
 0x404   :  { %4313 = vmatpush1.bf16.xpose.msra.mxu1 %v5904_v19  ;;  %3927 = vmatprep.subr.bf16.mxu0 %v5909_v20 }
 0x405   :  { %4314 = vmatprep.subr.bf16.mxu1 %v5912_v21  ;;  %3957 = vmatprep.mubr.bf16.mxu0 %v5999_v22  ;;  %v4358_v19 = vshrl.u32 %v4357_v18, 7 }
 0x406   :  { %4344 = vmatprep.mubr.bf16.mxu1 %v5999_v22  ;;  %v4355_v22 = vld [vmem:[%s7839_s2] sm:$0xf] }
 0x407   :  { %v4359_v20 = vsub.s32 0, %v4358_v19  ;;  %v4367_v21 = vsub.s32 2, %v4358_v19 }
 0x40b   :  { %3928 = vmatpush1.bf16.xpose.msra.mxu0 %v5907_v23  ;;  %v4363_v23 = vsub.s32 1, %v4358_v19 }
 0x40c   :  { %4315 = vmatpush1.bf16.xpose.msra.mxu1 %v5910_v24  ;;  %3929 = vmatprep.subr.bf16.mxu0 %v5915_v25  ;;  %v4371_v24 = vsub.s32 3, %v4358_v19  ;;  %v4385_v25 = vld [vmem:[%s7840_s3] sm:$0xf] }
 0x40d   :  { %4316 = vmatprep.subr.bf16.mxu1 %v5918_v26  ;;  %v4360_v26 = vrot.slane %v4355_v22, %v4359_v20 }
 0x413   :  { %3930 = vmatpush1.bf16.xpose.msra.mxu0 %v5913_v27  ;;  %v4368_v27 = vrot.slane %v4355_v22, %v4367_v21 }
 0x414   :  { %4317 = vmatpush1.bf16.xpose.msra.mxu1 %v5916_v28  ;;  %3931 = vmatprep.subr.bf16.mxu0 %v5921_v29  ;;  %v4364_v28 = vrot.slane %v4355_v22, %v4363_v23  ;;  %v4372_v29 = vrot.slane %v4355_v22, %v4371_v24 }
 0x415   :  { %4318 = vmatprep.subr.bf16.mxu1 %v5924_v30  ;;  %v4390_v30 = vrot.slane %v4385_v25, %v4359_v20 }
 0x41b   :  { %3932 = vmatpush1.bf16.xpose.msra.mxu0 %v5919_v31  ;;  %v4398_v31 = vrot.slane %v4385_v25, %v4367_v21 }
 0x41c   :  { %4319 = vmatpush1.bf16.xpose.msra.mxu1 %v5922_v32  ;;  %3933 = vmatprep.subr.bf16.mxu0 %v5927_v33 }
 0x41d   :  { %4320 = vmatprep.subr.bf16.mxu1 %v5930_v34  ;;  %v4394_v34 = vrot.slane %v4385_v25, %v4363_v23 }
 0x423   :  { %3934 = vmatpush1.bf16.xpose.msra.mxu0 %v5925_v35  ;;  %v4402_v35 = vrot.slane %v4385_v25, %v4371_v24 }
 0x424   :  { %4321 = vmatpush1.bf16.xpose.msra.mxu1 %v5928_v36  ;;  %3935 = vmatprep.subr.bf16.mxu0 %v5933_v37 }
 0x425   :  { %4322 = vmatprep.subr.bf16.mxu1 %v5936_v38 }
 0x42b   :  { %3936 = vmatpush1.bf16.xpose.msra.mxu0 %v5931_v39 }
 0x42c   :  { %4323 = vmatpush1.bf16.xpose.msra.mxu1 %v5934_v40  ;;  %3937 = vmatprep.subr.bf16.mxu0 %v5939_v41 }
 0x42d   :  { %4324 = vmatprep.subr.bf16.mxu1 %v5942_v42 }
 0x433   :  { %3938 = vmatpush1.bf16.xpose.msra.mxu0 %v5937_v43 }
 0x434   :  { %4325 = vmatpush1.bf16.xpose.msra.mxu1 %v5940_v44  ;;  %3939 = vmatprep.subr.bf16.mxu0 %v5945_v45 }
 0x435   :  { %4326 = vmatprep.subr.bf16.mxu1 %v5948_v46 }
 0x43b   :  { %3940 = vmatpush1.bf16.xpose.msra.mxu0 %v5943_v47 }
 0x43c   :  { %4327 = vmatpush1.bf16.xpose.msra.mxu1 %v5946_v48  ;;  %3941 = vmatprep.subr.bf16.mxu0 %v5951_v49 }
 0x43d   :  { %4328 = vmatprep.subr.bf16.mxu1 %v5954_v50 }
 0x443   :  { %3942 = vmatpush1.bf16.xpose.msra.mxu0 %v5949_v51 }
 0x444   :  { %4329 = vmatpush1.bf16.xpose.msra.mxu1 %v5952_v52  ;;  %3943 = vmatprep.subr.bf16.mxu0 %v5957_v53 }
 0x445   :  { %4330 = vmatprep.subr.bf16.mxu1 %v5960_v54 }
 0x44b   :  { %3944 = vmatpush1.bf16.xpose.msra.mxu0 %v5955_v55 }
 0x44c   :  { %4331 = vmatpush1.bf16.xpose.msra.mxu1 %v5958_v56  ;;  %3945 = vmatprep.subr.bf16.mxu0 %v5963_v57 }
 0x44d   :  { %4332 = vmatprep.subr.bf16.mxu1 %v5966_v58 }
 0x453   :  { %3946 = vmatpush1.bf16.xpose.msra.mxu0 %v5961_v59 }
 0x454   :  { %4333 = vmatpush1.bf16.xpose.msra.mxu1 %v5964_v60  ;;  %3947 = vmatprep.subr.bf16.mxu0 %v5969_v61 }
 0x455   :  { %4334 = vmatprep.subr.bf16.mxu1 %v5972_v62 }
 0x45b   :  { %3948 = vmatpush1.bf16.xpose.msra.mxu0 %v5967_v63 }
 0x45c   :  { %4335 = vmatpush1.bf16.xpose.msra.mxu1 %v5970_v0  ;;  %3949 = vmatprep.subr.bf16.mxu0 %v5975_v1 }
 0x45d   :  { %4336 = vmatprep.subr.bf16.mxu1 %v5978_v2 }
 0x463   :  { %3950 = vmatpush1.bf16.xpose.msra.mxu0 %v5973_v3 }
 0x464   :  { %4337 = vmatpush1.bf16.xpose.msra.mxu1 %v5976_v4  ;;  %3951 = vmatprep.subr.bf16.mxu0 %v5981_v5 }
 0x465   :  { %4338 = vmatprep.subr.bf16.mxu1 %v5984_v6 }
 0x46b   :  { %3952 = vmatpush1.bf16.xpose.msra.mxu0 %v5979_v7 }
 0x46c   :  { %4339 = vmatpush1.bf16.xpose.msra.mxu1 %v5982_v8  ;;  %3953 = vmatprep.subr.bf16.mxu0 %v5987_v9 }
 0x46d   :  { %4340 = vmatprep.subr.bf16.mxu1 %v5990_v10 }
 0x473   :  { %3954 = vmatpush1.bf16.xpose.msra.mxu0 %v5985_v11 }
 0x474   :  { %4341 = vmatpush1.bf16.xpose.msra.mxu1 %v5988_v12  ;;  %3955 = vmatprep.subr.bf16.mxu0 %v5993_v13 }
 0x475   :  { %4342 = vmatprep.subr.bf16.mxu1 %v5996_v14 }
 0x47b   :  { %3956 = vmatpush1.bf16.xpose.msra.mxu0 %v5991_v15 }
 0x47c   :  { %4343 = vmatpush1.bf16.xpose.msra.mxu1 %v5994_v16 }
 0x482   :  { %3958 = vmatmul.mubr.bf16.vlgmr.msra.gmra.mrb[0].mxu0 %v5997_v17 }
 0x483   :  { %4345 = vmatmul.mubr.bf16.vlgmr.msra.gmra.mrb[0].mxu1 %v5997_v17 }
 0x555   :  { %v3959_v32 = vpop.f32.mrb[0].mxu0 }
 0x556   :  { %v4346_v33 = vpop.f32.mrb[0].mxu1  ;;  %v4377_v36 = vmul.f32 %v4360_v26, %v3959_v32  ;;  %v3961_v38 = vpop.f32.mrb[1].mxu0 }
 0x557   :  { %v4379_v37 = vmul.f32 %v4368_v27, %v4346_v33  ;;  %v4348_v39 = vpop.f32.mrb[1].mxu1  ;;  %v4378_v40 = vmul.f32 %v4364_v28, %v3961_v38  ;;  %v3963_v42 = vpop.f32.mrb[2].mxu0 }
 0x558   :  { %v4380_v41 = vmul.f32 %v4372_v29, %v4348_v39  ;;  %v4350_v43 = vpop.f32.mrb[2].mxu1  ;;  %v4407_v44 = vadd.f32 %v4390_v30, %v4377_v36  ;;  %v4381_v46 = vmul.f32 %v4360_v26, %v3963_v42  ;;  %v3965_v48 = vpop.f32.mrb[3].mxu0 }
 0x559   :  { %v4409_v45 = vadd.f32 %v4398_v31, %v4379_v37  ;;  %v4383_v47 = vmul.f32 %v4368_v27, %v4350_v43  ;;  %v4352_v49 = vpop.f32.mrb[3].mxu1  ;;  %v4408_v50 = vadd.f32 %v4394_v34, %v4378_v40  ;;  %v4382_v52 = vmul.f32 %v4364_v28, %v3965_v48 }
 0x55a   :  { %v4410_v51 = vadd.f32 %v4402_v35, %v4380_v41  ;;  %v4384_v53 = vmul.f32 %v4372_v29, %v4352_v49  ;;  %vm4415_vm0 = vcmp.gt.f32.partialorder %v4407_v44, 0.0  ;;  %v4423_v54 = vmul.f32 0.2, %v4407_v44 }
 0x55b   :  { %vm4417_vm1 = vcmp.gt.f32.partialorder %v4409_v45, 0.0  ;;  %v4425_v55 = vmul.f32 0.2, %v4409_v45  ;;  %vm4416_vm2 = vcmp.gt.f32.partialorder %v4408_v50, 0.0  ;;  %v4424_v56 = vmul.f32 0.2, %v4408_v50 }
 0x55c   :  { %vm4418_vm3 = vcmp.gt.f32.partialorder %v4410_v51, 0.0  ;;  %v4426_v57 = vmul.f32 0.2, %v4410_v51  ;;  %v4431_v58 = vsel %vm4415_vm0, %v4407_v44, %v4423_v54  ;;  %v4411_v60 = vadd.f32 %v4390_v30, %v4381_v46 }
 0x55d   :  { %v4433_v59 = vsel %vm4417_vm1, %v4409_v45, %v4425_v55  ;;  %v4413_v61 = vadd.f32 %v4398_v31, %v4383_v47  ;;  %4439 = vst [vmem:[%s7841_s4] sm:$0xff] %v4431_v58  ;;  %v4432_v62 = vsel %vm4416_vm2, %v4408_v50, %v4424_v56  ;;  %v4412_v0 = vadd.f32 %v4394_v34, %v4382_v52 }
 0x55e   :  { %4441 = vst [vmem:[%s7841_s4 + $0x10] sm:$0xff] %v4433_v59  ;;  %v4434_v63 = vsel %vm4418_vm3, %v4410_v51, %v4426_v57  ;;  %v4414_v1 = vadd.f32 %v4402_v35, %v4384_v53  ;;  %4440 = vst [vmem:[%s7841_s4 + $0x8] sm:$0xff] %v4432_v62  ;;  %vm4419_vm4 = vcmp.gt.f32.partialorder %v4411_v60, 0.0  ;;  %v4427_v2 = vmul.f32 0.2, %v4411_v60 }
 0x55f   :  { %4442 = vst [vmem:[%s7841_s4 + $0x18] sm:$0xff] %v4434_v63  ;;  %vm4421_vm5 = vcmp.gt.f32.partialorder %v4413_v61, 0.0  ;;  %v4429_v3 = vmul.f32 0.2, %v4413_v61  ;;  %vm4420_vm6 = vcmp.gt.f32.partialorder %v4412_v0, 0.0 }
 0x560   :  { %v4428_v4 = vmul.f32 0.2, %v4412_v0  ;;  %vm4422_vm7 = vcmp.gt.f32.partialorder %v4414_v1, 0.0  ;;  %v4430_v5 = vmul.f32 0.2, %v4414_v1  ;;  %v4435_v6 = vsel %vm4419_vm4, %v4411_v60, %v4427_v2 }
 0x561   :  { %v4437_v7 = vsel %vm4421_vm5, %v4413_v61, %v4429_v3  ;;  %4443 = vst [vmem:[%s7841_s4 + $0x20] sm:$0xff] %v4435_v6 }
 0x562   :  { %4445 = vst [vmem:[%s7841_s4 + $0x30] sm:$0xff] %v4437_v7  ;;  %v4436_v8 = vsel %vm4420_vm6, %v4412_v0, %v4428_v4  ;;  %v4438_v9 = vsel %vm4422_vm7, %v4414_v1, %v4430_v5 }
 0x563   :  { %4444 = vst [vmem:[%s7841_s4 + $0x28] sm:$0xff] %v4436_v8  ;;  %4446 = vst [vmem:[%s7841_s4 + $0x38] sm:$0xff] %v4438_v9 }

// kernel: discriminator_forward.17
= control target key start
LH: loop header
LB: loop body
LE: loop exit
PB: predicated region body
PF: predicated region fallthrough
CT: control target
= control target key end

     0   :  { %s6676_s15 = smov 0   ;;  %s6678_s16 = smov 0   ;;  %s7438_s0 = inlined_call_operand.vmem [shape: bf16[16,4608], index: 0, kind: input, shape index: {}]   ;;  %s7439_s1 = inlined_call_operand.vmem [shape: bf16[512,4608], index: 1, kind: input, shape index: {}]   ;;  %s7440_s2 = inlined_call_operand.vmem [shape: f32[1,512], index: 2, kind: input, shape index: {}]   ;;  %s7441_s3 = inlined_call_operand.vmem [shape: f32[1,512], index: 3, kind: input, shape index: {}]   ;;  %s7442_s4 = inlined_call_operand.vmem [shape: f32[16,512], index: 4, kind: output, shape index: {}]  }
   0x1   :  { %s6680_s17 = smov 0   ;;  %s6682_s18 = smov 0  }
   0x2   :  { %s6684_s19 = smov 0  }
   0x3 LB: > { %s4955_s20 = sadd.s32 4294967295, %s6649_s19   ;;  %s29_s21 = sadd.s32 1, %s6645_s18  ;;  %s6649_s19 = sphi %s6684_s19, %s14_s19   ;;  %s6645_s18 = sphi %s6682_s18, %s7447_s18   ;;  %s6641_s17 = sphi %s6680_s17, %s7446_s17   ;;  %s6637_s16 = sphi %s6678_s16, %s7445_s16   ;;  %s6633_s15 = sphi %s6676_s15, %s7444_s15  }
   0x4   : > { %p31_p0 = scmp.ge.s32.totalorder %s29_s21, 2  ;;  %s150_s22 = sadd.s32 1, %s6637_s16 }
   0x5   : > { %p160_p1 = scmp.ne.s32.totalorder %s6637_s16, %s6633_s15  ;;  %p161_p2 = scmp.eq.s32.totalorder %s4955_s20, 1 }
   0x6   : > { %s7449_s21 = smov (%p31_p0, %s29_s21), 0  ;;  %p4960_p4 = scmp.ge.s32.totalorder %s6649_s19, 1 }
   0x7   : > { %p6708_p3 = por %p161_p2, %p160_p1  ;;  %s146_s24 = ssub.s32 %s6645_s18, %s7449_s21 }
   0x8   : > { %p231_p5 = scmp.lt.s32.totalorder %s6649_s19, 3  ;;  %p148_p6 = scmp.eq.s32.totalorder %s146_s24, 0 }
   0xa   : > { %p232_p7 = pnand %p4960_p4, %p231_p5 }
   0xb   : > { %s6717_s25 = scalar_select %p148_p6, %s6637_s16, %s150_s22  }
   0xc   : > { %235 = sbr.rel (%p232_p7) target bundleno = 1409 (0x581), region = 36  ;;  %s4962_s26 = sshll.u32 (!%p232_p7), %s6641_s17, 5  ;;  %v5791_v0 = vld [vmem:[%s7438_s0 + $0x4] ss:$144 sps:$4 sm:$0xff] (!%p232_p7)   ;;  %v5797_v1 = vld [vmem:[%s7438_s0 + $0x4c] ss:$144 sps:$4 sm:$0xff] (!%p232_p7)  }
   0xd   : > { %p293_p8 = scmp.lt.s32.totalorder (!%p232_p7), %s4962_s26, 63  ;;  %4019 = vmatprep.mubr.bf16.mxu1 (!%p232_p7), %v5791_v0  ;;  %4406 = vmatprep.mubr.bf16.mxu0 (!%p232_p7), %v5797_v1  ;;  %s4964_s9 = sshll.u32 (!%p232_p7), %s6641_s17, 1 }
   0xe   : > { %p304_p9 = scmp.lt.s32.totalorder (!%p232_p7), %s4964_s9, 3  ;;  %s276_s20 = sand.u32 (!%p232_p7), 1, %s6633_s15  }
   0xf   : > { %s4961_s22 = sshll.u32 (!%p232_p7), %s276_s20, 5 }
  0x10   : > { %s278_s15 = scalar_lea.vmem (!%p232_p7), [#allocation2], %s4961_s22 }
  0x13   : > { %s7451_s26 = smov (!%p293_p8, %s4962_s26), 63  ;;  %s7453_s9 = smov (!%p304_p9, %s4964_s9), 3 }
  0x14   : > { %s5652_s29 = smul.u32 144, %s7451_s26  ;;  %s306_s11 = scalar_lea.vmem %s7440_s2, %s7453_s9 }
  0x15   : > { %s311_s14 = scalar_lea.vmem %s7441_s3, %s7453_s9  ;;  %s5583_s24 = sshll.u32 (%p6708_p3), %s6641_s17, 4 }
  0x16   : > { %s6729_s8 = scalar_lea.vmem %s7439_s1, %s5652_s29  ;;  %s4821_s28 = scalar_lea.vmem (%p6708_p3), %s7442_s4, %s5583_s24 }
  0x17   : > { %v5693_v2 = vld [vmem:[%s6729_s8 + $0x4] ss:$144 sps:$4 sm:$0xff]   ;;  %v5695_v3 = vld [vmem:[%s6729_s8 + $0x4c] ss:$144 sps:$4 sm:$0xff]   ;;  %v5697_v4 = vld [vmem:[%s6729_s8] ss:$144 sps:$4 sm:$0xff]  }
  0x18   : > { %3987 = vmatprep.subr.bf16.mxu1 %v5693_v2  ;;  %v5698_v5 = vld [vmem:[%s6729_s8 + $0x48] ss:$144 sps:$4 sm:$0xff]   ;;  %4374 = vmatprep.subr.bf16.mxu0 %v5695_v3  ;;  %v5699_v6 = vld [vmem:[%s6729_s8 + $0x124] ss:$144 sps:$4 sm:$0xff]   ;;  %v5701_v7 = vld [vmem:[%s6729_s8 + $0x16c] ss:$144 sps:$4 sm:$0xff]  }
  0x19   : > { %3988 = vmatpush1.bf16.xpose.msra.mxu1 %v5697_v4  ;;  %4375 = vmatpush1.bf16.xpose.msra.mxu0 %v5698_v5  ;;  %v5703_v8 = vld [vmem:[%s6729_s8 + $0x120] ss:$144 sps:$4 sm:$0xff]   ;;  %v5704_v9 = vld [vmem:[%s6729_s8 + $0x168] ss:$144 sps:$4 sm:$0xff]   ;;  %v5705_v10 = vld [vmem:[%s6729_s8 + $0x244] ss:$144 sps:$4 sm:$0xff]  }
  0x1a   : > { %3989 = vmatprep.subr.bf16.mxu1 %v5699_v6  ;;  %4376 = vmatprep.subr.bf16.mxu0 %v5701_v7  ;;  %v5707_v11 = vld [vmem:[%s6729_s8 + $0x28c] ss:$144 sps:$4 sm:$0xff]   ;;  %v5709_v12 = vld [vmem:[%s6729_s8 + $0x240] ss:$144 sps:$4 sm:$0xff]   ;;  %v5710_v13 = vld [vmem:[%s6729_s8 + $0x288] ss:$144 sps:$4 sm:$0xff]  }
  0x1b   : > { %v5711_v14 = vld [vmem:[%s6729_s8 + $0x364] ss:$144 sps:$4 sm:$0xff]   ;;  %v5713_v15 = vld [vmem:[%s6729_s8 + $0x3ac] ss:$144 sps:$4 sm:$0xff]   ;;  %v5715_v16 = vld [vmem:[%s6729_s8 + $0x360] ss:$144 sps:$4 sm:$0xff]  }
  0x1c   : > { %v5716_v17 = vld [vmem:[%s6729_s8 + $0x3a8] ss:$144 sps:$4 sm:$0xff]   ;;  %v5717_v18 = vld [vmem:[%s6729_s8 + $0x484] ss:$144 sps:$4 sm:$0xff]   ;;  %v5719_v19 = vld [vmem:[%s6729_s8 + $0x4cc] ss:$144 sps:$4 sm:$0xff]  }
  0x1d   : > { %v5721_v20 = vld [vmem:[%s6729_s8 + $0x480] ss:$144 sps:$4 sm:$0xff]   ;;  %v5722_v21 = vld [vmem:[%s6729_s8 + $0x4c8] ss:$144 sps:$4 sm:$0xff]   ;;  %v5723_v22 = vld [vmem:[%s6729_s8 + $0x5a4] ss:$144 sps:$4 sm:$0xff]  }
  0x1e   : > { %v5725_v23 = vld [vmem:[%s6729_s8 + $0x5ec] ss:$144 sps:$4 sm:$0xff]   ;;  %v5727_v24 = vld [vmem:[%s6729_s8 + $0x5a0] ss:$144 sps:$4 sm:$0xff]   ;;  %v5728_v25 = vld [vmem:[%s6729_s8 + $0x5e8] ss:$144 sps:$4 sm:$0xff]  }
  0x1f   : > { %v5729_v26 = vld [vmem:[%s6729_s8 + $0x6c4] ss:$144 sps:$4 sm:$0xff]   ;;  %v5731_v27 = vld [vmem:[%s6729_s8 + $0x70c] ss:$144 sps:$4 sm:$0xff]   ;;  %v5733_v28 = vld [vmem:[%s6729_s8 + $0x6c0] ss:$144 sps:$4 sm:$0xff]  }
  0x20   : > { %v5734_v29 = vld [vmem:[%s6729_s8 + $0x708] ss:$144 sps:$4 sm:$0xff]   ;;  %v5735_v30 = vld [vmem:[%s6729_s8 + $0x7e4] ss:$144 sps:$4 sm:$0xff]   ;;  %v5737_v31 = vld [vmem:[%s6729_s8 + $0x82c] ss:$144 sps:$4 sm:$0xff]  }
  0x21   : > { %3990 = vmatpush1.bf16.xpose.msra.mxu1 %v5703_v8  ;;  %4377 = vmatpush1.bf16.xpose.msra.mxu0 %v5704_v9  ;;  %v5739_v32 = vld [vmem:[%s6729_s8 + $0x7e0] ss:$144 sps:$4 sm:$0xff]   ;;  %v5740_v33 = vld [vmem:[%s6729_s8 + $0x828] ss:$144 sps:$4 sm:$0xff]   ;;  %v5741_v34 = vld [vmem:[%s6729_s8 + $0x904] ss:$144 sps:$4 sm:$0xff]  }
  0x22   : > { %3991 = vmatprep.subr.bf16.mxu1 %v5705_v10  ;;  %4378 = vmatprep.subr.bf16.mxu0 %v5707_v11  ;;  %v5743_v35 = vld [vmem:[%s6729_s8 + $0x94c] ss:$144 sps:$4 sm:$0xff]   ;;  %v5745_v36 = vld [vmem:[%s6729_s8 + $0x900] ss:$144 sps:$4 sm:$0xff]   ;;  %v5746_v37 = vld [vmem:[%s6729_s8 + $0x948] ss:$144 sps:$4 sm:$0xff]  }
  0x23   : > { %v5747_v38 = vld [vmem:[%s6729_s8 + $0xa24] ss:$144 sps:$4 sm:$0xff]   ;;  %v5749_v39 = vld [vmem:[%s6729_s8 + $0xa6c] ss:$144 sps:$4 sm:$0xff]   ;;  %v5751_v40 = vld [vmem:[%s6729_s8 + $0xa20] ss:$144 sps:$4 sm:$0xff]  }
  0x24   : > { %v5752_v41 = vld [vmem:[%s6729_s8 + $0xa68] ss:$144 sps:$4 sm:$0xff]   ;;  %v5753_v42 = vld [vmem:[%s6729_s8 + $0xb44] ss:$144 sps:$4 sm:$0xff]   ;;  %v5755_v43 = vld [vmem:[%s6729_s8 + $0xb8c] ss:$144 sps:$4 sm:$0xff]  }
  0x25   : > { %v5757_v44 = vld [vmem:[%s6729_s8 + $0xb40] ss:$144 sps:$4 sm:$0xff]   ;;  %v5758_v45 = vld [vmem:[%s6729_s8 + $0xb88] ss:$144 sps:$4 sm:$0xff]   ;;  %v5759_v46 = vld [vmem:[%s6729_s8 + $0xc64] ss:$144 sps:$4 sm:$0xff]  }
  0x26   : > { %v5761_v47 = vld [vmem:[%s6729_s8 + $0xcac] ss:$144 sps:$4 sm:$0xff]   ;;  %v5763_v48 = vld [vmem:[%s6729_s8 + $0xc60] ss:$144 sps:$4 sm:$0xff]   ;;  %v5764_v49 = vld [vmem:[%s6729_s8 + $0xca8] ss:$144 sps:$4 sm:$0xff]  }
  0x27   : > { %v5765_v50 = vld [vmem:[%s6729_s8 + $0xd84] ss:$144 sps:$4 sm:$0xff]   ;;  %v5767_v51 = vld [vmem:[%s6729_s8 + $0xdcc] ss:$144 sps:$4 sm:$0xff]   ;;  %v5769_v52 = vld [vmem:[%s6729_s8 + $0xd80] ss:$144 sps:$4 sm:$0xff]  }
  0x28   : > { %v5770_v53 = vld [vmem:[%s6729_s8 + $0xdc8] ss:$144 sps:$4 sm:$0xff]   ;;  %v5771_v54 = vld [vmem:[%s6729_s8 + $0xea4] ss:$144 sps:$4 sm:$0xff]   ;;  %v5773_v55 = vld [vmem:[%s6729_s8 + $0xeec] ss:$144 sps:$4 sm:$0xff]  }
  0x29   : > { %3992 = vmatpush1.bf16.xpose.msra.mxu1 %v5709_v12  ;;  %4379 = vmatpush1.bf16.xpose.msra.mxu0 %v5710_v13  ;;  %v5775_v56 = vld [vmem:[%s6729_s8 + $0xea0] ss:$144 sps:$4 sm:$0xff]   ;;  %v5776_v57 = vld [vmem:[%s6729_s8 + $0xee8] ss:$144 sps:$4 sm:$0xff]   ;;  %v5777_v58 = vld [vmem:[%s6729_s8 + $0xfc4] ss:$144 sps:$4 sm:$0xff]  }
  0x2a   : > { %3993 = vmatprep.subr.bf16.mxu1 %v5711_v14  ;;  %4380 = vmatprep.subr.bf16.mxu0 %v5713_v15  ;;  %v5779_v59 = vld [vmem:[%s6729_s8 + $0x100c] ss:$144 sps:$4 sm:$0xff]   ;;  %v5781_v60 = vld [vmem:[%s6729_s8 + $0xfc0] ss:$144 sps:$4 sm:$0xff]   ;;  %v5782_v61 = vld [vmem:[%s6729_s8 + $0x1008] ss:$144 sps:$4 sm:$0xff]  }
  0x2b   : > { %v5783_v62 = vld [vmem:[%s6729_s8 + $0x10e4] ss:$144 sps:$4 sm:$0xff]   ;;  %v5785_v63 = vld [vmem:[%s6729_s8 + $0x112c] ss:$144 sps:$4 sm:$0xff]   ;;  %v5787_v0 = vld [vmem:[%s6729_s8 + $0x10e0] ss:$144 sps:$4 sm:$0xff]  }
  0x2c   : > { %v5788_v1 = vld [vmem:[%s6729_s8 + $0x1128] ss:$144 sps:$4 sm:$0xff]   ;;  %v5794_v2 = vld [vmem:[%s6729_s8 + $0xc] ss:$144 sps:$4 sm:$0xff]   ;;  %v5800_v3 = vld [vmem:[%s6729_s8 + $0x54] ss:$144 sps:$4 sm:$0xff]  }
  0x2d   : > { %v5789_v4 = vld [vmem:[%s7438_s0] ss:$144 sps:$4 sm:$0xff]   ;;  %v5795_v5 = vld [vmem:[%s7438_s0 + $0x48] ss:$144 sps:$4 sm:$0xff]   ;;  %v5803_v8 = vld [vmem:[%s6729_s8 + $0x12c] ss:$144 sps:$4 sm:$0xff]  }
  0x2e   : > { %v5792_v6 = vld [vmem:[%s6729_s8 + $0x8] ss:$144 sps:$4 sm:$0xff]   ;;  %v5798_v7 = vld [vmem:[%s6729_s8 + $0x50] ss:$144 sps:$4 sm:$0xff]   ;;  %v5806_v9 = vld [vmem:[%s6729_s8 + $0x174] ss:$144 sps:$4 sm:$0xff]  }
  0x2f   : > { %v5893_v10 = vld [vmem:[%s7438_s0 + $0xc] ss:$144 sps:$4 sm:$0xff]   ;;  %v5899_v11 = vld [vmem:[%s7438_s0 + $0x54] ss:$144 sps:$4 sm:$0xff]   ;;  %v5801_v12 = vld [vmem:[%s6729_s8 + $0x128] ss:$144 sps:$4 sm:$0xff]  }
  0x30   : > { %v5804_v13 = vld [vmem:[%s6729_s8 + $0x170] ss:$144 sps:$4 sm:$0xff]   ;;  %v5809_v14 = vld [vmem:[%s6729_s8 + $0x24c] ss:$144 sps:$4 sm:$0xff]   ;;  %v5812_v15 = vld [vmem:[%s6729_s8 + $0x294] ss:$144 sps:$4 sm:$0xff]  }
  0x31   : > { %3994 = vmatpush1.bf16.xpose.msra.mxu1 %v5715_v16  ;;  %4381 = vmatpush1.bf16.xpose.msra.mxu0 %v5716_v17  ;;  %v5807_v16 = vld [vmem:[%s6729_s8 + $0x248] ss:$144 sps:$4 sm:$0xff]   ;;  %v5810_v17 = vld [vmem:[%s6729_s8 + $0x290] ss:$144 sps:$4 sm:$0xff]  }
  0x32   : > { %3995 = vmatprep.subr.bf16.mxu1 %v5717_v18  ;;  %4382 = vmatprep.subr.bf16.mxu0 %v5719_v19  ;;  %v5815_v18 = vld [vmem:[%s6729_s8 + $0x36c] ss:$144 sps:$4 sm:$0xff]   ;;  %v5818_v19 = vld [vmem:[%s6729_s8 + $0x3b4] ss:$144 sps:$4 sm:$0xff]  }
  0x39   : > { %3996 = vmatpush1.bf16.xpose.msra.mxu1 %v5721_v20  ;;  %4383 = vmatpush1.bf16.xpose.msra.mxu0 %v5722_v21  ;;  %v5813_v20 = vld [vmem:[%s6729_s8 + $0x368] ss:$144 sps:$4 sm:$0xff]   ;;  %v5816_v21 = vld [vmem:[%s6729_s8 + $0x3b0] ss:$144 sps:$4 sm:$0xff]  }
  0x3a   : > { %3997 = vmatprep.subr.bf16.mxu1 %v5723_v22  ;;  %4384 = vmatprep.subr.bf16.mxu0 %v5725_v23  ;;  %v5821_v22 = vld [vmem:[%s6729_s8 + $0x48c] ss:$144 sps:$4 sm:$0xff]   ;;  %v5824_v23 = vld [vmem:[%s6729_s8 + $0x4d4] ss:$144 sps:$4 sm:$0xff]  }
  0x41   : > { %3998 = vmatpush1.bf16.xpose.msra.mxu1 %v5727_v24  ;;  %4385 = vmatpush1.bf16.xpose.msra.mxu0 %v5728_v25  ;;  %v5819_v24 = vld [vmem:[%s6729_s8 + $0x488] ss:$144 sps:$4 sm:$0xff]   ;;  %v5822_v25 = vld [vmem:[%s6729_s8 + $0x4d0] ss:$144 sps:$4 sm:$0xff]  }
  0x42   : > { %3999 = vmatprep.subr.bf16.mxu1 %v5729_v26  ;;  %4386 = vmatprep.subr.bf16.mxu0 %v5731_v27  ;;  %v5827_v26 = vld [vmem:[%s6729_s8 + $0x5ac] ss:$144 sps:$4 sm:$0xff]   ;;  %v5830_v27 = vld [vmem:[%s6729_s8 + $0x5f4] ss:$144 sps:$4 sm:$0xff]  }
  0x49   : > { %4000 = vmatpush1.bf16.xpose.msra.mxu1 %v5733_v28  ;;  %4387 = vmatpush1.bf16.xpose.msra.mxu0 %v5734_v29  ;;  %v5825_v28 = vld [vmem:[%s6729_s8 + $0x5a8] ss:$144 sps:$4 sm:$0xff]   ;;  %v5828_v29 = vld [vmem:[%s6729_s8 + $0x5f0] ss:$144 sps:$4 sm:$0xff]  }
  0x4a   : > { %4001 = vmatprep.subr.bf16.mxu1 %v5735_v30  ;;  %4388 = vmatprep.subr.bf16.mxu0 %v5737_v31  ;;  %v5833_v30 = vld [vmem:[%s6729_s8 + $0x6cc] ss:$144 sps:$4 sm:$0xff]   ;;  %v5836_v31 = vld [vmem:[%s6729_s8 + $0x714] ss:$144 sps:$4 sm:$0xff]  }
  0x51   : > { %4002 = vmatpush1.bf16.xpose.msra.mxu1 %v5739_v32  ;;  %4389 = vmatpush1.bf16.xpose.msra.mxu0 %v5740_v33  ;;  %v5831_v32 = vld [vmem:[%s6729_s8 + $0x6c8] ss:$144 sps:$4 sm:$0xff]   ;;  %v5834_v33 = vld [vmem:[%s6729_s8 + $0x710] ss:$144 sps:$4 sm:$0xff]  }
  0x52   : > { %4003 = vmatprep.subr.bf16.mxu1 %v5741_v34  ;;  %4390 = vmatprep.subr.bf16.mxu0 %v5743_v35  ;;  %v5839_v34 = vld [vmem:[%s6729_s8 + $0x7ec] ss:$144 sps:$4 sm:$0xff]   ;;  %v5842_v35 = vld [vmem:[%s6729_s8 + $0x834] ss:$144 sps:$4 sm:$0xff]  }
  0x59   : > { %4004 = vmatpush1.bf16.xpose.msra.mxu1 %v5745_v36  ;;  %4391 = vmatpush1.bf16.xpose.msra.mxu0 %v5746_v37  ;;  %v5837_v36 = vld [vmem:[%s6729_s8 + $0x7e8] ss:$144 sps:$4 sm:$0xff]   ;;  %v5840_v37 = vld [vmem:[%s6729_s8 + $0x830] ss:$144 sps:$4 sm:$0xff]  }
  0x5a   : > { %4005 = vmatprep.subr.bf16.mxu1 %v5747_v38  ;;  %4392 = vmatprep.subr.bf16.mxu0 %v5749_v39  ;;  %v5845_v38 = vld [vmem:[%s6729_s8 + $0x90c] ss:$144 sps:$4 sm:$0xff]   ;;  %v5848_v39 = vld [vmem:[%s6729_s8 + $0x954] ss:$144 sps:$4 sm:$0xff]  }
  0x61   : > { %4006 = vmatpush1.bf16.xpose.msra.mxu1 %v5751_v40  ;;  %4393 = vmatpush1.bf16.xpose.msra.mxu0 %v5752_v41  ;;  %v5843_v40 = vld [vmem:[%s6729_s8 + $0x908] ss:$144 sps:$4 sm:$0xff]   ;;  %v5846_v41 = vld [vmem:[%s6729_s8 + $0x950] ss:$144 sps:$4 sm:$0xff]  }
  0x62   : > { %4007 = vmatprep.subr.bf16.mxu1 %v5753_v42  ;;  %4394 = vmatprep.subr.bf16.mxu0 %v5755_v43  ;;  %v5851_v42 = vld [vmem:[%s6729_s8 + $0xa2c] ss:$144 sps:$4 sm:$0xff]   ;;  %v5854_v43 = vld [vmem:[%s6729_s8 + $0xa74] ss:$144 sps:$4 sm:$0xff]  }
  0x69   : > { %4008 = vmatpush1.bf16.xpose.msra.mxu1 %v5757_v44  ;;  %4395 = vmatpush1.bf16.xpose.msra.mxu0 %v5758_v45  ;;  %v5849_v44 = vld [vmem:[%s6729_s8 + $0xa28] ss:$144 sps:$4 sm:$0xff]   ;;  %v5852_v45 = vld [vmem:[%s6729_s8 + $0xa70] ss:$144 sps:$4 sm:$0xff]  }
  0x6a   : > { %4009 = vmatprep.subr.bf16.mxu1 %v5759_v46  ;;  %4396 = vmatprep.subr.bf16.mxu0 %v5761_v47  ;;  %v5857_v46 = vld [vmem:[%s6729_s8 + $0xb4c] ss:$144 sps:$4 sm:$0xff]   ;;  %v5860_v47 = vld [vmem:[%s6729_s8 + $0xb94] ss:$144 sps:$4 sm:$0xff]  }
  0x71   : > { %4010 = vmatpush1.bf16.xpose.msra.mxu1 %v5763_v48  ;;  %4397 = vmatpush1.bf16.xpose.msra.mxu0 %v5764_v49  ;;  %v5855_v48 = vld [vmem:[%s6729_s8 + $0xb48] ss:$144 sps:$4 sm:$0xff]   ;;  %v5858_v49 = vld [vmem:[%s6729_s8 + $0xb90] ss:$144 sps:$4 sm:$0xff]  }
  0x72   : > { %4011 = vmatprep.subr.bf16.mxu1 %v5765_v50  ;;  %4398 = vmatprep.subr.bf16.mxu0 %v5767_v51  ;;  %v5863_v50 = vld [vmem:[%s6729_s8 + $0xc6c] ss:$144 sps:$4 sm:$0xff]   ;;  %v5866_v51 = vld [vmem:[%s6729_s8 + $0xcb4] ss:$144 sps:$4 sm:$0xff]  }
  0x79   : > { %4012 = vmatpush1.bf16.xpose.msra.mxu1 %v5769_v52  ;;  %4399 = vmatpush1.bf16.xpose.msra.mxu0 %v5770_v53  ;;  %v5861_v52 = vld [vmem:[%s6729_s8 + $0xc68] ss:$144 sps:$4 sm:$0xff]   ;;  %v5864_v53 = vld [vmem:[%s6729_s8 + $0xcb0] ss:$144 sps:$4 sm:$0xff]  }
  0x7a   : > { %4013 = vmatprep.subr.bf16.mxu1 %v5771_v54  ;;  %4400 = vmatprep.subr.bf16.mxu0 %v5773_v55  ;;  %v5869_v54 = vld [vmem:[%s6729_s8 + $0xd8c] ss:$144 sps:$4 sm:$0xff]   ;;  %v5872_v55 = vld [vmem:[%s6729_s8 + $0xdd4] ss:$144 sps:$4 sm:$0xff]  }
  0x81   : > { %4014 = vmatpush1.bf16.xpose.msra.mxu1 %v5775_v56  ;;  %4401 = vmatpush1.bf16.xpose.msra.mxu0 %v5776_v57  ;;  %v5867_v56 = vld [vmem:[%s6729_s8 + $0xd88] ss:$144 sps:$4 sm:$0xff]   ;;  %v5870_v57 = vld [vmem:[%s6729_s8 + $0xdd0] ss:$144 sps:$4 sm:$0xff]  }
  0x82   : > { %4015 = vmatprep.subr.bf16.mxu1 %v5777_v58  ;;  %4402 = vmatprep.subr.bf16.mxu0 %v5779_v59  ;;  %v5875_v58 = vld [vmem:[%s6729_s8 + $0xeac] ss:$144 sps:$4 sm:$0xff]   ;;  %v5878_v59 = vld [vmem:[%s6729_s8 + $0xef4] ss:$144 sps:$4 sm:$0xff]  }
  0x89   : > { %4016 = vmatpush1.bf16.xpose.msra.mxu1 %v5781_v60  ;;  %4403 = vmatpush1.bf16.xpose.msra.mxu0 %v5782_v61  ;;  %v5873_v60 = vld [vmem:[%s6729_s8 + $0xea8] ss:$144 sps:$4 sm:$0xff]   ;;  %v5876_v61 = vld [vmem:[%s6729_s8 + $0xef0] ss:$144 sps:$4 sm:$0xff]  }
  0x8a   : > { %4017 = vmatprep.subr.bf16.mxu1 %v5783_v62  ;;  %4404 = vmatprep.subr.bf16.mxu0 %v5785_v63  ;;  %v5881_v62 = vld [vmem:[%s6729_s8 + $0xfcc] ss:$144 sps:$4 sm:$0xff]   ;;  %v5884_v63 = vld [vmem:[%s6729_s8 + $0x1014] ss:$144 sps:$4 sm:$0xff]  }
  0x91   : > { %4018 = vmatpush1.bf16.xpose.msra.mxu1 %v5787_v0  ;;  %4405 = vmatpush1.bf16.xpose.msra.mxu0 %v5788_v1  ;;  %v5879_v0 = vld [vmem:[%s6729_s8 + $0xfc8] ss:$144 sps:$4 sm:$0xff]   ;;  %v5882_v1 = vld [vmem:[%s6729_s8 + $0x1010] ss:$144 sps:$4 sm:$0xff]  }
  0x92   : > { %4030 = vmatprep.subr.bf16.mxu1 %v5794_v2  ;;  %4417 = vmatprep.subr.bf16.mxu0 %v5800_v3  ;;  %v5887_v2 = vld [vmem:[%s6729_s8 + $0x10ec] ss:$144 sps:$4 sm:$0xff]   ;;  %v5890_v3 = vld [vmem:[%s6729_s8 + $0x1134] ss:$144 sps:$4 sm:$0xff]  }
  0x98   : > { %4020 = vmatmul.mubr.bf16.vlgmr.msra.gmra.mrb[0].mxu1 %v5789_v4  ;;  %4407 = vmatmul.mubr.bf16.vlgmr.msra.gmra.mrb[0].mxu0 %v5795_v5  ;;  %v5885_v4 = vld [vmem:[%s6729_s8 + $0x10e8] ss:$144 sps:$4 sm:$0xff]   ;;  %v5888_v5 = vld [vmem:[%s6729_s8 + $0x1130] ss:$144 sps:$4 sm:$0xff]  }
  0x99   : > { %4031 = vmatpush1.bf16.xpose.msra.mxu1 %v5792_v6  ;;  %4418 = vmatpush1.bf16.xpose.msra.mxu0 %v5798_v7  ;;  %v5896_v6 = vld [vmem:[%s6729_s8 + $0x14] ss:$144 sps:$4 sm:$0xff]   ;;  %v5902_v7 = vld [vmem:[%s6729_s8 + $0x5c] ss:$144 sps:$4 sm:$0xff]  }
  0x9a   : > { %4032 = vmatprep.subr.bf16.mxu1 %v5803_v8  ;;  %4419 = vmatprep.subr.bf16.mxu0 %v5806_v9  ;;  %v5891_v8 = vld [vmem:[%s7438_s0 + $0x8] ss:$144 sps:$4 sm:$0xff]   ;;  %v5894_v9 = vld [vmem:[%s6729_s8 + $0x10] ss:$144 sps:$4 sm:$0xff]  }
  0x9b   : > { %4062 = vmatprep.mubr.bf16.mxu1 %v5893_v10  ;;  %4449 = vmatprep.mubr.bf16.mxu0 %v5899_v11  ;;  %v5897_v10 = vld [vmem:[%s7438_s0 + $0x50] ss:$144 sps:$4 sm:$0xff]   ;;  %v5900_v11 = vld [vmem:[%s6729_s8 + $0x58] ss:$144 sps:$4 sm:$0xff]  }
  0xa1   : > { %4033 = vmatpush1.bf16.xpose.msra.mxu1 %v5801_v12  ;;  %4420 = vmatpush1.bf16.xpose.msra.mxu0 %v5804_v13  ;;  %v5905_v12 = vld [vmem:[%s6729_s8 + $0x134] ss:$144 sps:$4 sm:$0xff]   ;;  %v5908_v13 = vld [vmem:[%s6729_s8 + $0x17c] ss:$144 sps:$4 sm:$0xff]  }
  0xa2   : > { %4034 = vmatprep.subr.bf16.mxu1 %v5809_v14  ;;  %4421 = vmatprep.subr.bf16.mxu0 %v5812_v15  ;;  %v5995_v14 = vld [vmem:[%s7438_s0 + $0x14] ss:$144 sps:$4 sm:$0xff]   ;;  %v6001_v15 = vld [vmem:[%s7438_s0 + $0x5c] ss:$144 sps:$4 sm:$0xff]  }
  0xa9   : > { %4035 = vmatpush1.bf16.xpose.msra.mxu1 %v5807_v16  ;;  %4422 = vmatpush1.bf16.xpose.msra.mxu0 %v5810_v17  ;;  %v5903_v16 = vld [vmem:[%s6729_s8 + $0x130] ss:$144 sps:$4 sm:$0xff]   ;;  %v5906_v17 = vld [vmem:[%s6729_s8 + $0x178] ss:$144 sps:$4 sm:$0xff]  }
  0xaa   : > { %4036 = vmatprep.subr.bf16.mxu1 %v5815_v18  ;;  %4423 = vmatprep.subr.bf16.mxu0 %v5818_v19  ;;  %v5911_v18 = vld [vmem:[%s6729_s8 + $0x254] ss:$144 sps:$4 sm:$0xff]   ;;  %v5914_v19 = vld [vmem:[%s6729_s8 + $0x29c] ss:$144 sps:$4 sm:$0xff]  }
  0xb1   : > { %4037 = vmatpush1.bf16.xpose.msra.mxu1 %v5813_v20  ;;  %4424 = vmatpush1.bf16.xpose.msra.mxu0 %v5816_v21  ;;  %v5909_v20 = vld [vmem:[%s6729_s8 + $0x250] ss:$144 sps:$4 sm:$0xff]   ;;  %v5912_v21 = vld [vmem:[%s6729_s8 + $0x298] ss:$144 sps:$4 sm:$0xff]  }
  0xb2   : > { %4038 = vmatprep.subr.bf16.mxu1 %v5821_v22  ;;  %4425 = vmatprep.subr.bf16.mxu0 %v5824_v23  ;;  %v5917_v22 = vld [vmem:[%s6729_s8 + $0x374] ss:$144 sps:$4 sm:$0xff]   ;;  %v5920_v23 = vld [vmem:[%s6729_s8 + $0x3bc] ss:$144 sps:$4 sm:$0xff]  }
  0xb9   : > { %4039 = vmatpush1.bf16.xpose.msra.mxu1 %v5819_v24  ;;  %4426 = vmatpush1.bf16.xpose.msra.mxu0 %v5822_v25  ;;  %v5915_v24 = vld [vmem:[%s6729_s8 + $0x370] ss:$144 sps:$4 sm:$0xff]   ;;  %v5918_v25 = vld [vmem:[%s6729_s8 + $0x3b8] ss:$144 sps:$4 sm:$0xff]  }
  0xba   : > { %4040 = vmatprep.subr.bf16.mxu1 %v5827_v26  ;;  %4427 = vmatprep.subr.bf16.mxu0 %v5830_v27  ;;  %v5923_v26 = vld [vmem:[%s6729_s8 + $0x494] ss:$144 sps:$4 sm:$0xff]   ;;  %v5926_v27 = vld [vmem:[%s6729_s8 + $0x4dc] ss:$144 sps:$4 sm:$0xff]  }
  0xc1   : > { %4041 = vmatpush1.bf16.xpose.msra.mxu1 %v5825_v28  ;;  %4428 = vmatpush1.bf16.xpose.msra.mxu0 %v5828_v29  ;;  %v5921_v28 = vld [vmem:[%s6729_s8 + $0x490] ss:$144 sps:$4 sm:$0xff]   ;;  %v5924_v29 = vld [vmem:[%s6729_s8 + $0x4d8] ss:$144 sps:$4 sm:$0xff]  }
  0xc2   : > { %4042 = vmatprep.subr.bf16.mxu1 %v5833_v30  ;;  %4429 = vmatprep.subr.bf16.mxu0 %v5836_v31  ;;  %v5929_v30 = vld [vmem:[%s6729_s8 + $0x5b4] ss:$144 sps:$4 sm:$0xff]   ;;  %v5932_v31 = vld [vmem:[%s6729_s8 + $0x5fc] ss:$144 sps:$4 sm:$0xff]  }
  0xc9   : > { %4043 = vmatpush1.bf16.xpose.msra.mxu1 %v5831_v32  ;;  %4430 = vmatpush1.bf16.xpose.msra.mxu0 %v5834_v33  ;;  %v5927_v32 = vld [vmem:[%s6729_s8 + $0x5b0] ss:$144 sps:$4 sm:$0xff]   ;;  %v5930_v33 = vld [vmem:[%s6729_s8 + $0x5f8] ss:$144 sps:$4 sm:$0xff]  }
  0xca   : > { %4044 = vmatprep.subr.bf16.mxu1 %v5839_v34  ;;  %4431 = vmatprep.subr.bf16.mxu0 %v5842_v35  ;;  %v5935_v34 = vld [vmem:[%s6729_s8 + $0x6d4] ss:$144 sps:$4 sm:$0xff]   ;;  %v5938_v35 = vld [vmem:[%s6729_s8 + $0x71c] ss:$144 sps:$4 sm:$0xff]  }
  0xd1   : > { %4045 = vmatpush1.bf16.xpose.msra.mxu1 %v5837_v36  ;;  %4432 = vmatpush1.bf16.xpose.msra.mxu0 %v5840_v37  ;;  %v5933_v36 = vld [vmem:[%s6729_s8 + $0x6d0] ss:$144 sps:$4 sm:$0xff]   ;;  %v5936_v37 = vld [vmem:[%s6729_s8 + $0x718] ss:$144 sps:$4 sm:$0xff]  }
  0xd2   : > { %4046 = vmatprep.subr.bf16.mxu1 %v5845_v38  ;;  %4433 = vmatprep.subr.bf16.mxu0 %v5848_v39  ;;  %v5941_v38 = vld [vmem:[%s6729_s8 + $0x7f4] ss:$144 sps:$4 sm:$0xff]   ;;  %v5944_v39 = vld [vmem:[%s6729_s8 + $0x83c] ss:$144 sps:$4 sm:$0xff]  }
  0xd9   : > { %4047 = vmatpush1.bf16.xpose.msra.mxu1 %v5843_v40  ;;  %4434 = vmatpush1.bf16.xpose.msra.mxu0 %v5846_v41  ;;  %v5939_v40 = vld [vmem:[%s6729_s8 + $0x7f0] ss:$144 sps:$4 sm:$0xff]   ;;  %v5942_v41 = vld [vmem:[%s6729_s8 + $0x838] ss:$144 sps:$4 sm:$0xff]  }
  0xda   : > { %4048 = vmatprep.subr.bf16.mxu1 %v5851_v42  ;;  %4435 = vmatprep.subr.bf16.mxu0 %v5854_v43  ;;  %v5947_v42 = vld [vmem:[%s6729_s8 + $0x914] ss:$144 sps:$4 sm:$0xff]   ;;  %v5950_v43 = vld [vmem:[%s6729_s8 + $0x95c] ss:$144 sps:$4 sm:$0xff]  }
  0xe1   : > { %4049 = vmatpush1.bf16.xpose.msra.mxu1 %v5849_v44  ;;  %4436 = vmatpush1.bf16.xpose.msra.mxu0 %v5852_v45  ;;  %v5945_v44 = vld [vmem:[%s6729_s8 + $0x910] ss:$144 sps:$4 sm:$0xff]   ;;  %v5948_v45 = vld [vmem:[%s6729_s8 + $0x958] ss:$144 sps:$4 sm:$0xff]  }
  0xe2   : > { %4050 = vmatprep.subr.bf16.mxu1 %v5857_v46  ;;  %4437 = vmatprep.subr.bf16.mxu0 %v5860_v47  ;;  %v5953_v46 = vld [vmem:[%s6729_s8 + $0xa34] ss:$144 sps:$4 sm:$0xff]   ;;  %v5956_v47 = vld [vmem:[%s6729_s8 + $0xa7c] ss:$144 sps:$4 sm:$0xff]  }
  0xe9   : > { %4051 = vmatpush1.bf16.xpose.msra.mxu1 %v5855_v48  ;;  %4438 = vmatpush1.bf16.xpose.msra.mxu0 %v5858_v49  ;;  %v5951_v48 = vld [vmem:[%s6729_s8 + $0xa30] ss:$144 sps:$4 sm:$0xff]   ;;  %v5954_v49 = vld [vmem:[%s6729_s8 + $0xa78] ss:$144 sps:$4 sm:$0xff]  }
  0xea   : > { %4052 = vmatprep.subr.bf16.mxu1 %v5863_v50  ;;  %4439 = vmatprep.subr.bf16.mxu0 %v5866_v51  ;;  %v5959_v50 = vld [vmem:[%s6729_s8 + $0xb54] ss:$144 sps:$4 sm:$0xff]   ;;  %v5962_v51 = vld [vmem:[%s6729_s8 + $0xb9c] ss:$144 sps:$4 sm:$0xff]  }
  0xf1   : > { %4053 = vmatpush1.bf16.xpose.msra.mxu1 %v5861_v52  ;;  %4440 = vmatpush1.bf16.xpose.msra.mxu0 %v5864_v53  ;;  %v5957_v52 = vld [vmem:[%s6729_s8 + $0xb50] ss:$144 sps:$4 sm:$0xff]   ;;  %v5960_v53 = vld [vmem:[%s6729_s8 + $0xb98] ss:$144 sps:$4 sm:$0xff]  }
  0xf2   : > { %4054 = vmatprep.subr.bf16.mxu1 %v5869_v54  ;;  %4441 = vmatprep.subr.bf16.mxu0 %v5872_v55  ;;  %v5965_v54 = vld [vmem:[%s6729_s8 + $0xc74] ss:$144 sps:$4 sm:$0xff]   ;;  %v5968_v55 = vld [vmem:[%s6729_s8 + $0xcbc] ss:$144 sps:$4 sm:$0xff]  }
  0xf9   : > { %4055 = vmatpush1.bf16.xpose.msra.mxu1 %v5867_v56  ;;  %4442 = vmatpush1.bf16.xpose.msra.mxu0 %v5870_v57  ;;  %v5963_v56 = vld [vmem:[%s6729_s8 + $0xc70] ss:$144 sps:$4 sm:$0xff]   ;;  %v5966_v57 = vld [vmem:[%s6729_s8 + $0xcb8] ss:$144 sps:$4 sm:$0xff]  }
  0xfa   : > { %4056 = vmatprep.subr.bf16.mxu1 %v5875_v58  ;;  %4443 = vmatprep.subr.bf16.mxu0 %v5878_v59  ;;  %v5971_v58 = vld [vmem:[%s6729_s8 + $0xd94] ss:$144 sps:$4 sm:$0xff]   ;;  %v5974_v59 = vld [vmem:[%s6729_s8 + $0xddc] ss:$144 sps:$4 sm:$0xff]  }
 0x101   : > { %4057 = vmatpush1.bf16.xpose.msra.mxu1 %v5873_v60  ;;  %4444 = vmatpush1.bf16.xpose.msra.mxu0 %v5876_v61  ;;  %v5969_v60 = vld [vmem:[%s6729_s8 + $0xd90] ss:$144 sps:$4 sm:$0xff]   ;;  %v5972_v61 = vld [vmem:[%s6729_s8 + $0xdd8] ss:$144 sps:$4 sm:$0xff]  }
 0x102   : > { %4058 = vmatprep.subr.bf16.mxu1 %v5881_v62  ;;  %4445 = vmatprep.subr.bf16.mxu0 %v5884_v63  ;;  %v5977_v62 = vld [vmem:[%s6729_s8 + $0xeb4] ss:$144 sps:$4 sm:$0xff]   ;;  %v5980_v63 = vld [vmem:[%s6729_s8 + $0xefc] ss:$144 sps:$4 sm:$0xff]  }
 0x109   : > { %4059 = vmatpush1.bf16.xpose.msra.mxu1 %v5879_v0  ;;  %4446 = vmatpush1.bf16.xpose.msra.mxu0 %v5882_v1  ;;  %v5975_v0 = vld [vmem:[%s6729_s8 + $0xeb0] ss:$144 sps:$4 sm:$0xff]   ;;  %v5978_v1 = vld [vmem:[%s6729_s8 + $0xef8] ss:$144 sps:$4 sm:$0xff]  }
 0x10a   : > { %4060 = vmatprep.subr.bf16.mxu1 %v5887_v2  ;;  %4447 = vmatprep.subr.bf16.mxu0 %v5890_v3  ;;  %v5983_v2 = vld [vmem:[%s6729_s8 + $0xfd4] ss:$144 sps:$4 sm:$0xff]   ;;  %v5986_v3 = vld [vmem:[%s6729_s8 + $0x101c] ss:$144 sps:$4 sm:$0xff]  }
 0x111   : > { %4061 = vmatpush1.bf16.xpose.msra.mxu1 %v5885_v4  ;;  %4448 = vmatpush1.bf16.xpose.msra.mxu0 %v5888_v5  ;;  %v5981_v4 = vld [vmem:[%s6729_s8 + $0xfd0] ss:$144 sps:$4 sm:$0xff]   ;;  %v5984_v5 = vld [vmem:[%s6729_s8 + $0x1018] ss:$144 sps:$4 sm:$0xff]  }
 0x112   : > { %4073 = vmatprep.subr.bf16.mxu1 %v5896_v6  ;;  %4460 = vmatprep.subr.bf16.mxu0 %v5902_v7  ;;  %v5989_v6 = vld [vmem:[%s6729_s8 + $0x10f4] ss:$144 sps:$4 sm:$0xff]   ;;  %v5992_v7 = vld [vmem:[%s6729_s8 + $0x113c] ss:$144 sps:$4 sm:$0xff]  }
 0x118   : > { %4063 = vmatmul.mubr.bf16.vlgmr.msra.gmra.mrb[0].mxu1 %v5891_v8  ;;  %4450 = vmatmul.mubr.bf16.vlgmr.msra.gmra.mrb[0].mxu0 %v5897_v10  ;;  %v5987_v8 = vld [vmem:[%s6729_s8 + $0x10f0] ss:$144 sps:$4 sm:$0xff]   ;;  %v5998_v10 = vld [vmem:[%s6729_s8 + $0x1c] ss:$144 sps:$4 sm:$0xff]  }
 0x119   : > { %4074 = vmatpush1.bf16.xpose.msra.mxu1 %v5894_v9  ;;  %4461 = vmatpush1.bf16.xpose.msra.mxu0 %v5900_v11  ;;  %v5990_v9 = vld [vmem:[%s6729_s8 + $0x1138] ss:$144 sps:$4 sm:$0xff]   ;;  %v6004_v11 = vld [vmem:[%s6729_s8 + $0x64] ss:$144 sps:$4 sm:$0xff]  }
 0x11a   : > { %4075 = vmatprep.subr.bf16.mxu1 %v5905_v12  ;;  %4462 = vmatprep.subr.bf16.mxu0 %v5908_v13  ;;  %v5993_v12 = vld [vmem:[%s7438_s0 + $0x10] ss:$144 sps:$4 sm:$0xff]   ;;  %v5999_v13 = vld [vmem:[%s7438_s0 + $0x58] ss:$144 sps:$4 sm:$0xff]  }
 0x11b   : > { %4105 = vmatprep.mubr.bf16.mxu1 %v5995_v14  ;;  %4492 = vmatprep.mubr.bf16.mxu0 %v6001_v15  ;;  %v5996_v14 = vld [vmem:[%s6729_s8 + $0x18] ss:$144 sps:$4 sm:$0xff]   ;;  %v6002_v15 = vld [vmem:[%s6729_s8 + $0x60] ss:$144 sps:$4 sm:$0xff]  }
 0x121   : > { %4076 = vmatpush1.bf16.xpose.msra.mxu1 %v5903_v16  ;;  %4463 = vmatpush1.bf16.xpose.msra.mxu0 %v5906_v17  ;;  %v6007_v16 = vld [vmem:[%s6729_s8 + $0x13c] ss:$144 sps:$4 sm:$0xff]   ;;  %v6010_v17 = vld [vmem:[%s6729_s8 + $0x184] ss:$144 sps:$4 sm:$0xff]  }
 0x122   : > { %4077 = vmatprep.subr.bf16.mxu1 %v5911_v18  ;;  %4464 = vmatprep.subr.bf16.mxu0 %v5914_v19  ;;  %v6097_v18 = vld [vmem:[%s7438_s0 + $0x1c] ss:$144 sps:$4 sm:$0xff]   ;;  %v6103_v19 = vld [vmem:[%s7438_s0 + $0x64] ss:$144 sps:$4 sm:$0xff]  }
 0x129   : > { %4078 = vmatpush1.bf16.xpose.msra.mxu1 %v5909_v20  ;;  %4465 = vmatpush1.bf16.xpose.msra.mxu0 %v5912_v21  ;;  %v6005_v20 = vld [vmem:[%s6729_s8 + $0x138] ss:$144 sps:$4 sm:$0xff]   ;;  %v6008_v21 = vld [vmem:[%s6729_s8 + $0x180] ss:$144 sps:$4 sm:$0xff]  }
 0x12a   : > { %4079 = vmatprep.subr.bf16.mxu1 %v5917_v22  ;;  %4466 = vmatprep.subr.bf16.mxu0 %v5920_v23  ;;  %v6013_v22 = vld [vmem:[%s6729_s8 + $0x25c] ss:$144 sps:$4 sm:$0xff]   ;;  %v6016_v23 = vld [vmem:[%s6729_s8 + $0x2a4] ss:$144 sps:$4 sm:$0xff]  }
 0x131   : > { %4080 = vmatpush1.bf16.xpose.msra.mxu1 %v5915_v24  ;;  %4467 = vmatpush1.bf16.xpose.msra.mxu0 %v5918_v25  ;;  %v6011_v24 = vld [vmem:[%s6729_s8 + $0x258] ss:$144 sps:$4 sm:$0xff]   ;;  %v6014_v25 = vld [vmem:[%s6729_s8 + $0x2a0] ss:$144 sps:$4 sm:$0xff]  }
 0x132   : > { %4081 = vmatprep.subr.bf16.mxu1 %v5923_v26  ;;  %4468 = vmatprep.subr.bf16.mxu0 %v5926_v27  ;;  %v6019_v26 = vld [vmem:[%s6729_s8 + $0x37c] ss:$144 sps:$4 sm:$0xff]   ;;  %v6022_v27 = vld [vmem:[%s6729_s8 + $0x3c4] ss:$144 sps:$4 sm:$0xff]  }
 0x139   : > { %4082 = vmatpush1.bf16.xpose.msra.mxu1 %v5921_v28  ;;  %4469 = vmatpush1.bf16.xpose.msra.mxu0 %v5924_v29  ;;  %v6017_v28 = vld [vmem:[%s6729_s8 + $0x378] ss:$144 sps:$4 sm:$0xff]   ;;  %v6020_v29 = vld [vmem:[%s6729_s8 + $0x3c0] ss:$144 sps:$4 sm:$0xff]  }
 0x13a   : > { %4083 = vmatprep.subr.bf16.mxu1 %v5929_v30  ;;  %4470 = vmatprep.subr.bf16.mxu0 %v5932_v31  ;;  %v6025_v30 = vld [vmem:[%s6729_s8 + $0x49c] ss:$144 sps:$4 sm:$0xff]   ;;  %v6028_v31 = vld [vmem:[%s6729_s8 + $0x4e4] ss:$144 sps:$4 sm:$0xff]  }
 0x141   : > { %4084 = vmatpush1.bf16.xpose.msra.mxu1 %v5927_v32  ;;  %4471 = vmatpush1.bf16.xpose.msra.mxu0 %v5930_v33  ;;  %v6023_v32 = vld [vmem:[%s6729_s8 + $0x498] ss:$144 sps:$4 sm:$0xff]   ;;  %v6026_v33 = vld [vmem:[%s6729_s8 + $0x4e0] ss:$144 sps:$4 sm:$0xff]  }
 0x142   : > { %4085 = vmatprep.subr.bf16.mxu1 %v5935_v34  ;;  %4472 = vmatprep.subr.bf16.mxu0 %v5938_v35  ;;  %v6031_v34 = vld [vmem:[%s6729_s8 + $0x5bc] ss:$144 sps:$4 sm:$0xff]   ;;  %v6034_v35 = vld [vmem:[%s6729_s8 + $0x604] ss:$144 sps:$4 sm:$0xff]  }
 0x149   : > { %4086 = vmatpush1.bf16.xpose.msra.mxu1 %v5933_v36  ;;  %4473 = vmatpush1.bf16.xpose.msra.mxu0 %v5936_v37  ;;  %v6029_v36 = vld [vmem:[%s6729_s8 + $0x5b8] ss:$144 sps:$4 sm:$0xff]   ;;  %v6032_v37 = vld [vmem:[%s6729_s8 + $0x600] ss:$144 sps:$4 sm:$0xff]  }
 0x14a   : > { %4087 = vmatprep.subr.bf16.mxu1 %v5941_v38  ;;  %4474 = vmatprep.subr.bf16.mxu0 %v5944_v39  ;;  %v6037_v38 = vld [vmem:[%s6729_s8 + $0x6dc] ss:$144 sps:$4 sm:$0xff]   ;;  %v6040_v39 = vld [vmem:[%s6729_s8 + $0x724] ss:$144 sps:$4 sm:$0xff]  }
 0x151   : > { %4088 = vmatpush1.bf16.xpose.msra.mxu1 %v5939_v40  ;;  %4475 = vmatpush1.bf16.xpose.msra.mxu0 %v5942_v41  ;;  %v6035_v40 = vld [vmem:[%s6729_s8 + $0x6d8] ss:$144 sps:$4 sm:$0xff]   ;;  %v6038_v41 = vld [vmem:[%s6729_s8 + $0x720] ss:$144 sps:$4 sm:$0xff]  }
 0x152   : > { %4089 = vmatprep.subr.bf16.mxu1 %v5947_v42  ;;  %4476 = vmatprep.subr.bf16.mxu0 %v5950_v43  ;;  %v6043_v42 = vld [vmem:[%s6729_s8 + $0x7fc] ss:$144 sps:$4 sm:$0xff]   ;;  %v6046_v43 = vld [vmem:[%s6729_s8 + $0x844] ss:$144 sps:$4 sm:$0xff]  }
 0x159   : > { %4090 = vmatpush1.bf16.xpose.msra.mxu1 %v5945_v44  ;;  %4477 = vmatpush1.bf16.xpose.msra.mxu0 %v5948_v45  ;;  %v6041_v44 = vld [vmem:[%s6729_s8 + $0x7f8] ss:$144 sps:$4 sm:$0xff]   ;;  %v6044_v45 = vld [vmem:[%s6729_s8 + $0x840] ss:$144 sps:$4 sm:$0xff]  }
 0x15a   : > { %4091 = vmatprep.subr.bf16.mxu1 %v5953_v46  ;;  %4478 = vmatprep.subr.bf16.mxu0 %v5956_v47  ;;  %v6049_v46 = vld [vmem:[%s6729_s8 + $0x91c] ss:$144 sps:$4 sm:$0xff]   ;;  %v6052_v47 = vld [vmem:[%s6729_s8 + $0x964] ss:$144 sps:$4 sm:$0xff]  }
 0x161   : > { %4092 = vmatpush1.bf16.xpose.msra.mxu1 %v5951_v48  ;;  %4479 = vmatpush1.bf16.xpose.msra.mxu0 %v5954_v49  ;;  %v6047_v48 = vld [vmem:[%s6729_s8 + $0x918] ss:$144 sps:$4 sm:$0xff]   ;;  %v6050_v49 = vld [vmem:[%s6729_s8 + $0x960] ss:$144 sps:$4 sm:$0xff]  }
 0x162   : > { %4093 = vmatprep.subr.bf16.mxu1 %v5959_v50  ;;  %4480 = vmatprep.subr.bf16.mxu0 %v5962_v51  ;;  %v6055_v50 = vld [vmem:[%s6729_s8 + $0xa3c] ss:$144 sps:$4 sm:$0xff]   ;;  %v6058_v51 = vld [vmem:[%s6729_s8 + $0xa84] ss:$144 sps:$4 sm:$0xff]  }
 0x169   : > { %4094 = vmatpush1.bf16.xpose.msra.mxu1 %v5957_v52  ;;  %4481 = vmatpush1.bf16.xpose.msra.mxu0 %v5960_v53  ;;  %v6053_v52 = vld [vmem:[%s6729_s8 + $0xa38] ss:$144 sps:$4 sm:$0xff]   ;;  %v6056_v53 = vld [vmem:[%s6729_s8 + $0xa80] ss:$144 sps:$4 sm:$0xff]  }
 0x16a   : > { %4095 = vmatprep.subr.bf16.mxu1 %v5965_v54  ;;  %4482 = vmatprep.subr.bf16.mxu0 %v5968_v55  ;;  %v6061_v54 = vld [vmem:[%s6729_s8 + $0xb5c] ss:$144 sps:$4 sm:$0xff]   ;;  %v6064_v55 = vld [vmem:[%s6729_s8 + $0xba4] ss:$144 sps:$4 sm:$0xff]  }
 0x171   : > { %4096 = vmatpush1.bf16.xpose.msra.mxu1 %v5963_v56  ;;  %4483 = vmatpush1.bf16.xpose.msra.mxu0 %v5966_v57  ;;  %v6059_v56 = vld [vmem:[%s6729_s8 + $0xb58] ss:$144 sps:$4 sm:$0xff]   ;;  %v6062_v57 = vld [vmem:[%s6729_s8 + $0xba0] ss:$144 sps:$4 sm:$0xff]  }
 0x172   : > { %4097 = vmatprep.subr.bf16.mxu1 %v5971_v58  ;;  %4484 = vmatprep.subr.bf16.mxu0 %v5974_v59  ;;  %v6067_v58 = vld [vmem:[%s6729_s8 + $0xc7c] ss:$144 sps:$4 sm:$0xff]   ;;  %v6070_v59 = vld [vmem:[%s6729_s8 + $0xcc4] ss:$144 sps:$4 sm:$0xff]  }
 0x179   : > { %4098 = vmatpush1.bf16.xpose.msra.mxu1 %v5969_v60  ;;  %4485 = vmatpush1.bf16.xpose.msra.mxu0 %v5972_v61  ;;  %v6065_v60 = vld [vmem:[%s6729_s8 + $0xc78] ss:$144 sps:$4 sm:$0xff]   ;;  %v6068_v61 = vld [vmem:[%s6729_s8 + $0xcc0] ss:$144 sps:$4 sm:$0xff]  }
 0x17a   : > { %4099 = vmatprep.subr.bf16.mxu1 %v5977_v62  ;;  %4486 = vmatprep.subr.bf16.mxu0 %v5980_v63  ;;  %v6073_v62 = vld [vmem:[%s6729_s8 + $0xd9c] ss:$144 sps:$4 sm:$0xff]   ;;  %v6076_v63 = vld [vmem:[%s6729_s8 + $0xde4] ss:$144 sps:$4 sm:$0xff]  }
 0x181   : > { %4100 = vmatpush1.bf16.xpose.msra.mxu1 %v5975_v0  ;;  %4487 = vmatpush1.bf16.xpose.msra.mxu0 %v5978_v1  ;;  %v6071_v0 = vld [vmem:[%s6729_s8 + $0xd98] ss:$144 sps:$4 sm:$0xff]   ;;  %v6074_v1 = vld [vmem:[%s6729_s8 + $0xde0] ss:$144 sps:$4 sm:$0xff]  }
 0x182   : > { %4101 = vmatprep.subr.bf16.mxu1 %v5983_v2  ;;  %4488 = vmatprep.subr.bf16.mxu0 %v5986_v3  ;;  %v6079_v2 = vld [vmem:[%s6729_s8 + $0xebc] ss:$144 sps:$4 sm:$0xff]   ;;  %v6082_v3 = vld [vmem:[%s6729_s8 + $0xf04] ss:$144 sps:$4 sm:$0xff]  }
 0x189   : > { %4102 = vmatpush1.bf16.xpose.msra.mxu1 %v5981_v4  ;;  %4489 = vmatpush1.bf16.xpose.msra.mxu0 %v5984_v5  ;;  %v6077_v4 = vld [vmem:[%s6729_s8 + $0xeb8] ss:$144 sps:$4 sm:$0xff]   ;;  %v6080_v5 = vld [vmem:[%s6729_s8 + $0xf00] ss:$144 sps:$4 sm:$0xff]  }
 0x18a   : > { %4103 = vmatprep.subr.bf16.mxu1 %v5989_v6  ;;  %4490 = vmatprep.subr.bf16.mxu0 %v5992_v7  ;;  %v6085_v6 = vld [vmem:[%s6729_s8 + $0xfdc] ss:$144 sps:$4 sm:$0xff]   ;;  %v6088_v7 = vld [vmem:[%s6729_s8 + $0x1024] ss:$144 sps:$4 sm:$0xff]  }
 0x191   : > { %4104 = vmatpush1.bf16.xpose.msra.mxu1 %v5987_v8  ;;  %4491 = vmatpush1.bf16.xpose.msra.mxu0 %v5990_v9  ;;  %v6083_v8 = vld [vmem:[%s6729_s8 + $0xfd8] ss:$144 sps:$4 sm:$0xff]   ;;  %v6086_v9 = vld [vmem:[%s6729_s8 + $0x1020] ss:$144 sps:$4 sm:$0xff]  }
 0x192   : > { %4116 = vmatprep.subr.bf16.mxu1 %v5998_v10  ;;  %4503 = vmatprep.subr.bf16.mxu0 %v6004_v11  ;;  %v6091_v10 = vld [vmem:[%s6729_s8 + $0x10fc] ss:$144 sps:$4 sm:$0xff]   ;;  %v6094_v11 = vld [vmem:[%s6729_s8 + $0x1144] ss:$144 sps:$4 sm:$0xff]  }
 0x198   : > { %4106 = vmatmul.mubr.bf16.vlgmr.msra.gmra.mrb[0].mxu1 %v5993_v12  ;;  %4493 = vmatmul.mubr.bf16.vlgmr.msra.gmra.mrb[0].mxu0 %v5999_v13  ;;  %v6089_v12 = vld [vmem:[%s6729_s8 + $0x10f8] ss:$144 sps:$4 sm:$0xff]   ;;  %v6092_v13 = vld [vmem:[%s6729_s8 + $0x1140] ss:$144 sps:$4 sm:$0xff]  }
 0x199   : > { %4117 = vmatpush1.bf16.xpose.msra.mxu1 %v5996_v14  ;;  %4504 = vmatpush1.bf16.xpose.msra.mxu0 %v6002_v15  ;;  %v6100_v14 = vld [vmem:[%s6729_s8 + $0x24] ss:$144 sps:$4 sm:$0xff]   ;;  %v6106_v15 = vld [vmem:[%s6729_s8 + $0x6c] ss:$144 sps:$4 sm:$0xff]  }
 0x19a   : > { %4118 = vmatprep.subr.bf16.mxu1 %v6007_v16  ;;  %4505 = vmatprep.subr.bf16.mxu0 %v6010_v17  ;;  %v6095_v16 = vld [vmem:[%s7438_s0 + $0x18] ss:$144 sps:$4 sm:$0xff]   ;;  %v6101_v17 = vld [vmem:[%s7438_s0 + $0x60] ss:$144 sps:$4 sm:$0xff]  }
 0x19b   : > { %4148 = vmatprep.mubr.bf16.mxu1 %v6097_v18  ;;  %4535 = vmatprep.mubr.bf16.mxu0 %v6103_v19  ;;  %v6098_v18 = vld [vmem:[%s6729_s8 + $0x20] ss:$144 sps:$4 sm:$0xff]   ;;  %v6104_v19 = vld [vmem:[%s6729_s8 + $0x68] ss:$144 sps:$4 sm:$0xff]  }
 0x1a1   : > { %4119 = vmatpush1.bf16.xpose.msra.mxu1 %v6005_v20  ;;  %4506 = vmatpush1.bf16.xpose.msra.mxu0 %v6008_v21  ;;  %v6109_v20 = vld [vmem:[%s6729_s8 + $0x144] ss:$144 sps:$4 sm:$0xff]   ;;  %v6112_v21 = vld [vmem:[%s6729_s8 + $0x18c] ss:$144 sps:$4 sm:$0xff]  }
 0x1a2   : > { %4120 = vmatprep.subr.bf16.mxu1 %v6013_v22  ;;  %4507 = vmatprep.subr.bf16.mxu0 %v6016_v23  ;;  %v6199_v22 = vld [vmem:[%s7438_s0 + $0x24] ss:$144 sps:$4 sm:$0xff]   ;;  %v6205_v23 = vld [vmem:[%s7438_s0 + $0x6c] ss:$144 sps:$4 sm:$0xff]  }
 0x1a9   : > { %4121 = vmatpush1.bf16.xpose.msra.mxu1 %v6011_v24  ;;  %4508 = vmatpush1.bf16.xpose.msra.mxu0 %v6014_v25  ;;  %v6107_v24 = vld [vmem:[%s6729_s8 + $0x140] ss:$144 sps:$4 sm:$0xff]   ;;  %v6110_v25 = vld [vmem:[%s6729_s8 + $0x188] ss:$144 sps:$4 sm:$0xff]  }
 0x1aa   : > { %4122 = vmatprep.subr.bf16.mxu1 %v6019_v26  ;;  %4509 = vmatprep.subr.bf16.mxu0 %v6022_v27  ;;  %v6115_v26 = vld [vmem:[%s6729_s8 + $0x264] ss:$144 sps:$4 sm:$0xff]   ;;  %v6118_v27 = vld [vmem:[%s6729_s8 + $0x2ac] ss:$144 sps:$4 sm:$0xff]  }
 0x1b1   : > { %4123 = vmatpush1.bf16.xpose.msra.mxu1 %v6017_v28  ;;  %4510 = vmatpush1.bf16.xpose.msra.mxu0 %v6020_v29  ;;  %v6113_v28 = vld [vmem:[%s6729_s8 + $0x260] ss:$144 sps:$4 sm:$0xff]   ;;  %v6116_v29 = vld [vmem:[%s6729_s8 + $0x2a8] ss:$144 sps:$4 sm:$0xff]  }
 0x1b2   : > { %4124 = vmatprep.subr.bf16.mxu1 %v6025_v30  ;;  %4511 = vmatprep.subr.bf16.mxu0 %v6028_v31  ;;  %v6121_v30 = vld [vmem:[%s6729_s8 + $0x384] ss:$144 sps:$4 sm:$0xff]   ;;  %v6124_v31 = vld [vmem:[%s6729_s8 + $0x3cc] ss:$144 sps:$4 sm:$0xff]  }
 0x1b9   : > { %4125 = vmatpush1.bf16.xpose.msra.mxu1 %v6023_v32  ;;  %4512 = vmatpush1.bf16.xpose.msra.mxu0 %v6026_v33  ;;  %v6119_v32 = vld [vmem:[%s6729_s8 + $0x380] ss:$144 sps:$4 sm:$0xff]   ;;  %v6122_v33 = vld [vmem:[%s6729_s8 + $0x3c8] ss:$144 sps:$4 sm:$0xff]  }
 0x1ba   : > { %4126 = vmatprep.subr.bf16.mxu1 %v6031_v34  ;;  %4513 = vmatprep.subr.bf16.mxu0 %v6034_v35  ;;  %v6127_v34 = vld [vmem:[%s6729_s8 + $0x4a4] ss:$144 sps:$4 sm:$0xff]   ;;  %v6130_v35 = vld [vmem:[%s6729_s8 + $0x4ec] ss:$144 sps:$4 sm:$0xff]  }
 0x1c1   : > { %4127 = vmatpush1.bf16.xpose.msra.mxu1 %v6029_v36  ;;  %4514 = vmatpush1.bf16.xpose.msra.mxu0 %v6032_v37  ;;  %v6125_v36 = vld [vmem:[%s6729_s8 + $0x4a0] ss:$144 sps:$4 sm:$0xff]   ;;  %v6128_v37 = vld [vmem:[%s6729_s8 + $0x4e8] ss:$144 sps:$4 sm:$0xff]  }
 0x1c2   : > { %4128 = vmatprep.subr.bf16.mxu1 %v6037_v38  ;;  %4515 = vmatprep.subr.bf16.mxu0 %v6040_v39  ;;  %v6133_v38 = vld [vmem:[%s6729_s8 + $0x5c4] ss:$144 sps:$4 sm:$0xff]   ;;  %v6136_v39 = vld [vmem:[%s6729_s8 + $0x60c] ss:$144 sps:$4 sm:$0xff]  }
 0x1c9   : > { %4129 = vmatpush1.bf16.xpose.msra.mxu1 %v6035_v40  ;;  %4516 = vmatpush1.bf16.xpose.msra.mxu0 %v6038_v41  ;;  %v6131_v40 = vld [vmem:[%s6729_s8 + $0x5c0] ss:$144 sps:$4 sm:$0xff]   ;;  %v6134_v41 = vld [vmem:[%s6729_s8 + $0x608] ss:$144 sps:$4 sm:$0xff]  }
 0x1ca   : > { %4130 = vmatprep.subr.bf16.mxu1 %v6043_v42  ;;  %4517 = vmatprep.subr.bf16.mxu0 %v6046_v43  ;;  %v6139_v42 = vld [vmem:[%s6729_s8 + $0x6e4] ss:$144 sps:$4 sm:$0xff]   ;;  %v6142_v43 = vld [vmem:[%s6729_s8 + $0x72c] ss:$144 sps:$4 sm:$0xff]  }
 0x1d1   : > { %4131 = vmatpush1.bf16.xpose.msra.mxu1 %v6041_v44  ;;  %4518 = vmatpush1.bf16.xpose.msra.mxu0 %v6044_v45  ;;  %v6137_v44 = vld [vmem:[%s6729_s8 + $0x6e0] ss:$144 sps:$4 sm:$0xff]   ;;  %v6140_v45 = vld [vmem:[%s6729_s8 + $0x728] ss:$144 sps:$4 sm:$0xff]  }
 0x1d2   : > { %4132 = vmatprep.subr.bf16.mxu1 %v6049_v46  ;;  %4519 = vmatprep.subr.bf16.mxu0 %v6052_v47  ;;  %v6145_v46 = vld [vmem:[%s6729_s8 + $0x804] ss:$144 sps:$4 sm:$0xff]   ;;  %v6148_v47 = vld [vmem:[%s6729_s8 + $0x84c] ss:$144 sps:$4 sm:$0xff]  }
 0x1d9   : > { %4133 = vmatpush1.bf16.xpose.msra.mxu1 %v6047_v48  ;;  %4520 = vmatpush1.bf16.xpose.msra.mxu0 %v6050_v49  ;;  %v6143_v48 = vld [vmem:[%s6729_s8 + $0x800] ss:$144 sps:$4 sm:$0xff]   ;;  %v6146_v49 = vld [vmem:[%s6729_s8 + $0x848] ss:$144 sps:$4 sm:$0xff]  }
 0x1da   : > { %4134 = vmatprep.subr.bf16.mxu1 %v6055_v50  ;;  %4521 = vmatprep.subr.bf16.mxu0 %v6058_v51  ;;  %v6151_v50 = vld [vmem:[%s6729_s8 + $0x924] ss:$144 sps:$4 sm:$0xff]   ;;  %v6154_v51 = vld [vmem:[%s6729_s8 + $0x96c] ss:$144 sps:$4 sm:$0xff]  }
 0x1e1   : > { %4135 = vmatpush1.bf16.xpose.msra.mxu1 %v6053_v52  ;;  %4522 = vmatpush1.bf16.xpose.msra.mxu0 %v6056_v53  ;;  %v6149_v52 = vld [vmem:[%s6729_s8 + $0x920] ss:$144 sps:$4 sm:$0xff]   ;;  %v6152_v53 = vld [vmem:[%s6729_s8 + $0x968] ss:$144 sps:$4 sm:$0xff]  }
 0x1e2   : > { %4136 = vmatprep.subr.bf16.mxu1 %v6061_v54  ;;  %4523 = vmatprep.subr.bf16.mxu0 %v6064_v55  ;;  %v6157_v54 = vld [vmem:[%s6729_s8 + $0xa44] ss:$144 sps:$4 sm:$0xff]   ;;  %v6160_v55 = vld [vmem:[%s6729_s8 + $0xa8c] ss:$144 sps:$4 sm:$0xff]  }
 0x1e9   : > { %4137 = vmatpush1.bf16.xpose.msra.mxu1 %v6059_v56  ;;  %4524 = vmatpush1.bf16.xpose.msra.mxu0 %v6062_v57  ;;  %v6155_v56 = vld [vmem:[%s6729_s8 + $0xa40] ss:$144 sps:$4 sm:$0xff]   ;;  %v6158_v57 = vld [vmem:[%s6729_s8 + $0xa88] ss:$144 sps:$4 sm:$0xff]  }
 0x1ea   : > { %4138 = vmatprep.subr.bf16.mxu1 %v6067_v58  ;;  %4525 = vmatprep.subr.bf16.mxu0 %v6070_v59  ;;  %v6163_v58 = vld [vmem:[%s6729_s8 + $0xb64] ss:$144 sps:$4 sm:$0xff]   ;;  %v6166_v59 = vld [vmem:[%s6729_s8 + $0xbac] ss:$144 sps:$4 sm:$0xff]  }
 0x1f1   : > { %4139 = vmatpush1.bf16.xpose.msra.mxu1 %v6065_v60  ;;  %4526 = vmatpush1.bf16.xpose.msra.mxu0 %v6068_v61  ;;  %v6161_v60 = vld [vmem:[%s6729_s8 + $0xb60] ss:$144 sps:$4 sm:$0xff]   ;;  %v6164_v61 = vld [vmem:[%s6729_s8 + $0xba8] ss:$144 sps:$4 sm:$0xff]  }
 0x1f2   : > { %4140 = vmatprep.subr.bf16.mxu1 %v6073_v62  ;;  %4527 = vmatprep.subr.bf16.mxu0 %v6076_v63  ;;  %v6169_v62 = vld [vmem:[%s6729_s8 + $0xc84] ss:$144 sps:$4 sm:$0xff]   ;;  %v6172_v63 = vld [vmem:[%s6729_s8 + $0xccc] ss:$144 sps:$4 sm:$0xff]  }
 0x1f9   : > { %4141 = vmatpush1.bf16.xpose.msra.mxu1 %v6071_v0  ;;  %4528 = vmatpush1.bf16.xpose.msra.mxu0 %v6074_v1  ;;  %v6167_v0 = vld [vmem:[%s6729_s8 + $0xc80] ss:$144 sps:$4 sm:$0xff]   ;;  %v6170_v1 = vld [vmem:[%s6729_s8 + $0xcc8] ss:$144 sps:$4 sm:$0xff]  }
 0x1fa   : > { %4142 = vmatprep.subr.bf16.mxu1 %v6079_v2  ;;  %4529 = vmatprep.subr.bf16.mxu0 %v6082_v3  ;;  %v6175_v2 = vld [vmem:[%s6729_s8 + $0xda4] ss:$144 sps:$4 sm:$0xff]   ;;  %v6178_v3 = vld [vmem:[%s6729_s8 + $0xdec] ss:$144 sps:$4 sm:$0xff]  }
 0x201   : > { %4143 = vmatpush1.bf16.xpose.msra.mxu1 %v6077_v4  ;;  %4530 = vmatpush1.bf16.xpose.msra.mxu0 %v6080_v5  ;;  %v6173_v4 = vld [vmem:[%s6729_s8 + $0xda0] ss:$144 sps:$4 sm:$0xff]   ;;  %v6176_v5 = vld [vmem:[%s6729_s8 + $0xde8] ss:$144 sps:$4 sm:$0xff]  }
 0x202   : > { %4144 = vmatprep.subr.bf16.mxu1 %v6085_v6  ;;  %4531 = vmatprep.subr.bf16.mxu0 %v6088_v7  ;;  %v6181_v6 = vld [vmem:[%s6729_s8 + $0xec4] ss:$144 sps:$4 sm:$0xff]   ;;  %v6184_v7 = vld [vmem:[%s6729_s8 + $0xf0c] ss:$144 sps:$4 sm:$0xff]  }
 0x209   : > { %4145 = vmatpush1.bf16.xpose.msra.mxu1 %v6083_v8  ;;  %4532 = vmatpush1.bf16.xpose.msra.mxu0 %v6086_v9  ;;  %v6179_v8 = vld [vmem:[%s6729_s8 + $0xec0] ss:$144 sps:$4 sm:$0xff]   ;;  %v6182_v9 = vld [vmem:[%s6729_s8 + $0xf08] ss:$144 sps:$4 sm:$0xff]  }
 0x20a   : > { %4146 = vmatprep.subr.bf16.mxu1 %v6091_v10  ;;  %4533 = vmatprep.subr.bf16.mxu0 %v6094_v11  ;;  %v6187_v10 = vld [vmem:[%s6729_s8 + $0xfe4] ss:$144 sps:$4 sm:$0xff]   ;;  %v6190_v11 = vld [vmem:[%s6729_s8 + $0x102c] ss:$144 sps:$4 sm:$0xff]  }
 0x211   : > { %4147 = vmatpush1.bf16.xpose.msra.mxu1 %v6089_v12  ;;  %4534 = vmatpush1.bf16.xpose.msra.mxu0 %v6092_v13  ;;  %v6185_v12 = vld [vmem:[%s6729_s8 + $0xfe0] ss:$144 sps:$4 sm:$0xff]   ;;  %v6188_v13 = vld [vmem:[%s6729_s8 + $0x1028] ss:$144 sps:$4 sm:$0xff]  }
 0x212   : > { %4159 = vmatprep.subr.bf16.mxu1 %v6100_v14  ;;  %4546 = vmatprep.subr.bf16.mxu0 %v6106_v15  ;;  %v6193_v14 = vld [vmem:[%s6729_s8 + $0x1104] ss:$144 sps:$4 sm:$0xff]   ;;  %v6196_v15 = vld [vmem:[%s6729_s8 + $0x114c] ss:$144 sps:$4 sm:$0xff]  }
 0x218   : > { %4149 = vmatmul.mubr.bf16.vlgmr.msra.gmra.mrb[0].mxu1 %v6095_v16  ;;  %4536 = vmatmul.mubr.bf16.vlgmr.msra.gmra.mrb[0].mxu0 %v6101_v17  ;;  %v6191_v16 = vld [vmem:[%s6729_s8 + $0x1100] ss:$144 sps:$4 sm:$0xff]   ;;  %v6194_v17 = vld [vmem:[%s6729_s8 + $0x1148] ss:$144 sps:$4 sm:$0xff]  }
 0x219   : > { %4160 = vmatpush1.bf16.xpose.msra.mxu1 %v6098_v18  ;;  %4547 = vmatpush1.bf16.xpose.msra.mxu0 %v6104_v19  ;;  %v6202_v18 = vld [vmem:[%s6729_s8 + $0x2c] ss:$144 sps:$4 sm:$0xff]   ;;  %v6208_v19 = vld [vmem:[%s6729_s8 + $0x74] ss:$144 sps:$4 sm:$0xff]  }
 0x21a   : > { %4161 = vmatprep.subr.bf16.mxu1 %v6109_v20  ;;  %4548 = vmatprep.subr.bf16.mxu0 %v6112_v21  ;;  %v6197_v20 = vld [vmem:[%s7438_s0 + $0x20] ss:$144 sps:$4 sm:$0xff]   ;;  %v6203_v21 = vld [vmem:[%s7438_s0 + $0x68] ss:$144 sps:$4 sm:$0xff]  }
 0x21b   : > { %4191 = vmatprep.mubr.bf16.mxu1 %v6199_v22  ;;  %4578 = vmatprep.mubr.bf16.mxu0 %v6205_v23  ;;  %v6200_v22 = vld [vmem:[%s6729_s8 + $0x28] ss:$144 sps:$4 sm:$0xff]   ;;  %v6206_v23 = vld [vmem:[%s6729_s8 + $0x70] ss:$144 sps:$4 sm:$0xff]  }
 0x221   : > { %4162 = vmatpush1.bf16.xpose.msra.mxu1 %v6107_v24  ;;  %4549 = vmatpush1.bf16.xpose.msra.mxu0 %v6110_v25  ;;  %v6211_v24 = vld [vmem:[%s6729_s8 + $0x14c] ss:$144 sps:$4 sm:$0xff]   ;;  %v6214_v25 = vld [vmem:[%s6729_s8 + $0x194] ss:$144 sps:$4 sm:$0xff]  }
 0x222   : > { %4163 = vmatprep.subr.bf16.mxu1 %v6115_v26  ;;  %4550 = vmatprep.subr.bf16.mxu0 %v6118_v27  ;;  %v6301_v26 = vld [vmem:[%s7438_s0 + $0x2c] ss:$144 sps:$4 sm:$0xff]   ;;  %v6307_v27 = vld [vmem:[%s7438_s0 + $0x74] ss:$144 sps:$4 sm:$0xff]  }
 0x229   : > { %4164 = vmatpush1.bf16.xpose.msra.mxu1 %v6113_v28  ;;  %4551 = vmatpush1.bf16.xpose.msra.mxu0 %v6116_v29  ;;  %v6209_v28 = vld [vmem:[%s6729_s8 + $0x148] ss:$144 sps:$4 sm:$0xff]   ;;  %v6212_v29 = vld [vmem:[%s6729_s8 + $0x190] ss:$144 sps:$4 sm:$0xff]  }
 0x22a   : > { %4165 = vmatprep.subr.bf16.mxu1 %v6121_v30  ;;  %4552 = vmatprep.subr.bf16.mxu0 %v6124_v31  ;;  %v6217_v30 = vld [vmem:[%s6729_s8 + $0x26c] ss:$144 sps:$4 sm:$0xff]   ;;  %v6220_v31 = vld [vmem:[%s6729_s8 + $0x2b4] ss:$144 sps:$4 sm:$0xff]  }
 0x231   : > { %4166 = vmatpush1.bf16.xpose.msra.mxu1 %v6119_v32  ;;  %4553 = vmatpush1.bf16.xpose.msra.mxu0 %v6122_v33  ;;  %v6215_v32 = vld [vmem:[%s6729_s8 + $0x268] ss:$144 sps:$4 sm:$0xff]   ;;  %v6218_v33 = vld [vmem:[%s6729_s8 + $0x2b0] ss:$144 sps:$4 sm:$0xff]  }
 0x232   : > { %4167 = vmatprep.subr.bf16.mxu1 %v6127_v34  ;;  %4554 = vmatprep.subr.bf16.mxu0 %v6130_v35  ;;  %v6223_v34 = vld [vmem:[%s6729_s8 + $0x38c] ss:$144 sps:$4 sm:$0xff]   ;;  %v6226_v35 = vld [vmem:[%s6729_s8 + $0x3d4] ss:$144 sps:$4 sm:$0xff]  }
 0x239   : > { %4168 = vmatpush1.bf16.xpose.msra.mxu1 %v6125_v36  ;;  %4555 = vmatpush1.bf16.xpose.msra.mxu0 %v6128_v37  ;;  %v6221_v36 = vld [vmem:[%s6729_s8 + $0x388] ss:$144 sps:$4 sm:$0xff]   ;;  %v6224_v37 = vld [vmem:[%s6729_s8 + $0x3d0] ss:$144 sps:$4 sm:$0xff]  }
 0x23a   : > { %4169 = vmatprep.subr.bf16.mxu1 %v6133_v38  ;;  %4556 = vmatprep.subr.bf16.mxu0 %v6136_v39  ;;  %v6229_v38 = vld [vmem:[%s6729_s8 + $0x4ac] ss:$144 sps:$4 sm:$0xff]   ;;  %v6232_v39 = vld [vmem:[%s6729_s8 + $0x4f4] ss:$144 sps:$4 sm:$0xff]  }
 0x241   : > { %4170 = vmatpush1.bf16.xpose.msra.mxu1 %v6131_v40  ;;  %4557 = vmatpush1.bf16.xpose.msra.mxu0 %v6134_v41  ;;  %v6227_v40 = vld [vmem:[%s6729_s8 + $0x4a8] ss:$144 sps:$4 sm:$0xff]   ;;  %v6230_v41 = vld [vmem:[%s6729_s8 + $0x4f0] ss:$144 sps:$4 sm:$0xff]  }
 0x242   : > { %4171 = vmatprep.subr.bf16.mxu1 %v6139_v42  ;;  %4558 = vmatprep.subr.bf16.mxu0 %v6142_v43  ;;  %v6235_v42 = vld [vmem:[%s6729_s8 + $0x5cc] ss:$144 sps:$4 sm:$0xff]   ;;  %v6238_v43 = vld [vmem:[%s6729_s8 + $0x614] ss:$144 sps:$4 sm:$0xff]  }
 0x249   : > { %4172 = vmatpush1.bf16.xpose.msra.mxu1 %v6137_v44  ;;  %4559 = vmatpush1.bf16.xpose.msra.mxu0 %v6140_v45  ;;  %v6233_v44 = vld [vmem:[%s6729_s8 + $0x5c8] ss:$144 sps:$4 sm:$0xff]   ;;  %v6236_v45 = vld [vmem:[%s6729_s8 + $0x610] ss:$144 sps:$4 sm:$0xff]  }
 0x24a   : > { %4173 = vmatprep.subr.bf16.mxu1 %v6145_v46  ;;  %4560 = vmatprep.subr.bf16.mxu0 %v6148_v47  ;;  %v6241_v46 = vld [vmem:[%s6729_s8 + $0x6ec] ss:$144 sps:$4 sm:$0xff]   ;;  %v6244_v47 = vld [vmem:[%s6729_s8 + $0x734] ss:$144 sps:$4 sm:$0xff]  }
 0x251   : > { %4174 = vmatpush1.bf16.xpose.msra.mxu1 %v6143_v48  ;;  %4561 = vmatpush1.bf16.xpose.msra.mxu0 %v6146_v49  ;;  %v6239_v48 = vld [vmem:[%s6729_s8 + $0x6e8] ss:$144 sps:$4 sm:$0xff]   ;;  %v6242_v49 = vld [vmem:[%s6729_s8 + $0x730] ss:$144 sps:$4 sm:$0xff]  }
 0x252   : > { %4175 = vmatprep.subr.bf16.mxu1 %v6151_v50  ;;  %4562 = vmatprep.subr.bf16.mxu0 %v6154_v51  ;;  %v6247_v50 = vld [vmem:[%s6729_s8 + $0x80c] ss:$144 sps:$4 sm:$0xff]   ;;  %v6250_v51 = vld [vmem:[%s6729_s8 + $0x854] ss:$144 sps:$4 sm:$0xff]  }
 0x259   : > { %4176 = vmatpush1.bf16.xpose.msra.mxu1 %v6149_v52  ;;  %4563 = vmatpush1.bf16.xpose.msra.mxu0 %v6152_v53  ;;  %v6245_v52 = vld [vmem:[%s6729_s8 + $0x808] ss:$144 sps:$4 sm:$0xff]   ;;  %v6248_v53 = vld [vmem:[%s6729_s8 + $0x850] ss:$144 sps:$4 sm:$0xff]  }
 0x25a   : > { %4177 = vmatprep.subr.bf16.mxu1 %v6157_v54  ;;  %4564 = vmatprep.subr.bf16.mxu0 %v6160_v55  ;;  %v6253_v54 = vld [vmem:[%s6729_s8 + $0x92c] ss:$144 sps:$4 sm:$0xff]   ;;  %v6256_v55 = vld [vmem:[%s6729_s8 + $0x974] ss:$144 sps:$4 sm:$0xff]  }
 0x261   : > { %4178 = vmatpush1.bf16.xpose.msra.mxu1 %v6155_v56  ;;  %4565 = vmatpush1.bf16.xpose.msra.mxu0 %v6158_v57  ;;  %v6251_v56 = vld [vmem:[%s6729_s8 + $0x928] ss:$144 sps:$4 sm:$0xff]   ;;  %v6254_v57 = vld [vmem:[%s6729_s8 + $0x970] ss:$144 sps:$4 sm:$0xff]  }
 0x262   : > { %4179 = vmatprep.subr.bf16.mxu1 %v6163_v58  ;;  %4566 = vmatprep.subr.bf16.mxu0 %v6166_v59  ;;  %v6259_v58 = vld [vmem:[%s6729_s8 + $0xa4c] ss:$144 sps:$4 sm:$0xff]   ;;  %v6262_v59 = vld [vmem:[%s6729_s8 + $0xa94] ss:$144 sps:$4 sm:$0xff]  }
 0x269   : > { %4180 = vmatpush1.bf16.xpose.msra.mxu1 %v6161_v60  ;;  %4567 = vmatpush1.bf16.xpose.msra.mxu0 %v6164_v61  ;;  %v6257_v60 = vld [vmem:[%s6729_s8 + $0xa48] ss:$144 sps:$4 sm:$0xff]   ;;  %v6260_v61 = vld [vmem:[%s6729_s8 + $0xa90] ss:$144 sps:$4 sm:$0xff]  }
 0x26a   : > { %4181 = vmatprep.subr.bf16.mxu1 %v6169_v62  ;;  %4568 = vmatprep.subr.bf16.mxu0 %v6172_v63  ;;  %v6265_v62 = vld [vmem:[%s6729_s8 + $0xb6c] ss:$144 sps:$4 sm:$0xff]   ;;  %v6268_v63 = vld [vmem:[%s6729_s8 + $0xbb4] ss:$144 sps:$4 sm:$0xff]  }
 0x271   : > { %4182 = vmatpush1.bf16.xpose.msra.mxu1 %v6167_v0  ;;  %4569 = vmatpush1.bf16.xpose.msra.mxu0 %v6170_v1  ;;  %v6263_v0 = vld [vmem:[%s6729_s8 + $0xb68] ss:$144 sps:$4 sm:$0xff]   ;;  %v6266_v1 = vld [vmem:[%s6729_s8 + $0xbb0] ss:$144 sps:$4 sm:$0xff]  }
 0x272   : > { %4183 = vmatprep.subr.bf16.mxu1 %v6175_v2  ;;  %4570 = vmatprep.subr.bf16.mxu0 %v6178_v3  ;;  %v6271_v2 = vld [vmem:[%s6729_s8 + $0xc8c] ss:$144 sps:$4 sm:$0xff]   ;;  %v6274_v3 = vld [vmem:[%s6729_s8 + $0xcd4] ss:$144 sps:$4 sm:$0xff]  }
 0x279   : > { %4184 = vmatpush1.bf16.xpose.msra.mxu1 %v6173_v4  ;;  %4571 = vmatpush1.bf16.xpose.msra.mxu0 %v6176_v5  ;;  %v6269_v4 = vld [vmem:[%s6729_s8 + $0xc88] ss:$144 sps:$4 sm:$0xff]   ;;  %v6272_v5 = vld [vmem:[%s6729_s8 + $0xcd0] ss:$144 sps:$4 sm:$0xff]  }
 0x27a   : > { %4185 = vmatprep.subr.bf16.mxu1 %v6181_v6  ;;  %4572 = vmatprep.subr.bf16.mxu0 %v6184_v7  ;;  %v6277_v6 = vld [vmem:[%s6729_s8 + $0xdac] ss:$144 sps:$4 sm:$0xff]   ;;  %v6280_v7 = vld [vmem:[%s6729_s8 + $0xdf4] ss:$144 sps:$4 sm:$0xff]  }
 0x281   : > { %4186 = vmatpush1.bf16.xpose.msra.mxu1 %v6179_v8  ;;  %4573 = vmatpush1.bf16.xpose.msra.mxu0 %v6182_v9  ;;  %v6275_v8 = vld [vmem:[%s6729_s8 + $0xda8] ss:$144 sps:$4 sm:$0xff]   ;;  %v6278_v9 = vld [vmem:[%s6729_s8 + $0xdf0] ss:$144 sps:$4 sm:$0xff]  }
 0x282   : > { %4187 = vmatprep.subr.bf16.mxu1 %v6187_v10  ;;  %4574 = vmatprep.subr.bf16.mxu0 %v6190_v11  ;;  %v6283_v10 = vld [vmem:[%s6729_s8 + $0xecc] ss:$144 sps:$4 sm:$0xff]   ;;  %v6286_v11 = vld [vmem:[%s6729_s8 + $0xf14] ss:$144 sps:$4 sm:$0xff]  }
 0x289   : > { %4188 = vmatpush1.bf16.xpose.msra.mxu1 %v6185_v12  ;;  %4575 = vmatpush1.bf16.xpose.msra.mxu0 %v6188_v13  ;;  %v6281_v12 = vld [vmem:[%s6729_s8 + $0xec8] ss:$144 sps:$4 sm:$0xff]   ;;  %v6284_v13 = vld [vmem:[%s6729_s8 + $0xf10] ss:$144 sps:$4 sm:$0xff]  }
 0x28a   : > { %4189 = vmatprep.subr.bf16.mxu1 %v6193_v14  ;;  %4576 = vmatprep.subr.bf16.mxu0 %v6196_v15  ;;  %v6289_v14 = vld [vmem:[%s6729_s8 + $0xfec] ss:$144 sps:$4 sm:$0xff]   ;;  %v6292_v15 = vld [vmem:[%s6729_s8 + $0x1034] ss:$144 sps:$4 sm:$0xff]  }
 0x291   : > { %4190 = vmatpush1.bf16.xpose.msra.mxu1 %v6191_v16  ;;  %4577 = vmatpush1.bf16.xpose.msra.mxu0 %v6194_v17  ;;  %v6287_v16 = vld [vmem:[%s6729_s8 + $0xfe8] ss:$144 sps:$4 sm:$0xff]   ;;  %v6290_v17 = vld [vmem:[%s6729_s8 + $0x1030] ss:$144 sps:$4 sm:$0xff]  }
 0x292   : > { %4202 = vmatprep.subr.bf16.mxu1 %v6202_v18  ;;  %4589 = vmatprep.subr.bf16.mxu0 %v6208_v19  ;;  %v6295_v18 = vld [vmem:[%s6729_s8 + $0x110c] ss:$144 sps:$4 sm:$0xff]   ;;  %v6298_v19 = vld [vmem:[%s6729_s8 + $0x1154] ss:$144 sps:$4 sm:$0xff]  }
 0x298   : > { %4192 = vmatmul.mubr.bf16.vlgmr.msra.gmra.mrb[0].mxu1 %v6197_v20  ;;  %4579 = vmatmul.mubr.bf16.vlgmr.msra.gmra.mrb[0].mxu0 %v6203_v21  ;;  %v6293_v20 = vld [vmem:[%s6729_s8 + $0x1108] ss:$144 sps:$4 sm:$0xff]   ;;  %v6296_v21 = vld [vmem:[%s6729_s8 + $0x1150] ss:$144 sps:$4 sm:$0xff]  }
 0x299   : > { %4203 = vmatpush1.bf16.xpose.msra.mxu1 %v6200_v22  ;;  %4590 = vmatpush1.bf16.xpose.msra.mxu0 %v6206_v23  ;;  %v6304_v22 = vld [vmem:[%s6729_s8 + $0x34] ss:$144 sps:$4 sm:$0xff]   ;;  %v6310_v23 = vld [vmem:[%s6729_s8 + $0x7c] ss:$144 sps:$4 sm:$0xff]  }
 0x29a   : > { %4204 = vmatprep.subr.bf16.mxu1 %v6211_v24  ;;  %4591 = vmatprep.subr.bf16.mxu0 %v6214_v25  ;;  %v6299_v24 = vld [vmem:[%s7438_s0 + $0x28] ss:$144 sps:$4 sm:$0xff]   ;;  %v6305_v25 = vld [vmem:[%s7438_s0 + $0x70] ss:$144 sps:$4 sm:$0xff]  }
 0x29b   : > { %4234 = vmatprep.mubr.bf16.mxu1 %v6301_v26  ;;  %4621 = vmatprep.mubr.bf16.mxu0 %v6307_v27  ;;  %v6302_v26 = vld [vmem:[%s6729_s8 + $0x30] ss:$144 sps:$4 sm:$0xff]   ;;  %v6308_v27 = vld [vmem:[%s6729_s8 + $0x78] ss:$144 sps:$4 sm:$0xff]  }
 0x2a1   : > { %4205 = vmatpush1.bf16.xpose.msra.mxu1 %v6209_v28  ;;  %4592 = vmatpush1.bf16.xpose.msra.mxu0 %v6212_v29  ;;  %v6313_v28 = vld [vmem:[%s6729_s8 + $0x154] ss:$144 sps:$4 sm:$0xff]   ;;  %v6316_v29 = vld [vmem:[%s6729_s8 + $0x19c] ss:$144 sps:$4 sm:$0xff]  }
 0x2a2   : > { %4206 = vmatprep.subr.bf16.mxu1 %v6217_v30  ;;  %4593 = vmatprep.subr.bf16.mxu0 %v6220_v31  ;;  %v6403_v30 = vld [vmem:[%s7438_s0 + $0x34] ss:$144 sps:$4 sm:$0xff]   ;;  %v6409_v31 = vld [vmem:[%s7438_s0 + $0x7c] ss:$144 sps:$4 sm:$0xff]  }
 0x2a9   : > { %4207 = vmatpush1.bf16.xpose.msra.mxu1 %v6215_v32  ;;  %4594 = vmatpush1.bf16.xpose.msra.mxu0 %v6218_v33  ;;  %v6311_v32 = vld [vmem:[%s6729_s8 + $0x150] ss:$144 sps:$4 sm:$0xff]   ;;  %v6314_v33 = vld [vmem:[%s6729_s8 + $0x198] ss:$144 sps:$4 sm:$0xff]  }
 0x2aa   : > { %4208 = vmatprep.subr.bf16.mxu1 %v6223_v34  ;;  %4595 = vmatprep.subr.bf16.mxu0 %v6226_v35  ;;  %v6319_v34 = vld [vmem:[%s6729_s8 + $0x274] ss:$144 sps:$4 sm:$0xff]   ;;  %v6322_v35 = vld [vmem:[%s6729_s8 + $0x2bc] ss:$144 sps:$4 sm:$0xff]  }
 0x2b1   : > { %4209 = vmatpush1.bf16.xpose.msra.mxu1 %v6221_v36  ;;  %4596 = vmatpush1.bf16.xpose.msra.mxu0 %v6224_v37  ;;  %v6317_v36 = vld [vmem:[%s6729_s8 + $0x270] ss:$144 sps:$4 sm:$0xff]   ;;  %v6320_v37 = vld [vmem:[%s6729_s8 + $0x2b8] ss:$144 sps:$4 sm:$0xff]  }
 0x2b2   : > { %4210 = vmatprep.subr.bf16.mxu1 %v6229_v38  ;;  %4597 = vmatprep.subr.bf16.mxu0 %v6232_v39  ;;  %v6325_v38 = vld [vmem:[%s6729_s8 + $0x394] ss:$144 sps:$4 sm:$0xff]   ;;  %v6328_v39 = vld [vmem:[%s6729_s8 + $0x3dc] ss:$144 sps:$4 sm:$0xff]  }
 0x2b9   : > { %4211 = vmatpush1.bf16.xpose.msra.mxu1 %v6227_v40  ;;  %4598 = vmatpush1.bf16.xpose.msra.mxu0 %v6230_v41  ;;  %v6323_v40 = vld [vmem:[%s6729_s8 + $0x390] ss:$144 sps:$4 sm:$0xff]   ;;  %v6326_v41 = vld [vmem:[%s6729_s8 + $0x3d8] ss:$144 sps:$4 sm:$0xff]  }
 0x2ba   : > { %4212 = vmatprep.subr.bf16.mxu1 %v6235_v42  ;;  %4599 = vmatprep.subr.bf16.mxu0 %v6238_v43  ;;  %v6331_v42 = vld [vmem:[%s6729_s8 + $0x4b4] ss:$144 sps:$4 sm:$0xff]   ;;  %v6334_v43 = vld [vmem:[%s6729_s8 + $0x4fc] ss:$144 sps:$4 sm:$0xff]  }
 0x2c1   : > { %4213 = vmatpush1.bf16.xpose.msra.mxu1 %v6233_v44  ;;  %4600 = vmatpush1.bf16.xpose.msra.mxu0 %v6236_v45  ;;  %v6329_v44 = vld [vmem:[%s6729_s8 + $0x4b0] ss:$144 sps:$4 sm:$0xff]   ;;  %v6332_v45 = vld [vmem:[%s6729_s8 + $0x4f8] ss:$144 sps:$4 sm:$0xff]  }
 0x2c2   : > { %4214 = vmatprep.subr.bf16.mxu1 %v6241_v46  ;;  %4601 = vmatprep.subr.bf16.mxu0 %v6244_v47  ;;  %v6337_v46 = vld [vmem:[%s6729_s8 + $0x5d4] ss:$144 sps:$4 sm:$0xff]   ;;  %v6340_v47 = vld [vmem:[%s6729_s8 + $0x61c] ss:$144 sps:$4 sm:$0xff]  }
 0x2c9   : > { %4215 = vmatpush1.bf16.xpose.msra.mxu1 %v6239_v48  ;;  %4602 = vmatpush1.bf16.xpose.msra.mxu0 %v6242_v49  ;;  %v6335_v48 = vld [vmem:[%s6729_s8 + $0x5d0] ss:$144 sps:$4 sm:$0xff]   ;;  %v6338_v49 = vld [vmem:[%s6729_s8 + $0x618] ss:$144 sps:$4 sm:$0xff]  }
 0x2ca   : > { %4216 = vmatprep.subr.bf16.mxu1 %v6247_v50  ;;  %4603 = vmatprep.subr.bf16.mxu0 %v6250_v51  ;;  %v6343_v50 = vld [vmem:[%s6729_s8 + $0x6f4] ss:$144 sps:$4 sm:$0xff]   ;;  %v6346_v51 = vld [vmem:[%s6729_s8 + $0x73c] ss:$144 sps:$4 sm:$0xff]  }
 0x2d1   : > { %4217 = vmatpush1.bf16.xpose.msra.mxu1 %v6245_v52  ;;  %4604 = vmatpush1.bf16.xpose.msra.mxu0 %v6248_v53  ;;  %v6341_v52 = vld [vmem:[%s6729_s8 + $0x6f0] ss:$144 sps:$4 sm:$0xff]   ;;  %v6344_v53 = vld [vmem:[%s6729_s8 + $0x738] ss:$144 sps:$4 sm:$0xff]  }
 0x2d2   : > { %4218 = vmatprep.subr.bf16.mxu1 %v6253_v54  ;;  %4605 = vmatprep.subr.bf16.mxu0 %v6256_v55  ;;  %v6349_v54 = vld [vmem:[%s6729_s8 + $0x814] ss:$144 sps:$4 sm:$0xff]   ;;  %v6352_v55 = vld [vmem:[%s6729_s8 + $0x85c] ss:$144 sps:$4 sm:$0xff]  }
 0x2d9   : > { %4219 = vmatpush1.bf16.xpose.msra.mxu1 %v6251_v56  ;;  %4606 = vmatpush1.bf16.xpose.msra.mxu0 %v6254_v57  ;;  %v6347_v56 = vld [vmem:[%s6729_s8 + $0x810] ss:$144 sps:$4 sm:$0xff]   ;;  %v6350_v57 = vld [vmem:[%s6729_s8 + $0x858] ss:$144 sps:$4 sm:$0xff]  }
 0x2da   : > { %4220 = vmatprep.subr.bf16.mxu1 %v6259_v58  ;;  %4607 = vmatprep.subr.bf16.mxu0 %v6262_v59  ;;  %v6355_v58 = vld [vmem:[%s6729_s8 + $0x934] ss:$144 sps:$4 sm:$0xff]   ;;  %v6358_v59 = vld [vmem:[%s6729_s8 + $0x97c] ss:$144 sps:$4 sm:$0xff]  }
 0x2e1   : > { %4221 = vmatpush1.bf16.xpose.msra.mxu1 %v6257_v60  ;;  %4608 = vmatpush1.bf16.xpose.msra.mxu0 %v6260_v61  ;;  %v6353_v60 = vld [vmem:[%s6729_s8 + $0x930] ss:$144 sps:$4 sm:$0xff]   ;;  %v6356_v61 = vld [vmem:[%s6729_s8 + $0x978] ss:$144 sps:$4 sm:$0xff]  }
 0x2e2   : > { %4222 = vmatprep.subr.bf16.mxu1 %v6265_v62  ;;  %4609 = vmatprep.subr.bf16.mxu0 %v6268_v63  ;;  %v6361_v62 = vld [vmem:[%s6729_s8 + $0xa54] ss:$144 sps:$4 sm:$0xff]   ;;  %v6364_v63 = vld [vmem:[%s6729_s8 + $0xa9c] ss:$144 sps:$4 sm:$0xff]  }
 0x2e9   : > { %4223 = vmatpush1.bf16.xpose.msra.mxu1 %v6263_v0  ;;  %4610 = vmatpush1.bf16.xpose.msra.mxu0 %v6266_v1  ;;  %v6359_v0 = vld [vmem:[%s6729_s8 + $0xa50] ss:$144 sps:$4 sm:$0xff]   ;;  %v6362_v1 = vld [vmem:[%s6729_s8 + $0xa98] ss:$144 sps:$4 sm:$0xff]  }
 0x2ea   : > { %4224 = vmatprep.subr.bf16.mxu1 %v6271_v2  ;;  %4611 = vmatprep.subr.bf16.mxu0 %v6274_v3  ;;  %v6367_v2 = vld [vmem:[%s6729_s8 + $0xb74] ss:$144 sps:$4 sm:$0xff]   ;;  %v6370_v3 = vld [vmem:[%s6729_s8 + $0xbbc] ss:$144 sps:$4 sm:$0xff]  }
 0x2f1   : > { %4225 = vmatpush1.bf16.xpose.msra.mxu1 %v6269_v4  ;;  %4612 = vmatpush1.bf16.xpose.msra.mxu0 %v6272_v5  ;;  %v6365_v4 = vld [vmem:[%s6729_s8 + $0xb70] ss:$144 sps:$4 sm:$0xff]   ;;  %v6368_v5 = vld [vmem:[%s6729_s8 + $0xbb8] ss:$144 sps:$4 sm:$0xff]  }
 0x2f2   : > { %4226 = vmatprep.subr.bf16.mxu1 %v6277_v6  ;;  %4613 = vmatprep.subr.bf16.mxu0 %v6280_v7  ;;  %v6373_v6 = vld [vmem:[%s6729_s8 + $0xc94] ss:$144 sps:$4 sm:$0xff]   ;;  %v6376_v7 = vld [vmem:[%s6729_s8 + $0xcdc] ss:$144 sps:$4 sm:$0xff]  }
 0x2f9   : > { %4227 = vmatpush1.bf16.xpose.msra.mxu1 %v6275_v8  ;;  %4614 = vmatpush1.bf16.xpose.msra.mxu0 %v6278_v9  ;;  %v6371_v8 = vld [vmem:[%s6729_s8 + $0xc90] ss:$144 sps:$4 sm:$0xff]   ;;  %v6374_v9 = vld [vmem:[%s6729_s8 + $0xcd8] ss:$144 sps:$4 sm:$0xff]  }
 0x2fa   : > { %4228 = vmatprep.subr.bf16.mxu1 %v6283_v10  ;;  %4615 = vmatprep.subr.bf16.mxu0 %v6286_v11  ;;  %v6379_v10 = vld [vmem:[%s6729_s8 + $0xdb4] ss:$144 sps:$4 sm:$0xff]   ;;  %v6382_v11 = vld [vmem:[%s6729_s8 + $0xdfc] ss:$144 sps:$4 sm:$0xff]  }
 0x301   : > { %4229 = vmatpush1.bf16.xpose.msra.mxu1 %v6281_v12  ;;  %4616 = vmatpush1.bf16.xpose.msra.mxu0 %v6284_v13  ;;  %v6377_v12 = vld [vmem:[%s6729_s8 + $0xdb0] ss:$144 sps:$4 sm:$0xff]   ;;  %v6380_v13 = vld [vmem:[%s6729_s8 + $0xdf8] ss:$144 sps:$4 sm:$0xff]  }
 0x302   : > { %4230 = vmatprep.subr.bf16.mxu1 %v6289_v14  ;;  %4617 = vmatprep.subr.bf16.mxu0 %v6292_v15  ;;  %v6385_v14 = vld [vmem:[%s6729_s8 + $0xed4] ss:$144 sps:$4 sm:$0xff]   ;;  %v6388_v15 = vld [vmem:[%s6729_s8 + $0xf1c] ss:$144 sps:$4 sm:$0xff]  }
 0x309   : > { %4231 = vmatpush1.bf16.xpose.msra.mxu1 %v6287_v16  ;;  %4618 = vmatpush1.bf16.xpose.msra.mxu0 %v6290_v17  ;;  %v6383_v16 = vld [vmem:[%s6729_s8 + $0xed0] ss:$144 sps:$4 sm:$0xff]   ;;  %v6386_v17 = vld [vmem:[%s6729_s8 + $0xf18] ss:$144 sps:$4 sm:$0xff]  }
 0x30a   : > { %4232 = vmatprep.subr.bf16.mxu1 %v6295_v18  ;;  %4619 = vmatprep.subr.bf16.mxu0 %v6298_v19  ;;  %v6391_v18 = vld [vmem:[%s6729_s8 + $0xff4] ss:$144 sps:$4 sm:$0xff]   ;;  %v6394_v19 = vld [vmem:[%s6729_s8 + $0x103c] ss:$144 sps:$4 sm:$0xff]  }
 0x311   : > { %4233 = vmatpush1.bf16.xpose.msra.mxu1 %v6293_v20  ;;  %4620 = vmatpush1.bf16.xpose.msra.mxu0 %v6296_v21  ;;  %v6389_v20 = vld [vmem:[%s6729_s8 + $0xff0] ss:$144 sps:$4 sm:$0xff]   ;;  %v6392_v21 = vld [vmem:[%s6729_s8 + $0x1038] ss:$144 sps:$4 sm:$0xff]  }
 0x312   : > { %4245 = vmatprep.subr.bf16.mxu1 %v6304_v22  ;;  %4632 = vmatprep.subr.bf16.mxu0 %v6310_v23  ;;  %v6397_v22 = vld [vmem:[%s6729_s8 + $0x1114] ss:$144 sps:$4 sm:$0xff]   ;;  %v6400_v23 = vld [vmem:[%s6729_s8 + $0x115c] ss:$144 sps:$4 sm:$0xff]  }
 0x318   : > { %4235 = vmatmul.mubr.bf16.vlgmr.msra.gmra.mrb[0].mxu1 %v6299_v24  ;;  %4622 = vmatmul.mubr.bf16.vlgmr.msra.gmra.mrb[0].mxu0 %v6305_v25  ;;  %v6395_v24 = vld [vmem:[%s6729_s8 + $0x1110] ss:$144 sps:$4 sm:$0xff]   ;;  %v6398_v25 = vld [vmem:[%s6729_s8 + $0x1158] ss:$144 sps:$4 sm:$0xff]  }
 0x319   : > { %4246 = vmatpush1.bf16.xpose.msra.mxu1 %v6302_v26  ;;  %4633 = vmatpush1.bf16.xpose.msra.mxu0 %v6308_v27  ;;  %v6406_v26 = vld [vmem:[%s6729_s8 + $0x3c] ss:$144 sps:$4 sm:$0xff]   ;;  %v6412_v27 = vld [vmem:[%s6729_s8 + $0x84] ss:$144 sps:$4 sm:$0xff]  }
 0x31a   : > { %4247 = vmatprep.subr.bf16.mxu1 %v6313_v28  ;;  %4634 = vmatprep.subr.bf16.mxu0 %v6316_v29  ;;  %v6401_v28 = vld [vmem:[%s7438_s0 + $0x30] ss:$144 sps:$4 sm:$0xff]   ;;  %v6407_v29 = vld [vmem:[%s7438_s0 + $0x78] ss:$144 sps:$4 sm:$0xff]  }
 0x31b   : > { %4277 = vmatprep.mubr.bf16.mxu1 %v6403_v30  ;;  %4664 = vmatprep.mubr.bf16.mxu0 %v6409_v31  ;;  %v6404_v30 = vld [vmem:[%s6729_s8 + $0x38] ss:$144 sps:$4 sm:$0xff]   ;;  %v6410_v31 = vld [vmem:[%s6729_s8 + $0x80] ss:$144 sps:$4 sm:$0xff]  }
 0x321   : > { %4248 = vmatpush1.bf16.xpose.msra.mxu1 %v6311_v32  ;;  %4635 = vmatpush1.bf16.xpose.msra.mxu0 %v6314_v33  ;;  %v6415_v32 = vld [vmem:[%s6729_s8 + $0x15c] ss:$144 sps:$4 sm:$0xff]   ;;  %v6418_v33 = vld [vmem:[%s6729_s8 + $0x1a4] ss:$144 sps:$4 sm:$0xff]  }
 0x322   : > { %4249 = vmatprep.subr.bf16.mxu1 %v6319_v34  ;;  %4636 = vmatprep.subr.bf16.mxu0 %v6322_v35  ;;  %v6505_v34 = vld [vmem:[%s7438_s0 + $0x3c] ss:$144 sps:$4 sm:$0xff]   ;;  %v6511_v35 = vld [vmem:[%s7438_s0 + $0x84] ss:$144 sps:$4 sm:$0xff]  }
 0x329   : > { %4250 = vmatpush1.bf16.xpose.msra.mxu1 %v6317_v36  ;;  %4637 = vmatpush1.bf16.xpose.msra.mxu0 %v6320_v37  ;;  %v6413_v36 = vld [vmem:[%s6729_s8 + $0x158] ss:$144 sps:$4 sm:$0xff]   ;;  %v6416_v37 = vld [vmem:[%s6729_s8 + $0x1a0] ss:$144 sps:$4 sm:$0xff]  }
 0x32a   : > { %4251 = vmatprep.subr.bf16.mxu1 %v6325_v38  ;;  %4638 = vmatprep.subr.bf16.mxu0 %v6328_v39  ;;  %v6421_v38 = vld [vmem:[%s6729_s8 + $0x27c] ss:$144 sps:$4 sm:$0xff]   ;;  %v6424_v39 = vld [vmem:[%s6729_s8 + $0x2c4] ss:$144 sps:$4 sm:$0xff]  }
 0x331   : > { %4252 = vmatpush1.bf16.xpose.msra.mxu1 %v6323_v40  ;;  %4639 = vmatpush1.bf16.xpose.msra.mxu0 %v6326_v41  ;;  %v6419_v40 = vld [vmem:[%s6729_s8 + $0x278] ss:$144 sps:$4 sm:$0xff]   ;;  %v6422_v41 = vld [vmem:[%s6729_s8 + $0x2c0] ss:$144 sps:$4 sm:$0xff]  }
 0x332   : > { %4253 = vmatprep.subr.bf16.mxu1 %v6331_v42  ;;  %4640 = vmatprep.subr.bf16.mxu0 %v6334_v43  ;;  %v6427_v42 = vld [vmem:[%s6729_s8 + $0x39c] ss:$144 sps:$4 sm:$0xff]   ;;  %v6430_v43 = vld [vmem:[%s6729_s8 + $0x3e4] ss:$144 sps:$4 sm:$0xff]  }
 0x339   : > { %4254 = vmatpush1.bf16.xpose.msra.mxu1 %v6329_v44  ;;  %4641 = vmatpush1.bf16.xpose.msra.mxu0 %v6332_v45  ;;  %v6425_v44 = vld [vmem:[%s6729_s8 + $0x398] ss:$144 sps:$4 sm:$0xff]   ;;  %v6428_v45 = vld [vmem:[%s6729_s8 + $0x3e0] ss:$144 sps:$4 sm:$0xff]  }
 0x33a   : > { %4255 = vmatprep.subr.bf16.mxu1 %v6337_v46  ;;  %4642 = vmatprep.subr.bf16.mxu0 %v6340_v47  ;;  %v6433_v46 = vld [vmem:[%s6729_s8 + $0x4bc] ss:$144 sps:$4 sm:$0xff]   ;;  %v6436_v47 = vld [vmem:[%s6729_s8 + $0x504] ss:$144 sps:$4 sm:$0xff]  }
 0x341   : > { %4256 = vmatpush1.bf16.xpose.msra.mxu1 %v6335_v48  ;;  %4643 = vmatpush1.bf16.xpose.msra.mxu0 %v6338_v49  ;;  %v6431_v48 = vld [vmem:[%s6729_s8 + $0x4b8] ss:$144 sps:$4 sm:$0xff]   ;;  %v6434_v49 = vld [vmem:[%s6729_s8 + $0x500] ss:$144 sps:$4 sm:$0xff]  }
 0x342   : > { %4257 = vmatprep.subr.bf16.mxu1 %v6343_v50  ;;  %4644 = vmatprep.subr.bf16.mxu0 %v6346_v51  ;;  %v6439_v50 = vld [vmem:[%s6729_s8 + $0x5dc] ss:$144 sps:$4 sm:$0xff]   ;;  %v6442_v51 = vld [vmem:[%s6729_s8 + $0x624] ss:$144 sps:$4 sm:$0xff]  }
 0x349   : > { %4258 = vmatpush1.bf16.xpose.msra.mxu1 %v6341_v52  ;;  %4645 = vmatpush1.bf16.xpose.msra.mxu0 %v6344_v53  ;;  %v6437_v52 = vld [vmem:[%s6729_s8 + $0x5d8] ss:$144 sps:$4 sm:$0xff]   ;;  %v6440_v53 = vld [vmem:[%s6729_s8 + $0x620] ss:$144 sps:$4 sm:$0xff]  }
 0x34a   : > { %4259 = vmatprep.subr.bf16.mxu1 %v6349_v54  ;;  %4646 = vmatprep.subr.bf16.mxu0 %v6352_v55  ;;  %v6445_v54 = vld [vmem:[%s6729_s8 + $0x6fc] ss:$144 sps:$4 sm:$0xff]   ;;  %v6448_v55 = vld [vmem:[%s6729_s8 + $0x744] ss:$144 sps:$4 sm:$0xff]  }
 0x351   : > { %4260 = vmatpush1.bf16.xpose.msra.mxu1 %v6347_v56  ;;  %4647 = vmatpush1.bf16.xpose.msra.mxu0 %v6350_v57  ;;  %v6443_v56 = vld [vmem:[%s6729_s8 + $0x6f8] ss:$144 sps:$4 sm:$0xff]   ;;  %v6446_v57 = vld [vmem:[%s6729_s8 + $0x740] ss:$144 sps:$4 sm:$0xff]  }
 0x352   : > { %4261 = vmatprep.subr.bf16.mxu1 %v6355_v58  ;;  %4648 = vmatprep.subr.bf16.mxu0 %v6358_v59  ;;  %v6451_v58 = vld [vmem:[%s6729_s8 + $0x81c] ss:$144 sps:$4 sm:$0xff]   ;;  %v6454_v59 = vld [vmem:[%s6729_s8 + $0x864] ss:$144 sps:$4 sm:$0xff]  }
 0x359   : > { %4262 = vmatpush1.bf16.xpose.msra.mxu1 %v6353_v60  ;;  %4649 = vmatpush1.bf16.xpose.msra.mxu0 %v6356_v61  ;;  %v6449_v60 = vld [vmem:[%s6729_s8 + $0x818] ss:$144 sps:$4 sm:$0xff]   ;;  %v6452_v61 = vld [vmem:[%s6729_s8 + $0x860] ss:$144 sps:$4 sm:$0xff]  }
 0x35a   : > { %4263 = vmatprep.subr.bf16.mxu1 %v6361_v62  ;;  %4650 = vmatprep.subr.bf16.mxu0 %v6364_v63  ;;  %v6457_v62 = vld [vmem:[%s6729_s8 + $0x93c] ss:$144 sps:$4 sm:$0xff]   ;;  %v6460_v63 = vld [vmem:[%s6729_s8 + $0x984] ss:$144 sps:$4 sm:$0xff]  }
 0x361   : > { %4264 = vmatpush1.bf16.xpose.msra.mxu1 %v6359_v0  ;;  %4651 = vmatpush1.bf16.xpose.msra.mxu0 %v6362_v1  ;;  %v6455_v0 = vld [vmem:[%s6729_s8 + $0x938] ss:$144 sps:$4 sm:$0xff]   ;;  %v6458_v1 = vld [vmem:[%s6729_s8 + $0x980] ss:$144 sps:$4 sm:$0xff]  }
 0x362   : > { %4265 = vmatprep.subr.bf16.mxu1 %v6367_v2  ;;  %4652 = vmatprep.subr.bf16.mxu0 %v6370_v3  ;;  %v6463_v2 = vld [vmem:[%s6729_s8 + $0xa5c] ss:$144 sps:$4 sm:$0xff]   ;;  %v6466_v3 = vld [vmem:[%s6729_s8 + $0xaa4] ss:$144 sps:$4 sm:$0xff]  }
 0x369   : > { %4266 = vmatpush1.bf16.xpose.msra.mxu1 %v6365_v4  ;;  %4653 = vmatpush1.bf16.xpose.msra.mxu0 %v6368_v5  ;;  %v6461_v4 = vld [vmem:[%s6729_s8 + $0xa58] ss:$144 sps:$4 sm:$0xff]   ;;  %v6464_v5 = vld [vmem:[%s6729_s8 + $0xaa0] ss:$144 sps:$4 sm:$0xff]  }
 0x36a   : > { %4267 = vmatprep.subr.bf16.mxu1 %v6373_v6  ;;  %4654 = vmatprep.subr.bf16.mxu0 %v6376_v7  ;;  %v6469_v6 = vld [vmem:[%s6729_s8 + $0xb7c] ss:$144 sps:$4 sm:$0xff]   ;;  %v6472_v7 = vld [vmem:[%s6729_s8 + $0xbc4] ss:$144 sps:$4 sm:$0xff]  }
 0x371   : > { %4268 = vmatpush1.bf16.xpose.msra.mxu1 %v6371_v8  ;;  %4655 = vmatpush1.bf16.xpose.msra.mxu0 %v6374_v9  ;;  %v6467_v8 = vld [vmem:[%s6729_s8 + $0xb78] ss:$144 sps:$4 sm:$0xff]   ;;  %v6470_v9 = vld [vmem:[%s6729_s8 + $0xbc0] ss:$144 sps:$4 sm:$0xff]  }
 0x372   : > { %4269 = vmatprep.subr.bf16.mxu1 %v6379_v10  ;;  %4656 = vmatprep.subr.bf16.mxu0 %v6382_v11  ;;  %v6475_v10 = vld [vmem:[%s6729_s8 + $0xc9c] ss:$144 sps:$4 sm:$0xff]   ;;  %v6478_v11 = vld [vmem:[%s6729_s8 + $0xce4] ss:$144 sps:$4 sm:$0xff]  }
 0x379   : > { %4270 = vmatpush1.bf16.xpose.msra.mxu1 %v6377_v12  ;;  %4657 = vmatpush1.bf16.xpose.msra.mxu0 %v6380_v13  ;;  %v6473_v12 = vld [vmem:[%s6729_s8 + $0xc98] ss:$144 sps:$4 sm:$0xff]   ;;  %v6476_v13 = vld [vmem:[%s6729_s8 + $0xce0] ss:$144 sps:$4 sm:$0xff]  }
 0x37a   : > { %4271 = vmatprep.subr.bf16.mxu1 %v6385_v14  ;;  %4658 = vmatprep.subr.bf16.mxu0 %v6388_v15  ;;  %v6481_v14 = vld [vmem:[%s6729_s8 + $0xdbc] ss:$144 sps:$4 sm:$0xff]   ;;  %v6484_v15 = vld [vmem:[%s6729_s8 + $0xe04] ss:$144 sps:$4 sm:$0xff]  }
 0x381   : > { %4272 = vmatpush1.bf16.xpose.msra.mxu1 %v6383_v16  ;;  %4659 = vmatpush1.bf16.xpose.msra.mxu0 %v6386_v17  ;;  %v6479_v16 = vld [vmem:[%s6729_s8 + $0xdb8] ss:$144 sps:$4 sm:$0xff]   ;;  %v6482_v17 = vld [vmem:[%s6729_s8 + $0xe00] ss:$144 sps:$4 sm:$0xff]  }
 0x382   : > { %4273 = vmatprep.subr.bf16.mxu1 %v6391_v18  ;;  %4660 = vmatprep.subr.bf16.mxu0 %v6394_v19  ;;  %v6487_v18 = vld [vmem:[%s6729_s8 + $0xedc] ss:$144 sps:$4 sm:$0xff]   ;;  %v6490_v19 = vld [vmem:[%s6729_s8 + $0xf24] ss:$144 sps:$4 sm:$0xff]  }
 0x389   : > { %4274 = vmatpush1.bf16.xpose.msra.mxu1 %v6389_v20  ;;  %4661 = vmatpush1.bf16.xpose.msra.mxu0 %v6392_v21  ;;  %v6485_v20 = vld [vmem:[%s6729_s8 + $0xed8] ss:$144 sps:$4 sm:$0xff]   ;;  %v6488_v21 = vld [vmem:[%s6729_s8 + $0xf20] ss:$144 sps:$4 sm:$0xff]  }
 0x38a   : > { %4275 = vmatprep.subr.bf16.mxu1 %v6397_v22  ;;  %4662 = vmatprep.subr.bf16.mxu0 %v6400_v23  ;;  %v6493_v22 = vld [vmem:[%s6729_s8 + $0xffc] ss:$144 sps:$4 sm:$0xff]   ;;  %v6496_v23 = vld [vmem:[%s6729_s8 + $0x1044] ss:$144 sps:$4 sm:$0xff]  }
 0x391   : > { %4276 = vmatpush1.bf16.xpose.msra.mxu1 %v6395_v24  ;;  %4663 = vmatpush1.bf16.xpose.msra.mxu0 %v6398_v25  ;;  %v6491_v24 = vld [vmem:[%s6729_s8 + $0xff8] ss:$144 sps:$4 sm:$0xff]   ;;  %v6494_v25 = vld [vmem:[%s6729_s8 + $0x1040] ss:$144 sps:$4 sm:$0xff]  }
 0x392   : > { %4288 = vmatprep.subr.bf16.mxu1 %v6406_v26  ;;  %4675 = vmatprep.subr.bf16.mxu0 %v6412_v27  ;;  %v6499_v26 = vld [vmem:[%s6729_s8 + $0x111c] ss:$144 sps:$4 sm:$0xff]   ;;  %v6502_v27 = vld [vmem:[%s6729_s8 + $0x1164] ss:$144 sps:$4 sm:$0xff]  }
 0x398   : > { %4278 = vmatmul.mubr.bf16.vlgmr.msra.gmra.mrb[0].mxu1 %v6401_v28  ;;  %4665 = vmatmul.mubr.bf16.vlgmr.msra.gmra.mrb[0].mxu0 %v6407_v29  ;;  %v6497_v28 = vld [vmem:[%s6729_s8 + $0x1118] ss:$144 sps:$4 sm:$0xff]   ;;  %v6500_v29 = vld [vmem:[%s6729_s8 + $0x1160] ss:$144 sps:$4 sm:$0xff]  }
 0x399   : > { %4289 = vmatpush1.bf16.xpose.msra.mxu1 %v6404_v30  ;;  %4676 = vmatpush1.bf16.xpose.msra.mxu0 %v6410_v31  ;;  %v6508_v30 = vld [vmem:[%s6729_s8 + $0x44] ss:$144 sps:$4 sm:$0xff]   ;;  %v6514_v31 = vld [vmem:[%s6729_s8 + $0x8c] ss:$144 sps:$4 sm:$0xff]  }
 0x39a   : > { %4290 = vmatprep.subr.bf16.mxu1 %v6415_v32  ;;  %4677 = vmatprep.subr.bf16.mxu0 %v6418_v33  ;;  %v6503_v32 = vld [vmem:[%s7438_s0 + $0x38] ss:$144 sps:$4 sm:$0xff]   ;;  %v6509_v33 = vld [vmem:[%s7438_s0 + $0x80] ss:$144 sps:$4 sm:$0xff]  }
 0x39b   : > { %4320 = vmatprep.mubr.bf16.mxu1 %v6505_v34  ;;  %4707 = vmatprep.mubr.bf16.mxu0 %v6511_v35  ;;  %v6506_v34 = vld [vmem:[%s6729_s8 + $0x40] ss:$144 sps:$4 sm:$0xff]   ;;  %v6512_v35 = vld [vmem:[%s6729_s8 + $0x88] ss:$144 sps:$4 sm:$0xff]  }
 0x3a1   : > { %4291 = vmatpush1.bf16.xpose.msra.mxu1 %v6413_v36  ;;  %4678 = vmatpush1.bf16.xpose.msra.mxu0 %v6416_v37  ;;  %v6517_v36 = vld [vmem:[%s6729_s8 + $0x164] ss:$144 sps:$4 sm:$0xff]   ;;  %v6520_v37 = vld [vmem:[%s6729_s8 + $0x1ac] ss:$144 sps:$4 sm:$0xff]  }
 0x3a2   : > { %4292 = vmatprep.subr.bf16.mxu1 %v6421_v38  ;;  %4679 = vmatprep.subr.bf16.mxu0 %v6424_v39  ;;  %v6607_v38 = vld [vmem:[%s7438_s0 + $0x44] ss:$144 sps:$4 sm:$0xff]   ;;  %v6610_v39 = vld [vmem:[%s7438_s0 + $0x8c] ss:$144 sps:$4 sm:$0xff]  }
 0x3a9   : > { %4293 = vmatpush1.bf16.xpose.msra.mxu1 %v6419_v40  ;;  %4680 = vmatpush1.bf16.xpose.msra.mxu0 %v6422_v41  ;;  %v6515_v40 = vld [vmem:[%s6729_s8 + $0x160] ss:$144 sps:$4 sm:$0xff]   ;;  %v6518_v41 = vld [vmem:[%s6729_s8 + $0x1a8] ss:$144 sps:$4 sm:$0xff]  }
 0x3aa   : > { %4294 = vmatprep.subr.bf16.mxu1 %v6427_v42  ;;  %4681 = vmatprep.subr.bf16.mxu0 %v6430_v43  ;;  %v6523_v42 = vld [vmem:[%s6729_s8 + $0x284] ss:$144 sps:$4 sm:$0xff]   ;;  %v6526_v43 = vld [vmem:[%s6729_s8 + $0x2cc] ss:$144 sps:$4 sm:$0xff]  }
 0x3b1   : > { %4295 = vmatpush1.bf16.xpose.msra.mxu1 %v6425_v44  ;;  %4682 = vmatpush1.bf16.xpose.msra.mxu0 %v6428_v45  ;;  %v6521_v44 = vld [vmem:[%s6729_s8 + $0x280] ss:$144 sps:$4 sm:$0xff]   ;;  %v6524_v45 = vld [vmem:[%s6729_s8 + $0x2c8] ss:$144 sps:$4 sm:$0xff]  }
 0x3b2   : > { %4296 = vmatprep.subr.bf16.mxu1 %v6433_v46  ;;  %4683 = vmatprep.subr.bf16.mxu0 %v6436_v47  ;;  %v6529_v46 = vld [vmem:[%s6729_s8 + $0x3a4] ss:$144 sps:$4 sm:$0xff]   ;;  %v6532_v47 = vld [vmem:[%s6729_s8 + $0x3ec] ss:$144 sps:$4 sm:$0xff]  }
 0x3b9   : > { %4297 = vmatpush1.bf16.xpose.msra.mxu1 %v6431_v48  ;;  %4684 = vmatpush1.bf16.xpose.msra.mxu0 %v6434_v49  ;;  %v6527_v48 = vld [vmem:[%s6729_s8 + $0x3a0] ss:$144 sps:$4 sm:$0xff]   ;;  %v6530_v49 = vld [vmem:[%s6729_s8 + $0x3e8] ss:$144 sps:$4 sm:$0xff]  }
 0x3ba   : > { %4298 = vmatprep.subr.bf16.mxu1 %v6439_v50  ;;  %4685 = vmatprep.subr.bf16.mxu0 %v6442_v51  ;;  %v6535_v50 = vld [vmem:[%s6729_s8 + $0x4c4] ss:$144 sps:$4 sm:$0xff]   ;;  %v6538_v51 = vld [vmem:[%s6729_s8 + $0x50c] ss:$144 sps:$4 sm:$0xff]  }
 0x3c1   : > { %4299 = vmatpush1.bf16.xpose.msra.mxu1 %v6437_v52  ;;  %4686 = vmatpush1.bf16.xpose.msra.mxu0 %v6440_v53  ;;  %v6533_v52 = vld [vmem:[%s6729_s8 + $0x4c0] ss:$144 sps:$4 sm:$0xff]   ;;  %v6536_v53 = vld [vmem:[%s6729_s8 + $0x508] ss:$144 sps:$4 sm:$0xff]  }
 0x3c2   : > { %4300 = vmatprep.subr.bf16.mxu1 %v6445_v54  ;;  %4687 = vmatprep.subr.bf16.mxu0 %v6448_v55  ;;  %v6541_v54 = vld [vmem:[%s6729_s8 + $0x5e4] ss:$144 sps:$4 sm:$0xff]   ;;  %v6544_v55 = vld [vmem:[%s6729_s8 + $0x62c] ss:$144 sps:$4 sm:$0xff]  }
 0x3c9   : > { %4301 = vmatpush1.bf16.xpose.msra.mxu1 %v6443_v56  ;;  %4688 = vmatpush1.bf16.xpose.msra.mxu0 %v6446_v57  ;;  %v6539_v56 = vld [vmem:[%s6729_s8 + $0x5e0] ss:$144 sps:$4 sm:$0xff]   ;;  %v6542_v57 = vld [vmem:[%s6729_s8 + $0x628] ss:$144 sps:$4 sm:$0xff]  }
 0x3ca   : > { %4302 = vmatprep.subr.bf16.mxu1 %v6451_v58  ;;  %4689 = vmatprep.subr.bf16.mxu0 %v6454_v59  ;;  %v6547_v58 = vld [vmem:[%s6729_s8 + $0x704] ss:$144 sps:$4 sm:$0xff]   ;;  %v6550_v59 = vld [vmem:[%s6729_s8 + $0x74c] ss:$144 sps:$4 sm:$0xff]  }
 0x3d1   : > { %4303 = vmatpush1.bf16.xpose.msra.mxu1 %v6449_v60  ;;  %4690 = vmatpush1.bf16.xpose.msra.mxu0 %v6452_v61  ;;  %v6545_v60 = vld [vmem:[%s6729_s8 + $0x700] ss:$144 sps:$4 sm:$0xff]   ;;  %v6548_v61 = vld [vmem:[%s6729_s8 + $0x748] ss:$144 sps:$4 sm:$0xff]  }
 0x3d2   : > { %4304 = vmatprep.subr.bf16.mxu1 %v6457_v62  ;;  %4691 = vmatprep.subr.bf16.mxu0 %v6460_v63  ;;  %v6553_v62 = vld [vmem:[%s6729_s8 + $0x824] ss:$144 sps:$4 sm:$0xff]   ;;  %v6556_v63 = vld [vmem:[%s6729_s8 + $0x86c] ss:$144 sps:$4 sm:$0xff]  }
 0x3d9   : > { %4305 = vmatpush1.bf16.xpose.msra.mxu1 %v6455_v0  ;;  %4692 = vmatpush1.bf16.xpose.msra.mxu0 %v6458_v1  ;;  %v6551_v0 = vld [vmem:[%s6729_s8 + $0x820] ss:$144 sps:$4 sm:$0xff]   ;;  %v6554_v1 = vld [vmem:[%s6729_s8 + $0x868] ss:$144 sps:$4 sm:$0xff]  }
 0x3da   : > { %4306 = vmatprep.subr.bf16.mxu1 %v6463_v2  ;;  %4693 = vmatprep.subr.bf16.mxu0 %v6466_v3  ;;  %v6559_v2 = vld [vmem:[%s6729_s8 + $0x944] ss:$144 sps:$4 sm:$0xff]   ;;  %v6562_v3 = vld [vmem:[%s6729_s8 + $0x98c] ss:$144 sps:$4 sm:$0xff]  }
 0x3e1   : > { %4307 = vmatpush1.bf16.xpose.msra.mxu1 %v6461_v4  ;;  %4694 = vmatpush1.bf16.xpose.msra.mxu0 %v6464_v5  ;;  %v6557_v4 = vld [vmem:[%s6729_s8 + $0x940] ss:$144 sps:$4 sm:$0xff]   ;;  %v6560_v5 = vld [vmem:[%s6729_s8 + $0x988] ss:$144 sps:$4 sm:$0xff]  }
 0x3e2   : > { %4308 = vmatprep.subr.bf16.mxu1 %v6469_v6  ;;  %4695 = vmatprep.subr.bf16.mxu0 %v6472_v7  ;;  %v6565_v6 = vld [vmem:[%s6729_s8 + $0xa64] ss:$144 sps:$4 sm:$0xff]   ;;  %v6568_v7 = vld [vmem:[%s6729_s8 + $0xaac] ss:$144 sps:$4 sm:$0xff]  }
 0x3e9   : > { %4309 = vmatpush1.bf16.xpose.msra.mxu1 %v6467_v8  ;;  %4696 = vmatpush1.bf16.xpose.msra.mxu0 %v6470_v9  ;;  %v6563_v8 = vld [vmem:[%s6729_s8 + $0xa60] ss:$144 sps:$4 sm:$0xff]   ;;  %v6566_v9 = vld [vmem:[%s6729_s8 + $0xaa8] ss:$144 sps:$4 sm:$0xff]  }
 0x3ea   : > { %4310 = vmatprep.subr.bf16.mxu1 %v6475_v10  ;;  %4697 = vmatprep.subr.bf16.mxu0 %v6478_v11  ;;  %v6571_v10 = vld [vmem:[%s6729_s8 + $0xb84] ss:$144 sps:$4 sm:$0xff]   ;;  %v6574_v11 = vld [vmem:[%s6729_s8 + $0xbcc] ss:$144 sps:$4 sm:$0xff]  }
 0x3f1   : > { %4311 = vmatpush1.bf16.xpose.msra.mxu1 %v6473_v12  ;;  %4698 = vmatpush1.bf16.xpose.msra.mxu0 %v6476_v13  ;;  %v6569_v12 = vld [vmem:[%s6729_s8 + $0xb80] ss:$144 sps:$4 sm:$0xff]   ;;  %v6572_v13 = vld [vmem:[%s6729_s8 + $0xbc8] ss:$144 sps:$4 sm:$0xff]  }
 0x3f2   : > { %4312 = vmatprep.subr.bf16.mxu1 %v6481_v14  ;;  %4699 = vmatprep.subr.bf16.mxu0 %v6484_v15  ;;  %v6577_v14 = vld [vmem:[%s6729_s8 + $0xca4] ss:$144 sps:$4 sm:$0xff]   ;;  %v6580_v15 = vld [vmem:[%s6729_s8 + $0xcec] ss:$144 sps:$4 sm:$0xff]  }
 0x3f9   : > { %4313 = vmatpush1.bf16.xpose.msra.mxu1 %v6479_v16  ;;  %4700 = vmatpush1.bf16.xpose.msra.mxu0 %v6482_v17  ;;  %v6575_v16 = vld [vmem:[%s6729_s8 + $0xca0] ss:$144 sps:$4 sm:$0xff]   ;;  %v6578_v17 = vld [vmem:[%s6729_s8 + $0xce8] ss:$144 sps:$4 sm:$0xff]  }
 0x3fa   : > { %4314 = vmatprep.subr.bf16.mxu1 %v6487_v18  ;;  %4701 = vmatprep.subr.bf16.mxu0 %v6490_v19  ;;  %v6583_v18 = vld [vmem:[%s6729_s8 + $0xdc4] ss:$144 sps:$4 sm:$0xff]   ;;  %v6586_v19 = vld [vmem:[%s6729_s8 + $0xe0c] ss:$144 sps:$4 sm:$0xff]  }
 0x401   : > { %4315 = vmatpush1.bf16.xpose.msra.mxu1 %v6485_v20  ;;  %4702 = vmatpush1.bf16.xpose.msra.mxu0 %v6488_v21  ;;  %v6581_v20 = vld [vmem:[%s6729_s8 + $0xdc0] ss:$144 sps:$4 sm:$0xff]   ;;  %v6584_v21 = vld [vmem:[%s6729_s8 + $0xe08] ss:$144 sps:$4 sm:$0xff]  }
 0x402   : > { %4316 = vmatprep.subr.bf16.mxu1 %v6493_v22  ;;  %4703 = vmatprep.subr.bf16.mxu0 %v6496_v23  ;;  %v6589_v22 = vld [vmem:[%s6729_s8 + $0xee4] ss:$144 sps:$4 sm:$0xff]   ;;  %v6592_v23 = vld [vmem:[%s6729_s8 + $0xf2c] ss:$144 sps:$4 sm:$0xff]  }
 0x409   : > { %4317 = vmatpush1.bf16.xpose.msra.mxu1 %v6491_v24  ;;  %4704 = vmatpush1.bf16.xpose.msra.mxu0 %v6494_v25  ;;  %v6587_v24 = vld [vmem:[%s6729_s8 + $0xee0] ss:$144 sps:$4 sm:$0xff]   ;;  %v6590_v25 = vld [vmem:[%s6729_s8 + $0xf28] ss:$144 sps:$4 sm:$0xff]  }
 0x40a   : > { %4318 = vmatprep.subr.bf16.mxu1 %v6499_v26  ;;  %4705 = vmatprep.subr.bf16.mxu0 %v6502_v27  ;;  %v6595_v26 = vld [vmem:[%s6729_s8 + $0x1004] ss:$144 sps:$4 sm:$0xff]   ;;  %v6598_v27 = vld [vmem:[%s6729_s8 + $0x104c] ss:$144 sps:$4 sm:$0xff]  }
 0x411   : > { %4319 = vmatpush1.bf16.xpose.msra.mxu1 %v6497_v28  ;;  %4706 = vmatpush1.bf16.xpose.msra.mxu0 %v6500_v29  ;;  %v6593_v28 = vld [vmem:[%s6729_s8 + $0x1000] ss:$144 sps:$4 sm:$0xff]   ;;  %v6596_v29 = vld [vmem:[%s6729_s8 + $0x1048] ss:$144 sps:$4 sm:$0xff]  }
 0x412   : > { %4331 = vmatprep.subr.bf16.mxu1 %v6508_v30  ;;  %4718 = vmatprep.subr.bf16.mxu0 %v6514_v31  ;;  %v6601_v30 = vld [vmem:[%s6729_s8 + $0x1124] ss:$144 sps:$4 sm:$0xff]   ;;  %v6604_v31 = vld [vmem:[%s6729_s8 + $0x116c] ss:$144 sps:$4 sm:$0xff]  }
 0x418   : > { %4321 = vmatmul.mubr.bf16.vlgmr.msra.gmra.mrb[0].mxu1 %v6503_v32  ;;  %4708 = vmatmul.mubr.bf16.vlgmr.msra.gmra.mrb[0].mxu0 %v6509_v33  ;;  %v6599_v32 = vld [vmem:[%s6729_s8 + $0x1120] ss:$144 sps:$4 sm:$0xff]   ;;  %v6602_v33 = vld [vmem:[%s6729_s8 + $0x1168] ss:$144 sps:$4 sm:$0xff]  }
 0x419   : > { %4332 = vmatpush1.bf16.xpose.msra.mxu1 %v6506_v34  ;;  %4719 = vmatpush1.bf16.xpose.msra.mxu0 %v6512_v35  ;;  %v6605_v34 = vld [vmem:[%s7438_s0 + $0x40] ss:$144 sps:$4 sm:$0xff]   ;;  %v6608_v35 = vld [vmem:[%s7438_s0 + $0x88] ss:$144 sps:$4 sm:$0xff]  }
 0x41a   : > { %4333 = vmatprep.subr.bf16.mxu1 %v6517_v36  ;;  %4720 = vmatprep.subr.bf16.mxu0 %v6520_v37  ;;  %v4763_v36 = vlaneseq }
 0x41b   : > { %4363 = vmatprep.mubr.bf16.mxu1 %v6607_v38  ;;  %4750 = vmatprep.mubr.bf16.mxu0 %v6610_v39  ;;  %v4761_v39 = vld [vmem:[%s306_s11] sm:$0x3] }
 0x41c   : > { %v4764_v37 = vshrl.u32 %v4763_v36, 7 }
 0x41e   : > { %v4765_v38 = vsub.s32 0, %v4764_v37 }
 0x421   : > { %4334 = vmatpush1.bf16.xpose.msra.mxu1 %v6515_v40  ;;  %4721 = vmatpush1.bf16.xpose.msra.mxu0 %v6518_v41  ;;  %v4769_v40 = vsub.s32 1, %v4764_v37  ;;  %v4777_v41 = vld [vmem:[%s311_s14] sm:$0x3] }
 0x422   : > { %4335 = vmatprep.subr.bf16.mxu1 %v6523_v42  ;;  %4722 = vmatprep.subr.bf16.mxu0 %v6526_v43  ;;  %v4766_v42 = vrot.slane %v4761_v39, %v4765_v38 }
 0x429   : > { %4336 = vmatpush1.bf16.xpose.msra.mxu1 %v6521_v44  ;;  %4723 = vmatpush1.bf16.xpose.msra.mxu0 %v6524_v45  ;;  %v4770_v45 = vrot.slane %v4761_v39, %v4769_v40 }
 0x42a   : > { %4337 = vmatprep.subr.bf16.mxu1 %v6529_v46  ;;  %4724 = vmatprep.subr.bf16.mxu0 %v6532_v47  ;;  %v4782_v47 = vrot.slane %v4777_v41, %v4765_v38 }
 0x431   : > { %4338 = vmatpush1.bf16.xpose.msra.mxu1 %v6527_v48  ;;  %4725 = vmatpush1.bf16.xpose.msra.mxu0 %v6530_v49 }
 0x432   : > { %4339 = vmatprep.subr.bf16.mxu1 %v6535_v50  ;;  %4726 = vmatprep.subr.bf16.mxu0 %v6538_v51  ;;  %v4786_v51 = vrot.slane %v4777_v41, %v4769_v40 }
 0x439   : > { %4340 = vmatpush1.bf16.xpose.msra.mxu1 %v6533_v52  ;;  %4727 = vmatpush1.bf16.xpose.msra.mxu0 %v6536_v53 }
 0x43a   : > { %4341 = vmatprep.subr.bf16.mxu1 %v6541_v54  ;;  %4728 = vmatprep.subr.bf16.mxu0 %v6544_v55 }
 0x441   : > { %4342 = vmatpush1.bf16.xpose.msra.mxu1 %v6539_v56  ;;  %4729 = vmatpush1.bf16.xpose.msra.mxu0 %v6542_v57 }
 0x442   : > { %4343 = vmatprep.subr.bf16.mxu1 %v6547_v58  ;;  %4730 = vmatprep.subr.bf16.mxu0 %v6550_v59 }
 0x449   : > { %4344 = vmatpush1.bf16.xpose.msra.mxu1 %v6545_v60  ;;  %4731 = vmatpush1.bf16.xpose.msra.mxu0 %v6548_v61 }
 0x44a   : > { %4345 = vmatprep.subr.bf16.mxu1 %v6553_v62  ;;  %4732 = vmatprep.subr.bf16.mxu0 %v6556_v63 }
 0x451   : > { %4346 = vmatpush1.bf16.xpose.msra.mxu1 %v6551_v0  ;;  %4733 = vmatpush1.bf16.xpose.msra.mxu0 %v6554_v1 }
 0x452   : > { %4347 = vmatprep.subr.bf16.mxu1 %v6559_v2  ;;  %4734 = vmatprep.subr.bf16.mxu0 %v6562_v3 }
 0x459   : > { %4348 = vmatpush1.bf16.xpose.msra.mxu1 %v6557_v4  ;;  %4735 = vmatpush1.bf16.xpose.msra.mxu0 %v6560_v5 }
 0x45a   : > { %4349 = vmatprep.subr.bf16.mxu1 %v6565_v6  ;;  %4736 = vmatprep.subr.bf16.mxu0 %v6568_v7 }
 0x461   : > { %4350 = vmatpush1.bf16.xpose.msra.mxu1 %v6563_v8  ;;  %4737 = vmatpush1.bf16.xpose.msra.mxu0 %v6566_v9 }
 0x462   : > { %4351 = vmatprep.subr.bf16.mxu1 %v6571_v10  ;;  %4738 = vmatprep.subr.bf16.mxu0 %v6574_v11 }
 0x469   : > { %4352 = vmatpush1.bf16.xpose.msra.mxu1 %v6569_v12  ;;  %4739 = vmatpush1.bf16.xpose.msra.mxu0 %v6572_v13 }
 0x46a   : > { %4353 = vmatprep.subr.bf16.mxu1 %v6577_v14  ;;  %4740 = vmatprep.subr.bf16.mxu0 %v6580_v15 }
 0x471   : > { %4354 = vmatpush1.bf16.xpose.msra.mxu1 %v6575_v16  ;;  %4741 = vmatpush1.bf16.xpose.msra.mxu0 %v6578_v17 }
 0x472   : > { %4355 = vmatprep.subr.bf16.mxu1 %v6583_v18  ;;  %4742 = vmatprep.subr.bf16.mxu0 %v6586_v19 }
 0x479   : > { %4356 = vmatpush1.bf16.xpose.msra.mxu1 %v6581_v20  ;;  %4743 = vmatpush1.bf16.xpose.msra.mxu0 %v6584_v21 }
 0x47a   : > { %4357 = vmatprep.subr.bf16.mxu1 %v6589_v22  ;;  %4744 = vmatprep.subr.bf16.mxu0 %v6592_v23 }
 0x481   : > { %4358 = vmatpush1.bf16.xpose.msra.mxu1 %v6587_v24  ;;  %4745 = vmatpush1.bf16.xpose.msra.mxu0 %v6590_v25 }
 0x482   : > { %4359 = vmatprep.subr.bf16.mxu1 %v6595_v26  ;;  %4746 = vmatprep.subr.bf16.mxu0 %v6598_v27 }
 0x489   : > { %4360 = vmatpush1.bf16.xpose.msra.mxu1 %v6593_v28  ;;  %4747 = vmatpush1.bf16.xpose.msra.mxu0 %v6596_v29 }
 0x48a   : > { %4361 = vmatprep.subr.bf16.mxu1 %v6601_v30  ;;  %4748 = vmatprep.subr.bf16.mxu0 %v6604_v31 }
 0x491   : > { %4362 = vmatpush1.bf16.xpose.msra.mxu1 %v6599_v32  ;;  %4749 = vmatpush1.bf16.xpose.msra.mxu0 %v6602_v33 }
 0x498   : > { %4364 = vmatmul.mubr.bf16.vlgmr.msra.gmra.mrb[0].mxu1 %v6605_v34  ;;  %4751 = vmatmul.mubr.bf16.vlgmr.msra.gmra.mrb[0].mxu0 %v6608_v35 }
 0x56b   : > { %v4365_v43 = vpop.f32.mrb[0].mxu1  ;;  %v4752_v44 = vpop.f32.mrb[0].mxu0 }
 0x56c   : > { %v5584_v46 = vadd.f32 %v4752_v44, %v4365_v43  ;;  %v4367_v48 = vpop.f32.mrb[1].mxu1  ;;  %v4754_v49 = vpop.f32.mrb[1].mxu0 }
 0x56d   : > { %v5585_v50 = vadd.f32 %v4754_v49, %v4367_v48  ;;  %v4369_v52 = vpop.f32.mrb[2].mxu1  ;;  %v4756_v53 = vpop.f32.mrb[2].mxu0 }
 0x56e   : > { %v4773_v54 = vmul.f32 %v5584_v46, %v4766_v42  ;;  %v5586_v55 = vadd.f32 %v4756_v53, %v4369_v52  ;;  %v4371_v56 = vpop.f32.mrb[3].mxu1  ;;  %v4758_v57 = vpop.f32.mrb[3].mxu0 }
 0x56f   : > { %v4774_v58 = vmul.f32 %v5585_v50, %v4770_v45  ;;  %v5587_v59 = vadd.f32 %v4758_v57, %v4371_v56 }
 0x570   : > { %v4789_v60 = vadd.f32 %v4782_v47, %v4773_v54  ;;  %v4775_v61 = vmul.f32 %v5586_v55, %v4766_v42 }
 0x571   : > { %v4790_v62 = vadd.f32 %v4786_v51, %v4774_v58  ;;  %v4776_v63 = vmul.f32 %v5587_v59, %v4770_v45 }
 0x572   : > { %vm4793_vm0 = vcmp.gt.f32.partialorder %v4789_v60, 0.0  ;;  %v4797_v0 = vmul.f32 0.2, %v4789_v60  ;;  %v4791_v1 = vadd.f32 %v4782_v47, %v4775_v61  ;;  %4815 = sbr.rel (!%p6708_p3) target bundleno = 1409 (0x581), region = 40 }
 0x573   : > { %vm4794_vm1 = vcmp.gt.f32.partialorder %v4790_v62, 0.0  ;;  %v4798_v2 = vmul.f32 0.2, %v4790_v62  ;;  %v4792_v3 = vadd.f32 %v4786_v51, %v4776_v63 }
 0x574   : > { %v4801_v4 = vsel %vm4793_vm0, %v4789_v60, %v4797_v0  ;;  %vm4795_vm2 = vcmp.gt.f32.partialorder %v4791_v1, 0.0  ;;  %v4799_v5 = vmul.f32 0.2, %v4791_v1 }
 0x575   : > { %4805 = vst [vmem:[%s278_s15] sm:$0xff] %v4801_v4  ;;  %v4802_v6 = vsel %vm4794_vm1, %v4790_v62, %v4798_v2  ;;  %vm4796_vm3 = vcmp.gt.f32.partialorder %v4792_v3, 0.0  ;;  %v4800_v7 = vmul.f32 0.2, %v4792_v3 }
 0x576   : > { %4806 = vst [vmem:[%s278_s15 + $0x8] sm:$0xff] %v4802_v6  ;;  %v4803_v8 = vsel %vm4795_vm2, %v4791_v1, %v4799_v5 }
 0x577   : > { %4807 = vst [vmem:[%s278_s15 + $0x10] sm:$0xff] %v4803_v8  ;;  %v4804_v9 = vsel %vm4796_vm3, %v4792_v3, %v4800_v7 }
 0x578   : > { %4808 = vst [vmem:[%s278_s15 + $0x18] sm:$0xff] %v4804_v9 }
 0x57c   : > { %v4834_v10 = vld [vmem:[%s278_s15] sm:$0xff] }
 0x57d   : > { %v4836_v11 = vld [vmem:[%s278_s15 + $0x8] sm:$0xff]  ;;  %4835 = vst [vmem:[%s4821_s28] sm:$0xff] %v4834_v10 }
 0x57e   : > { %v4838_v12 = vld [vmem:[%s278_s15 + $0x10] sm:$0xff]  ;;  %4837 = vst [vmem:[%s4821_s28 + $0x8] sm:$0xff] %v4836_v11 }
 0x57f   : > { %v4840_v13 = vld [vmem:[%s278_s15 + $0x18] sm:$0xff]  ;;  %4839 = vst [vmem:[%s4821_s28 + $0x20] sm:$0xff] %v4838_v12 }
 0x580   : > { %4841 = vst [vmem:[%s4821_s28 + $0x28] sm:$0xff] %v4840_v13 }
 0x581 PF: > { %s14_s19 = sadd.s32 1, %s6649_s19   ;;  %s7444_s15 = smov %s6637_s16 }
 0x582   : > { %p11_p10 = scmp.ge.s32.totalorder %s14_s19, 4   ;;  %s7445_s16 = smov %s6717_s25 }
 0x583   : > { %s7446_s17 = smov %s6645_s18  ;;  %s7447_s18 = smov %s7449_s21 }
 0x584   :  { %13 = sbr.rel (!%p11_p10) target bundleno = 3 (0x3), region = 98 }

// kernel: discriminator_forward.18
= control target key start
LH: loop header
LB: loop body
LE: loop exit
PB: predicated region body
PF: predicated region fallthrough
CT: control target
= control target key end

     0   :  { %s1987_s15 = smov 0   ;;  %s1989_s16 = smov 0   ;;  %s2226_s0 = inlined_call_operand.vmem [shape: bf16[16,512], index: 0, kind: input, shape index: {}]   ;;  %s2227_s1 = inlined_call_operand.vmem [shape: bf16[1024,512], index: 1, kind: input, shape index: {}]   ;;  %s2228_s2 = inlined_call_operand.vmem [shape: f32[1,1024], index: 2, kind: input, shape index: {}]   ;;  %s2229_s3 = inlined_call_operand.vmem [shape: f32[1,1024], index: 3, kind: input, shape index: {}]   ;;  %s2230_s4 = inlined_call_operand.vmem [shape: f32[16,1024], index: 4, kind: output, shape index: {}]  }
   0x1   :  { %s1991_s17 = smov 0   ;;  %s1993_s18 = smov 0  }
   0x2   :  { %s1995_s19 = smov 0  }
   0x3 LB: > { %s1525_s20 = sadd.s32 4294967295, %s1960_s19   ;;  %s29_s21 = sadd.s32 1, %s1956_s18  ;;  %s1960_s19 = sphi %s1995_s19, %s14_s19   ;;  %s1956_s18 = sphi %s1993_s18, %s2235_s18   ;;  %s1952_s17 = sphi %s1991_s17, %s2234_s17   ;;  %s1948_s16 = sphi %s1989_s16, %s2233_s16   ;;  %s1944_s15 = sphi %s1987_s15, %s2232_s15  }
   0x4   : > { %p31_p0 = scmp.ge.s32.totalorder %s29_s21, 2  ;;  %s150_s22 = sadd.s32 1, %s1948_s16 }
   0x5   : > { %p160_p1 = scmp.ne.s32.totalorder %s1948_s16, %s1944_s15  ;;  %p161_p2 = scmp.eq.s32.totalorder %s1525_s20, 1 }
   0x6   : > { %s2237_s21 = smov (%p31_p0, %s29_s21), 0  ;;  %p1530_p4 = scmp.ge.s32.totalorder %s1960_s19, 1 }
   0x7   : > { %p2019_p3 = por %p161_p2, %p160_p1  ;;  %s146_s24 = ssub.s32 %s1956_s18, %s2237_s21 }
   0x8   : > { %p231_p5 = scmp.lt.s32.totalorder %s1960_s19, 3  ;;  %p148_p6 = scmp.eq.s32.totalorder %s146_s24, 0 }
   0xa   : > { %p232_p7 = pnand %p1530_p4, %p231_p5 }
   0xb   : > { %s2028_s25 = scalar_select %p148_p6, %s1948_s16, %s150_s22  }
   0xc   : > { %235 = sbr.rel (%p232_p7) target bundleno = 513 (0x201), region = 36  ;;  %s1532_s26 = sshll.u32 (!%p232_p7), %s1952_s17, 6  ;;  %v1822_v0 = vld [vmem:[%s2226_s0 + $0x4] ss:$16 sps:$4 sm:$0xff] (!%p232_p7)  }
   0xd   : > { %p293_p8 = scmp.lt.s32.totalorder (!%p232_p7), %s1532_s26, 127  ;;  %1139 = vmatprep.mubr.bf16.mxu0 (!%p232_p7), %v1822_v0  ;;  %1225 = vmatprep.mubr.bf16.mxu1 (!%p232_p7), %v1822_v0  ;;  %s1535_s13 = sshll.u32 (!%p232_p7), %s1952_s17, 2 }
   0xe   : > { %p304_p9 = scmp.lt.s32.totalorder (!%p232_p7), %s1535_s13, 7  ;;  %s276_s28 = sand.u32 (!%p232_p7), 1, %s1944_s15  }
  0x13   : > { %s2239_s26 = smov (!%p293_p8, %s1532_s26), 127  ;;  %s2241_s13 = smov (!%p304_p9, %s1535_s13), 7 }
  0x14   : > { %s1674_s29 = sshll.u32 %s2239_s26, 4  ;;  %s306_s22 = scalar_lea.vmem %s2228_s2, %s2241_s13 }
  0x15   : > { %s2037_s6 = scalar_lea.vmem %s2227_s1, %s1674_s29  ;;  %s311_s27 = scalar_lea.vmem %s2229_s3, %s2241_s13 }
  0x16   : > { %v1724_v1 = vld [vmem:[%s2037_s6 + $0x4] ss:$16 sps:$4 sm:$0xff]   ;;  %v1728_v3 = vld [vmem:[%s2037_s6] ss:$16 sps:$4 sm:$0xff]   ;;  %s2184_s29 = sshll.u32 %s276_s28, 6  ;;  %s1675_s30 = sshll.u32 (%p2019_p3), %s1952_s17, 5 }
  0x17   : > { %v1726_v2 = vld [vmem:[%s2037_s6 + $0x204] ss:$16 sps:$4 sm:$0xff]   ;;  %1107 = vmatprep.subr.bf16.mxu0 %v1724_v1  ;;  %v1729_v4 = vld [vmem:[%s2037_s6 + $0x200] ss:$16 sps:$4 sm:$0xff]   ;;  %v1825_v1 = vld [vmem:[%s2037_s6 + $0xc] ss:$16 sps:$4 sm:$0xff]   ;;  %s1383_s7 = scalar_lea.vmem (%p2019_p3), %s2230_s4, %s1675_s30 }
  0x18   : > { %1193 = vmatprep.subr.bf16.mxu1 %v1726_v2  ;;  %v1730_v5 = vld [vmem:[%s2037_s6 + $0x24] ss:$16 sps:$4 sm:$0xff]   ;;  %1108 = vmatpush1.bf16.xpose.msra.mxu0 %v1728_v3  ;;  %v1734_v7 = vld [vmem:[%s2037_s6 + $0x20] ss:$16 sps:$4 sm:$0xff]   ;;  %v1828_v2 = vld [vmem:[%s2037_s6 + $0x20c] ss:$16 sps:$4 sm:$0xff]  }
  0x19   : > { %1194 = vmatpush1.bf16.xpose.msra.mxu1 %v1729_v4  ;;  %v1732_v6 = vld [vmem:[%s2037_s6 + $0x224] ss:$16 sps:$4 sm:$0xff]   ;;  %1109 = vmatprep.subr.bf16.mxu0 %v1730_v5  ;;  %v1735_v8 = vld [vmem:[%s2037_s6 + $0x220] ss:$16 sps:$4 sm:$0xff]   ;;  %v1823_v4 = vld [vmem:[%s2037_s6 + $0x8] ss:$16 sps:$4 sm:$0xff]  }
  0x1a   : > { %1195 = vmatprep.subr.bf16.mxu1 %v1732_v6  ;;  %v1736_v9 = vld [vmem:[%s2037_s6 + $0x44] ss:$16 sps:$4 sm:$0xff]   ;;  %v1740_v11 = vld [vmem:[%s2037_s6 + $0x40] ss:$16 sps:$4 sm:$0xff]   ;;  %v1826_v5 = vld [vmem:[%s2037_s6 + $0x208] ss:$16 sps:$4 sm:$0xff]  }
  0x1b   : > { %v1738_v10 = vld [vmem:[%s2037_s6 + $0x244] ss:$16 sps:$4 sm:$0xff]   ;;  %v1741_v12 = vld [vmem:[%s2037_s6 + $0x240] ss:$16 sps:$4 sm:$0xff]   ;;  %v1831_v6 = vld [vmem:[%s2037_s6 + $0x2c] ss:$16 sps:$4 sm:$0xff]  }
  0x1c   : > { %v1742_v13 = vld [vmem:[%s2037_s6 + $0x64] ss:$16 sps:$4 sm:$0xff]   ;;  %v1746_v15 = vld [vmem:[%s2037_s6 + $0x60] ss:$16 sps:$4 sm:$0xff]   ;;  %s2187_s15 = scalar_lea.vmem [#allocation2], %s2184_s29 }
  0x1d   : > { %v1744_v14 = vld [vmem:[%s2037_s6 + $0x264] ss:$16 sps:$4 sm:$0xff]   ;;  %v1747_v16 = vld [vmem:[%s2037_s6 + $0x260] ss:$16 sps:$4 sm:$0xff]  }
  0x1e   : > { %v1748_v17 = vld [vmem:[%s2037_s6 + $0x84] ss:$16 sps:$4 sm:$0xff]   ;;  %v1752_v19 = vld [vmem:[%s2037_s6 + $0x80] ss:$16 sps:$4 sm:$0xff]  }
  0x1f   : > { %v1750_v18 = vld [vmem:[%s2037_s6 + $0x284] ss:$16 sps:$4 sm:$0xff]   ;;  %v1753_v20 = vld [vmem:[%s2037_s6 + $0x280] ss:$16 sps:$4 sm:$0xff]  }
  0x20   : > { %1110 = vmatpush1.bf16.xpose.msra.mxu0 %v1734_v7  ;;  %v1754_v21 = vld [vmem:[%s2037_s6 + $0xa4] ss:$16 sps:$4 sm:$0xff]   ;;  %v1758_v23 = vld [vmem:[%s2037_s6 + $0xa0] ss:$16 sps:$4 sm:$0xff]   ;;  %v1834_v7 = vld [vmem:[%s2037_s6 + $0x22c] ss:$16 sps:$4 sm:$0xff]  }
  0x21   : > { %1196 = vmatpush1.bf16.xpose.msra.mxu1 %v1735_v8  ;;  %1111 = vmatprep.subr.bf16.mxu0 %v1736_v9  ;;  %v1756_v22 = vld [vmem:[%s2037_s6 + $0x2a4] ss:$16 sps:$4 sm:$0xff]   ;;  %v1759_v24 = vld [vmem:[%s2037_s6 + $0x2a0] ss:$16 sps:$4 sm:$0xff]   ;;  %v1921_v8 = vld [vmem:[%s2226_s0 + $0xc] ss:$16 sps:$4 sm:$0xff]  }
  0x22   : > { %1197 = vmatprep.subr.bf16.mxu1 %v1738_v10  ;;  %v1760_v25 = vld [vmem:[%s2037_s6 + $0xc4] ss:$16 sps:$4 sm:$0xff]   ;;  %v1764_v27 = vld [vmem:[%s2037_s6 + $0xc0] ss:$16 sps:$4 sm:$0xff]   ;;  %v1829_v9 = vld [vmem:[%s2037_s6 + $0x28] ss:$16 sps:$4 sm:$0xff]  }
  0x23   : > { %v1762_v26 = vld [vmem:[%s2037_s6 + $0x2c4] ss:$16 sps:$4 sm:$0xff]   ;;  %v1765_v28 = vld [vmem:[%s2037_s6 + $0x2c0] ss:$16 sps:$4 sm:$0xff]   ;;  %v1832_v10 = vld [vmem:[%s2037_s6 + $0x228] ss:$16 sps:$4 sm:$0xff]  }
  0x24   : > { %v1766_v29 = vld [vmem:[%s2037_s6 + $0xe4] ss:$16 sps:$4 sm:$0xff]   ;;  %v1770_v31 = vld [vmem:[%s2037_s6 + $0xe0] ss:$16 sps:$4 sm:$0xff]  }
  0x25   : > { %v1768_v30 = vld [vmem:[%s2037_s6 + $0x2e4] ss:$16 sps:$4 sm:$0xff]   ;;  %v1771_v32 = vld [vmem:[%s2037_s6 + $0x2e0] ss:$16 sps:$4 sm:$0xff]  }
  0x26   : > { %v1772_v33 = vld [vmem:[%s2037_s6 + $0x104] ss:$16 sps:$4 sm:$0xff]   ;;  %v1776_v35 = vld [vmem:[%s2037_s6 + $0x100] ss:$16 sps:$4 sm:$0xff]  }
  0x27   : > { %v1774_v34 = vld [vmem:[%s2037_s6 + $0x304] ss:$16 sps:$4 sm:$0xff]   ;;  %v1777_v36 = vld [vmem:[%s2037_s6 + $0x300] ss:$16 sps:$4 sm:$0xff]  }
  0x28   : > { %1112 = vmatpush1.bf16.xpose.msra.mxu0 %v1740_v11  ;;  %v1778_v37 = vld [vmem:[%s2037_s6 + $0x124] ss:$16 sps:$4 sm:$0xff]   ;;  %v1782_v39 = vld [vmem:[%s2037_s6 + $0x120] ss:$16 sps:$4 sm:$0xff]   ;;  %v1837_v11 = vld [vmem:[%s2037_s6 + $0x4c] ss:$16 sps:$4 sm:$0xff]  }
  0x29   : > { %1198 = vmatpush1.bf16.xpose.msra.mxu1 %v1741_v12  ;;  %1113 = vmatprep.subr.bf16.mxu0 %v1742_v13  ;;  %v1780_v38 = vld [vmem:[%s2037_s6 + $0x324] ss:$16 sps:$4 sm:$0xff]   ;;  %v1783_v40 = vld [vmem:[%s2037_s6 + $0x320] ss:$16 sps:$4 sm:$0xff]   ;;  %v1840_v12 = vld [vmem:[%s2037_s6 + $0x24c] ss:$16 sps:$4 sm:$0xff]  }
  0x2a   : > { %1199 = vmatprep.subr.bf16.mxu1 %v1744_v14  ;;  %v1784_v41 = vld [vmem:[%s2037_s6 + $0x144] ss:$16 sps:$4 sm:$0xff]   ;;  %v1788_v43 = vld [vmem:[%s2037_s6 + $0x140] ss:$16 sps:$4 sm:$0xff]   ;;  %v1835_v13 = vld [vmem:[%s2037_s6 + $0x48] ss:$16 sps:$4 sm:$0xff]  }
  0x2b   : > { %v1786_v42 = vld [vmem:[%s2037_s6 + $0x344] ss:$16 sps:$4 sm:$0xff]   ;;  %v1789_v44 = vld [vmem:[%s2037_s6 + $0x340] ss:$16 sps:$4 sm:$0xff]   ;;  %v1838_v14 = vld [vmem:[%s2037_s6 + $0x248] ss:$16 sps:$4 sm:$0xff]  }
  0x2c   : > { %v1790_v45 = vld [vmem:[%s2037_s6 + $0x164] ss:$16 sps:$4 sm:$0xff]   ;;  %v1794_v47 = vld [vmem:[%s2037_s6 + $0x160] ss:$16 sps:$4 sm:$0xff]  }
  0x2d   : > { %v1792_v46 = vld [vmem:[%s2037_s6 + $0x364] ss:$16 sps:$4 sm:$0xff]   ;;  %v1795_v48 = vld [vmem:[%s2037_s6 + $0x360] ss:$16 sps:$4 sm:$0xff]  }
  0x2e   : > { %v1796_v49 = vld [vmem:[%s2037_s6 + $0x184] ss:$16 sps:$4 sm:$0xff]   ;;  %v1800_v51 = vld [vmem:[%s2037_s6 + $0x180] ss:$16 sps:$4 sm:$0xff]  }
  0x2f   : > { %v1798_v50 = vld [vmem:[%s2037_s6 + $0x384] ss:$16 sps:$4 sm:$0xff]   ;;  %v1801_v52 = vld [vmem:[%s2037_s6 + $0x380] ss:$16 sps:$4 sm:$0xff]  }
  0x30   : > { %1114 = vmatpush1.bf16.xpose.msra.mxu0 %v1746_v15  ;;  %v1802_v53 = vld [vmem:[%s2037_s6 + $0x1a4] ss:$16 sps:$4 sm:$0xff]   ;;  %v1806_v55 = vld [vmem:[%s2037_s6 + $0x1a0] ss:$16 sps:$4 sm:$0xff]   ;;  %v1843_v15 = vld [vmem:[%s2037_s6 + $0x6c] ss:$16 sps:$4 sm:$0xff]  }
  0x31   : > { %1200 = vmatpush1.bf16.xpose.msra.mxu1 %v1747_v16  ;;  %1115 = vmatprep.subr.bf16.mxu0 %v1748_v17  ;;  %v1804_v54 = vld [vmem:[%s2037_s6 + $0x3a4] ss:$16 sps:$4 sm:$0xff]   ;;  %v1807_v56 = vld [vmem:[%s2037_s6 + $0x3a0] ss:$16 sps:$4 sm:$0xff]   ;;  %v1846_v16 = vld [vmem:[%s2037_s6 + $0x26c] ss:$16 sps:$4 sm:$0xff]  }
  0x32   : > { %1201 = vmatprep.subr.bf16.mxu1 %v1750_v18  ;;  %v1808_v57 = vld [vmem:[%s2037_s6 + $0x1c4] ss:$16 sps:$4 sm:$0xff]   ;;  %v1812_v59 = vld [vmem:[%s2037_s6 + $0x1c0] ss:$16 sps:$4 sm:$0xff]   ;;  %v1841_v17 = vld [vmem:[%s2037_s6 + $0x68] ss:$16 sps:$4 sm:$0xff]  }
  0x33   : > { %v1810_v58 = vld [vmem:[%s2037_s6 + $0x3c4] ss:$16 sps:$4 sm:$0xff]   ;;  %v1813_v60 = vld [vmem:[%s2037_s6 + $0x3c0] ss:$16 sps:$4 sm:$0xff]   ;;  %v1844_v18 = vld [vmem:[%s2037_s6 + $0x268] ss:$16 sps:$4 sm:$0xff]  }
  0x34   : > { %v1814_v61 = vld [vmem:[%s2037_s6 + $0x1e4] ss:$16 sps:$4 sm:$0xff]   ;;  %v1818_v63 = vld [vmem:[%s2037_s6 + $0x1e0] ss:$16 sps:$4 sm:$0xff]  }
  0x35   : > { %v1816_v62 = vld [vmem:[%s2037_s6 + $0x3e4] ss:$16 sps:$4 sm:$0xff]   ;;  %v1819_v0 = vld [vmem:[%s2037_s6 + $0x3e0] ss:$16 sps:$4 sm:$0xff]  }
  0x36   : > { %v1820_v3 = vld [vmem:[%s2226_s0] ss:$16 sps:$4 sm:$0xff]  }
  0x38   : > { %1116 = vmatpush1.bf16.xpose.msra.mxu0 %v1752_v19  ;;  %v1849_v19 = vld [vmem:[%s2037_s6 + $0x8c] ss:$16 sps:$4 sm:$0xff]  }
  0x39   : > { %1202 = vmatpush1.bf16.xpose.msra.mxu1 %v1753_v20  ;;  %1117 = vmatprep.subr.bf16.mxu0 %v1754_v21  ;;  %v1852_v20 = vld [vmem:[%s2037_s6 + $0x28c] ss:$16 sps:$4 sm:$0xff]   ;;  %v1847_v21 = vld [vmem:[%s2037_s6 + $0x88] ss:$16 sps:$4 sm:$0xff]  }
  0x3a   : > { %1203 = vmatprep.subr.bf16.mxu1 %v1756_v22  ;;  %v1850_v22 = vld [vmem:[%s2037_s6 + $0x288] ss:$16 sps:$4 sm:$0xff]  }
  0x40   : > { %1118 = vmatpush1.bf16.xpose.msra.mxu0 %v1758_v23  ;;  %v1855_v23 = vld [vmem:[%s2037_s6 + $0xac] ss:$16 sps:$4 sm:$0xff]  }
  0x41   : > { %1204 = vmatpush1.bf16.xpose.msra.mxu1 %v1759_v24  ;;  %1119 = vmatprep.subr.bf16.mxu0 %v1760_v25  ;;  %v1858_v24 = vld [vmem:[%s2037_s6 + $0x2ac] ss:$16 sps:$4 sm:$0xff]   ;;  %v1853_v25 = vld [vmem:[%s2037_s6 + $0xa8] ss:$16 sps:$4 sm:$0xff]  }
  0x42   : > { %1205 = vmatprep.subr.bf16.mxu1 %v1762_v26  ;;  %v1856_v26 = vld [vmem:[%s2037_s6 + $0x2a8] ss:$16 sps:$4 sm:$0xff]  }
  0x48   : > { %1120 = vmatpush1.bf16.xpose.msra.mxu0 %v1764_v27  ;;  %v1861_v27 = vld [vmem:[%s2037_s6 + $0xcc] ss:$16 sps:$4 sm:$0xff]  }
  0x49   : > { %1206 = vmatpush1.bf16.xpose.msra.mxu1 %v1765_v28  ;;  %1121 = vmatprep.subr.bf16.mxu0 %v1766_v29  ;;  %v1864_v28 = vld [vmem:[%s2037_s6 + $0x2cc] ss:$16 sps:$4 sm:$0xff]   ;;  %v1859_v29 = vld [vmem:[%s2037_s6 + $0xc8] ss:$16 sps:$4 sm:$0xff]  }
  0x4a   : > { %1207 = vmatprep.subr.bf16.mxu1 %v1768_v30  ;;  %v1862_v30 = vld [vmem:[%s2037_s6 + $0x2c8] ss:$16 sps:$4 sm:$0xff]  }
  0x50   : > { %1122 = vmatpush1.bf16.xpose.msra.mxu0 %v1770_v31  ;;  %v1867_v31 = vld [vmem:[%s2037_s6 + $0xec] ss:$16 sps:$4 sm:$0xff]  }
  0x51   : > { %1208 = vmatpush1.bf16.xpose.msra.mxu1 %v1771_v32  ;;  %1123 = vmatprep.subr.bf16.mxu0 %v1772_v33  ;;  %v1870_v32 = vld [vmem:[%s2037_s6 + $0x2ec] ss:$16 sps:$4 sm:$0xff]   ;;  %v1865_v33 = vld [vmem:[%s2037_s6 + $0xe8] ss:$16 sps:$4 sm:$0xff]  }
  0x52   : > { %1209 = vmatprep.subr.bf16.mxu1 %v1774_v34  ;;  %v1868_v34 = vld [vmem:[%s2037_s6 + $0x2e8] ss:$16 sps:$4 sm:$0xff]  }
  0x58   : > { %1124 = vmatpush1.bf16.xpose.msra.mxu0 %v1776_v35  ;;  %v1873_v35 = vld [vmem:[%s2037_s6 + $0x10c] ss:$16 sps:$4 sm:$0xff]  }
  0x59   : > { %1210 = vmatpush1.bf16.xpose.msra.mxu1 %v1777_v36  ;;  %1125 = vmatprep.subr.bf16.mxu0 %v1778_v37  ;;  %v1876_v36 = vld [vmem:[%s2037_s6 + $0x30c] ss:$16 sps:$4 sm:$0xff]   ;;  %v1871_v37 = vld [vmem:[%s2037_s6 + $0x108] ss:$16 sps:$4 sm:$0xff]  }
  0x5a   : > { %1211 = vmatprep.subr.bf16.mxu1 %v1780_v38  ;;  %v1874_v38 = vld [vmem:[%s2037_s6 + $0x308] ss:$16 sps:$4 sm:$0xff]  }
  0x60   : > { %1126 = vmatpush1.bf16.xpose.msra.mxu0 %v1782_v39  ;;  %v1879_v39 = vld [vmem:[%s2037_s6 + $0x12c] ss:$16 sps:$4 sm:$0xff]  }
  0x61   : > { %1212 = vmatpush1.bf16.xpose.msra.mxu1 %v1783_v40  ;;  %1127 = vmatprep.subr.bf16.mxu0 %v1784_v41  ;;  %v1882_v40 = vld [vmem:[%s2037_s6 + $0x32c] ss:$16 sps:$4 sm:$0xff]   ;;  %v1877_v41 = vld [vmem:[%s2037_s6 + $0x128] ss:$16 sps:$4 sm:$0xff]  }
  0x62   : > { %1213 = vmatprep.subr.bf16.mxu1 %v1786_v42  ;;  %v1880_v42 = vld [vmem:[%s2037_s6 + $0x328] ss:$16 sps:$4 sm:$0xff]  }
  0x68   : > { %1128 = vmatpush1.bf16.xpose.msra.mxu0 %v1788_v43  ;;  %v1885_v43 = vld [vmem:[%s2037_s6 + $0x14c] ss:$16 sps:$4 sm:$0xff]  }
  0x69   : > { %1214 = vmatpush1.bf16.xpose.msra.mxu1 %v1789_v44  ;;  %1129 = vmatprep.subr.bf16.mxu0 %v1790_v45  ;;  %v1888_v44 = vld [vmem:[%s2037_s6 + $0x34c] ss:$16 sps:$4 sm:$0xff]   ;;  %v1883_v45 = vld [vmem:[%s2037_s6 + $0x148] ss:$16 sps:$4 sm:$0xff]  }
  0x6a   : > { %1215 = vmatprep.subr.bf16.mxu1 %v1792_v46  ;;  %v1886_v46 = vld [vmem:[%s2037_s6 + $0x348] ss:$16 sps:$4 sm:$0xff]  }
  0x70   : > { %1130 = vmatpush1.bf16.xpose.msra.mxu0 %v1794_v47  ;;  %v1891_v47 = vld [vmem:[%s2037_s6 + $0x16c] ss:$16 sps:$4 sm:$0xff]  }
  0x71   : > { %1216 = vmatpush1.bf16.xpose.msra.mxu1 %v1795_v48  ;;  %1131 = vmatprep.subr.bf16.mxu0 %v1796_v49  ;;  %v1894_v48 = vld [vmem:[%s2037_s6 + $0x36c] ss:$16 sps:$4 sm:$0xff]   ;;  %v1889_v49 = vld [vmem:[%s2037_s6 + $0x168] ss:$16 sps:$4 sm:$0xff]  }
  0x72   : > { %1217 = vmatprep.subr.bf16.mxu1 %v1798_v50  ;;  %v1892_v50 = vld [vmem:[%s2037_s6 + $0x368] ss:$16 sps:$4 sm:$0xff]  }
  0x78   : > { %1132 = vmatpush1.bf16.xpose.msra.mxu0 %v1800_v51  ;;  %v1897_v51 = vld [vmem:[%s2037_s6 + $0x18c] ss:$16 sps:$4 sm:$0xff]  }
  0x79   : > { %1218 = vmatpush1.bf16.xpose.msra.mxu1 %v1801_v52  ;;  %1133 = vmatprep.subr.bf16.mxu0 %v1802_v53  ;;  %v1900_v52 = vld [vmem:[%s2037_s6 + $0x38c] ss:$16 sps:$4 sm:$0xff]   ;;  %v1895_v53 = vld [vmem:[%s2037_s6 + $0x188] ss:$16 sps:$4 sm:$0xff]  }
  0x7a   : > { %1219 = vmatprep.subr.bf16.mxu1 %v1804_v54  ;;  %v1898_v54 = vld [vmem:[%s2037_s6 + $0x388] ss:$16 sps:$4 sm:$0xff]  }
  0x80   : > { %1134 = vmatpush1.bf16.xpose.msra.mxu0 %v1806_v55  ;;  %v1903_v55 = vld [vmem:[%s2037_s6 + $0x1ac] ss:$16 sps:$4 sm:$0xff]  }
  0x81   : > { %1220 = vmatpush1.bf16.xpose.msra.mxu1 %v1807_v56  ;;  %1135 = vmatprep.subr.bf16.mxu0 %v1808_v57  ;;  %v1906_v56 = vld [vmem:[%s2037_s6 + $0x3ac] ss:$16 sps:$4 sm:$0xff]   ;;  %v1901_v57 = vld [vmem:[%s2037_s6 + $0x1a8] ss:$16 sps:$4 sm:$0xff]  }
  0x82   : > { %1221 = vmatprep.subr.bf16.mxu1 %v1810_v58  ;;  %v1904_v58 = vld [vmem:[%s2037_s6 + $0x3a8] ss:$16 sps:$4 sm:$0xff]  }
  0x88   : > { %1136 = vmatpush1.bf16.xpose.msra.mxu0 %v1812_v59  ;;  %v1909_v59 = vld [vmem:[%s2037_s6 + $0x1cc] ss:$16 sps:$4 sm:$0xff]  }
  0x89   : > { %1222 = vmatpush1.bf16.xpose.msra.mxu1 %v1813_v60  ;;  %1137 = vmatprep.subr.bf16.mxu0 %v1814_v61  ;;  %v1912_v60 = vld [vmem:[%s2037_s6 + $0x3cc] ss:$16 sps:$4 sm:$0xff]   ;;  %v1907_v61 = vld [vmem:[%s2037_s6 + $0x1c8] ss:$16 sps:$4 sm:$0xff]  }
  0x8a   : > { %1223 = vmatprep.subr.bf16.mxu1 %v1816_v62  ;;  %v1910_v62 = vld [vmem:[%s2037_s6 + $0x3c8] ss:$16 sps:$4 sm:$0xff]  }
  0x90   : > { %1138 = vmatpush1.bf16.xpose.msra.mxu0 %v1818_v63  ;;  %v1915_v63 = vld [vmem:[%s2037_s6 + $0x1ec] ss:$16 sps:$4 sm:$0xff]  }
  0x91   : > { %1224 = vmatpush1.bf16.xpose.msra.mxu1 %v1819_v0  ;;  %1150 = vmatprep.subr.bf16.mxu0 %v1825_v1  ;;  %v1918_v0 = vld [vmem:[%s2037_s6 + $0x3ec] ss:$16 sps:$4 sm:$0xff]   ;;  %v1913_v1 = vld [vmem:[%s2037_s6 + $0x1e8] ss:$16 sps:$4 sm:$0xff]  }
  0x92   : > { %1236 = vmatprep.subr.bf16.mxu1 %v1828_v2  ;;  %v1916_v2 = vld [vmem:[%s2037_s6 + $0x3e8] ss:$16 sps:$4 sm:$0xff]  }
  0x97   : > { %1140 = vmatmul.mubr.bf16.vlgmr.msra.gmra.mrb[0].mxu0 %v1820_v3 }
  0x98   : > { %1226 = vmatmul.mubr.bf16.vlgmr.msra.gmra.mrb[0].mxu1 %v1820_v3  ;;  %1151 = vmatpush1.bf16.xpose.msra.mxu0 %v1823_v4  ;;  %v1919_v3 = vld [vmem:[%s2226_s0 + $0x8] ss:$16 sps:$4 sm:$0xff]   ;;  %v1281_v4 = vlaneseq }
  0x99   : > { %1237 = vmatpush1.bf16.xpose.msra.mxu1 %v1826_v5  ;;  %1152 = vmatprep.subr.bf16.mxu0 %v1831_v6 }
  0x9a   : > { %1238 = vmatprep.subr.bf16.mxu1 %v1834_v7  ;;  %1182 = vmatprep.mubr.bf16.mxu0 %v1921_v8  ;;  %v1282_v5 = vshrl.u32 %v1281_v4, 7 }
  0x9b   : > { %1268 = vmatprep.mubr.bf16.mxu1 %v1921_v8  ;;  %v1279_v8 = vld [vmem:[%s306_s22] sm:$0xf] }
  0x9c   : > { %v1283_v6 = vsub.s32 0, %v1282_v5  ;;  %v1291_v7 = vsub.s32 2, %v1282_v5 }
  0xa0   : > { %1153 = vmatpush1.bf16.xpose.msra.mxu0 %v1829_v9  ;;  %v1287_v9 = vsub.s32 1, %v1282_v5 }
  0xa1   : > { %1239 = vmatpush1.bf16.xpose.msra.mxu1 %v1832_v10  ;;  %1154 = vmatprep.subr.bf16.mxu0 %v1837_v11  ;;  %v1295_v10 = vsub.s32 3, %v1282_v5  ;;  %v1309_v11 = vld [vmem:[%s311_s27] sm:$0xf] }
  0xa2   : > { %1240 = vmatprep.subr.bf16.mxu1 %v1840_v12  ;;  %v1284_v12 = vrot.slane %v1279_v8, %v1283_v6 }
  0xa8   : > { %1155 = vmatpush1.bf16.xpose.msra.mxu0 %v1835_v13  ;;  %v1292_v13 = vrot.slane %v1279_v8, %v1291_v7 }
  0xa9   : > { %1241 = vmatpush1.bf16.xpose.msra.mxu1 %v1838_v14  ;;  %1156 = vmatprep.subr.bf16.mxu0 %v1843_v15  ;;  %v1288_v14 = vrot.slane %v1279_v8, %v1287_v9  ;;  %v1296_v15 = vrot.slane %v1279_v8, %v1295_v10 }
  0xaa   : > { %1242 = vmatprep.subr.bf16.mxu1 %v1846_v16  ;;  %v1314_v16 = vrot.slane %v1309_v11, %v1283_v6 }
  0xb0   : > { %1157 = vmatpush1.bf16.xpose.msra.mxu0 %v1841_v17  ;;  %v1322_v17 = vrot.slane %v1309_v11, %v1291_v7 }
  0xb1   : > { %1243 = vmatpush1.bf16.xpose.msra.mxu1 %v1844_v18  ;;  %1158 = vmatprep.subr.bf16.mxu0 %v1849_v19 }
  0xb2   : > { %1244 = vmatprep.subr.bf16.mxu1 %v1852_v20  ;;  %v1318_v20 = vrot.slane %v1309_v11, %v1287_v9 }
  0xb8   : > { %1159 = vmatpush1.bf16.xpose.msra.mxu0 %v1847_v21  ;;  %v1326_v21 = vrot.slane %v1309_v11, %v1295_v10 }
  0xb9   : > { %1245 = vmatpush1.bf16.xpose.msra.mxu1 %v1850_v22  ;;  %1160 = vmatprep.subr.bf16.mxu0 %v1855_v23 }
  0xba   : > { %1246 = vmatprep.subr.bf16.mxu1 %v1858_v24 }
  0xc0   : > { %1161 = vmatpush1.bf16.xpose.msra.mxu0 %v1853_v25 }
  0xc1   : > { %1247 = vmatpush1.bf16.xpose.msra.mxu1 %v1856_v26  ;;  %1162 = vmatprep.subr.bf16.mxu0 %v1861_v27 }
  0xc2   : > { %1248 = vmatprep.subr.bf16.mxu1 %v1864_v28 }
  0xc8   : > { %1163 = vmatpush1.bf16.xpose.msra.mxu0 %v1859_v29 }
  0xc9   : > { %1249 = vmatpush1.bf16.xpose.msra.mxu1 %v1862_v30  ;;  %1164 = vmatprep.subr.bf16.mxu0 %v1867_v31 }
  0xca   : > { %1250 = vmatprep.subr.bf16.mxu1 %v1870_v32 }
  0xd0   : > { %1165 = vmatpush1.bf16.xpose.msra.mxu0 %v1865_v33 }
  0xd1   : > { %1251 = vmatpush1.bf16.xpose.msra.mxu1 %v1868_v34  ;;  %1166 = vmatprep.subr.bf16.mxu0 %v1873_v35 }
  0xd2   : > { %1252 = vmatprep.subr.bf16.mxu1 %v1876_v36 }
  0xd8   : > { %1167 = vmatpush1.bf16.xpose.msra.mxu0 %v1871_v37 }
  0xd9   : > { %1253 = vmatpush1.bf16.xpose.msra.mxu1 %v1874_v38  ;;  %1168 = vmatprep.subr.bf16.mxu0 %v1879_v39 }
  0xda   : > { %1254 = vmatprep.subr.bf16.mxu1 %v1882_v40 }
  0xe0   : > { %1169 = vmatpush1.bf16.xpose.msra.mxu0 %v1877_v41 }
  0xe1   : > { %1255 = vmatpush1.bf16.xpose.msra.mxu1 %v1880_v42  ;;  %1170 = vmatprep.subr.bf16.mxu0 %v1885_v43 }
  0xe2   : > { %1256 = vmatprep.subr.bf16.mxu1 %v1888_v44 }
  0xe8   : > { %1171 = vmatpush1.bf16.xpose.msra.mxu0 %v1883_v45 }
  0xe9   : > { %1257 = vmatpush1.bf16.xpose.msra.mxu1 %v1886_v46  ;;  %1172 = vmatprep.subr.bf16.mxu0 %v1891_v47 }
  0xea   : > { %1258 = vmatprep.subr.bf16.mxu1 %v1894_v48 }
  0xf0   : > { %1173 = vmatpush1.bf16.xpose.msra.mxu0 %v1889_v49 }
  0xf1   : > { %1259 = vmatpush1.bf16.xpose.msra.mxu1 %v1892_v50  ;;  %1174 = vmatprep.subr.bf16.mxu0 %v1897_v51 }
  0xf2   : > { %1260 = vmatprep.subr.bf16.mxu1 %v1900_v52 }
  0xf8   : > { %1175 = vmatpush1.bf16.xpose.msra.mxu0 %v1895_v53 }
  0xf9   : > { %1261 = vmatpush1.bf16.xpose.msra.mxu1 %v1898_v54  ;;  %1176 = vmatprep.subr.bf16.mxu0 %v1903_v55 }
  0xfa   : > { %1262 = vmatprep.subr.bf16.mxu1 %v1906_v56 }
 0x100   : > { %1177 = vmatpush1.bf16.xpose.msra.mxu0 %v1901_v57 }
 0x101   : > { %1263 = vmatpush1.bf16.xpose.msra.mxu1 %v1904_v58  ;;  %1178 = vmatprep.subr.bf16.mxu0 %v1909_v59 }
 0x102   : > { %1264 = vmatprep.subr.bf16.mxu1 %v1912_v60 }
 0x108   : > { %1179 = vmatpush1.bf16.xpose.msra.mxu0 %v1907_v61 }
 0x109   : > { %1265 = vmatpush1.bf16.xpose.msra.mxu1 %v1910_v62  ;;  %1180 = vmatprep.subr.bf16.mxu0 %v1915_v63 }
 0x10a   : > { %1266 = vmatprep.subr.bf16.mxu1 %v1918_v0 }
 0x110   : > { %1181 = vmatpush1.bf16.xpose.msra.mxu0 %v1913_v1 }
 0x111   : > { %1267 = vmatpush1.bf16.xpose.msra.mxu1 %v1916_v2 }
 0x117   : > { %1183 = vmatmul.mubr.bf16.vlgmr.msra.gmra.mrb[0].mxu0 %v1919_v3 }
 0x118   : > { %1269 = vmatmul.mubr.bf16.vlgmr.msra.gmra.mrb[0].mxu1 %v1919_v3 }
 0x1ea   : > { %v1184_v18 = vpop.f32.mrb[0].mxu0 }
 0x1eb   : > { %v1270_v19 = vpop.f32.mrb[0].mxu1  ;;  %v1301_v22 = vmul.f32 %v1284_v12, %v1184_v18  ;;  %v1186_v24 = vpop.f32.mrb[1].mxu0 }
 0x1ec   : > { %v1303_v23 = vmul.f32 %v1292_v13, %v1270_v19  ;;  %v1272_v25 = vpop.f32.mrb[1].mxu1  ;;  %v1302_v26 = vmul.f32 %v1288_v14, %v1186_v24  ;;  %v1188_v28 = vpop.f32.mrb[2].mxu0 }
 0x1ed   : > { %v1304_v27 = vmul.f32 %v1296_v15, %v1272_v25  ;;  %v1274_v29 = vpop.f32.mrb[2].mxu1  ;;  %v1331_v30 = vadd.f32 %v1314_v16, %v1301_v22  ;;  %v1305_v32 = vmul.f32 %v1284_v12, %v1188_v28  ;;  %v1190_v34 = vpop.f32.mrb[3].mxu0 }
 0x1ee   : > { %v1333_v31 = vadd.f32 %v1322_v17, %v1303_v23  ;;  %v1307_v33 = vmul.f32 %v1292_v13, %v1274_v29  ;;  %v1276_v35 = vpop.f32.mrb[3].mxu1  ;;  %v1332_v36 = vadd.f32 %v1318_v20, %v1302_v26  ;;  %v1306_v38 = vmul.f32 %v1288_v14, %v1190_v34 }
 0x1ef   : > { %v1334_v37 = vadd.f32 %v1326_v21, %v1304_v27  ;;  %v1308_v39 = vmul.f32 %v1296_v15, %v1276_v35  ;;  %vm1339_vm0 = vcmp.gt.f32.partialorder %v1331_v30, 0.0  ;;  %v1347_v40 = vmul.f32 0.2, %v1331_v30 }
 0x1f0   : > { %vm1341_vm1 = vcmp.gt.f32.partialorder %v1333_v31, 0.0  ;;  %v1349_v41 = vmul.f32 0.2, %v1333_v31  ;;  %vm1340_vm2 = vcmp.gt.f32.partialorder %v1332_v36, 0.0  ;;  %v1348_v42 = vmul.f32 0.2, %v1332_v36 }
 0x1f1   : > { %vm1342_vm3 = vcmp.gt.f32.partialorder %v1334_v37, 0.0  ;;  %v1350_v43 = vmul.f32 0.2, %v1334_v37  ;;  %v1355_v44 = vsel %vm1339_vm0, %v1331_v30, %v1347_v40  ;;  %v1335_v46 = vadd.f32 %v1314_v16, %v1305_v32 }
 0x1f2   : > { %v1357_v45 = vsel %vm1341_vm1, %v1333_v31, %v1349_v41  ;;  %v1337_v47 = vadd.f32 %v1322_v17, %v1307_v33  ;;  %1363 = vst [vmem:[%s2187_s15] sm:$0xff] %v1355_v44  ;;  %v1356_v48 = vsel %vm1340_vm2, %v1332_v36, %v1348_v42  ;;  %v1336_v50 = vadd.f32 %v1318_v20, %v1306_v38  ;;  %1377 = sbr.rel (!%p2019_p3) target bundleno = 513 (0x201), region = 40 }
 0x1f3   : > { %1365 = vst [vmem:[%s2187_s15 + $0x10] sm:$0xff] %v1357_v45  ;;  %v1358_v49 = vsel %vm1342_vm3, %v1334_v37, %v1350_v43  ;;  %v1338_v51 = vadd.f32 %v1326_v21, %v1308_v39  ;;  %1364 = vst [vmem:[%s2187_s15 + $0x8] sm:$0xff] %v1356_v48  ;;  %vm1343_vm4 = vcmp.gt.f32.partialorder %v1335_v46, 0.0  ;;  %v1351_v52 = vmul.f32 0.2, %v1335_v46 }
 0x1f4   : > { %1366 = vst [vmem:[%s2187_s15 + $0x18] sm:$0xff] %v1358_v49  ;;  %vm1345_vm5 = vcmp.gt.f32.partialorder %v1337_v47, 0.0  ;;  %v1353_v53 = vmul.f32 0.2, %v1337_v47  ;;  %vm1344_vm6 = vcmp.gt.f32.partialorder %v1336_v50, 0.0 }
 0x1f5   : > { %v1352_v54 = vmul.f32 0.2, %v1336_v50  ;;  %vm1346_vm7 = vcmp.gt.f32.partialorder %v1338_v51, 0.0  ;;  %v1354_v55 = vmul.f32 0.2, %v1338_v51  ;;  %v1359_v56 = vsel %vm1343_vm4, %v1335_v46, %v1351_v52 }
 0x1f6   : > { %v1361_v57 = vsel %vm1345_vm5, %v1337_v47, %v1353_v53  ;;  %1367 = vst [vmem:[%s2187_s15 + $0x20] sm:$0xff] %v1359_v56 }
 0x1f7   : > { %1369 = vst [vmem:[%s2187_s15 + $0x30] sm:$0xff] %v1361_v57  ;;  %v1360_v58 = vsel %vm1344_vm6, %v1336_v50, %v1352_v54  ;;  %v1362_v59 = vsel %vm1346_vm7, %v1338_v51, %v1354_v55 }
 0x1f8   : > { %1368 = vst [vmem:[%s2187_s15 + $0x28] sm:$0xff] %v1360_v58  ;;  %1370 = vst [vmem:[%s2187_s15 + $0x38] sm:$0xff] %v1362_v59 }
 0x1f9   : > { %v1396_v60 = vld [vmem:[%s2187_s15] sm:$0xff] }
 0x1fa   : > { %v1398_v61 = vld [vmem:[%s2187_s15 + $0x8] sm:$0xff]  ;;  %v1400_v62 = vld [vmem:[%s2187_s15 + $0x10] sm:$0xff]  ;;  %1397 = vst [vmem:[%s1383_s7] sm:$0xff] %v1396_v60 }
 0x1fb   : > { %v1402_v63 = vld [vmem:[%s2187_s15 + $0x18] sm:$0xff]  ;;  %1399 = vst [vmem:[%s1383_s7 + $0x8] sm:$0xff] %v1398_v61  ;;  %1401 = vst [vmem:[%s1383_s7 + $0x10] sm:$0xff] %v1400_v62 }
 0x1fc   : > { %1403 = vst [vmem:[%s1383_s7 + $0x18] sm:$0xff] %v1402_v63 }
 0x1fd   : > { %v1404_v0 = vld [vmem:[%s2187_s15 + $0x20] sm:$0xff] }
 0x1fe   : > { %1405 = vst [vmem:[%s1383_s7 + $0x40] sm:$0xff] %v1404_v0  ;;  %v1408_v2 = vld [vmem:[%s2187_s15 + $0x30] sm:$0xff] }
 0x1ff   : > { %v1406_v1 = vld [vmem:[%s2187_s15 + $0x28] sm:$0xff]  ;;  %v1410_v3 = vld [vmem:[%s2187_s15 + $0x38] sm:$0xff]  ;;  %1409 = vst [vmem:[%s1383_s7 + $0x50] sm:$0xff] %v1408_v2 }
 0x200   : > { %1407 = vst [vmem:[%s1383_s7 + $0x48] sm:$0xff] %v1406_v1  ;;  %1411 = vst [vmem:[%s1383_s7 + $0x58] sm:$0xff] %v1410_v3 }
 0x201 PF: > { %s14_s19 = sadd.s32 1, %s1960_s19   ;;  %s2232_s15 = smov %s1948_s16 }
 0x202   : > { %p11_p10 = scmp.ge.s32.totalorder %s14_s19, 4   ;;  %s2233_s16 = smov %s2028_s25 }
 0x203   : > { %s2234_s17 = smov %s1956_s18  ;;  %s2235_s18 = smov %s2237_s21 }
 0x204   :  { %13 = sbr.rel (!%p11_p10) target bundleno = 3 (0x3), region = 98 }

// kernel: discriminator_forward.19
= control target key start
LH: loop header
LB: loop body
LE: loop exit
PB: predicated region body
PF: predicated region fallthrough
CT: control target
= control target key end

     0   :  { %s1007_s1 = inlined_call_operand.vmem [shape: bf16[128,1024], index: 1, kind: input, shape index: {}]   ;;  %s1008_s0 = inlined_call_operand.vmem [shape: bf16[16,1024], index: 0, kind: input, shape index: {}]   ;;  %s1009_s2 = inlined_call_operand.vmem [shape: f32[1,128], index: 2, kind: input, shape index: {}]   ;;  %s1010_s3 = inlined_call_operand.vmem [shape: f32[1,128], index: 3, kind: input, shape index: {}]   ;;  %s1011_s4 = inlined_call_operand.vmem [shape: f32[16,128], index: 4, kind: output, shape index: {}]  }
   0x1   :  { %v26_v0 = vld [vmem:[%s1007_s1] sm:$0xff]  ;;  %v28_v2 = vld [vmem:[%s1007_s1 + $0x10] sm:$0xff] }
   0x2   :  { %v30_v1 = vld [vmem:[%s1007_s1 + $0x20] sm:$0xff]  ;;  %v32_v4 = vld [vmem:[%s1007_s1 + $0x30] sm:$0xff] }
   0x3   :  { %v647_v3 = vcombine.high %v26_v0, %v30_v1  ;;  %v646_v5 = vcombine.low %v26_v0, %v30_v1  ;;  %v34_v6 = vld [vmem:[%s1007_s1 + $0x40] sm:$0xff]  ;;  %v651_v8 = vcombine.high %v28_v2, %v32_v4  ;;  %v650_v9 = vcombine.low %v28_v2, %v32_v4  ;;  %v36_v11 = vld [vmem:[%s1007_s1 + $0x50] sm:$0xff]  ;;  %v27_v4 = vld [vmem:[%s1007_s1 + $0x8] sm:$0xff] }
   0x4   :  { %v38_v7 = vld [vmem:[%s1007_s1 + $0x60] sm:$0xff]  ;;  %v40_v12 = vld [vmem:[%s1007_s1 + $0x70] sm:$0xff] }
   0x5   :  { %v655_v10 = vcombine.high %v34_v6, %v38_v7  ;;  %450 = vmatprep.subr.bf16.mxu1 %v647_v3  ;;  %v659_v13 = vcombine.high %v36_v11, %v40_v12  ;;  %532 = vmatprep.subr.bf16.mxu0 %v651_v8  ;;  %v42_v14 = vld [vmem:[%s1007_s1 + $0x80] sm:$0xff]  ;;  %v44_v16 = vld [vmem:[%s1007_s1 + $0x90] sm:$0xff]  ;;  %v654_v18 = vcombine.low %v34_v6, %v38_v7  ;;  %v29_v6 = vld [vmem:[%s1007_s1 + $0x18] sm:$0xff] }
   0x6   :  { %451 = vmatpush1.bf16.xpose.msra.mxu1 %v646_v5  ;;  %533 = vmatpush1.bf16.xpose.msra.mxu0 %v650_v9  ;;  %v46_v15 = vld [vmem:[%s1007_s1 + $0xa0] sm:$0xff]  ;;  %v48_v17 = vld [vmem:[%s1007_s1 + $0xb0] sm:$0xff]  ;;  %v658_v19 = vcombine.low %v36_v11, %v40_v12  ;;  %v31_v5 = vld [vmem:[%s1007_s1 + $0x28] sm:$0xff] }
   0x7   :  { %452 = vmatprep.subr.bf16.mxu1 %v655_v10  ;;  %534 = vmatprep.subr.bf16.mxu0 %v659_v13  ;;  %v663_v20 = vcombine.high %v42_v14, %v46_v15  ;;  %v667_v21 = vcombine.high %v44_v16, %v48_v17  ;;  %v786_v22 = vld [vmem:[%s1008_s0] sm:$0xff]  ;;  %v798_v25 = vld [vmem:[%s1008_s0 + $0x10] sm:$0xff]  ;;  %v662_v32 = vcombine.low %v42_v14, %v46_v15  ;;  %v33_v7 = vld [vmem:[%s1007_s1 + $0x38] sm:$0xff] }
   0x8   :  { %v791_v23 = vld [vmem:[%s1008_s0 + $0x20] sm:$0xff]  ;;  %v803_v26 = vld [vmem:[%s1008_s0 + $0x30] sm:$0xff]  ;;  %v666_v33 = vcombine.low %v44_v16, %v48_v17  ;;  %v649_v10 = vcombine.high %v27_v4, %v31_v5  ;;  %v653_v11 = vcombine.high %v29_v6, %v33_v7  ;;  %v35_v12 = vld [vmem:[%s1007_s1 + $0x48] sm:$0xff] }
   0x9   :  { %v639_v24 = vcombine.high %v786_v22, %v791_v23  ;;  %v643_v27 = vcombine.high %v798_v25, %v803_v26  ;;  %v50_v28 = vld [vmem:[%s1007_s1 + $0xc0] sm:$0xff]  ;;  %v52_v30 = vld [vmem:[%s1007_s1 + $0xd0] sm:$0xff]  ;;  %v39_v13 = vld [vmem:[%s1007_s1 + $0x68] sm:$0xff]  ;;  %v638_v15 = vcombine.low %v786_v22, %v791_v23  ;;  %v652_v23 = vcombine.low %v29_v6, %v33_v7 }
   0xa   :  { %v54_v29 = vld [vmem:[%s1007_s1 + $0xe0] sm:$0xff]  ;;  %v56_v31 = vld [vmem:[%s1007_s1 + $0xf0] sm:$0xff]  ;;  %v37_v14 = vld [vmem:[%s1007_s1 + $0x58] sm:$0xff] }
   0xb   :  { %482 = vmatprep.mubr.bf16.mxu1 %v639_v24  ;;  %564 = vmatprep.mubr.bf16.mxu0 %v643_v27  ;;  %v671_v34 = vcombine.high %v50_v28, %v54_v29  ;;  %v675_v35 = vcombine.high %v52_v30, %v56_v31  ;;  %v58_v36 = vld [vmem:[%s1007_s1 + $0x100] sm:$0xff]  ;;  %v60_v38 = vld [vmem:[%s1007_s1 + $0x110] sm:$0xff]  ;;  %v670_v40 = vcombine.low %v50_v28, %v54_v29  ;;  %v41_v16 = vld [vmem:[%s1007_s1 + $0x78] sm:$0xff] }
   0xc   :  { %v62_v37 = vld [vmem:[%s1007_s1 + $0x120] sm:$0xff]  ;;  %v64_v39 = vld [vmem:[%s1007_s1 + $0x130] sm:$0xff]  ;;  %v674_v41 = vcombine.low %v52_v30, %v56_v31  ;;  %v896_v17 = vld [vmem:[%s1008_s0 + $0x8] sm:$0xff]  ;;  %v657_v24 = vcombine.high %v35_v12, %v39_v13  ;;  %v661_v27 = vcombine.high %v37_v14, %v41_v16 }
   0xd   :  { %v679_v42 = vcombine.high %v58_v36, %v62_v37  ;;  %v683_v43 = vcombine.high %v60_v38, %v64_v39  ;;  %v66_v44 = vld [vmem:[%s1007_s1 + $0x140] sm:$0xff]  ;;  %v68_v46 = vld [vmem:[%s1007_s1 + $0x150] sm:$0xff]  ;;  %v678_v48 = vcombine.low %v58_v36, %v62_v37  ;;  %v682_v49 = vcombine.low %v60_v38, %v64_v39  ;;  %v913_v22 = vld [vmem:[%s1008_s0 + $0x38] sm:$0xff] }
   0xe   :  { %453 = vmatpush1.bf16.xpose.msra.mxu1 %v654_v18  ;;  %535 = vmatpush1.bf16.xpose.msra.mxu0 %v658_v19  ;;  %v70_v45 = vld [vmem:[%s1007_s1 + $0x160] sm:$0xff]  ;;  %v72_v47 = vld [vmem:[%s1007_s1 + $0x170] sm:$0xff]  ;;  %v901_v18 = vld [vmem:[%s1008_s0 + $0x28] sm:$0xff]  ;;  %v648_v19 = vcombine.low %v27_v4, %v31_v5 }
   0xf   :  { %454 = vmatprep.subr.bf16.mxu1 %v663_v20  ;;  %536 = vmatprep.subr.bf16.mxu0 %v667_v21  ;;  %v687_v50 = vcombine.high %v66_v44, %v70_v45  ;;  %v691_v51 = vcombine.high %v68_v46, %v72_v47  ;;  %v74_v52 = vld [vmem:[%s1007_s1 + $0x180] sm:$0xff]  ;;  %v76_v54 = vld [vmem:[%s1007_s1 + $0x190] sm:$0xff]  ;;  %v686_v56 = vcombine.low %v66_v44, %v70_v45  ;;  %v908_v21 = vld [vmem:[%s1008_s0 + $0x18] sm:$0xff] }
  0x10   :  { %v78_v53 = vld [vmem:[%s1007_s1 + $0x1a0] sm:$0xff]  ;;  %v80_v55 = vld [vmem:[%s1007_s1 + $0x1b0] sm:$0xff]  ;;  %v690_v57 = vcombine.low %v68_v46, %v72_v47  ;;  %v642_v20 = vcombine.low %v798_v25, %v803_v26  ;;  %v641_v28 = vcombine.high %v896_v17, %v901_v18  ;;  %v645_v25 = vcombine.high %v908_v21, %v913_v22  ;;  %v43_v26 = vld [vmem:[%s1007_s1 + $0x88] sm:$0xff] }
  0x11   :  { %v695_v58 = vcombine.high %v74_v52, %v78_v53  ;;  %v699_v59 = vcombine.high %v76_v54, %v80_v55  ;;  %v82_v60 = vld [vmem:[%s1007_s1 + $0x1c0] sm:$0xff]  ;;  %v84_v62 = vld [vmem:[%s1007_s1 + $0x1d0] sm:$0xff]  ;;  %v694_v0 = vcombine.low %v74_v52, %v78_v53  ;;  %v698_v1 = vcombine.low %v76_v54, %v80_v55  ;;  %v47_v29 = vld [vmem:[%s1007_s1 + $0xa8] sm:$0xff] }
  0x12   :  { %v86_v61 = vld [vmem:[%s1007_s1 + $0x1e0] sm:$0xff]  ;;  %v88_v63 = vld [vmem:[%s1007_s1 + $0x1f0] sm:$0xff]  ;;  %v45_v30 = vld [vmem:[%s1007_s1 + $0x98] sm:$0xff] }
  0x13   :  { %v703_v2 = vcombine.high %v82_v60, %v86_v61  ;;  %v707_v3 = vcombine.high %v84_v62, %v88_v63  ;;  %v702_v8 = vcombine.low %v82_v60, %v86_v61  ;;  %v706_v9 = vcombine.low %v84_v62, %v88_v63  ;;  %v49_v31 = vld [vmem:[%s1007_s1 + $0xb8] sm:$0xff]  ;;  %v51_v36 = vld [vmem:[%s1007_s1 + $0xc8] sm:$0xff] }
  0x14   :  { %v55_v37 = vld [vmem:[%s1007_s1 + $0xe8] sm:$0xff]  ;;  %v53_v38 = vld [vmem:[%s1007_s1 + $0xd8] sm:$0xff] }
  0x15   :  { %v57_v39 = vld [vmem:[%s1007_s1 + $0xf8] sm:$0xff]  ;;  %v59_v44 = vld [vmem:[%s1007_s1 + $0x108] sm:$0xff] }
  0x16   :  { %455 = vmatpush1.bf16.xpose.msra.mxu1 %v662_v32  ;;  %537 = vmatpush1.bf16.xpose.msra.mxu0 %v666_v33  ;;  %v656_v32 = vcombine.low %v35_v12, %v39_v13  ;;  %v660_v33 = vcombine.low %v37_v14, %v41_v16  ;;  %v63_v45 = vld [vmem:[%s1007_s1 + $0x128] sm:$0xff]  ;;  %v61_v46 = vld [vmem:[%s1007_s1 + $0x118] sm:$0xff]  ;;  %v640_v14 = vcombine.low %v896_v17, %v901_v18 }
  0x17   :  { %456 = vmatprep.subr.bf16.mxu1 %v671_v34  ;;  %538 = vmatprep.subr.bf16.mxu0 %v675_v35  ;;  %v665_v34 = vcombine.high %v43_v26, %v47_v29  ;;  %v669_v35 = vcombine.high %v45_v30, %v49_v31  ;;  %v65_v47 = vld [vmem:[%s1007_s1 + $0x138] sm:$0xff]  ;;  %v67_v52 = vld [vmem:[%s1007_s1 + $0x148] sm:$0xff] }
  0x18   :  { %v71_v53 = vld [vmem:[%s1007_s1 + $0x168] sm:$0xff]  ;;  %v69_v54 = vld [vmem:[%s1007_s1 + $0x158] sm:$0xff] }
  0x19   :  { %v73_v55 = vld [vmem:[%s1007_s1 + $0x178] sm:$0xff]  ;;  %v75_v60 = vld [vmem:[%s1007_s1 + $0x188] sm:$0xff] }
  0x1a   :  { %v79_v61 = vld [vmem:[%s1007_s1 + $0x1a8] sm:$0xff]  ;;  %v77_v62 = vld [vmem:[%s1007_s1 + $0x198] sm:$0xff] }
  0x1b   :  { %v81_v63 = vld [vmem:[%s1007_s1 + $0x1b8] sm:$0xff]  ;;  %v83_v4 = vld [vmem:[%s1007_s1 + $0x1c8] sm:$0xff] }
  0x1c   :  { %v87_v5 = vld [vmem:[%s1007_s1 + $0x1e8] sm:$0xff]  ;;  %v85_v6 = vld [vmem:[%s1007_s1 + $0x1d8] sm:$0xff] }
  0x1d   :  { %v89_v7 = vld [vmem:[%s1007_s1 + $0x1f8] sm:$0xff]  ;;  %v704_v12 = vcombine.low %v83_v4, %v87_v5 }
  0x1e   :  { %457 = vmatpush1.bf16.xpose.msra.mxu1 %v670_v40  ;;  %539 = vmatpush1.bf16.xpose.msra.mxu0 %v674_v41  ;;  %v664_v40 = vcombine.low %v43_v26, %v47_v29  ;;  %v668_v41 = vcombine.low %v45_v30, %v49_v31  ;;  %v708_v13 = vcombine.low %v85_v6, %v89_v7 }
  0x1f   :  { %458 = vmatprep.subr.bf16.mxu1 %v679_v42  ;;  %540 = vmatprep.subr.bf16.mxu0 %v683_v43  ;;  %v673_v42 = vcombine.high %v51_v36, %v55_v37  ;;  %v677_v43 = vcombine.high %v53_v38, %v57_v39 }
  0x26   :  { %459 = vmatpush1.bf16.xpose.msra.mxu1 %v678_v48  ;;  %541 = vmatpush1.bf16.xpose.msra.mxu0 %v682_v49  ;;  %v672_v48 = vcombine.low %v51_v36, %v55_v37  ;;  %v676_v49 = vcombine.low %v53_v38, %v57_v39 }
  0x27   :  { %460 = vmatprep.subr.bf16.mxu1 %v687_v50  ;;  %542 = vmatprep.subr.bf16.mxu0 %v691_v51  ;;  %v681_v50 = vcombine.high %v59_v44, %v63_v45  ;;  %v685_v51 = vcombine.high %v61_v46, %v65_v47 }
  0x2e   :  { %461 = vmatpush1.bf16.xpose.msra.mxu1 %v686_v56  ;;  %543 = vmatpush1.bf16.xpose.msra.mxu0 %v690_v57  ;;  %v680_v56 = vcombine.low %v59_v44, %v63_v45  ;;  %v684_v57 = vcombine.low %v61_v46, %v65_v47 }
  0x2f   :  { %462 = vmatprep.subr.bf16.mxu1 %v695_v58  ;;  %544 = vmatprep.subr.bf16.mxu0 %v699_v59  ;;  %v689_v58 = vcombine.high %v67_v52, %v71_v53  ;;  %v693_v59 = vcombine.high %v69_v54, %v73_v55 }
  0x36   :  { %463 = vmatpush1.bf16.xpose.msra.mxu1 %v694_v0  ;;  %545 = vmatpush1.bf16.xpose.msra.mxu0 %v698_v1  ;;  %v688_v0 = vcombine.low %v67_v52, %v71_v53  ;;  %v692_v1 = vcombine.low %v69_v54, %v73_v55 }
  0x37   :  { %464 = vmatprep.subr.bf16.mxu1 %v703_v2  ;;  %546 = vmatprep.subr.bf16.mxu0 %v707_v3  ;;  %v697_v2 = vcombine.high %v75_v60, %v79_v61  ;;  %v701_v3 = vcombine.high %v77_v62, %v81_v63 }
  0x3e   :  { %465 = vmatpush1.bf16.xpose.msra.mxu1 %v702_v8  ;;  %547 = vmatpush1.bf16.xpose.msra.mxu0 %v706_v9  ;;  %v696_v8 = vcombine.low %v75_v60, %v79_v61  ;;  %v700_v9 = vcombine.low %v77_v62, %v81_v63 }
  0x3f   :  { %491 = vmatprep.subr.bf16.mxu1 %v649_v10  ;;  %573 = vmatprep.subr.bf16.mxu0 %v653_v11  ;;  %v705_v10 = vcombine.high %v83_v4, %v87_v5  ;;  %v709_v11 = vcombine.high %v85_v6, %v89_v7 }
  0x45   :  { %483 = vmatmul.mubr.bf16.vlgmr.msra.gmra.mrb[0].mxu1 %v638_v15  ;;  %565 = vmatmul.mubr.bf16.vlgmr.msra.gmra.mrb[0].mxu0 %v642_v20  ;;  %v644_v15 = vcombine.low %v908_v21, %v913_v22  ;;  %v710_v20 = vld [vmem:[%s1009_s2] ss:$0 sm:$0xff] }
  0x46   :  { %492 = vmatpush1.bf16.xpose.msra.mxu1 %v648_v19  ;;  %574 = vmatpush1.bf16.xpose.msra.mxu0 %v652_v23 }
  0x47   :  { %493 = vmatprep.subr.bf16.mxu1 %v657_v24  ;;  %575 = vmatprep.subr.bf16.mxu0 %v661_v27 }
  0x48   :  { %523 = vmatprep.mubr.bf16.mxu1 %v641_v28  ;;  %605 = vmatprep.mubr.bf16.mxu0 %v645_v25  ;;  %v711_v25 = vld [vmem:[%s1010_s3] ss:$0 sm:$0xff] }
  0x4e   :  { %494 = vmatpush1.bf16.xpose.msra.mxu1 %v656_v32  ;;  %576 = vmatpush1.bf16.xpose.msra.mxu0 %v660_v33 }
  0x4f   :  { %495 = vmatprep.subr.bf16.mxu1 %v665_v34  ;;  %577 = vmatprep.subr.bf16.mxu0 %v669_v35 }
  0x56   :  { %496 = vmatpush1.bf16.xpose.msra.mxu1 %v664_v40  ;;  %578 = vmatpush1.bf16.xpose.msra.mxu0 %v668_v41 }
  0x57   :  { %497 = vmatprep.subr.bf16.mxu1 %v673_v42  ;;  %579 = vmatprep.subr.bf16.mxu0 %v677_v43 }
  0x5e   :  { %498 = vmatpush1.bf16.xpose.msra.mxu1 %v672_v48  ;;  %580 = vmatpush1.bf16.xpose.msra.mxu0 %v676_v49 }
  0x5f   :  { %499 = vmatprep.subr.bf16.mxu1 %v681_v50  ;;  %581 = vmatprep.subr.bf16.mxu0 %v685_v51 }
  0x66   :  { %500 = vmatpush1.bf16.xpose.msra.mxu1 %v680_v56  ;;  %582 = vmatpush1.bf16.xpose.msra.mxu0 %v684_v57 }
  0x67   :  { %501 = vmatprep.subr.bf16.mxu1 %v689_v58  ;;  %583 = vmatprep.subr.bf16.mxu0 %v693_v59 }
  0x6e   :  { %502 = vmatpush1.bf16.xpose.msra.mxu1 %v688_v0  ;;  %584 = vmatpush1.bf16.xpose.msra.mxu0 %v692_v1 }
  0x6f   :  { %503 = vmatprep.subr.bf16.mxu1 %v697_v2  ;;  %585 = vmatprep.subr.bf16.mxu0 %v701_v3 }
  0x76   :  { %504 = vmatpush1.bf16.xpose.msra.mxu1 %v696_v8  ;;  %586 = vmatpush1.bf16.xpose.msra.mxu0 %v700_v9 }
  0x77   :  { %505 = vmatprep.subr.bf16.mxu1 %v705_v10  ;;  %587 = vmatprep.subr.bf16.mxu0 %v709_v11 }
  0x7e   :  { %506 = vmatpush1.bf16.xpose.msra.mxu1 %v704_v12  ;;  %588 = vmatpush1.bf16.xpose.msra.mxu0 %v708_v13 }
  0x85   :  { %524 = vmatmul.mubr.bf16.vlgmr.msra.gmra.mrb[0].mxu1 %v640_v14  ;;  %606 = vmatmul.mubr.bf16.vlgmr.msra.gmra.mrb[0].mxu0 %v644_v15 }
 0x158   :  { %v525_v16 = vpop.f32.mrb[0].mxu1  ;;  %v607_v19 = vpop.f32.mrb[0].mxu0 }
 0x159   :  { %v527_v23 = vpop.f32.mrb[1].mxu1  ;;  %v712_v24 = vadd.f32 %v607_v19, %v525_v16  ;;  %v609_v27 = vpop.f32.mrb[1].mxu0 }
 0x15a   :  { %v528_v28 = vpop.f32.mrb[2].mxu1  ;;  %v610_v17 = vpop.f32.mrb[2].mxu0 }
 0x15b   :  { %v530_v18 = vpop.f32.mrb[3].mxu1  ;;  %v621_v26 = vmul.f32 %v712_v24, %v710_v20  ;;  %v713_v21 = vadd.f32 %v610_v17, %v528_v28  ;;  %v612_v22 = vpop.f32.mrb[3].mxu0 }
 0x15d   :  { %v630_v29 = vadd.f32 %v711_v25, %v621_v26  ;;  %v622_v30 = vmul.f32 %v713_v21, %v710_v20 }
 0x15f   :  { %632 = vst [vmem:[%s1011_s4] sm:$0xff] %v630_v29  ;;  %v631_v31 = vadd.f32 %v711_v25, %v622_v30 }
 0x161   :  { %633 = vst [vmem:[%s1011_s4 + $0x8] sm:$0xff] %v631_v31 }

</bundles_post_ra>
